<compile_context>
chip_gen: v7x
topology: tpu7x:2x2x1
jax: 0.10.0
libtpu: 0.0.40
codegen_flags: <defaults>
</compile_context>

<pallas_src>
import math

import jax
import jax.numpy as jnp
from jax import lax
from jax.experimental import pallas as pl
from jax.experimental.pallas import tpu as pltpu  # noqa: F401  (TPU backend)


# ----------------------------- in-kernel helpers -----------------------------

def _layernorm(x, w, b, eps=1e-5):
    mu = jnp.mean(x, axis=-1, keepdims=True)
    var = jnp.mean((x - mu) ** 2, axis=-1, keepdims=True)
    return (x - mu) * lax.rsqrt(var + eps) * w + b


def _erf_poly(x):
    # Abramowitz & Stegun 7.1.26, max abs error ~1.5e-7.
    # Only exp / mul / add / where -> always lowers on the Mosaic TPU backend.
    a1, a2, a3, a4, a5 = 0.254829592, -0.284496736, 1.421413741, -1.453152027, 1.061405429
    p = 0.3275911
    ax = jnp.abs(x)
    t = 1.0 / (1.0 + p * ax)
    poly = ((((a5 * t + a4) * t + a3) * t + a2) * t + a1) * t
    y = 1.0 - poly * jnp.exp(-ax * ax)
    return jnp.where(x < 0, -y, y)


def _gelu_kernel(x):
    # exact-erf GELU (reference `gelu`), erf via high-precision polynomial
    return x * 0.5 * (1.0 + _erf_poly(x * (1.0 / math.sqrt(2.0))))


# --------------------------- fused whole-model kernel -------------------------

def model_kernel(x_ref, lvec_ref, bqkv_ref,
                 wq_ref, wk_ref, wv_ref, wo_ref,
                 w1_ref, b1_ref, w2_ref,
                 dvec_ref, wd_ref, embT_ref, biasv_ref,
                 o_ref):
    B, T, D = x_ref.shape                 # T is the padded sequence length
    L, H, _, hd = wq_ref.shape
    scale = 1.0 / math.sqrt(hd)

    # causal mask: built once, reused across all layers and batch elements.
    # Padded key columns (col >= real T) always have col > row for real query
    # rows, so they are masked out automatically.
    row = lax.broadcasted_iota(jnp.int32, (T, T), 0)
    col = lax.broadcasted_iota(jnp.int32, (T, T), 1)
    causal = col <= row

    # decoder / tied-logits params, loaded once
    dv = dvec_ref[...]            # (5, D): ln1w, ln1b, bd, ln2w, ln2b
    wd = wd_ref[...]              # (D, D)
    embT = embT_ref[...]          # (D, Vpad)
    biasv = biasv_ref[...]        # (1, Vpad)

    # "NT" matmul: contract last dims of both operands (q @ k^T w/o transpose)
    nt = (((1,), (1,)), ((), ()))

    for b in range(B):                       # static batch loop (B is tiny)
        x = x_ref[b]                         # (T, D), stays on-chip end-to-end
        for l in range(L):                   # static layer loop (fused network)
            lv = lvec_ref[l]                 # (6, D): ln1w, ln1b, bo, ln2w, ln2b, b2
            ln1w, ln1b, bo = lv[0:1], lv[1:2], lv[2:3]
            ln2w, ln2b, b2 = lv[3:4], lv[4:5], lv[5:6]
            batt = bqkv_ref[l]               # (3, H, hd): q/k/v biases, head-major
            wql = wq_ref[l]                  # (H, D, hd)
            wkl = wk_ref[l]
            wvl = wv_ref[l]
            wol = wo_ref[l]                  # (H, hd, D)

            # ---- causal self-attention (head-major, no lane-axis slicing) ----
            xn = _layernorm(x, ln1w, ln1b)
            y = None
            for h in range(H):               # static head loop over (D, hd) tiles
                qh = jnp.dot(xn, wql[h],
                             preferred_element_type=jnp.float32) + batt[0, h:h + 1]
                kh = jnp.dot(xn, wkl[h],
                             preferred_element_type=jnp.float32) + batt[1, h:h + 1]
                vh = jnp.dot(xn, wvl[h],
                             preferred_element_type=jnp.float32) + batt[2, h:h + 1]
                att = lax.dot_general(qh, kh, nt,
                                      preferred_element_type=jnp.float32) * scale
                att = jnp.where(causal, att, -1e30)
                att = att - jnp.max(att, axis=-1, keepdims=True)
                e = jnp.exp(att)
                p = e * pl.reciprocal(jnp.sum(e, axis=-1, keepdims=True), approx=False)
                ph = jnp.dot(p, vh, preferred_element_type=jnp.float32)   # (T, hd)
                # fold the output projection into a per-head accumulation
                c = jnp.dot(ph, wol[h], preferred_element_type=jnp.float32)
                y = c if y is None else y + c
            x = x + y + bo                                   # attention residual

            # ---- MLP branch ----
            xn2 = _layernorm(x, ln2w, ln2b)
            h1 = jnp.dot(xn2, w1_ref[l],
                         preferred_element_type=jnp.float32) + b1_ref[l]
            h1 = _gelu_kernel(h1)
            h2 = jnp.dot(h1, w2_ref[l], preferred_element_type=jnp.float32) + b2
            x = x + h2                                       # MLP residual

        # ---- GPTPrediction head + tied decoder logits (lane-dense vocab) ----
        xd = _layernorm(x, dv[0:1], dv[1:2])
        xd = jnp.dot(xd, wd, preferred_element_type=jnp.float32) + dv[2:3]
        xd = _gelu_kernel(xd)
        xd = _layernorm(xd, dv[3:4], dv[4:5])
        o_ref[b] = jnp.dot(xd, embT, preferred_element_type=jnp.float32) + biasv


# ------------------------------ parameter setup -------------------------------

def init_params(key, n_layer, D, vocab, pos_num, n_class=55):
    std = 0.02
    ks = iter(jax.random.split(key, 8 * n_layer + 16))
    nrm = lambda shape: std * jax.random.normal(next(ks), shape, jnp.float32)

    layers = []
    for _ in range(n_layer):
        layers.append(dict(
            ln1w=jnp.ones((1, D), jnp.float32), ln1b=jnp.zeros((1, D), jnp.float32),
            wq=nrm((D, D)), bq=jnp.zeros((1, D), jnp.float32),
            wk=nrm((D, D)), bk=jnp.zeros((1, D), jnp.float32),
            wv=nrm((D, D)), bv=jnp.zeros((1, D), jnp.float32),
            wo=nrm((D, D)), bo=jnp.zeros((1, D), jnp.float32),
            ln2w=jnp.ones((1, D), jnp.float32), ln2b=jnp.zeros((1, D), jnp.float32),
            w1=nrm((D, 4 * D)), b1=jnp.zeros((1, 4 * D), jnp.float32),
            w2=nrm((4 * D, D)), b2=jnp.zeros((1, D), jnp.float32),
        ))

    params = dict(
        layers=layers,
        dec=dict(
            ln1w=jnp.ones((1, D), jnp.float32), ln1b=jnp.zeros((1, D), jnp.float32),
            wd=nrm((D, D)), bd=jnp.zeros((1, D), jnp.float32),
            ln2w=jnp.ones((1, D), jnp.float32), ln2b=jnp.zeros((1, D), jnp.float32),
        ),
        emb=nrm((vocab, D)),                       # token embedding (tied decoder)
        pos_emb=nrm((pos_num + 1, D)),
        class_emb=nrm((n_class, D)),
        value_start=nrm((1, D)),
        bias_value=jnp.zeros((1, vocab), jnp.float32),
    )
    return params


def pack_params(params, n_head):
    """Stack per-layer weights, reshape attention weights head-major, pad vocab."""
    layers = params["layers"]
    D = params["emb"].shape[1]
    V = params["emb"].shape[0]
    hd = D // n_head
    Vpad = ((V + 127) // 128) * 128
    f32 = jnp.float32

    vec = lambda a: jnp.asarray(a, f32).reshape(-1)

    # packed per-layer (1,D)-sized vectors -> (L, 6, D)
    lvecs = jnp.stack([
        jnp.stack([vec(lp["ln1w"]), vec(lp["ln1b"]), vec(lp["bo"]),
                   vec(lp["ln2w"]), vec(lp["ln2b"]), vec(lp["b2"])])
        for lp in layers])

    # attention biases, head-major -> (L, 3, H, hd)
    bqkv = jnp.stack([
        jnp.stack([vec(lp["bq"]).reshape(n_head, hd),
                   vec(lp["bk"]).reshape(n_head, hd),
                   vec(lp["bv"]).reshape(n_head, hd)])
        for lp in layers])

    def head_cols(w):   # (D, D) -> (H, D, hd): per-head output-column blocks
        return w.reshape(D, n_head, hd).transpose(1, 0, 2)

    wq = jnp.stack([head_cols(lp["wq"]) for lp in layers])     # (L, H, D, hd)
    wk = jnp.stack([head_cols(lp["wk"]) for lp in layers])
    wv = jnp.stack([head_cols(lp["wv"]) for lp in layers])
    wo = jnp.stack([lp["wo"].reshape(n_head, hd, D) for lp in layers])  # (L,H,hd,D)

    w1 = jnp.stack([lp["w1"] for lp in layers])                # (L, D, 4D)
    b1 = jnp.stack([lp["b1"].reshape(1, -1) for lp in layers]) # (L, 1, 4D)
    w2 = jnp.stack([lp["w2"] for lp in layers])                # (L, 4D, D)

    dp = params["dec"]
    dvecs = jnp.stack([vec(dp["ln1w"]), vec(dp["ln1b"]), vec(dp["bd"]),
                       vec(dp["ln2w"]), vec(dp["ln2b"])])      # (5, D)
    wd = dp["wd"]

    # tied decoder, padded to a lane-dense (multiple of 128) vocab
    embT = jnp.zeros((D, Vpad), f32).at[:, :V].set(params["emb"].T)
    biasv = jnp.zeros((1, Vpad), f32).at[:, :V].set(params["bias_value"].reshape(1, -1))

    return (lvecs, bqkv, wq, wk, wv, wo, w1, b1, w2, dvecs, wd, embT, biasv), Vpad


# ------------------------------ forward (wrapper) ------------------------------

def forward(plane_index, class_idx, params, n_head):
    B, Tp = plane_index.shape
    D = params["emb"].shape[1]
    V = params["emb"].shape[0]
    T = Tp + 2                                    # [class] + [value_start] + tokens
    Tpad = ((T + 7) // 8) * 8                     # sublane-aligned sequence length

    # embedding glue (data-dependent gathers / concats) in plain JAX
    class_embed = params["class_emb"][class_idx][:, None, :]          # (B,1,D)
    tok = params["emb"][plane_index]                                  # (B,Tp,D)
    vs = jnp.broadcast_to(params["value_start"][None, :, :], (B, 1, D))
    x = jnp.concatenate([vs, tok], axis=1) + params["pos_emb"][: Tp + 1][None]
    x = jnp.concatenate([class_embed, x], axis=1)                     # (B,T,D)
    x = jnp.pad(x, ((0, 0), (0, Tpad - T), (0, 0)))                   # (B,Tpad,D)

    wts, Vpad = pack_params(params, n_head)

    # single fused pallas_call, no grid: every operand is a whole-array VMEM
    # ref, fetched once; activations never round-trip through HBM.
    logits_pad = pl.pallas_call(
        model_kernel,
        out_shape=jax.ShapeDtypeStruct((B, Tpad, Vpad), jnp.float32),
    )(x, *wts)

    # drop class token / final position, the seq padding and the vocab padding
    return logits_pad[:, 1:T - 1, :V]


# ------------------------------ pure-JAX reference ------------------------------

def _gelu_ref(x):
    return x * 0.5 * (1.0 + lax.erf(x / math.sqrt(2.0)))


def _ref_block(x, lp, n_head):
    B, T, D = x.shape
    hd = D // n_head
    xn = _layernorm(x, lp["ln1w"], lp["ln1b"])
    q = xn @ lp["wq"] + lp["bq"]
    k = xn @ lp["wk"] + lp["bk"]
    v = xn @ lp["wv"] + lp["bv"]
    q = q.reshape(B, T, n_head, hd).transpose(0, 2, 1, 3)
    k = k.reshape(B, T, n_head, hd).transpose(0, 2, 1, 3)
    v = v.reshape(B, T, n_head, hd).transpose(0, 2, 1, 3)
    att = jnp.einsum("bhtd,bhsd->bhts", q, k) / math.sqrt(hd)
    mask = jnp.tril(jnp.ones((T, T), bool))
    att = jnp.where(mask[None, None], att, -jnp.inf)
    att = jax.nn.softmax(att, axis=-1)
    y = jnp.einsum("bhts,bhsd->bhtd", att, v).transpose(0, 2, 1, 3).reshape(B, T, D)
    x = x + (y @ lp["wo"] + lp["bo"])
    xn2 = _layernorm(x, lp["ln2w"], lp["ln2b"])
    h = _gelu_ref(xn2 @ lp["w1"] + lp["b1"]) @ lp["w2"] + lp["b2"]
    return x + h


def forward_ref(plane_index, class_idx, params, n_head):
    B, Tp = plane_index.shape
    D = params["emb"].shape[1]
    class_embed = params["class_emb"][class_idx][:, None, :]
    tok = params["emb"][plane_index]
    vs = jnp.broadcast_to(params["value_start"][None, :, :], (B, 1, D))
    x = jnp.concatenate([vs, tok], axis=1) + params["pos_emb"][: Tp + 1][None]
    x = jnp.concatenate([class_embed, x], axis=1)
    for lp in params["layers"]:
        x = _ref_block(x, lp, n_head)
    dp = params["dec"]
    x = _layernorm(x, dp["ln1w"], dp["ln1b"])
    x = _gelu_ref(x @ dp["wd"] + dp["bd"])
    x = _layernorm(x, dp["ln2w"], dp["ln2b"])
    logits = x @ params["emb"].T + params["bias_value"]
    return logits[:, 1:-1, :]


# ------------------------------------ main -------------------------------------

if __name__ == "__main__":
    # small config consistent with the module
    B = 2            # batch
    Tp = 8           # plane_index sequence length -> transformer T = Tp + 2 = 10
    D = 32           # transformer_embed_dim == stage2_embed_dim (init_with_vqvae=False)
    n_head = 4
    n_layer = 2
    vocab = 64       # quantizer embedding_num
    pos_num = 16
    n_class = 55

    key = jax.random.PRNGKey(0)
    kp, ki, kc = jax.random.split(key, 3)
    params = init_params(kp, n_layer, D, vocab, pos_num, n_class)

    plane_index = jax.random.randint(ki, (B, Tp), 0, vocab, dtype=jnp.int32)
    class_idx = jax.random.randint(kc, (B,), 0, n_class, dtype=jnp.int32)

    out = forward(plane_index, class_idx, params, n_head)
    out = jax.block_until_ready(out)
    assert out.shape == (B, Tp, vocab), out.shape

    ref = jax.block_until_ready(forward_ref(plane_index, class_idx, params, n_head))
    assert jnp.allclose(out, ref, atol=1e-3, rtol=1e-3), float(jnp.max(jnp.abs(out - ref)))

    print("KERNEL_OK")
</pallas_src>

<mosaic_0001>
module attributes {stable_mosaic.version = 11 : i64} {
  func.func @model_kernel(%arg0: memref<2x16x32xf32, #tpu.memory_space<vmem>>, %arg1: memref<2x6x32xf32, #tpu.memory_space<vmem>>, %arg2: memref<2x3x4x8xf32, #tpu.memory_space<vmem>>, %arg3: memref<2x4x32x8xf32, #tpu.memory_space<vmem>>, %arg4: memref<2x4x32x8xf32, #tpu.memory_space<vmem>>, %arg5: memref<2x4x32x8xf32, #tpu.memory_space<vmem>>, %arg6: memref<2x4x8x32xf32, #tpu.memory_space<vmem>>, %arg7: memref<2x32x128xf32, #tpu.memory_space<vmem>>, %arg8: memref<2x1x128xf32, #tpu.memory_space<vmem>>, %arg9: memref<2x128x32xf32, #tpu.memory_space<vmem>>, %arg10: memref<5x32xf32, #tpu.memory_space<vmem>>, %arg11: memref<32x32xf32, #tpu.memory_space<vmem>>, %arg12: memref<32x128xf32, #tpu.memory_space<vmem>>, %arg13: memref<1x128xf32, #tpu.memory_space<vmem>>, %arg14: memref<2x16x128xf32, #tpu.memory_space<vmem>>) attributes {dimension_semantics = [], scalar_prefetch = 0 : i64, scratch_operands = 0 : i64, tpu.core_type = #tpu.core_type<tc>} {
    %0 = tpu.iota {dimensions = array<i32: 0>} : vector<16x16xi32>
    %1 = tpu.iota {dimensions = array<i32: 1>} : vector<16x16xi32>
    %2 = arith.cmpi sle, %1, %0 : vector<16x16xi32>
    %c0 = arith.constant 0 : index
    %c0_0 = arith.constant 0 : index
    %3 = vector.load %arg10[%c0, %c0_0] : memref<5x32xf32, #tpu.memory_space<vmem>>, vector<5x32xf32>
    %c0_1 = arith.constant 0 : index
    %c0_2 = arith.constant 0 : index
    %4 = vector.load %arg11[%c0_1, %c0_2] : memref<32x32xf32, #tpu.memory_space<vmem>>, vector<32x32xf32>
    %c0_3 = arith.constant 0 : index
    %c0_4 = arith.constant 0 : index
    %5 = vector.load %arg12[%c0_3, %c0_4] : memref<32x128xf32, #tpu.memory_space<vmem>>, vector<32x128xf32>
    %c0_5 = arith.constant 0 : index
    %c0_6 = arith.constant 0 : index
    %6 = vector.load %arg13[%c0_5, %c0_6] : memref<1x128xf32, #tpu.memory_space<vmem>>, vector<1x128xf32>
    %c0_7 = arith.constant 0 : index
    %c0_8 = arith.constant 0 : index
    %c0_9 = arith.constant 0 : index
    %7 = vector.load %arg0[%c0_7, %c0_8, %c0_9] : memref<2x16x32xf32, #tpu.memory_space<vmem>>, vector<1x16x32xf32>
    %8 = vector.shape_cast %7 : vector<1x16x32xf32> to vector<16x32xf32>
    %c0_10 = arith.constant 0 : index
    %c0_11 = arith.constant 0 : index
    %c0_12 = arith.constant 0 : index
    %9 = vector.load %arg1[%c0_10, %c0_11, %c0_12] : memref<2x6x32xf32, #tpu.memory_space<vmem>>, vector<1x6x32xf32>
    %10 = vector.shape_cast %9 : vector<1x6x32xf32> to vector<6x32xf32>
    %11 = vector.extract_strided_slice %10 {offsets = [0, 0], sizes = [1, 32], strides = [1, 1]} : vector<6x32xf32> to vector<1x32xf32>
    %12 = vector.extract_strided_slice %10 {offsets = [1, 0], sizes = [1, 32], strides = [1, 1]} : vector<6x32xf32> to vector<1x32xf32>
    %13 = vector.extract_strided_slice %10 {offsets = [2, 0], sizes = [1, 32], strides = [1, 1]} : vector<6x32xf32> to vector<1x32xf32>
    %14 = vector.extract_strided_slice %10 {offsets = [3, 0], sizes = [1, 32], strides = [1, 1]} : vector<6x32xf32> to vector<1x32xf32>
    %15 = vector.extract_strided_slice %10 {offsets = [4, 0], sizes = [1, 32], strides = [1, 1]} : vector<6x32xf32> to vector<1x32xf32>
    %16 = vector.extract_strided_slice %10 {offsets = [5, 0], sizes = [1, 32], strides = [1, 1]} : vector<6x32xf32> to vector<1x32xf32>
    %c0_13 = arith.constant 0 : index
    %c0_14 = arith.constant 0 : index
    %c0_15 = arith.constant 0 : index
    %c0_16 = arith.constant 0 : index
    %17 = vector.load %arg2[%c0_13, %c0_14, %c0_15, %c0_16] : memref<2x3x4x8xf32, #tpu.memory_space<vmem>>, vector<1x3x4x8xf32>
    %18 = vector.shape_cast %17 : vector<1x3x4x8xf32> to vector<3x4x8xf32>
    %c0_17 = arith.constant 0 : index
    %c0_18 = arith.constant 0 : index
    %c0_19 = arith.constant 0 : index
    %c0_20 = arith.constant 0 : index
    %19 = vector.load %arg3[%c0_17, %c0_18, %c0_19, %c0_20] : memref<2x4x32x8xf32, #tpu.memory_space<vmem>>, vector<1x4x32x8xf32>
    %20 = vector.shape_cast %19 : vector<1x4x32x8xf32> to vector<4x32x8xf32>
    %c0_21 = arith.constant 0 : index
    %c0_22 = arith.constant 0 : index
    %c0_23 = arith.constant 0 : index
    %c0_24 = arith.constant 0 : index
    %21 = vector.load %arg4[%c0_21, %c0_22, %c0_23, %c0_24] : memref<2x4x32x8xf32, #tpu.memory_space<vmem>>, vector<1x4x32x8xf32>
    %22 = vector.shape_cast %21 : vector<1x4x32x8xf32> to vector<4x32x8xf32>
    %c0_25 = arith.constant 0 : index
    %c0_26 = arith.constant 0 : index
    %c0_27 = arith.constant 0 : index
    %c0_28 = arith.constant 0 : index
    %23 = vector.load %arg5[%c0_25, %c0_26, %c0_27, %c0_28] : memref<2x4x32x8xf32, #tpu.memory_space<vmem>>, vector<1x4x32x8xf32>
    %24 = vector.shape_cast %23 : vector<1x4x32x8xf32> to vector<4x32x8xf32>
    %c0_29 = arith.constant 0 : index
    %c0_30 = arith.constant 0 : index
    %c0_31 = arith.constant 0 : index
    %c0_32 = arith.constant 0 : index
    %25 = vector.load %arg6[%c0_29, %c0_30, %c0_31, %c0_32] : memref<2x4x8x32xf32, #tpu.memory_space<vmem>>, vector<1x4x8x32xf32>
    %26 = vector.shape_cast %25 : vector<1x4x8x32xf32> to vector<4x8x32xf32>
    %cst = arith.constant dense<0.000000e+00> : vector<16xf32>
    %27 = vector.multi_reduction <add>, %8, %cst [1] : vector<16x32xf32> to vector<16xf32>
    %28 = vector.shape_cast %27 : vector<16xf32> to vector<16x1xf32>
    %cst_33 = arith.constant 3.200000e+01 : f32
    %29 = vector.broadcast %cst_33 : f32 to vector<16x1xf32>
    %30 = arith.divf %28, %29 : vector<16x1xf32>
    %31 = vector.broadcast %30 : vector<16x1xf32> to vector<16x32xf32>
    %32 = arith.subf %8, %31 : vector<16x32xf32>
    %33 = arith.mulf %32, %32 : vector<16x32xf32>
    %cst_34 = arith.constant dense<0.000000e+00> : vector<16xf32>
    %34 = vector.multi_reduction <add>, %33, %cst_34 [1] : vector<16x32xf32> to vector<16xf32>
    %35 = vector.shape_cast %34 : vector<16xf32> to vector<16x1xf32>
    %cst_35 = arith.constant 3.200000e+01 : f32
    %36 = vector.broadcast %cst_35 : f32 to vector<16x1xf32>
    %37 = arith.divf %35, %36 : vector<16x1xf32>
    %38 = vector.broadcast %30 : vector<16x1xf32> to vector<16x32xf32>
    %39 = arith.subf %8, %38 : vector<16x32xf32>
    %cst_36 = arith.constant 9.99999974E-6 : f32
    %40 = vector.broadcast %cst_36 : f32 to vector<16x1xf32>
    %41 = arith.addf %37, %40 : vector<16x1xf32>
    %42 = math.rsqrt %41 : vector<16x1xf32>
    %43 = vector.broadcast %42 : vector<16x1xf32> to vector<16x32xf32>
    %44 = arith.mulf %39, %43 : vector<16x32xf32>
    %45 = vector.broadcast %11 : vector<1x32xf32> to vector<16x32xf32>
    %46 = arith.mulf %44, %45 : vector<16x32xf32>
    %47 = vector.broadcast %12 : vector<1x32xf32> to vector<16x32xf32>
    %48 = arith.addf %46, %47 : vector<16x32xf32>
    %49 = vector.extract_strided_slice %20 {offsets = [0, 0, 0], sizes = [1, 32, 8], strides = [1, 1, 1]} : vector<4x32x8xf32> to vector<1x32x8xf32>
    %50 = vector.shape_cast %49 : vector<1x32x8xf32> to vector<32x8xf32>
    %cst_37 = arith.constant dense<0.000000e+00> : vector<16x8xf32>
    %51 = tpu.matmul %48, %50, %cst_37 {dimension_numbers = #tpu.dot_dimension_numbers<[1], [0], [0], [1], [0, 0, 1, 1], [], []>} : vector<16x32xf32>, vector<32x8xf32>, vector<16x8xf32> -> vector<16x8xf32>
    %52 = vector.extract_strided_slice %18 {offsets = [0, 0, 0], sizes = [1, 1, 8], strides = [1, 1, 1]} : vector<3x4x8xf32> to vector<1x1x8xf32>
    %53 = vector.shape_cast %52 : vector<1x1x8xf32> to vector<1x8xf32>
    %54 = vector.broadcast %53 : vector<1x8xf32> to vector<16x8xf32>
    %55 = arith.addf %51, %54 : vector<16x8xf32>
    %56 = vector.extract_strided_slice %22 {offsets = [0, 0, 0], sizes = [1, 32, 8], strides = [1, 1, 1]} : vector<4x32x8xf32> to vector<1x32x8xf32>
    %57 = vector.shape_cast %56 : vector<1x32x8xf32> to vector<32x8xf32>
    %cst_38 = arith.constant dense<0.000000e+00> : vector<16x8xf32>
    %58 = tpu.matmul %48, %57, %cst_38 {dimension_numbers = #tpu.dot_dimension_numbers<[1], [0], [0], [1], [0, 0, 1, 1], [], []>} : vector<16x32xf32>, vector<32x8xf32>, vector<16x8xf32> -> vector<16x8xf32>
    %59 = vector.extract_strided_slice %18 {offsets = [1, 0, 0], sizes = [1, 1, 8], strides = [1, 1, 1]} : vector<3x4x8xf32> to vector<1x1x8xf32>
    %60 = vector.shape_cast %59 : vector<1x1x8xf32> to vector<1x8xf32>
    %61 = vector.broadcast %60 : vector<1x8xf32> to vector<16x8xf32>
    %62 = arith.addf %58, %61 : vector<16x8xf32>
    %63 = vector.extract_strided_slice %24 {offsets = [0, 0, 0], sizes = [1, 32, 8], strides = [1, 1, 1]} : vector<4x32x8xf32> to vector<1x32x8xf32>
    %64 = vector.shape_cast %63 : vector<1x32x8xf32> to vector<32x8xf32>
    %cst_39 = arith.constant dense<0.000000e+00> : vector<16x8xf32>
    %65 = tpu.matmul %48, %64, %cst_39 {dimension_numbers = #tpu.dot_dimension_numbers<[1], [0], [0], [1], [0, 0, 1, 1], [], []>} : vector<16x32xf32>, vector<32x8xf32>, vector<16x8xf32> -> vector<16x8xf32>
    %66 = vector.extract_strided_slice %18 {offsets = [2, 0, 0], sizes = [1, 1, 8], strides = [1, 1, 1]} : vector<3x4x8xf32> to vector<1x1x8xf32>
    %67 = vector.shape_cast %66 : vector<1x1x8xf32> to vector<1x8xf32>
    %68 = vector.broadcast %67 : vector<1x8xf32> to vector<16x8xf32>
    %69 = arith.addf %65, %68 : vector<16x8xf32>
    %cst_40 = arith.constant dense<0.000000e+00> : vector<16x16xf32>
    %70 = tpu.matmul %55, %62, %cst_40 {dimension_numbers = #tpu.dot_dimension_numbers<[1], [1], [0], [0], [0, 0, 1, 0], [], []>} : vector<16x8xf32>, vector<16x8xf32>, vector<16x16xf32> -> vector<16x16xf32>
    %cst_41 = arith.constant 0.353553385 : f32
    %71 = vector.broadcast %cst_41 : f32 to vector<16x16xf32>
    %72 = arith.mulf %70, %71 : vector<16x16xf32>
    %cst_42 = arith.constant -1.000000e+30 : f32
    %73 = vector.broadcast %cst_42 : f32 to vector<16x16xf32>
    %74 = arith.select %2, %72, %73 : vector<16x16xi1>, vector<16x16xf32>
    %cst_43 = arith.constant dense<0xFF800000> : vector<16xf32>
    %75 = vector.multi_reduction <maximumf>, %74, %cst_43 [1] : vector<16x16xf32> to vector<16xf32>
    %76 = vector.shape_cast %75 : vector<16xf32> to vector<16x1xf32>
    %77 = vector.broadcast %76 : vector<16x1xf32> to vector<16x16xf32>
    %78 = arith.subf %74, %77 : vector<16x16xf32>
    %79 = math.exp %78 : vector<16x16xf32>
    %cst_44 = arith.constant dense<0.000000e+00> : vector<16xf32>
    %80 = vector.multi_reduction <add>, %79, %cst_44 [1] : vector<16x16xf32> to vector<16xf32>
    %81 = vector.shape_cast %80 : vector<16xf32> to vector<16x1xf32>
    %82 = tpu.reciprocal %81 : vector<16x1xf32> -> vector<16x1xf32>
    %83 = vector.broadcast %82 : vector<16x1xf32> to vector<16x16xf32>
    %84 = arith.mulf %79, %83 : vector<16x16xf32>
    %cst_45 = arith.constant dense<0.000000e+00> : vector<16x8xf32>
    %85 = tpu.matmul %84, %69, %cst_45 {dimension_numbers = #tpu.dot_dimension_numbers<[1], [0], [0], [1], [0, 0, 1, 1], [], []>} : vector<16x16xf32>, vector<16x8xf32>, vector<16x8xf32> -> vector<16x8xf32>
    %86 = vector.extract_strided_slice %26 {offsets = [0, 0, 0], sizes = [1, 8, 32], strides = [1, 1, 1]} : vector<4x8x32xf32> to vector<1x8x32xf32>
    %87 = vector.shape_cast %86 : vector<1x8x32xf32> to vector<8x32xf32>
    %cst_46 = arith.constant dense<0.000000e+00> : vector<16x32xf32>
    %88 = tpu.matmul %85, %87, %cst_46 {dimension_numbers = #tpu.dot_dimension_numbers<[1], [0], [0], [1], [0, 0, 1, 1], [], []>} : vector<16x8xf32>, vector<8x32xf32>, vector<16x32xf32> -> vector<16x32xf32>
    %89 = vector.extract_strided_slice %20 {offsets = [1, 0, 0], sizes = [1, 32, 8], strides = [1, 1, 1]} : vector<4x32x8xf32> to vector<1x32x8xf32>
    %90 = vector.shape_cast %89 : vector<1x32x8xf32> to vector<32x8xf32>
    %cst_47 = arith.constant dense<0.000000e+00> : vector<16x8xf32>
    %91 = tpu.matmul %48, %90, %cst_47 {dimension_numbers = #tpu.dot_dimension_numbers<[1], [0], [0], [1], [0, 0, 1, 1], [], []>} : vector<16x32xf32>, vector<32x8xf32>, vector<16x8xf32> -> vector<16x8xf32>
    %92 = vector.extract_strided_slice %18 {offsets = [0, 1, 0], sizes = [1, 1, 8], strides = [1, 1, 1]} : vector<3x4x8xf32> to vector<1x1x8xf32>
    %93 = vector.shape_cast %92 : vector<1x1x8xf32> to vector<1x8xf32>
    %94 = vector.broadcast %93 : vector<1x8xf32> to vector<16x8xf32>
    %95 = arith.addf %91, %94 : vector<16x8xf32>
    %96 = vector.extract_strided_slice %22 {offsets = [1, 0, 0], sizes = [1, 32, 8], strides = [1, 1, 1]} : vector<4x32x8xf32> to vector<1x32x8xf32>
    %97 = vector.shape_cast %96 : vector<1x32x8xf32> to vector<32x8xf32>
    %cst_48 = arith.constant dense<0.000000e+00> : vector<16x8xf32>
    %98 = tpu.matmul %48, %97, %cst_48 {dimension_numbers = #tpu.dot_dimension_numbers<[1], [0], [0], [1], [0, 0, 1, 1], [], []>} : vector<16x32xf32>, vector<32x8xf32>, vector<16x8xf32> -> vector<16x8xf32>
    %99 = vector.extract_strided_slice %18 {offsets = [1, 1, 0], sizes = [1, 1, 8], strides = [1, 1, 1]} : vector<3x4x8xf32> to vector<1x1x8xf32>
    %100 = vector.shape_cast %99 : vector<1x1x8xf32> to vector<1x8xf32>
    %101 = vector.broadcast %100 : vector<1x8xf32> to vector<16x8xf32>
    %102 = arith.addf %98, %101 : vector<16x8xf32>
    %103 = vector.extract_strided_slice %24 {offsets = [1, 0, 0], sizes = [1, 32, 8], strides = [1, 1, 1]} : vector<4x32x8xf32> to vector<1x32x8xf32>
    %104 = vector.shape_cast %103 : vector<1x32x8xf32> to vector<32x8xf32>
    %cst_49 = arith.constant dense<0.000000e+00> : vector<16x8xf32>
    %105 = tpu.matmul %48, %104, %cst_49 {dimension_numbers = #tpu.dot_dimension_numbers<[1], [0], [0], [1], [0, 0, 1, 1], [], []>} : vector<16x32xf32>, vector<32x8xf32>, vector<16x8xf32> -> vector<16x8xf32>
    %106 = vector.extract_strided_slice %18 {offsets = [2, 1, 0], sizes = [1, 1, 8], strides = [1, 1, 1]} : vector<3x4x8xf32> to vector<1x1x8xf32>
    %107 = vector.shape_cast %106 : vector<1x1x8xf32> to vector<1x8xf32>
    %108 = vector.broadcast %107 : vector<1x8xf32> to vector<16x8xf32>
    %109 = arith.addf %105, %108 : vector<16x8xf32>
    %cst_50 = arith.constant dense<0.000000e+00> : vector<16x16xf32>
    %110 = tpu.matmul %95, %102, %cst_50 {dimension_numbers = #tpu.dot_dimension_numbers<[1], [1], [0], [0], [0, 0, 1, 0], [], []>} : vector<16x8xf32>, vector<16x8xf32>, vector<16x16xf32> -> vector<16x16xf32>
    %cst_51 = arith.constant 0.353553385 : f32
    %111 = vector.broadcast %cst_51 : f32 to vector<16x16xf32>
    %112 = arith.mulf %110, %111 : vector<16x16xf32>
    %cst_52 = arith.constant -1.000000e+30 : f32
    %113 = vector.broadcast %cst_52 : f32 to vector<16x16xf32>
    %114 = arith.select %2, %112, %113 : vector<16x16xi1>, vector<16x16xf32>
    %cst_53 = arith.constant dense<0xFF800000> : vector<16xf32>
    %115 = vector.multi_reduction <maximumf>, %114, %cst_53 [1] : vector<16x16xf32> to vector<16xf32>
    %116 = vector.shape_cast %115 : vector<16xf32> to vector<16x1xf32>
    %117 = vector.broadcast %116 : vector<16x1xf32> to vector<16x16xf32>
    %118 = arith.subf %114, %117 : vector<16x16xf32>
    %119 = math.exp %118 : vector<16x16xf32>
    %cst_54 = arith.constant dense<0.000000e+00> : vector<16xf32>
    %120 = vector.multi_reduction <add>, %119, %cst_54 [1] : vector<16x16xf32> to vector<16xf32>
    %121 = vector.shape_cast %120 : vector<16xf32> to vector<16x1xf32>
    %122 = tpu.reciprocal %121 : vector<16x1xf32> -> vector<16x1xf32>
    %123 = vector.broadcast %122 : vector<16x1xf32> to vector<16x16xf32>
    %124 = arith.mulf %119, %123 : vector<16x16xf32>
    %cst_55 = arith.constant dense<0.000000e+00> : vector<16x8xf32>
    %125 = tpu.matmul %124, %109, %cst_55 {dimension_numbers = #tpu.dot_dimension_numbers<[1], [0], [0], [1], [0, 0, 1, 1], [], []>} : vector<16x16xf32>, vector<16x8xf32>, vector<16x8xf32> -> vector<16x8xf32>
    %126 = vector.extract_strided_slice %26 {offsets = [1, 0, 0], sizes = [1, 8, 32], strides = [1, 1, 1]} : vector<4x8x32xf32> to vector<1x8x32xf32>
    %127 = vector.shape_cast %126 : vector<1x8x32xf32> to vector<8x32xf32>
    %cst_56 = arith.constant dense<0.000000e+00> : vector<16x32xf32>
    %128 = tpu.matmul %125, %127, %cst_56 {dimension_numbers = #tpu.dot_dimension_numbers<[1], [0], [0], [1], [0, 0, 1, 1], [], []>} : vector<16x8xf32>, vector<8x32xf32>, vector<16x32xf32> -> vector<16x32xf32>
    %129 = arith.addf %88, %128 : vector<16x32xf32>
    %130 = vector.extract_strided_slice %20 {offsets = [2, 0, 0], sizes = [1, 32, 8], strides = [1, 1, 1]} : vector<4x32x8xf32> to vector<1x32x8xf32>
    %131 = vector.shape_cast %130 : vector<1x32x8xf32> to vector<32x8xf32>
    %cst_57 = arith.constant dense<0.000000e+00> : vector<16x8xf32>
    %132 = tpu.matmul %48, %131, %cst_57 {dimension_numbers = #tpu.dot_dimension_numbers<[1], [0], [0], [1], [0, 0, 1, 1], [], []>} : vector<16x32xf32>, vector<32x8xf32>, vector<16x8xf32> -> vector<16x8xf32>
    %133 = vector.extract_strided_slice %18 {offsets = [0, 2, 0], sizes = [1, 1, 8], strides = [1, 1, 1]} : vector<3x4x8xf32> to vector<1x1x8xf32>
    %134 = vector.shape_cast %133 : vector<1x1x8xf32> to vector<1x8xf32>
    %135 = vector.broadcast %134 : vector<1x8xf32> to vector<16x8xf32>
    %136 = arith.addf %132, %135 : vector<16x8xf32>
    %137 = vector.extract_strided_slice %22 {offsets = [2, 0, 0], sizes = [1, 32, 8], strides = [1, 1, 1]} : vector<4x32x8xf32> to vector<1x32x8xf32>
    %138 = vector.shape_cast %137 : vector<1x32x8xf32> to vector<32x8xf32>
    %cst_58 = arith.constant dense<0.000000e+00> : vector<16x8xf32>
    %139 = tpu.matmul %48, %138, %cst_58 {dimension_numbers = #tpu.dot_dimension_numbers<[1], [0], [0], [1], [0, 0, 1, 1], [], []>} : vector<16x32xf32>, vector<32x8xf32>, vector<16x8xf32> -> vector<16x8xf32>
    %140 = vector.extract_strided_slice %18 {offsets = [1, 2, 0], sizes = [1, 1, 8], strides = [1, 1, 1]} : vector<3x4x8xf32> to vector<1x1x8xf32>
    %141 = vector.shape_cast %140 : vector<1x1x8xf32> to vector<1x8xf32>
    %142 = vector.broadcast %141 : vector<1x8xf32> to vector<16x8xf32>
    %143 = arith.addf %139, %142 : vector<16x8xf32>
    %144 = vector.extract_strided_slice %24 {offsets = [2, 0, 0], sizes = [1, 32, 8], strides = [1, 1, 1]} : vector<4x32x8xf32> to vector<1x32x8xf32>
    %145 = vector.shape_cast %144 : vector<1x32x8xf32> to vector<32x8xf32>
    %cst_59 = arith.constant dense<0.000000e+00> : vector<16x8xf32>
    %146 = tpu.matmul %48, %145, %cst_59 {dimension_numbers = #tpu.dot_dimension_numbers<[1], [0], [0], [1], [0, 0, 1, 1], [], []>} : vector<16x32xf32>, vector<32x8xf32>, vector<16x8xf32> -> vector<16x8xf32>
    %147 = vector.extract_strided_slice %18 {offsets = [2, 2, 0], sizes = [1, 1, 8], strides = [1, 1, 1]} : vector<3x4x8xf32> to vector<1x1x8xf32>
    %148 = vector.shape_cast %147 : vector<1x1x8xf32> to vector<1x8xf32>
    %149 = vector.broadcast %148 : vector<1x8xf32> to vector<16x8xf32>
    %150 = arith.addf %146, %149 : vector<16x8xf32>
    %cst_60 = arith.constant dense<0.000000e+00> : vector<16x16xf32>
    %151 = tpu.matmul %136, %143, %cst_60 {dimension_numbers = #tpu.dot_dimension_numbers<[1], [1], [0], [0], [0, 0, 1, 0], [], []>} : vector<16x8xf32>, vector<16x8xf32>, vector<16x16xf32> -> vector<16x16xf32>
    %cst_61 = arith.constant 0.353553385 : f32
    %152 = vector.broadcast %cst_61 : f32 to vector<16x16xf32>
    %153 = arith.mulf %151, %152 : vector<16x16xf32>
    %cst_62 = arith.constant -1.000000e+30 : f32
    %154 = vector.broadcast %cst_62 : f32 to vector<16x16xf32>
    %155 = arith.select %2, %153, %154 : vector<16x16xi1>, vector<16x16xf32>
    %cst_63 = arith.constant dense<0xFF800000> : vector<16xf32>
    %156 = vector.multi_reduction <maximumf>, %155, %cst_63 [1] : vector<16x16xf32> to vector<16xf32>
    %157 = vector.shape_cast %156 : vector<16xf32> to vector<16x1xf32>
    %158 = vector.broadcast %157 : vector<16x1xf32> to vector<16x16xf32>
    %159 = arith.subf %155, %158 : vector<16x16xf32>
    %160 = math.exp %159 : vector<16x16xf32>
    %cst_64 = arith.constant dense<0.000000e+00> : vector<16xf32>
    %161 = vector.multi_reduction <add>, %160, %cst_64 [1] : vector<16x16xf32> to vector<16xf32>
    %162 = vector.shape_cast %161 : vector<16xf32> to vector<16x1xf32>
    %163 = tpu.reciprocal %162 : vector<16x1xf32> -> vector<16x1xf32>
    %164 = vector.broadcast %163 : vector<16x1xf32> to vector<16x16xf32>
    %165 = arith.mulf %160, %164 : vector<16x16xf32>
    %cst_65 = arith.constant dense<0.000000e+00> : vector<16x8xf32>
    %166 = tpu.matmul %165, %150, %cst_65 {dimension_numbers = #tpu.dot_dimension_numbers<[1], [0], [0], [1], [0, 0, 1, 1], [], []>} : vector<16x16xf32>, vector<16x8xf32>, vector<16x8xf32> -> vector<16x8xf32>
    %167 = vector.extract_strided_slice %26 {offsets = [2, 0, 0], sizes = [1, 8, 32], strides = [1, 1, 1]} : vector<4x8x32xf32> to vector<1x8x32xf32>
    %168 = vector.shape_cast %167 : vector<1x8x32xf32> to vector<8x32xf32>
    %cst_66 = arith.constant dense<0.000000e+00> : vector<16x32xf32>
    %169 = tpu.matmul %166, %168, %cst_66 {dimension_numbers = #tpu.dot_dimension_numbers<[1], [0], [0], [1], [0, 0, 1, 1], [], []>} : vector<16x8xf32>, vector<8x32xf32>, vector<16x32xf32> -> vector<16x32xf32>
    %170 = arith.addf %129, %169 : vector<16x32xf32>
    %171 = vector.extract_strided_slice %20 {offsets = [3, 0, 0], sizes = [1, 32, 8], strides = [1, 1, 1]} : vector<4x32x8xf32> to vector<1x32x8xf32>
    %172 = vector.shape_cast %171 : vector<1x32x8xf32> to vector<32x8xf32>
    %cst_67 = arith.constant dense<0.000000e+00> : vector<16x8xf32>
    %173 = tpu.matmul %48, %172, %cst_67 {dimension_numbers = #tpu.dot_dimension_numbers<[1], [0], [0], [1], [0, 0, 1, 1], [], []>} : vector<16x32xf32>, vector<32x8xf32>, vector<16x8xf32> -> vector<16x8xf32>
    %174 = vector.extract_strided_slice %18 {offsets = [0, 3, 0], sizes = [1, 1, 8], strides = [1, 1, 1]} : vector<3x4x8xf32> to vector<1x1x8xf32>
    %175 = vector.shape_cast %174 : vector<1x1x8xf32> to vector<1x8xf32>
    %176 = vector.broadcast %175 : vector<1x8xf32> to vector<16x8xf32>
    %177 = arith.addf %173, %176 : vector<16x8xf32>
    %178 = vector.extract_strided_slice %22 {offsets = [3, 0, 0], sizes = [1, 32, 8], strides = [1, 1, 1]} : vector<4x32x8xf32> to vector<1x32x8xf32>
    %179 = vector.shape_cast %178 : vector<1x32x8xf32> to vector<32x8xf32>
    %cst_68 = arith.constant dense<0.000000e+00> : vector<16x8xf32>
    %180 = tpu.matmul %48, %179, %cst_68 {dimension_numbers = #tpu.dot_dimension_numbers<[1], [0], [0], [1], [0, 0, 1, 1], [], []>} : vector<16x32xf32>, vector<32x8xf32>, vector<16x8xf32> -> vector<16x8xf32>
    %181 = vector.extract_strided_slice %18 {offsets = [1, 3, 0], sizes = [1, 1, 8], strides = [1, 1, 1]} : vector<3x4x8xf32> to vector<1x1x8xf32>
    %182 = vector.shape_cast %181 : vector<1x1x8xf32> to vector<1x8xf32>
    %183 = vector.broadcast %182 : vector<1x8xf32> to vector<16x8xf32>
    %184 = arith.addf %180, %183 : vector<16x8xf32>
    %185 = vector.extract_strided_slice %24 {offsets = [3, 0, 0], sizes = [1, 32, 8], strides = [1, 1, 1]} : vector<4x32x8xf32> to vector<1x32x8xf32>
    %186 = vector.shape_cast %185 : vector<1x32x8xf32> to vector<32x8xf32>
    %cst_69 = arith.constant dense<0.000000e+00> : vector<16x8xf32>
    %187 = tpu.matmul %48, %186, %cst_69 {dimension_numbers = #tpu.dot_dimension_numbers<[1], [0], [0], [1], [0, 0, 1, 1], [], []>} : vector<16x32xf32>, vector<32x8xf32>, vector<16x8xf32> -> vector<16x8xf32>
    %188 = vector.extract_strided_slice %18 {offsets = [2, 3, 0], sizes = [1, 1, 8], strides = [1, 1, 1]} : vector<3x4x8xf32> to vector<1x1x8xf32>
    %189 = vector.shape_cast %188 : vector<1x1x8xf32> to vector<1x8xf32>
    %190 = vector.broadcast %189 : vector<1x8xf32> to vector<16x8xf32>
    %191 = arith.addf %187, %190 : vector<16x8xf32>
    %cst_70 = arith.constant dense<0.000000e+00> : vector<16x16xf32>
    %192 = tpu.matmul %177, %184, %cst_70 {dimension_numbers = #tpu.dot_dimension_numbers<[1], [1], [0], [0], [0, 0, 1, 0], [], []>} : vector<16x8xf32>, vector<16x8xf32>, vector<16x16xf32> -> vector<16x16xf32>
    %cst_71 = arith.constant 0.353553385 : f32
    %193 = vector.broadcast %cst_71 : f32 to vector<16x16xf32>
    %194 = arith.mulf %192, %193 : vector<16x16xf32>
    %cst_72 = arith.constant -1.000000e+30 : f32
    %195 = vector.broadcast %cst_72 : f32 to vector<16x16xf32>
    %196 = arith.select %2, %194, %195 : vector<16x16xi1>, vector<16x16xf32>
    %cst_73 = arith.constant dense<0xFF800000> : vector<16xf32>
    %197 = vector.multi_reduction <maximumf>, %196, %cst_73 [1] : vector<16x16xf32> to vector<16xf32>
    %198 = vector.shape_cast %197 : vector<16xf32> to vector<16x1xf32>
    %199 = vector.broadcast %198 : vector<16x1xf32> to vector<16x16xf32>
    %200 = arith.subf %196, %199 : vector<16x16xf32>
    %201 = math.exp %200 : vector<16x16xf32>
    %cst_74 = arith.constant dense<0.000000e+00> : vector<16xf32>
    %202 = vector.multi_reduction <add>, %201, %cst_74 [1] : vector<16x16xf32> to vector<16xf32>
    %203 = vector.shape_cast %202 : vector<16xf32> to vector<16x1xf32>
    %204 = tpu.reciprocal %203 : vector<16x1xf32> -> vector<16x1xf32>
    %205 = vector.broadcast %204 : vector<16x1xf32> to vector<16x16xf32>
    %206 = arith.mulf %201, %205 : vector<16x16xf32>
    %cst_75 = arith.constant dense<0.000000e+00> : vector<16x8xf32>
    %207 = tpu.matmul %206, %191, %cst_75 {dimension_numbers = #tpu.dot_dimension_numbers<[1], [0], [0], [1], [0, 0, 1, 1], [], []>} : vector<16x16xf32>, vector<16x8xf32>, vector<16x8xf32> -> vector<16x8xf32>
    %208 = vector.extract_strided_slice %26 {offsets = [3, 0, 0], sizes = [1, 8, 32], strides = [1, 1, 1]} : vector<4x8x32xf32> to vector<1x8x32xf32>
    %209 = vector.shape_cast %208 : vector<1x8x32xf32> to vector<8x32xf32>
    %cst_76 = arith.constant dense<0.000000e+00> : vector<16x32xf32>
    %210 = tpu.matmul %207, %209, %cst_76 {dimension_numbers = #tpu.dot_dimension_numbers<[1], [0], [0], [1], [0, 0, 1, 1], [], []>} : vector<16x8xf32>, vector<8x32xf32>, vector<16x32xf32> -> vector<16x32xf32>
    %211 = arith.addf %170, %210 : vector<16x32xf32>
    %212 = arith.addf %8, %211 : vector<16x32xf32>
    %213 = vector.broadcast %13 : vector<1x32xf32> to vector<16x32xf32>
    %214 = arith.addf %212, %213 : vector<16x32xf32>
    %cst_77 = arith.constant dense<0.000000e+00> : vector<16xf32>
    %215 = vector.multi_reduction <add>, %214, %cst_77 [1] : vector<16x32xf32> to vector<16xf32>
    %216 = vector.shape_cast %215 : vector<16xf32> to vector<16x1xf32>
    %cst_78 = arith.constant 3.200000e+01 : f32
    %217 = vector.broadcast %cst_78 : f32 to vector<16x1xf32>
    %218 = arith.divf %216, %217 : vector<16x1xf32>
    %219 = vector.broadcast %218 : vector<16x1xf32> to vector<16x32xf32>
    %220 = arith.subf %214, %219 : vector<16x32xf32>
    %221 = arith.mulf %220, %220 : vector<16x32xf32>
    %cst_79 = arith.constant dense<0.000000e+00> : vector<16xf32>
    %222 = vector.multi_reduction <add>, %221, %cst_79 [1] : vector<16x32xf32> to vector<16xf32>
    %223 = vector.shape_cast %222 : vector<16xf32> to vector<16x1xf32>
    %cst_80 = arith.constant 3.200000e+01 : f32
    %224 = vector.broadcast %cst_80 : f32 to vector<16x1xf32>
    %225 = arith.divf %223, %224 : vector<16x1xf32>
    %226 = vector.broadcast %218 : vector<16x1xf32> to vector<16x32xf32>
    %227 = arith.subf %214, %226 : vector<16x32xf32>
    %cst_81 = arith.constant 9.99999974E-6 : f32
    %228 = vector.broadcast %cst_81 : f32 to vector<16x1xf32>
    %229 = arith.addf %225, %228 : vector<16x1xf32>
    %230 = math.rsqrt %229 : vector<16x1xf32>
    %231 = vector.broadcast %230 : vector<16x1xf32> to vector<16x32xf32>
    %232 = arith.mulf %227, %231 : vector<16x32xf32>
    %233 = vector.broadcast %14 : vector<1x32xf32> to vector<16x32xf32>
    %234 = arith.mulf %232, %233 : vector<16x32xf32>
    %235 = vector.broadcast %15 : vector<1x32xf32> to vector<16x32xf32>
    %236 = arith.addf %234, %235 : vector<16x32xf32>
    %c0_82 = arith.constant 0 : index
    %c0_83 = arith.constant 0 : index
    %c0_84 = arith.constant 0 : index
    %237 = vector.load %arg7[%c0_82, %c0_83, %c0_84] : memref<2x32x128xf32, #tpu.memory_space<vmem>>, vector<1x32x128xf32>
    %238 = vector.shape_cast %237 : vector<1x32x128xf32> to vector<32x128xf32>
    %cst_85 = arith.constant dense<0.000000e+00> : vector<16x128xf32>
    %239 = tpu.matmul %236, %238, %cst_85 {dimension_numbers = #tpu.dot_dimension_numbers<[1], [0], [0], [1], [0, 0, 1, 1], [], []>} : vector<16x32xf32>, vector<32x128xf32>, vector<16x128xf32> -> vector<16x128xf32>
    %c0_86 = arith.constant 0 : index
    %c0_87 = arith.constant 0 : index
    %c0_88 = arith.constant 0 : index
    %240 = vector.load %arg8[%c0_86, %c0_87, %c0_88] : memref<2x1x128xf32, #tpu.memory_space<vmem>>, vector<1x1x128xf32>
    %241 = vector.shape_cast %240 : vector<1x1x128xf32> to vector<1x128xf32>
    %242 = vector.broadcast %241 : vector<1x128xf32> to vector<16x128xf32>
    %243 = arith.addf %239, %242 : vector<16x128xf32>
    %cst_89 = arith.constant 5.000000e-01 : f32
    %244 = vector.broadcast %cst_89 : f32 to vector<16x128xf32>
    %245 = arith.mulf %243, %244 : vector<16x128xf32>
    %cst_90 = arith.constant 0.707106769 : f32
    %246 = vector.broadcast %cst_90 : f32 to vector<16x128xf32>
    %247 = arith.mulf %243, %246 : vector<16x128xf32>
    %248 = math.absf %247 : vector<16x128xf32>
    %cst_91 = arith.constant 0.327591091 : f32
    %249 = vector.broadcast %cst_91 : f32 to vector<16x128xf32>
    %250 = arith.mulf %249, %248 : vector<16x128xf32>
    %cst_92 = arith.constant 1.000000e+00 : f32
    %251 = vector.broadcast %cst_92 : f32 to vector<16x128xf32>
    %252 = arith.addf %251, %250 : vector<16x128xf32>
    %cst_93 = arith.constant 1.000000e+00 : f32
    %253 = vector.broadcast %cst_93 : f32 to vector<16x128xf32>
    %254 = arith.divf %253, %252 : vector<16x128xf32>
    %cst_94 = arith.constant 1.06140542 : f32
    %255 = vector.broadcast %cst_94 : f32 to vector<16x128xf32>
    %256 = arith.mulf %255, %254 : vector<16x128xf32>
    %cst_95 = arith.constant -1.45315206 : f32
    %257 = vector.broadcast %cst_95 : f32 to vector<16x128xf32>
    %258 = arith.addf %256, %257 : vector<16x128xf32>
    %259 = arith.mulf %258, %254 : vector<16x128xf32>
    %cst_96 = arith.constant 1.42141378 : f32
    %260 = vector.broadcast %cst_96 : f32 to vector<16x128xf32>
    %261 = arith.addf %259, %260 : vector<16x128xf32>
    %262 = arith.mulf %261, %254 : vector<16x128xf32>
    %cst_97 = arith.constant -0.284496725 : f32
    %263 = vector.broadcast %cst_97 : f32 to vector<16x128xf32>
    %264 = arith.addf %262, %263 : vector<16x128xf32>
    %265 = arith.mulf %264, %254 : vector<16x128xf32>
    %cst_98 = arith.constant 0.254829586 : f32
    %266 = vector.broadcast %cst_98 : f32 to vector<16x128xf32>
    %267 = arith.addf %265, %266 : vector<16x128xf32>
    %268 = arith.mulf %267, %254 : vector<16x128xf32>
    %cst_99 = arith.constant 0.000000e+00 : f32
    %269 = vector.broadcast %cst_99 : f32 to vector<16x128xf32>
    %270 = arith.subf %269, %248 : vector<16x128xf32>
    %271 = arith.mulf %270, %248 : vector<16x128xf32>
    %272 = math.exp %271 : vector<16x128xf32>
    %273 = arith.mulf %268, %272 : vector<16x128xf32>
    %cst_100 = arith.constant 1.000000e+00 : f32
    %274 = vector.broadcast %cst_100 : f32 to vector<16x128xf32>
    %275 = arith.subf %274, %273 : vector<16x128xf32>
    %cst_101 = arith.constant 0.000000e+00 : f32
    %276 = vector.broadcast %cst_101 : f32 to vector<16x128xf32>
    %277 = arith.cmpf olt, %247, %276 : vector<16x128xf32>
    %cst_102 = arith.constant 0.000000e+00 : f32
    %278 = vector.broadcast %cst_102 : f32 to vector<16x128xf32>
    %279 = arith.subf %278, %275 : vector<16x128xf32>
    %280 = arith.select %277, %279, %275 : vector<16x128xi1>, vector<16x128xf32>
    %cst_103 = arith.constant 1.000000e+00 : f32
    %281 = vector.broadcast %cst_103 : f32 to vector<16x128xf32>
    %282 = arith.addf %281, %280 : vector<16x128xf32>
    %283 = arith.mulf %245, %282 : vector<16x128xf32>
    %c0_104 = arith.constant 0 : index
    %c0_105 = arith.constant 0 : index
    %c0_106 = arith.constant 0 : index
    %284 = vector.load %arg9[%c0_104, %c0_105, %c0_106] : memref<2x128x32xf32, #tpu.memory_space<vmem>>, vector<1x128x32xf32>
    %285 = vector.shape_cast %284 : vector<1x128x32xf32> to vector<128x32xf32>
    %cst_107 = arith.constant dense<0.000000e+00> : vector<16x32xf32>
    %286 = tpu.matmul %283, %285, %cst_107 {dimension_numbers = #tpu.dot_dimension_numbers<[1], [0], [0], [1], [0, 0, 1, 1], [], []>} : vector<16x128xf32>, vector<128x32xf32>, vector<16x32xf32> -> vector<16x32xf32>
    %287 = vector.broadcast %16 : vector<1x32xf32> to vector<16x32xf32>
    %288 = arith.addf %286, %287 : vector<16x32xf32>
    %289 = arith.addf %214, %288 : vector<16x32xf32>
    %c1 = arith.constant 1 : index
    %c0_108 = arith.constant 0 : index
    %c0_109 = arith.constant 0 : index
    %290 = vector.load %arg1[%c1, %c0_108, %c0_109] : memref<2x6x32xf32, #tpu.memory_space<vmem>>, vector<1x6x32xf32>
    %291 = vector.shape_cast %290 : vector<1x6x32xf32> to vector<6x32xf32>
    %292 = vector.extract_strided_slice %291 {offsets = [0, 0], sizes = [1, 32], strides = [1, 1]} : vector<6x32xf32> to vector<1x32xf32>
    %293 = vector.extract_strided_slice %291 {offsets = [1, 0], sizes = [1, 32], strides = [1, 1]} : vector<6x32xf32> to vector<1x32xf32>
    %294 = vector.extract_strided_slice %291 {offsets = [2, 0], sizes = [1, 32], strides = [1, 1]} : vector<6x32xf32> to vector<1x32xf32>
    %295 = vector.extract_strided_slice %291 {offsets = [3, 0], sizes = [1, 32], strides = [1, 1]} : vector<6x32xf32> to vector<1x32xf32>
    %296 = vector.extract_strided_slice %291 {offsets = [4, 0], sizes = [1, 32], strides = [1, 1]} : vector<6x32xf32> to vector<1x32xf32>
    %297 = vector.extract_strided_slice %291 {offsets = [5, 0], sizes = [1, 32], strides = [1, 1]} : vector<6x32xf32> to vector<1x32xf32>
    %c1_110 = arith.constant 1 : index
    %c0_111 = arith.constant 0 : index
    %c0_112 = arith.constant 0 : index
    %c0_113 = arith.constant 0 : index
    %298 = vector.load %arg2[%c1_110, %c0_111, %c0_112, %c0_113] : memref<2x3x4x8xf32, #tpu.memory_space<vmem>>, vector<1x3x4x8xf32>
    %299 = vector.shape_cast %298 : vector<1x3x4x8xf32> to vector<3x4x8xf32>
    %c1_114 = arith.constant 1 : index
    %c0_115 = arith.constant 0 : index
    %c0_116 = arith.constant 0 : index
    %c0_117 = arith.constant 0 : index
    %300 = vector.load %arg3[%c1_114, %c0_115, %c0_116, %c0_117] : memref<2x4x32x8xf32, #tpu.memory_space<vmem>>, vector<1x4x32x8xf32>
    %301 = vector.shape_cast %300 : vector<1x4x32x8xf32> to vector<4x32x8xf32>
    %c1_118 = arith.constant 1 : index
    %c0_119 = arith.constant 0 : index
    %c0_120 = arith.constant 0 : index
    %c0_121 = arith.constant 0 : index
    %302 = vector.load %arg4[%c1_118, %c0_119, %c0_120, %c0_121] : memref<2x4x32x8xf32, #tpu.memory_space<vmem>>, vector<1x4x32x8xf32>
    %303 = vector.shape_cast %302 : vector<1x4x32x8xf32> to vector<4x32x8xf32>
    %c1_122 = arith.constant 1 : index
    %c0_123 = arith.constant 0 : index
    %c0_124 = arith.constant 0 : index
    %c0_125 = arith.constant 0 : index
    %304 = vector.load %arg5[%c1_122, %c0_123, %c0_124, %c0_125] : memref<2x4x32x8xf32, #tpu.memory_space<vmem>>, vector<1x4x32x8xf32>
    %305 = vector.shape_cast %304 : vector<1x4x32x8xf32> to vector<4x32x8xf32>
    %c1_126 = arith.constant 1 : index
    %c0_127 = arith.constant 0 : index
    %c0_128 = arith.constant 0 : index
    %c0_129 = arith.constant 0 : index
    %306 = vector.load %arg6[%c1_126, %c0_127, %c0_128, %c0_129] : memref<2x4x8x32xf32, #tpu.memory_space<vmem>>, vector<1x4x8x32xf32>
    %307 = vector.shape_cast %306 : vector<1x4x8x32xf32> to vector<4x8x32xf32>
    %cst_130 = arith.constant dense<0.000000e+00> : vector<16xf32>
    %308 = vector.multi_reduction <add>, %289, %cst_130 [1] : vector<16x32xf32> to vector<16xf32>
    %309 = vector.shape_cast %308 : vector<16xf32> to vector<16x1xf32>
    %cst_131 = arith.constant 3.200000e+01 : f32
    %310 = vector.broadcast %cst_131 : f32 to vector<16x1xf32>
    %311 = arith.divf %309, %310 : vector<16x1xf32>
    %312 = vector.broadcast %311 : vector<16x1xf32> to vector<16x32xf32>
    %313 = arith.subf %289, %312 : vector<16x32xf32>
    %314 = arith.mulf %313, %313 : vector<16x32xf32>
    %cst_132 = arith.constant dense<0.000000e+00> : vector<16xf32>
    %315 = vector.multi_reduction <add>, %314, %cst_132 [1] : vector<16x32xf32> to vector<16xf32>
    %316 = vector.shape_cast %315 : vector<16xf32> to vector<16x1xf32>
    %cst_133 = arith.constant 3.200000e+01 : f32
    %317 = vector.broadcast %cst_133 : f32 to vector<16x1xf32>
    %318 = arith.divf %316, %317 : vector<16x1xf32>
    %319 = vector.broadcast %311 : vector<16x1xf32> to vector<16x32xf32>
    %320 = arith.subf %289, %319 : vector<16x32xf32>
    %cst_134 = arith.constant 9.99999974E-6 : f32
    %321 = vector.broadcast %cst_134 : f32 to vector<16x1xf32>
    %322 = arith.addf %318, %321 : vector<16x1xf32>
    %323 = math.rsqrt %322 : vector<16x1xf32>
    %324 = vector.broadcast %323 : vector<16x1xf32> to vector<16x32xf32>
    %325 = arith.mulf %320, %324 : vector<16x32xf32>
    %326 = vector.broadcast %292 : vector<1x32xf32> to vector<16x32xf32>
    %327 = arith.mulf %325, %326 : vector<16x32xf32>
    %328 = vector.broadcast %293 : vector<1x32xf32> to vector<16x32xf32>
    %329 = arith.addf %327, %328 : vector<16x32xf32>
    %330 = vector.extract_strided_slice %301 {offsets = [0, 0, 0], sizes = [1, 32, 8], strides = [1, 1, 1]} : vector<4x32x8xf32> to vector<1x32x8xf32>
    %331 = vector.shape_cast %330 : vector<1x32x8xf32> to vector<32x8xf32>
    %cst_135 = arith.constant dense<0.000000e+00> : vector<16x8xf32>
    %332 = tpu.matmul %329, %331, %cst_135 {dimension_numbers = #tpu.dot_dimension_numbers<[1], [0], [0], [1], [0, 0, 1, 1], [], []>} : vector<16x32xf32>, vector<32x8xf32>, vector<16x8xf32> -> vector<16x8xf32>
    %333 = vector.extract_strided_slice %299 {offsets = [0, 0, 0], sizes = [1, 1, 8], strides = [1, 1, 1]} : vector<3x4x8xf32> to vector<1x1x8xf32>
    %334 = vector.shape_cast %333 : vector<1x1x8xf32> to vector<1x8xf32>
    %335 = vector.broadcast %334 : vector<1x8xf32> to vector<16x8xf32>
    %336 = arith.addf %332, %335 : vector<16x8xf32>
    %337 = vector.extract_strided_slice %303 {offsets = [0, 0, 0], sizes = [1, 32, 8], strides = [1, 1, 1]} : vector<4x32x8xf32> to vector<1x32x8xf32>
    %338 = vector.shape_cast %337 : vector<1x32x8xf32> to vector<32x8xf32>
    %cst_136 = arith.constant dense<0.000000e+00> : vector<16x8xf32>
    %339 = tpu.matmul %329, %338, %cst_136 {dimension_numbers = #tpu.dot_dimension_numbers<[1], [0], [0], [1], [0, 0, 1, 1], [], []>} : vector<16x32xf32>, vector<32x8xf32>, vector<16x8xf32> -> vector<16x8xf32>
    %340 = vector.extract_strided_slice %299 {offsets = [1, 0, 0], sizes = [1, 1, 8], strides = [1, 1, 1]} : vector<3x4x8xf32> to vector<1x1x8xf32>
    %341 = vector.shape_cast %340 : vector<1x1x8xf32> to vector<1x8xf32>
    %342 = vector.broadcast %341 : vector<1x8xf32> to vector<16x8xf32>
    %343 = arith.addf %339, %342 : vector<16x8xf32>
    %344 = vector.extract_strided_slice %305 {offsets = [0, 0, 0], sizes = [1, 32, 8], strides = [1, 1, 1]} : vector<4x32x8xf32> to vector<1x32x8xf32>
    %345 = vector.shape_cast %344 : vector<1x32x8xf32> to vector<32x8xf32>
    %cst_137 = arith.constant dense<0.000000e+00> : vector<16x8xf32>
    %346 = tpu.matmul %329, %345, %cst_137 {dimension_numbers = #tpu.dot_dimension_numbers<[1], [0], [0], [1], [0, 0, 1, 1], [], []>} : vector<16x32xf32>, vector<32x8xf32>, vector<16x8xf32> -> vector<16x8xf32>
    %347 = vector.extract_strided_slice %299 {offsets = [2, 0, 0], sizes = [1, 1, 8], strides = [1, 1, 1]} : vector<3x4x8xf32> to vector<1x1x8xf32>
    %348 = vector.shape_cast %347 : vector<1x1x8xf32> to vector<1x8xf32>
    %349 = vector.broadcast %348 : vector<1x8xf32> to vector<16x8xf32>
    %350 = arith.addf %346, %349 : vector<16x8xf32>
    %cst_138 = arith.constant dense<0.000000e+00> : vector<16x16xf32>
    %351 = tpu.matmul %336, %343, %cst_138 {dimension_numbers = #tpu.dot_dimension_numbers<[1], [1], [0], [0], [0, 0, 1, 0], [], []>} : vector<16x8xf32>, vector<16x8xf32>, vector<16x16xf32> -> vector<16x16xf32>
    %cst_139 = arith.constant 0.353553385 : f32
    %352 = vector.broadcast %cst_139 : f32 to vector<16x16xf32>
    %353 = arith.mulf %351, %352 : vector<16x16xf32>
    %cst_140 = arith.constant -1.000000e+30 : f32
    %354 = vector.broadcast %cst_140 : f32 to vector<16x16xf32>
    %355 = arith.select %2, %353, %354 : vector<16x16xi1>, vector<16x16xf32>
    %cst_141 = arith.constant dense<0xFF800000> : vector<16xf32>
    %356 = vector.multi_reduction <maximumf>, %355, %cst_141 [1] : vector<16x16xf32> to vector<16xf32>
    %357 = vector.shape_cast %356 : vector<16xf32> to vector<16x1xf32>
    %358 = vector.broadcast %357 : vector<16x1xf32> to vector<16x16xf32>
    %359 = arith.subf %355, %358 : vector<16x16xf32>
    %360 = math.exp %359 : vector<16x16xf32>
    %cst_142 = arith.constant dense<0.000000e+00> : vector<16xf32>
    %361 = vector.multi_reduction <add>, %360, %cst_142 [1] : vector<16x16xf32> to vector<16xf32>
    %362 = vector.shape_cast %361 : vector<16xf32> to vector<16x1xf32>
    %363 = tpu.reciprocal %362 : vector<16x1xf32> -> vector<16x1xf32>
    %364 = vector.broadcast %363 : vector<16x1xf32> to vector<16x16xf32>
    %365 = arith.mulf %360, %364 : vector<16x16xf32>
    %cst_143 = arith.constant dense<0.000000e+00> : vector<16x8xf32>
    %366 = tpu.matmul %365, %350, %cst_143 {dimension_numbers = #tpu.dot_dimension_numbers<[1], [0], [0], [1], [0, 0, 1, 1], [], []>} : vector<16x16xf32>, vector<16x8xf32>, vector<16x8xf32> -> vector<16x8xf32>
    %367 = vector.extract_strided_slice %307 {offsets = [0, 0, 0], sizes = [1, 8, 32], strides = [1, 1, 1]} : vector<4x8x32xf32> to vector<1x8x32xf32>
    %368 = vector.shape_cast %367 : vector<1x8x32xf32> to vector<8x32xf32>
    %cst_144 = arith.constant dense<0.000000e+00> : vector<16x32xf32>
    %369 = tpu.matmul %366, %368, %cst_144 {dimension_numbers = #tpu.dot_dimension_numbers<[1], [0], [0], [1], [0, 0, 1, 1], [], []>} : vector<16x8xf32>, vector<8x32xf32>, vector<16x32xf32> -> vector<16x32xf32>
    %370 = vector.extract_strided_slice %301 {offsets = [1, 0, 0], sizes = [1, 32, 8], strides = [1, 1, 1]} : vector<4x32x8xf32> to vector<1x32x8xf32>
    %371 = vector.shape_cast %370 : vector<1x32x8xf32> to vector<32x8xf32>
    %cst_145 = arith.constant dense<0.000000e+00> : vector<16x8xf32>
    %372 = tpu.matmul %329, %371, %cst_145 {dimension_numbers = #tpu.dot_dimension_numbers<[1], [0], [0], [1], [0, 0, 1, 1], [], []>} : vector<16x32xf32>, vector<32x8xf32>, vector<16x8xf32> -> vector<16x8xf32>
    %373 = vector.extract_strided_slice %299 {offsets = [0, 1, 0], sizes = [1, 1, 8], strides = [1, 1, 1]} : vector<3x4x8xf32> to vector<1x1x8xf32>
    %374 = vector.shape_cast %373 : vector<1x1x8xf32> to vector<1x8xf32>
    %375 = vector.broadcast %374 : vector<1x8xf32> to vector<16x8xf32>
    %376 = arith.addf %372, %375 : vector<16x8xf32>
    %377 = vector.extract_strided_slice %303 {offsets = [1, 0, 0], sizes = [1, 32, 8], strides = [1, 1, 1]} : vector<4x32x8xf32> to vector<1x32x8xf32>
    %378 = vector.shape_cast %377 : vector<1x32x8xf32> to vector<32x8xf32>
    %cst_146 = arith.constant dense<0.000000e+00> : vector<16x8xf32>
    %379 = tpu.matmul %329, %378, %cst_146 {dimension_numbers = #tpu.dot_dimension_numbers<[1], [0], [0], [1], [0, 0, 1, 1], [], []>} : vector<16x32xf32>, vector<32x8xf32>, vector<16x8xf32> -> vector<16x8xf32>
    %380 = vector.extract_strided_slice %299 {offsets = [1, 1, 0], sizes = [1, 1, 8], strides = [1, 1, 1]} : vector<3x4x8xf32> to vector<1x1x8xf32>
    %381 = vector.shape_cast %380 : vector<1x1x8xf32> to vector<1x8xf32>
    %382 = vector.broadcast %381 : vector<1x8xf32> to vector<16x8xf32>
    %383 = arith.addf %379, %382 : vector<16x8xf32>
    %384 = vector.extract_strided_slice %305 {offsets = [1, 0, 0], sizes = [1, 32, 8], strides = [1, 1, 1]} : vector<4x32x8xf32> to vector<1x32x8xf32>
    %385 = vector.shape_cast %384 : vector<1x32x8xf32> to vector<32x8xf32>
    %cst_147 = arith.constant dense<0.000000e+00> : vector<16x8xf32>
    %386 = tpu.matmul %329, %385, %cst_147 {dimension_numbers = #tpu.dot_dimension_numbers<[1], [0], [0], [1], [0, 0, 1, 1], [], []>} : vector<16x32xf32>, vector<32x8xf32>, vector<16x8xf32> -> vector<16x8xf32>
    %387 = vector.extract_strided_slice %299 {offsets = [2, 1, 0], sizes = [1, 1, 8], strides = [1, 1, 1]} : vector<3x4x8xf32> to vector<1x1x8xf32>
    %388 = vector.shape_cast %387 : vector<1x1x8xf32> to vector<1x8xf32>
    %389 = vector.broadcast %388 : vector<1x8xf32> to vector<16x8xf32>
    %390 = arith.addf %386, %389 : vector<16x8xf32>
    %cst_148 = arith.constant dense<0.000000e+00> : vector<16x16xf32>
    %391 = tpu.matmul %376, %383, %cst_148 {dimension_numbers = #tpu.dot_dimension_numbers<[1], [1], [0], [0], [0, 0, 1, 0], [], []>} : vector<16x8xf32>, vector<16x8xf32>, vector<16x16xf32> -> vector<16x16xf32>
    %cst_149 = arith.constant 0.353553385 : f32
    %392 = vector.broadcast %cst_149 : f32 to vector<16x16xf32>
    %393 = arith.mulf %391, %392 : vector<16x16xf32>
    %cst_150 = arith.constant -1.000000e+30 : f32
    %394 = vector.broadcast %cst_150 : f32 to vector<16x16xf32>
    %395 = arith.select %2, %393, %394 : vector<16x16xi1>, vector<16x16xf32>
    %cst_151 = arith.constant dense<0xFF800000> : vector<16xf32>
    %396 = vector.multi_reduction <maximumf>, %395, %cst_151 [1] : vector<16x16xf32> to vector<16xf32>
    %397 = vector.shape_cast %396 : vector<16xf32> to vector<16x1xf32>
    %398 = vector.broadcast %397 : vector<16x1xf32> to vector<16x16xf32>
    %399 = arith.subf %395, %398 : vector<16x16xf32>
    %400 = math.exp %399 : vector<16x16xf32>
    %cst_152 = arith.constant dense<0.000000e+00> : vector<16xf32>
    %401 = vector.multi_reduction <add>, %400, %cst_152 [1] : vector<16x16xf32> to vector<16xf32>
    %402 = vector.shape_cast %401 : vector<16xf32> to vector<16x1xf32>
    %403 = tpu.reciprocal %402 : vector<16x1xf32> -> vector<16x1xf32>
    %404 = vector.broadcast %403 : vector<16x1xf32> to vector<16x16xf32>
    %405 = arith.mulf %400, %404 : vector<16x16xf32>
    %cst_153 = arith.constant dense<0.000000e+00> : vector<16x8xf32>
    %406 = tpu.matmul %405, %390, %cst_153 {dimension_numbers = #tpu.dot_dimension_numbers<[1], [0], [0], [1], [0, 0, 1, 1], [], []>} : vector<16x16xf32>, vector<16x8xf32>, vector<16x8xf32> -> vector<16x8xf32>
    %407 = vector.extract_strided_slice %307 {offsets = [1, 0, 0], sizes = [1, 8, 32], strides = [1, 1, 1]} : vector<4x8x32xf32> to vector<1x8x32xf32>
    %408 = vector.shape_cast %407 : vector<1x8x32xf32> to vector<8x32xf32>
    %cst_154 = arith.constant dense<0.000000e+00> : vector<16x32xf32>
    %409 = tpu.matmul %406, %408, %cst_154 {dimension_numbers = #tpu.dot_dimension_numbers<[1], [0], [0], [1], [0, 0, 1, 1], [], []>} : vector<16x8xf32>, vector<8x32xf32>, vector<16x32xf32> -> vector<16x32xf32>
    %410 = arith.addf %369, %409 : vector<16x32xf32>
    %411 = vector.extract_strided_slice %301 {offsets = [2, 0, 0], sizes = [1, 32, 8], strides = [1, 1, 1]} : vector<4x32x8xf32> to vector<1x32x8xf32>
    %412 = vector.shape_cast %411 : vector<1x32x8xf32> to vector<32x8xf32>
    %cst_155 = arith.constant dense<0.000000e+00> : vector<16x8xf32>
    %413 = tpu.matmul %329, %412, %cst_155 {dimension_numbers = #tpu.dot_dimension_numbers<[1], [0], [0], [1], [0, 0, 1, 1], [], []>} : vector<16x32xf32>, vector<32x8xf32>, vector<16x8xf32> -> vector<16x8xf32>
    %414 = vector.extract_strided_slice %299 {offsets = [0, 2, 0], sizes = [1, 1, 8], strides = [1, 1, 1]} : vector<3x4x8xf32> to vector<1x1x8xf32>
    %415 = vector.shape_cast %414 : vector<1x1x8xf32> to vector<1x8xf32>
    %416 = vector.broadcast %415 : vector<1x8xf32> to vector<16x8xf32>
    %417 = arith.addf %413, %416 : vector<16x8xf32>
    %418 = vector.extract_strided_slice %303 {offsets = [2, 0, 0], sizes = [1, 32, 8], strides = [1, 1, 1]} : vector<4x32x8xf32> to vector<1x32x8xf32>
    %419 = vector.shape_cast %418 : vector<1x32x8xf32> to vector<32x8xf32>
    %cst_156 = arith.constant dense<0.000000e+00> : vector<16x8xf32>
    %420 = tpu.matmul %329, %419, %cst_156 {dimension_numbers = #tpu.dot_dimension_numbers<[1], [0], [0], [1], [0, 0, 1, 1], [], []>} : vector<16x32xf32>, vector<32x8xf32>, vector<16x8xf32> -> vector<16x8xf32>
    %421 = vector.extract_strided_slice %299 {offsets = [1, 2, 0], sizes = [1, 1, 8], strides = [1, 1, 1]} : vector<3x4x8xf32> to vector<1x1x8xf32>
    %422 = vector.shape_cast %421 : vector<1x1x8xf32> to vector<1x8xf32>
    %423 = vector.broadcast %422 : vector<1x8xf32> to vector<16x8xf32>
    %424 = arith.addf %420, %423 : vector<16x8xf32>
    %425 = vector.extract_strided_slice %305 {offsets = [2, 0, 0], sizes = [1, 32, 8], strides = [1, 1, 1]} : vector<4x32x8xf32> to vector<1x32x8xf32>
    %426 = vector.shape_cast %425 : vector<1x32x8xf32> to vector<32x8xf32>
    %cst_157 = arith.constant dense<0.000000e+00> : vector<16x8xf32>
    %427 = tpu.matmul %329, %426, %cst_157 {dimension_numbers = #tpu.dot_dimension_numbers<[1], [0], [0], [1], [0, 0, 1, 1], [], []>} : vector<16x32xf32>, vector<32x8xf32>, vector<16x8xf32> -> vector<16x8xf32>
    %428 = vector.extract_strided_slice %299 {offsets = [2, 2, 0], sizes = [1, 1, 8], strides = [1, 1, 1]} : vector<3x4x8xf32> to vector<1x1x8xf32>
    %429 = vector.shape_cast %428 : vector<1x1x8xf32> to vector<1x8xf32>
    %430 = vector.broadcast %429 : vector<1x8xf32> to vector<16x8xf32>
    %431 = arith.addf %427, %430 : vector<16x8xf32>
    %cst_158 = arith.constant dense<0.000000e+00> : vector<16x16xf32>
    %432 = tpu.matmul %417, %424, %cst_158 {dimension_numbers = #tpu.dot_dimension_numbers<[1], [1], [0], [0], [0, 0, 1, 0], [], []>} : vector<16x8xf32>, vector<16x8xf32>, vector<16x16xf32> -> vector<16x16xf32>
    %cst_159 = arith.constant 0.353553385 : f32
    %433 = vector.broadcast %cst_159 : f32 to vector<16x16xf32>
    %434 = arith.mulf %432, %433 : vector<16x16xf32>
    %cst_160 = arith.constant -1.000000e+30 : f32
    %435 = vector.broadcast %cst_160 : f32 to vector<16x16xf32>
    %436 = arith.select %2, %434, %435 : vector<16x16xi1>, vector<16x16xf32>
    %cst_161 = arith.constant dense<0xFF800000> : vector<16xf32>
    %437 = vector.multi_reduction <maximumf>, %436, %cst_161 [1] : vector<16x16xf32> to vector<16xf32>
    %438 = vector.shape_cast %437 : vector<16xf32> to vector<16x1xf32>
    %439 = vector.broadcast %438 : vector<16x1xf32> to vector<16x16xf32>
    %440 = arith.subf %436, %439 : vector<16x16xf32>
    %441 = math.exp %440 : vector<16x16xf32>
    %cst_162 = arith.constant dense<0.000000e+00> : vector<16xf32>
    %442 = vector.multi_reduction <add>, %441, %cst_162 [1] : vector<16x16xf32> to vector<16xf32>
    %443 = vector.shape_cast %442 : vector<16xf32> to vector<16x1xf32>
    %444 = tpu.reciprocal %443 : vector<16x1xf32> -> vector<16x1xf32>
    %445 = vector.broadcast %444 : vector<16x1xf32> to vector<16x16xf32>
    %446 = arith.mulf %441, %445 : vector<16x16xf32>
    %cst_163 = arith.constant dense<0.000000e+00> : vector<16x8xf32>
    %447 = tpu.matmul %446, %431, %cst_163 {dimension_numbers = #tpu.dot_dimension_numbers<[1], [0], [0], [1], [0, 0, 1, 1], [], []>} : vector<16x16xf32>, vector<16x8xf32>, vector<16x8xf32> -> vector<16x8xf32>
    %448 = vector.extract_strided_slice %307 {offsets = [2, 0, 0], sizes = [1, 8, 32], strides = [1, 1, 1]} : vector<4x8x32xf32> to vector<1x8x32xf32>
    %449 = vector.shape_cast %448 : vector<1x8x32xf32> to vector<8x32xf32>
    %cst_164 = arith.constant dense<0.000000e+00> : vector<16x32xf32>
    %450 = tpu.matmul %447, %449, %cst_164 {dimension_numbers = #tpu.dot_dimension_numbers<[1], [0], [0], [1], [0, 0, 1, 1], [], []>} : vector<16x8xf32>, vector<8x32xf32>, vector<16x32xf32> -> vector<16x32xf32>
    %451 = arith.addf %410, %450 : vector<16x32xf32>
    %452 = vector.extract_strided_slice %301 {offsets = [3, 0, 0], sizes = [1, 32, 8], strides = [1, 1, 1]} : vector<4x32x8xf32> to vector<1x32x8xf32>
    %453 = vector.shape_cast %452 : vector<1x32x8xf32> to vector<32x8xf32>
    %cst_165 = arith.constant dense<0.000000e+00> : vector<16x8xf32>
    %454 = tpu.matmul %329, %453, %cst_165 {dimension_numbers = #tpu.dot_dimension_numbers<[1], [0], [0], [1], [0, 0, 1, 1], [], []>} : vector<16x32xf32>, vector<32x8xf32>, vector<16x8xf32> -> vector<16x8xf32>
    %455 = vector.extract_strided_slice %299 {offsets = [0, 3, 0], sizes = [1, 1, 8], strides = [1, 1, 1]} : vector<3x4x8xf32> to vector<1x1x8xf32>
    %456 = vector.shape_cast %455 : vector<1x1x8xf32> to vector<1x8xf32>
    %457 = vector.broadcast %456 : vector<1x8xf32> to vector<16x8xf32>
    %458 = arith.addf %454, %457 : vector<16x8xf32>
    %459 = vector.extract_strided_slice %303 {offsets = [3, 0, 0], sizes = [1, 32, 8], strides = [1, 1, 1]} : vector<4x32x8xf32> to vector<1x32x8xf32>
    %460 = vector.shape_cast %459 : vector<1x32x8xf32> to vector<32x8xf32>
    %cst_166 = arith.constant dense<0.000000e+00> : vector<16x8xf32>
    %461 = tpu.matmul %329, %460, %cst_166 {dimension_numbers = #tpu.dot_dimension_numbers<[1], [0], [0], [1], [0, 0, 1, 1], [], []>} : vector<16x32xf32>, vector<32x8xf32>, vector<16x8xf32> -> vector<16x8xf32>
    %462 = vector.extract_strided_slice %299 {offsets = [1, 3, 0], sizes = [1, 1, 8], strides = [1, 1, 1]} : vector<3x4x8xf32> to vector<1x1x8xf32>
    %463 = vector.shape_cast %462 : vector<1x1x8xf32> to vector<1x8xf32>
    %464 = vector.broadcast %463 : vector<1x8xf32> to vector<16x8xf32>
    %465 = arith.addf %461, %464 : vector<16x8xf32>
    %466 = vector.extract_strided_slice %305 {offsets = [3, 0, 0], sizes = [1, 32, 8], strides = [1, 1, 1]} : vector<4x32x8xf32> to vector<1x32x8xf32>
    %467 = vector.shape_cast %466 : vector<1x32x8xf32> to vector<32x8xf32>
    %cst_167 = arith.constant dense<0.000000e+00> : vector<16x8xf32>
    %468 = tpu.matmul %329, %467, %cst_167 {dimension_numbers = #tpu.dot_dimension_numbers<[1], [0], [0], [1], [0, 0, 1, 1], [], []>} : vector<16x32xf32>, vector<32x8xf32>, vector<16x8xf32> -> vector<16x8xf32>
    %469 = vector.extract_strided_slice %299 {offsets = [2, 3, 0], sizes = [1, 1, 8], strides = [1, 1, 1]} : vector<3x4x8xf32> to vector<1x1x8xf32>
    %470 = vector.shape_cast %469 : vector<1x1x8xf32> to vector<1x8xf32>
    %471 = vector.broadcast %470 : vector<1x8xf32> to vector<16x8xf32>
    %472 = arith.addf %468, %471 : vector<16x8xf32>
    %cst_168 = arith.constant dense<0.000000e+00> : vector<16x16xf32>
    %473 = tpu.matmul %458, %465, %cst_168 {dimension_numbers = #tpu.dot_dimension_numbers<[1], [1], [0], [0], [0, 0, 1, 0], [], []>} : vector<16x8xf32>, vector<16x8xf32>, vector<16x16xf32> -> vector<16x16xf32>
    %cst_169 = arith.constant 0.353553385 : f32
    %474 = vector.broadcast %cst_169 : f32 to vector<16x16xf32>
    %475 = arith.mulf %473, %474 : vector<16x16xf32>
    %cst_170 = arith.constant -1.000000e+30 : f32
    %476 = vector.broadcast %cst_170 : f32 to vector<16x16xf32>
    %477 = arith.select %2, %475, %476 : vector<16x16xi1>, vector<16x16xf32>
    %cst_171 = arith.constant dense<0xFF800000> : vector<16xf32>
    %478 = vector.multi_reduction <maximumf>, %477, %cst_171 [1] : vector<16x16xf32> to vector<16xf32>
    %479 = vector.shape_cast %478 : vector<16xf32> to vector<16x1xf32>
    %480 = vector.broadcast %479 : vector<16x1xf32> to vector<16x16xf32>
    %481 = arith.subf %477, %480 : vector<16x16xf32>
    %482 = math.exp %481 : vector<16x16xf32>
    %cst_172 = arith.constant dense<0.000000e+00> : vector<16xf32>
    %483 = vector.multi_reduction <add>, %482, %cst_172 [1] : vector<16x16xf32> to vector<16xf32>
    %484 = vector.shape_cast %483 : vector<16xf32> to vector<16x1xf32>
    %485 = tpu.reciprocal %484 : vector<16x1xf32> -> vector<16x1xf32>
    %486 = vector.broadcast %485 : vector<16x1xf32> to vector<16x16xf32>
    %487 = arith.mulf %482, %486 : vector<16x16xf32>
    %cst_173 = arith.constant dense<0.000000e+00> : vector<16x8xf32>
    %488 = tpu.matmul %487, %472, %cst_173 {dimension_numbers = #tpu.dot_dimension_numbers<[1], [0], [0], [1], [0, 0, 1, 1], [], []>} : vector<16x16xf32>, vector<16x8xf32>, vector<16x8xf32> -> vector<16x8xf32>
    %489 = vector.extract_strided_slice %307 {offsets = [3, 0, 0], sizes = [1, 8, 32], strides = [1, 1, 1]} : vector<4x8x32xf32> to vector<1x8x32xf32>
    %490 = vector.shape_cast %489 : vector<1x8x32xf32> to vector<8x32xf32>
    %cst_174 = arith.constant dense<0.000000e+00> : vector<16x32xf32>
    %491 = tpu.matmul %488, %490, %cst_174 {dimension_numbers = #tpu.dot_dimension_numbers<[1], [0], [0], [1], [0, 0, 1, 1], [], []>} : vector<16x8xf32>, vector<8x32xf32>, vector<16x32xf32> -> vector<16x32xf32>
    %492 = arith.addf %451, %491 : vector<16x32xf32>
    %493 = arith.addf %289, %492 : vector<16x32xf32>
    %494 = vector.broadcast %294 : vector<1x32xf32> to vector<16x32xf32>
    %495 = arith.addf %493, %494 : vector<16x32xf32>
    %cst_175 = arith.constant dense<0.000000e+00> : vector<16xf32>
    %496 = vector.multi_reduction <add>, %495, %cst_175 [1] : vector<16x32xf32> to vector<16xf32>
    %497 = vector.shape_cast %496 : vector<16xf32> to vector<16x1xf32>
    %cst_176 = arith.constant 3.200000e+01 : f32
    %498 = vector.broadcast %cst_176 : f32 to vector<16x1xf32>
    %499 = arith.divf %497, %498 : vector<16x1xf32>
    %500 = vector.broadcast %499 : vector<16x1xf32> to vector<16x32xf32>
    %501 = arith.subf %495, %500 : vector<16x32xf32>
    %502 = arith.mulf %501, %501 : vector<16x32xf32>
    %cst_177 = arith.constant dense<0.000000e+00> : vector<16xf32>
    %503 = vector.multi_reduction <add>, %502, %cst_177 [1] : vector<16x32xf32> to vector<16xf32>
    %504 = vector.shape_cast %503 : vector<16xf32> to vector<16x1xf32>
    %cst_178 = arith.constant 3.200000e+01 : f32
    %505 = vector.broadcast %cst_178 : f32 to vector<16x1xf32>
    %506 = arith.divf %504, %505 : vector<16x1xf32>
    %507 = vector.broadcast %499 : vector<16x1xf32> to vector<16x32xf32>
    %508 = arith.subf %495, %507 : vector<16x32xf32>
    %cst_179 = arith.constant 9.99999974E-6 : f32
    %509 = vector.broadcast %cst_179 : f32 to vector<16x1xf32>
    %510 = arith.addf %506, %509 : vector<16x1xf32>
    %511 = math.rsqrt %510 : vector<16x1xf32>
    %512 = vector.broadcast %511 : vector<16x1xf32> to vector<16x32xf32>
    %513 = arith.mulf %508, %512 : vector<16x32xf32>
    %514 = vector.broadcast %295 : vector<1x32xf32> to vector<16x32xf32>
    %515 = arith.mulf %513, %514 : vector<16x32xf32>
    %516 = vector.broadcast %296 : vector<1x32xf32> to vector<16x32xf32>
    %517 = arith.addf %515, %516 : vector<16x32xf32>
    %c1_180 = arith.constant 1 : index
    %c0_181 = arith.constant 0 : index
    %c0_182 = arith.constant 0 : index
    %518 = vector.load %arg7[%c1_180, %c0_181, %c0_182] : memref<2x32x128xf32, #tpu.memory_space<vmem>>, vector<1x32x128xf32>
    %519 = vector.shape_cast %518 : vector<1x32x128xf32> to vector<32x128xf32>
    %cst_183 = arith.constant dense<0.000000e+00> : vector<16x128xf32>
    %520 = tpu.matmul %517, %519, %cst_183 {dimension_numbers = #tpu.dot_dimension_numbers<[1], [0], [0], [1], [0, 0, 1, 1], [], []>} : vector<16x32xf32>, vector<32x128xf32>, vector<16x128xf32> -> vector<16x128xf32>
    %c1_184 = arith.constant 1 : index
    %c0_185 = arith.constant 0 : index
    %c0_186 = arith.constant 0 : index
    %521 = vector.load %arg8[%c1_184, %c0_185, %c0_186] : memref<2x1x128xf32, #tpu.memory_space<vmem>>, vector<1x1x128xf32>
    %522 = vector.shape_cast %521 : vector<1x1x128xf32> to vector<1x128xf32>
    %523 = vector.broadcast %522 : vector<1x128xf32> to vector<16x128xf32>
    %524 = arith.addf %520, %523 : vector<16x128xf32>
    %cst_187 = arith.constant 5.000000e-01 : f32
    %525 = vector.broadcast %cst_187 : f32 to vector<16x128xf32>
    %526 = arith.mulf %524, %525 : vector<16x128xf32>
    %cst_188 = arith.constant 0.707106769 : f32
    %527 = vector.broadcast %cst_188 : f32 to vector<16x128xf32>
    %528 = arith.mulf %524, %527 : vector<16x128xf32>
    %529 = math.absf %528 : vector<16x128xf32>
    %cst_189 = arith.constant 0.327591091 : f32
    %530 = vector.broadcast %cst_189 : f32 to vector<16x128xf32>
    %531 = arith.mulf %530, %529 : vector<16x128xf32>
    %cst_190 = arith.constant 1.000000e+00 : f32
    %532 = vector.broadcast %cst_190 : f32 to vector<16x128xf32>
    %533 = arith.addf %532, %531 : vector<16x128xf32>
    %cst_191 = arith.constant 1.000000e+00 : f32
    %534 = vector.broadcast %cst_191 : f32 to vector<16x128xf32>
    %535 = arith.divf %534, %533 : vector<16x128xf32>
    %cst_192 = arith.constant 1.06140542 : f32
    %536 = vector.broadcast %cst_192 : f32 to vector<16x128xf32>
    %537 = arith.mulf %536, %535 : vector<16x128xf32>
    %cst_193 = arith.constant -1.45315206 : f32
    %538 = vector.broadcast %cst_193 : f32 to vector<16x128xf32>
    %539 = arith.addf %537, %538 : vector<16x128xf32>
    %540 = arith.mulf %539, %535 : vector<16x128xf32>
    %cst_194 = arith.constant 1.42141378 : f32
    %541 = vector.broadcast %cst_194 : f32 to vector<16x128xf32>
    %542 = arith.addf %540, %541 : vector<16x128xf32>
    %543 = arith.mulf %542, %535 : vector<16x128xf32>
    %cst_195 = arith.constant -0.284496725 : f32
    %544 = vector.broadcast %cst_195 : f32 to vector<16x128xf32>
    %545 = arith.addf %543, %544 : vector<16x128xf32>
    %546 = arith.mulf %545, %535 : vector<16x128xf32>
    %cst_196 = arith.constant 0.254829586 : f32
    %547 = vector.broadcast %cst_196 : f32 to vector<16x128xf32>
    %548 = arith.addf %546, %547 : vector<16x128xf32>
    %549 = arith.mulf %548, %535 : vector<16x128xf32>
    %cst_197 = arith.constant 0.000000e+00 : f32
    %550 = vector.broadcast %cst_197 : f32 to vector<16x128xf32>
    %551 = arith.subf %550, %529 : vector<16x128xf32>
    %552 = arith.mulf %551, %529 : vector<16x128xf32>
    %553 = math.exp %552 : vector<16x128xf32>
    %554 = arith.mulf %549, %553 : vector<16x128xf32>
    %cst_198 = arith.constant 1.000000e+00 : f32
    %555 = vector.broadcast %cst_198 : f32 to vector<16x128xf32>
    %556 = arith.subf %555, %554 : vector<16x128xf32>
    %cst_199 = arith.constant 0.000000e+00 : f32
    %557 = vector.broadcast %cst_199 : f32 to vector<16x128xf32>
    %558 = arith.cmpf olt, %528, %557 : vector<16x128xf32>
    %cst_200 = arith.constant 0.000000e+00 : f32
    %559 = vector.broadcast %cst_200 : f32 to vector<16x128xf32>
    %560 = arith.subf %559, %556 : vector<16x128xf32>
    %561 = arith.select %558, %560, %556 : vector<16x128xi1>, vector<16x128xf32>
    %cst_201 = arith.constant 1.000000e+00 : f32
    %562 = vector.broadcast %cst_201 : f32 to vector<16x128xf32>
    %563 = arith.addf %562, %561 : vector<16x128xf32>
    %564 = arith.mulf %526, %563 : vector<16x128xf32>
    %c1_202 = arith.constant 1 : index
    %c0_203 = arith.constant 0 : index
    %c0_204 = arith.constant 0 : index
    %565 = vector.load %arg9[%c1_202, %c0_203, %c0_204] : memref<2x128x32xf32, #tpu.memory_space<vmem>>, vector<1x128x32xf32>
    %566 = vector.shape_cast %565 : vector<1x128x32xf32> to vector<128x32xf32>
    %cst_205 = arith.constant dense<0.000000e+00> : vector<16x32xf32>
    %567 = tpu.matmul %564, %566, %cst_205 {dimension_numbers = #tpu.dot_dimension_numbers<[1], [0], [0], [1], [0, 0, 1, 1], [], []>} : vector<16x128xf32>, vector<128x32xf32>, vector<16x32xf32> -> vector<16x32xf32>
    %568 = vector.broadcast %297 : vector<1x32xf32> to vector<16x32xf32>
    %569 = arith.addf %567, %568 : vector<16x32xf32>
    %570 = arith.addf %495, %569 : vector<16x32xf32>
    %571 = vector.extract_strided_slice %3 {offsets = [0, 0], sizes = [1, 32], strides = [1, 1]} : vector<5x32xf32> to vector<1x32xf32>
    %572 = vector.extract_strided_slice %3 {offsets = [1, 0], sizes = [1, 32], strides = [1, 1]} : vector<5x32xf32> to vector<1x32xf32>
    %cst_206 = arith.constant dense<0.000000e+00> : vector<16xf32>
    %573 = vector.multi_reduction <add>, %570, %cst_206 [1] : vector<16x32xf32> to vector<16xf32>
    %574 = vector.shape_cast %573 : vector<16xf32> to vector<16x1xf32>
    %cst_207 = arith.constant 3.200000e+01 : f32
    %575 = vector.broadcast %cst_207 : f32 to vector<16x1xf32>
    %576 = arith.divf %574, %575 : vector<16x1xf32>
    %577 = vector.broadcast %576 : vector<16x1xf32> to vector<16x32xf32>
    %578 = arith.subf %570, %577 : vector<16x32xf32>
    %579 = arith.mulf %578, %578 : vector<16x32xf32>
    %cst_208 = arith.constant dense<0.000000e+00> : vector<16xf32>
    %580 = vector.multi_reduction <add>, %579, %cst_208 [1] : vector<16x32xf32> to vector<16xf32>
    %581 = vector.shape_cast %580 : vector<16xf32> to vector<16x1xf32>
    %cst_209 = arith.constant 3.200000e+01 : f32
    %582 = vector.broadcast %cst_209 : f32 to vector<16x1xf32>
    %583 = arith.divf %581, %582 : vector<16x1xf32>
    %584 = vector.broadcast %576 : vector<16x1xf32> to vector<16x32xf32>
    %585 = arith.subf %570, %584 : vector<16x32xf32>
    %cst_210 = arith.constant 9.99999974E-6 : f32
    %586 = vector.broadcast %cst_210 : f32 to vector<16x1xf32>
    %587 = arith.addf %583, %586 : vector<16x1xf32>
    %588 = math.rsqrt %587 : vector<16x1xf32>
    %589 = vector.broadcast %588 : vector<16x1xf32> to vector<16x32xf32>
    %590 = arith.mulf %585, %589 : vector<16x32xf32>
    %591 = vector.broadcast %571 : vector<1x32xf32> to vector<16x32xf32>
    %592 = arith.mulf %590, %591 : vector<16x32xf32>
    %593 = vector.broadcast %572 : vector<1x32xf32> to vector<16x32xf32>
    %594 = arith.addf %592, %593 : vector<16x32xf32>
    %cst_211 = arith.constant dense<0.000000e+00> : vector<16x32xf32>
    %595 = tpu.matmul %594, %4, %cst_211 {dimension_numbers = #tpu.dot_dimension_numbers<[1], [0], [0], [1], [0, 0, 1, 1], [], []>} : vector<16x32xf32>, vector<32x32xf32>, vector<16x32xf32> -> vector<16x32xf32>
    %596 = vector.extract_strided_slice %3 {offsets = [2, 0], sizes = [1, 32], strides = [1, 1]} : vector<5x32xf32> to vector<1x32xf32>
    %597 = vector.broadcast %596 : vector<1x32xf32> to vector<16x32xf32>
    %598 = arith.addf %595, %597 : vector<16x32xf32>
    %cst_212 = arith.constant 5.000000e-01 : f32
    %599 = vector.broadcast %cst_212 : f32 to vector<16x32xf32>
    %600 = arith.mulf %598, %599 : vector<16x32xf32>
    %cst_213 = arith.constant 0.707106769 : f32
    %601 = vector.broadcast %cst_213 : f32 to vector<16x32xf32>
    %602 = arith.mulf %598, %601 : vector<16x32xf32>
    %603 = math.absf %602 : vector<16x32xf32>
    %cst_214 = arith.constant 0.327591091 : f32
    %604 = vector.broadcast %cst_214 : f32 to vector<16x32xf32>
    %605 = arith.mulf %604, %603 : vector<16x32xf32>
    %cst_215 = arith.constant 1.000000e+00 : f32
    %606 = vector.broadcast %cst_215 : f32 to vector<16x32xf32>
    %607 = arith.addf %606, %605 : vector<16x32xf32>
    %cst_216 = arith.constant 1.000000e+00 : f32
    %608 = vector.broadcast %cst_216 : f32 to vector<16x32xf32>
    %609 = arith.divf %608, %607 : vector<16x32xf32>
    %cst_217 = arith.constant 1.06140542 : f32
    %610 = vector.broadcast %cst_217 : f32 to vector<16x32xf32>
    %611 = arith.mulf %610, %609 : vector<16x32xf32>
    %cst_218 = arith.constant -1.45315206 : f32
    %612 = vector.broadcast %cst_218 : f32 to vector<16x32xf32>
    %613 = arith.addf %611, %612 : vector<16x32xf32>
    %614 = arith.mulf %613, %609 : vector<16x32xf32>
    %cst_219 = arith.constant 1.42141378 : f32
    %615 = vector.broadcast %cst_219 : f32 to vector<16x32xf32>
    %616 = arith.addf %614, %615 : vector<16x32xf32>
    %617 = arith.mulf %616, %609 : vector<16x32xf32>
    %cst_220 = arith.constant -0.284496725 : f32
    %618 = vector.broadcast %cst_220 : f32 to vector<16x32xf32>
    %619 = arith.addf %617, %618 : vector<16x32xf32>
    %620 = arith.mulf %619, %609 : vector<16x32xf32>
    %cst_221 = arith.constant 0.254829586 : f32
    %621 = vector.broadcast %cst_221 : f32 to vector<16x32xf32>
    %622 = arith.addf %620, %621 : vector<16x32xf32>
    %623 = arith.mulf %622, %609 : vector<16x32xf32>
    %cst_222 = arith.constant 0.000000e+00 : f32
    %624 = vector.broadcast %cst_222 : f32 to vector<16x32xf32>
    %625 = arith.subf %624, %603 : vector<16x32xf32>
    %626 = arith.mulf %625, %603 : vector<16x32xf32>
    %627 = math.exp %626 : vector<16x32xf32>
    %628 = arith.mulf %623, %627 : vector<16x32xf32>
    %cst_223 = arith.constant 1.000000e+00 : f32
    %629 = vector.broadcast %cst_223 : f32 to vector<16x32xf32>
    %630 = arith.subf %629, %628 : vector<16x32xf32>
    %cst_224 = arith.constant 0.000000e+00 : f32
    %631 = vector.broadcast %cst_224 : f32 to vector<16x32xf32>
    %632 = arith.cmpf olt, %602, %631 : vector<16x32xf32>
    %cst_225 = arith.constant 0.000000e+00 : f32
    %633 = vector.broadcast %cst_225 : f32 to vector<16x32xf32>
    %634 = arith.subf %633, %630 : vector<16x32xf32>
    %635 = arith.select %632, %634, %630 : vector<16x32xi1>, vector<16x32xf32>
    %cst_226 = arith.constant 1.000000e+00 : f32
    %636 = vector.broadcast %cst_226 : f32 to vector<16x32xf32>
    %637 = arith.addf %636, %635 : vector<16x32xf32>
    %638 = arith.mulf %600, %637 : vector<16x32xf32>
    %639 = vector.extract_strided_slice %3 {offsets = [3, 0], sizes = [1, 32], strides = [1, 1]} : vector<5x32xf32> to vector<1x32xf32>
    %640 = vector.extract_strided_slice %3 {offsets = [4, 0], sizes = [1, 32], strides = [1, 1]} : vector<5x32xf32> to vector<1x32xf32>
    %cst_227 = arith.constant dense<0.000000e+00> : vector<16xf32>
    %641 = vector.multi_reduction <add>, %638, %cst_227 [1] : vector<16x32xf32> to vector<16xf32>
    %642 = vector.shape_cast %641 : vector<16xf32> to vector<16x1xf32>
    %cst_228 = arith.constant 3.200000e+01 : f32
    %643 = vector.broadcast %cst_228 : f32 to vector<16x1xf32>
    %644 = arith.divf %642, %643 : vector<16x1xf32>
    %645 = vector.broadcast %644 : vector<16x1xf32> to vector<16x32xf32>
    %646 = arith.subf %638, %645 : vector<16x32xf32>
    %647 = arith.mulf %646, %646 : vector<16x32xf32>
    %cst_229 = arith.constant dense<0.000000e+00> : vector<16xf32>
    %648 = vector.multi_reduction <add>, %647, %cst_229 [1] : vector<16x32xf32> to vector<16xf32>
    %649 = vector.shape_cast %648 : vector<16xf32> to vector<16x1xf32>
    %cst_230 = arith.constant 3.200000e+01 : f32
    %650 = vector.broadcast %cst_230 : f32 to vector<16x1xf32>
    %651 = arith.divf %649, %650 : vector<16x1xf32>
    %652 = vector.broadcast %644 : vector<16x1xf32> to vector<16x32xf32>
    %653 = arith.subf %638, %652 : vector<16x32xf32>
    %cst_231 = arith.constant 9.99999974E-6 : f32
    %654 = vector.broadcast %cst_231 : f32 to vector<16x1xf32>
    %655 = arith.addf %651, %654 : vector<16x1xf32>
    %656 = math.rsqrt %655 : vector<16x1xf32>
    %657 = vector.broadcast %656 : vector<16x1xf32> to vector<16x32xf32>
    %658 = arith.mulf %653, %657 : vector<16x32xf32>
    %659 = vector.broadcast %639 : vector<1x32xf32> to vector<16x32xf32>
    %660 = arith.mulf %658, %659 : vector<16x32xf32>
    %661 = vector.broadcast %640 : vector<1x32xf32> to vector<16x32xf32>
    %662 = arith.addf %660, %661 : vector<16x32xf32>
    %cst_232 = arith.constant dense<0.000000e+00> : vector<16x128xf32>
    %663 = tpu.matmul %662, %5, %cst_232 {dimension_numbers = #tpu.dot_dimension_numbers<[1], [0], [0], [1], [0, 0, 1, 1], [], []>} : vector<16x32xf32>, vector<32x128xf32>, vector<16x128xf32> -> vector<16x128xf32>
    %664 = vector.broadcast %6 : vector<1x128xf32> to vector<16x128xf32>
    %665 = arith.addf %663, %664 : vector<16x128xf32>
    %c0_233 = arith.constant 0 : index
    %c0_234 = arith.constant 0 : index
    %c0_235 = arith.constant 0 : index
    %666 = vector.load %arg14[%c0_233, %c0_234, %c0_235] : memref<2x16x128xf32, #tpu.memory_space<vmem>>, vector<1x16x128xf32>
    %667 = vector.shape_cast %666 : vector<1x16x128xf32> to vector<16x128xf32>
    %668 = vector.shape_cast %665 : vector<16x128xf32> to vector<1x16x128xf32>
    tpu.vector_store %arg14[%c0_233, %c0_234, %c0_235], %668 {strides = array<i32>} : memref<2x16x128xf32, #tpu.memory_space<vmem>>, vector<1x16x128xf32>,
    %c1_236 = arith.constant 1 : index
    %c0_237 = arith.constant 0 : index
    %c0_238 = arith.constant 0 : index
    %669 = vector.load %arg0[%c1_236, %c0_237, %c0_238] : memref<2x16x32xf32, #tpu.memory_space<vmem>>, vector<1x16x32xf32>
    %670 = vector.shape_cast %669 : vector<1x16x32xf32> to vector<16x32xf32>
    %c0_239 = arith.constant 0 : index
    %c0_240 = arith.constant 0 : index
    %c0_241 = arith.constant 0 : index
    %671 = vector.load %arg1[%c0_239, %c0_240, %c0_241] : memref<2x6x32xf32, #tpu.memory_space<vmem>>, vector<1x6x32xf32>
    %672 = vector.shape_cast %671 : vector<1x6x32xf32> to vector<6x32xf32>
    %673 = vector.extract_strided_slice %672 {offsets = [0, 0], sizes = [1, 32], strides = [1, 1]} : vector<6x32xf32> to vector<1x32xf32>
    %674 = vector.extract_strided_slice %672 {offsets = [1, 0], sizes = [1, 32], strides = [1, 1]} : vector<6x32xf32> to vector<1x32xf32>
    %675 = vector.extract_strided_slice %672 {offsets = [2, 0], sizes = [1, 32], strides = [1, 1]} : vector<6x32xf32> to vector<1x32xf32>
    %676 = vector.extract_strided_slice %672 {offsets = [3, 0], sizes = [1, 32], strides = [1, 1]} : vector<6x32xf32> to vector<1x32xf32>
    %677 = vector.extract_strided_slice %672 {offsets = [4, 0], sizes = [1, 32], strides = [1, 1]} : vector<6x32xf32> to vector<1x32xf32>
    %678 = vector.extract_strided_slice %672 {offsets = [5, 0], sizes = [1, 32], strides = [1, 1]} : vector<6x32xf32> to vector<1x32xf32>
    %c0_242 = arith.constant 0 : index
    %c0_243 = arith.constant 0 : index
    %c0_244 = arith.constant 0 : index
    %c0_245 = arith.constant 0 : index
    %679 = vector.load %arg2[%c0_242, %c0_243, %c0_244, %c0_245] : memref<2x3x4x8xf32, #tpu.memory_space<vmem>>, vector<1x3x4x8xf32>
    %680 = vector.shape_cast %679 : vector<1x3x4x8xf32> to vector<3x4x8xf32>
    %c0_246 = arith.constant 0 : index
    %c0_247 = arith.constant 0 : index
    %c0_248 = arith.constant 0 : index
    %c0_249 = arith.constant 0 : index
    %681 = vector.load %arg3[%c0_246, %c0_247, %c0_248, %c0_249] : memref<2x4x32x8xf32, #tpu.memory_space<vmem>>, vector<1x4x32x8xf32>
    %682 = vector.shape_cast %681 : vector<1x4x32x8xf32> to vector<4x32x8xf32>
    %c0_250 = arith.constant 0 : index
    %c0_251 = arith.constant 0 : index
    %c0_252 = arith.constant 0 : index
    %c0_253 = arith.constant 0 : index
    %683 = vector.load %arg4[%c0_250, %c0_251, %c0_252, %c0_253] : memref<2x4x32x8xf32, #tpu.memory_space<vmem>>, vector<1x4x32x8xf32>
    %684 = vector.shape_cast %683 : vector<1x4x32x8xf32> to vector<4x32x8xf32>
    %c0_254 = arith.constant 0 : index
    %c0_255 = arith.constant 0 : index
    %c0_256 = arith.constant 0 : index
    %c0_257 = arith.constant 0 : index
    %685 = vector.load %arg5[%c0_254, %c0_255, %c0_256, %c0_257] : memref<2x4x32x8xf32, #tpu.memory_space<vmem>>, vector<1x4x32x8xf32>
    %686 = vector.shape_cast %685 : vector<1x4x32x8xf32> to vector<4x32x8xf32>
    %c0_258 = arith.constant 0 : index
    %c0_259 = arith.constant 0 : index
    %c0_260 = arith.constant 0 : index
    %c0_261 = arith.constant 0 : index
    %687 = vector.load %arg6[%c0_258, %c0_259, %c0_260, %c0_261] : memref<2x4x8x32xf32, #tpu.memory_space<vmem>>, vector<1x4x8x32xf32>
    %688 = vector.shape_cast %687 : vector<1x4x8x32xf32> to vector<4x8x32xf32>
    %cst_262 = arith.constant dense<0.000000e+00> : vector<16xf32>
    %689 = vector.multi_reduction <add>, %670, %cst_262 [1] : vector<16x32xf32> to vector<16xf32>
    %690 = vector.shape_cast %689 : vector<16xf32> to vector<16x1xf32>
    %cst_263 = arith.constant 3.200000e+01 : f32
    %691 = vector.broadcast %cst_263 : f32 to vector<16x1xf32>
    %692 = arith.divf %690, %691 : vector<16x1xf32>
    %693 = vector.broadcast %692 : vector<16x1xf32> to vector<16x32xf32>
    %694 = arith.subf %670, %693 : vector<16x32xf32>
    %695 = arith.mulf %694, %694 : vector<16x32xf32>
    %cst_264 = arith.constant dense<0.000000e+00> : vector<16xf32>
    %696 = vector.multi_reduction <add>, %695, %cst_264 [1] : vector<16x32xf32> to vector<16xf32>
    %697 = vector.shape_cast %696 : vector<16xf32> to vector<16x1xf32>
    %cst_265 = arith.constant 3.200000e+01 : f32
    %698 = vector.broadcast %cst_265 : f32 to vector<16x1xf32>
    %699 = arith.divf %697, %698 : vector<16x1xf32>
    %700 = vector.broadcast %692 : vector<16x1xf32> to vector<16x32xf32>
    %701 = arith.subf %670, %700 : vector<16x32xf32>
    %cst_266 = arith.constant 9.99999974E-6 : f32
    %702 = vector.broadcast %cst_266 : f32 to vector<16x1xf32>
    %703 = arith.addf %699, %702 : vector<16x1xf32>
    %704 = math.rsqrt %703 : vector<16x1xf32>
    %705 = vector.broadcast %704 : vector<16x1xf32> to vector<16x32xf32>
    %706 = arith.mulf %701, %705 : vector<16x32xf32>
    %707 = vector.broadcast %673 : vector<1x32xf32> to vector<16x32xf32>
    %708 = arith.mulf %706, %707 : vector<16x32xf32>
    %709 = vector.broadcast %674 : vector<1x32xf32> to vector<16x32xf32>
    %710 = arith.addf %708, %709 : vector<16x32xf32>
    %711 = vector.extract_strided_slice %682 {offsets = [0, 0, 0], sizes = [1, 32, 8], strides = [1, 1, 1]} : vector<4x32x8xf32> to vector<1x32x8xf32>
    %712 = vector.shape_cast %711 : vector<1x32x8xf32> to vector<32x8xf32>
    %cst_267 = arith.constant dense<0.000000e+00> : vector<16x8xf32>
    %713 = tpu.matmul %710, %712, %cst_267 {dimension_numbers = #tpu.dot_dimension_numbers<[1], [0], [0], [1], [0, 0, 1, 1], [], []>} : vector<16x32xf32>, vector<32x8xf32>, vector<16x8xf32> -> vector<16x8xf32>
    %714 = vector.extract_strided_slice %680 {offsets = [0, 0, 0], sizes = [1, 1, 8], strides = [1, 1, 1]} : vector<3x4x8xf32> to vector<1x1x8xf32>
    %715 = vector.shape_cast %714 : vector<1x1x8xf32> to vector<1x8xf32>
    %716 = vector.broadcast %715 : vector<1x8xf32> to vector<16x8xf32>
    %717 = arith.addf %713, %716 : vector<16x8xf32>
    %718 = vector.extract_strided_slice %684 {offsets = [0, 0, 0], sizes = [1, 32, 8], strides = [1, 1, 1]} : vector<4x32x8xf32> to vector<1x32x8xf32>
    %719 = vector.shape_cast %718 : vector<1x32x8xf32> to vector<32x8xf32>
    %cst_268 = arith.constant dense<0.000000e+00> : vector<16x8xf32>
    %720 = tpu.matmul %710, %719, %cst_268 {dimension_numbers = #tpu.dot_dimension_numbers<[1], [0], [0], [1], [0, 0, 1, 1], [], []>} : vector<16x32xf32>, vector<32x8xf32>, vector<16x8xf32> -> vector<16x8xf32>
    %721 = vector.extract_strided_slice %680 {offsets = [1, 0, 0], sizes = [1, 1, 8], strides = [1, 1, 1]} : vector<3x4x8xf32> to vector<1x1x8xf32>
    %722 = vector.shape_cast %721 : vector<1x1x8xf32> to vector<1x8xf32>
    %723 = vector.broadcast %722 : vector<1x8xf32> to vector<16x8xf32>
    %724 = arith.addf %720, %723 : vector<16x8xf32>
    %725 = vector.extract_strided_slice %686 {offsets = [0, 0, 0], sizes = [1, 32, 8], strides = [1, 1, 1]} : vector<4x32x8xf32> to vector<1x32x8xf32>
    %726 = vector.shape_cast %725 : vector<1x32x8xf32> to vector<32x8xf32>
    %cst_269 = arith.constant dense<0.000000e+00> : vector<16x8xf32>
    %727 = tpu.matmul %710, %726, %cst_269 {dimension_numbers = #tpu.dot_dimension_numbers<[1], [0], [0], [1], [0, 0, 1, 1], [], []>} : vector<16x32xf32>, vector<32x8xf32>, vector<16x8xf32> -> vector<16x8xf32>
    %728 = vector.extract_strided_slice %680 {offsets = [2, 0, 0], sizes = [1, 1, 8], strides = [1, 1, 1]} : vector<3x4x8xf32> to vector<1x1x8xf32>
    %729 = vector.shape_cast %728 : vector<1x1x8xf32> to vector<1x8xf32>
    %730 = vector.broadcast %729 : vector<1x8xf32> to vector<16x8xf32>
    %731 = arith.addf %727, %730 : vector<16x8xf32>
    %cst_270 = arith.constant dense<0.000000e+00> : vector<16x16xf32>
    %732 = tpu.matmul %717, %724, %cst_270 {dimension_numbers = #tpu.dot_dimension_numbers<[1], [1], [0], [0], [0, 0, 1, 0], [], []>} : vector<16x8xf32>, vector<16x8xf32>, vector<16x16xf32> -> vector<16x16xf32>
    %cst_271 = arith.constant 0.353553385 : f32
    %733 = vector.broadcast %cst_271 : f32 to vector<16x16xf32>
    %734 = arith.mulf %732, %733 : vector<16x16xf32>
    %cst_272 = arith.constant -1.000000e+30 : f32
    %735 = vector.broadcast %cst_272 : f32 to vector<16x16xf32>
    %736 = arith.select %2, %734, %735 : vector<16x16xi1>, vector<16x16xf32>
    %cst_273 = arith.constant dense<0xFF800000> : vector<16xf32>
    %737 = vector.multi_reduction <maximumf>, %736, %cst_273 [1] : vector<16x16xf32> to vector<16xf32>
    %738 = vector.shape_cast %737 : vector<16xf32> to vector<16x1xf32>
    %739 = vector.broadcast %738 : vector<16x1xf32> to vector<16x16xf32>
    %740 = arith.subf %736, %739 : vector<16x16xf32>
    %741 = math.exp %740 : vector<16x16xf32>
    %cst_274 = arith.constant dense<0.000000e+00> : vector<16xf32>
    %742 = vector.multi_reduction <add>, %741, %cst_274 [1] : vector<16x16xf32> to vector<16xf32>
    %743 = vector.shape_cast %742 : vector<16xf32> to vector<16x1xf32>
    %744 = tpu.reciprocal %743 : vector<16x1xf32> -> vector<16x1xf32>
    %745 = vector.broadcast %744 : vector<16x1xf32> to vector<16x16xf32>
    %746 = arith.mulf %741, %745 : vector<16x16xf32>
    %cst_275 = arith.constant dense<0.000000e+00> : vector<16x8xf32>
    %747 = tpu.matmul %746, %731, %cst_275 {dimension_numbers = #tpu.dot_dimension_numbers<[1], [0], [0], [1], [0, 0, 1, 1], [], []>} : vector<16x16xf32>, vector<16x8xf32>, vector<16x8xf32> -> vector<16x8xf32>
    %748 = vector.extract_strided_slice %688 {offsets = [0, 0, 0], sizes = [1, 8, 32], strides = [1, 1, 1]} : vector<4x8x32xf32> to vector<1x8x32xf32>
    %749 = vector.shape_cast %748 : vector<1x8x32xf32> to vector<8x32xf32>
    %cst_276 = arith.constant dense<0.000000e+00> : vector<16x32xf32>
    %750 = tpu.matmul %747, %749, %cst_276 {dimension_numbers = #tpu.dot_dimension_numbers<[1], [0], [0], [1], [0, 0, 1, 1], [], []>} : vector<16x8xf32>, vector<8x32xf32>, vector<16x32xf32> -> vector<16x32xf32>
    %751 = vector.extract_strided_slice %682 {offsets = [1, 0, 0], sizes = [1, 32, 8], strides = [1, 1, 1]} : vector<4x32x8xf32> to vector<1x32x8xf32>
    %752 = vector.shape_cast %751 : vector<1x32x8xf32> to vector<32x8xf32>
    %cst_277 = arith.constant dense<0.000000e+00> : vector<16x8xf32>
    %753 = tpu.matmul %710, %752, %cst_277 {dimension_numbers = #tpu.dot_dimension_numbers<[1], [0], [0], [1], [0, 0, 1, 1], [], []>} : vector<16x32xf32>, vector<32x8xf32>, vector<16x8xf32> -> vector<16x8xf32>
    %754 = vector.extract_strided_slice %680 {offsets = [0, 1, 0], sizes = [1, 1, 8], strides = [1, 1, 1]} : vector<3x4x8xf32> to vector<1x1x8xf32>
    %755 = vector.shape_cast %754 : vector<1x1x8xf32> to vector<1x8xf32>
    %756 = vector.broadcast %755 : vector<1x8xf32> to vector<16x8xf32>
    %757 = arith.addf %753, %756 : vector<16x8xf32>
    %758 = vector.extract_strided_slice %684 {offsets = [1, 0, 0], sizes = [1, 32, 8], strides = [1, 1, 1]} : vector<4x32x8xf32> to vector<1x32x8xf32>
    %759 = vector.shape_cast %758 : vector<1x32x8xf32> to vector<32x8xf32>
    %cst_278 = arith.constant dense<0.000000e+00> : vector<16x8xf32>
    %760 = tpu.matmul %710, %759, %cst_278 {dimension_numbers = #tpu.dot_dimension_numbers<[1], [0], [0], [1], [0, 0, 1, 1], [], []>} : vector<16x32xf32>, vector<32x8xf32>, vector<16x8xf32> -> vector<16x8xf32>
    %761 = vector.extract_strided_slice %680 {offsets = [1, 1, 0], sizes = [1, 1, 8], strides = [1, 1, 1]} : vector<3x4x8xf32> to vector<1x1x8xf32>
    %762 = vector.shape_cast %761 : vector<1x1x8xf32> to vector<1x8xf32>
    %763 = vector.broadcast %762 : vector<1x8xf32> to vector<16x8xf32>
    %764 = arith.addf %760, %763 : vector<16x8xf32>
    %765 = vector.extract_strided_slice %686 {offsets = [1, 0, 0], sizes = [1, 32, 8], strides = [1, 1, 1]} : vector<4x32x8xf32> to vector<1x32x8xf32>
    %766 = vector.shape_cast %765 : vector<1x32x8xf32> to vector<32x8xf32>
    %cst_279 = arith.constant dense<0.000000e+00> : vector<16x8xf32>
    %767 = tpu.matmul %710, %766, %cst_279 {dimension_numbers = #tpu.dot_dimension_numbers<[1], [0], [0], [1], [0, 0, 1, 1], [], []>} : vector<16x32xf32>, vector<32x8xf32>, vector<16x8xf32> -> vector<16x8xf32>
    %768 = vector.extract_strided_slice %680 {offsets = [2, 1, 0], sizes = [1, 1, 8], strides = [1, 1, 1]} : vector<3x4x8xf32> to vector<1x1x8xf32>
    %769 = vector.shape_cast %768 : vector<1x1x8xf32> to vector<1x8xf32>
    %770 = vector.broadcast %769 : vector<1x8xf32> to vector<16x8xf32>
    %771 = arith.addf %767, %770 : vector<16x8xf32>
    %cst_280 = arith.constant dense<0.000000e+00> : vector<16x16xf32>
    %772 = tpu.matmul %757, %764, %cst_280 {dimension_numbers = #tpu.dot_dimension_numbers<[1], [1], [0], [0], [0, 0, 1, 0], [], []>} : vector<16x8xf32>, vector<16x8xf32>, vector<16x16xf32> -> vector<16x16xf32>
    %cst_281 = arith.constant 0.353553385 : f32
    %773 = vector.broadcast %cst_281 : f32 to vector<16x16xf32>
    %774 = arith.mulf %772, %773 : vector<16x16xf32>
    %cst_282 = arith.constant -1.000000e+30 : f32
    %775 = vector.broadcast %cst_282 : f32 to vector<16x16xf32>
    %776 = arith.select %2, %774, %775 : vector<16x16xi1>, vector<16x16xf32>
    %cst_283 = arith.constant dense<0xFF800000> : vector<16xf32>
    %777 = vector.multi_reduction <maximumf>, %776, %cst_283 [1] : vector<16x16xf32> to vector<16xf32>
    %778 = vector.shape_cast %777 : vector<16xf32> to vector<16x1xf32>
    %779 = vector.broadcast %778 : vector<16x1xf32> to vector<16x16xf32>
    %780 = arith.subf %776, %779 : vector<16x16xf32>
    %781 = math.exp %780 : vector<16x16xf32>
    %cst_284 = arith.constant dense<0.000000e+00> : vector<16xf32>
    %782 = vector.multi_reduction <add>, %781, %cst_284 [1] : vector<16x16xf32> to vector<16xf32>
    %783 = vector.shape_cast %782 : vector<16xf32> to vector<16x1xf32>
    %784 = tpu.reciprocal %783 : vector<16x1xf32> -> vector<16x1xf32>
    %785 = vector.broadcast %784 : vector<16x1xf32> to vector<16x16xf32>
    %786 = arith.mulf %781, %785 : vector<16x16xf32>
    %cst_285 = arith.constant dense<0.000000e+00> : vector<16x8xf32>
    %787 = tpu.matmul %786, %771, %cst_285 {dimension_numbers = #tpu.dot_dimension_numbers<[1], [0], [0], [1], [0, 0, 1, 1], [], []>} : vector<16x16xf32>, vector<16x8xf32>, vector<16x8xf32> -> vector<16x8xf32>
    %788 = vector.extract_strided_slice %688 {offsets = [1, 0, 0], sizes = [1, 8, 32], strides = [1, 1, 1]} : vector<4x8x32xf32> to vector<1x8x32xf32>
    %789 = vector.shape_cast %788 : vector<1x8x32xf32> to vector<8x32xf32>
    %cst_286 = arith.constant dense<0.000000e+00> : vector<16x32xf32>
    %790 = tpu.matmul %787, %789, %cst_286 {dimension_numbers = #tpu.dot_dimension_numbers<[1], [0], [0], [1], [0, 0, 1, 1], [], []>} : vector<16x8xf32>, vector<8x32xf32>, vector<16x32xf32> -> vector<16x32xf32>
    %791 = arith.addf %750, %790 : vector<16x32xf32>
    %792 = vector.extract_strided_slice %682 {offsets = [2, 0, 0], sizes = [1, 32, 8], strides = [1, 1, 1]} : vector<4x32x8xf32> to vector<1x32x8xf32>
    %793 = vector.shape_cast %792 : vector<1x32x8xf32> to vector<32x8xf32>
    %cst_287 = arith.constant dense<0.000000e+00> : vector<16x8xf32>
    %794 = tpu.matmul %710, %793, %cst_287 {dimension_numbers = #tpu.dot_dimension_numbers<[1], [0], [0], [1], [0, 0, 1, 1], [], []>} : vector<16x32xf32>, vector<32x8xf32>, vector<16x8xf32> -> vector<16x8xf32>
    %795 = vector.extract_strided_slice %680 {offsets = [0, 2, 0], sizes = [1, 1, 8], strides = [1, 1, 1]} : vector<3x4x8xf32> to vector<1x1x8xf32>
    %796 = vector.shape_cast %795 : vector<1x1x8xf32> to vector<1x8xf32>
    %797 = vector.broadcast %796 : vector<1x8xf32> to vector<16x8xf32>
    %798 = arith.addf %794, %797 : vector<16x8xf32>
    %799 = vector.extract_strided_slice %684 {offsets = [2, 0, 0], sizes = [1, 32, 8], strides = [1, 1, 1]} : vector<4x32x8xf32> to vector<1x32x8xf32>
    %800 = vector.shape_cast %799 : vector<1x32x8xf32> to vector<32x8xf32>
    %cst_288 = arith.constant dense<0.000000e+00> : vector<16x8xf32>
    %801 = tpu.matmul %710, %800, %cst_288 {dimension_numbers = #tpu.dot_dimension_numbers<[1], [0], [0], [1], [0, 0, 1, 1], [], []>} : vector<16x32xf32>, vector<32x8xf32>, vector<16x8xf32> -> vector<16x8xf32>
    %802 = vector.extract_strided_slice %680 {offsets = [1, 2, 0], sizes = [1, 1, 8], strides = [1, 1, 1]} : vector<3x4x8xf32> to vector<1x1x8xf32>
    %803 = vector.shape_cast %802 : vector<1x1x8xf32> to vector<1x8xf32>
    %804 = vector.broadcast %803 : vector<1x8xf32> to vector<16x8xf32>
    %805 = arith.addf %801, %804 : vector<16x8xf32>
    %806 = vector.extract_strided_slice %686 {offsets = [2, 0, 0], sizes = [1, 32, 8], strides = [1, 1, 1]} : vector<4x32x8xf32> to vector<1x32x8xf32>
    %807 = vector.shape_cast %806 : vector<1x32x8xf32> to vector<32x8xf32>
    %cst_289 = arith.constant dense<0.000000e+00> : vector<16x8xf32>
    %808 = tpu.matmul %710, %807, %cst_289 {dimension_numbers = #tpu.dot_dimension_numbers<[1], [0], [0], [1], [0, 0, 1, 1], [], []>} : vector<16x32xf32>, vector<32x8xf32>, vector<16x8xf32> -> vector<16x8xf32>
    %809 = vector.extract_strided_slice %680 {offsets = [2, 2, 0], sizes = [1, 1, 8], strides = [1, 1, 1]} : vector<3x4x8xf32> to vector<1x1x8xf32>
    %810 = vector.shape_cast %809 : vector<1x1x8xf32> to vector<1x8xf32>
    %811 = vector.broadcast %810 : vector<1x8xf32> to vector<16x8xf32>
    %812 = arith.addf %808, %811 : vector<16x8xf32>
    %cst_290 = arith.constant dense<0.000000e+00> : vector<16x16xf32>
    %813 = tpu.matmul %798, %805, %cst_290 {dimension_numbers = #tpu.dot_dimension_numbers<[1], [1], [0], [0], [0, 0, 1, 0], [], []>} : vector<16x8xf32>, vector<16x8xf32>, vector<16x16xf32> -> vector<16x16xf32>
    %cst_291 = arith.constant 0.353553385 : f32
    %814 = vector.broadcast %cst_291 : f32 to vector<16x16xf32>
    %815 = arith.mulf %813, %814 : vector<16x16xf32>
    %cst_292 = arith.constant -1.000000e+30 : f32
    %816 = vector.broadcast %cst_292 : f32 to vector<16x16xf32>
    %817 = arith.select %2, %815, %816 : vector<16x16xi1>, vector<16x16xf32>
    %cst_293 = arith.constant dense<0xFF800000> : vector<16xf32>
    %818 = vector.multi_reduction <maximumf>, %817, %cst_293 [1] : vector<16x16xf32> to vector<16xf32>
    %819 = vector.shape_cast %818 : vector<16xf32> to vector<16x1xf32>
    %820 = vector.broadcast %819 : vector<16x1xf32> to vector<16x16xf32>
    %821 = arith.subf %817, %820 : vector<16x16xf32>
    %822 = math.exp %821 : vector<16x16xf32>
    %cst_294 = arith.constant dense<0.000000e+00> : vector<16xf32>
    %823 = vector.multi_reduction <add>, %822, %cst_294 [1] : vector<16x16xf32> to vector<16xf32>
    %824 = vector.shape_cast %823 : vector<16xf32> to vector<16x1xf32>
    %825 = tpu.reciprocal %824 : vector<16x1xf32> -> vector<16x1xf32>
    %826 = vector.broadcast %825 : vector<16x1xf32> to vector<16x16xf32>
    %827 = arith.mulf %822, %826 : vector<16x16xf32>
    %cst_295 = arith.constant dense<0.000000e+00> : vector<16x8xf32>
    %828 = tpu.matmul %827, %812, %cst_295 {dimension_numbers = #tpu.dot_dimension_numbers<[1], [0], [0], [1], [0, 0, 1, 1], [], []>} : vector<16x16xf32>, vector<16x8xf32>, vector<16x8xf32> -> vector<16x8xf32>
    %829 = vector.extract_strided_slice %688 {offsets = [2, 0, 0], sizes = [1, 8, 32], strides = [1, 1, 1]} : vector<4x8x32xf32> to vector<1x8x32xf32>
    %830 = vector.shape_cast %829 : vector<1x8x32xf32> to vector<8x32xf32>
    %cst_296 = arith.constant dense<0.000000e+00> : vector<16x32xf32>
    %831 = tpu.matmul %828, %830, %cst_296 {dimension_numbers = #tpu.dot_dimension_numbers<[1], [0], [0], [1], [0, 0, 1, 1], [], []>} : vector<16x8xf32>, vector<8x32xf32>, vector<16x32xf32> -> vector<16x32xf32>
    %832 = arith.addf %791, %831 : vector<16x32xf32>
    %833 = vector.extract_strided_slice %682 {offsets = [3, 0, 0], sizes = [1, 32, 8], strides = [1, 1, 1]} : vector<4x32x8xf32> to vector<1x32x8xf32>
    %834 = vector.shape_cast %833 : vector<1x32x8xf32> to vector<32x8xf32>
    %cst_297 = arith.constant dense<0.000000e+00> : vector<16x8xf32>
    %835 = tpu.matmul %710, %834, %cst_297 {dimension_numbers = #tpu.dot_dimension_numbers<[1], [0], [0], [1], [0, 0, 1, 1], [], []>} : vector<16x32xf32>, vector<32x8xf32>, vector<16x8xf32> -> vector<16x8xf32>
    %836 = vector.extract_strided_slice %680 {offsets = [0, 3, 0], sizes = [1, 1, 8], strides = [1, 1, 1]} : vector<3x4x8xf32> to vector<1x1x8xf32>
    %837 = vector.shape_cast %836 : vector<1x1x8xf32> to vector<1x8xf32>
    %838 = vector.broadcast %837 : vector<1x8xf32> to vector<16x8xf32>
    %839 = arith.addf %835, %838 : vector<16x8xf32>
    %840 = vector.extract_strided_slice %684 {offsets = [3, 0, 0], sizes = [1, 32, 8], strides = [1, 1, 1]} : vector<4x32x8xf32> to vector<1x32x8xf32>
    %841 = vector.shape_cast %840 : vector<1x32x8xf32> to vector<32x8xf32>
    %cst_298 = arith.constant dense<0.000000e+00> : vector<16x8xf32>
    %842 = tpu.matmul %710, %841, %cst_298 {dimension_numbers = #tpu.dot_dimension_numbers<[1], [0], [0], [1], [0, 0, 1, 1], [], []>} : vector<16x32xf32>, vector<32x8xf32>, vector<16x8xf32> -> vector<16x8xf32>
    %843 = vector.extract_strided_slice %680 {offsets = [1, 3, 0], sizes = [1, 1, 8], strides = [1, 1, 1]} : vector<3x4x8xf32> to vector<1x1x8xf32>
    %844 = vector.shape_cast %843 : vector<1x1x8xf32> to vector<1x8xf32>
    %845 = vector.broadcast %844 : vector<1x8xf32> to vector<16x8xf32>
    %846 = arith.addf %842, %845 : vector<16x8xf32>
    %847 = vector.extract_strided_slice %686 {offsets = [3, 0, 0], sizes = [1, 32, 8], strides = [1, 1, 1]} : vector<4x32x8xf32> to vector<1x32x8xf32>
    %848 = vector.shape_cast %847 : vector<1x32x8xf32> to vector<32x8xf32>
    %cst_299 = arith.constant dense<0.000000e+00> : vector<16x8xf32>
    %849 = tpu.matmul %710, %848, %cst_299 {dimension_numbers = #tpu.dot_dimension_numbers<[1], [0], [0], [1], [0, 0, 1, 1], [], []>} : vector<16x32xf32>, vector<32x8xf32>, vector<16x8xf32> -> vector<16x8xf32>
    %850 = vector.extract_strided_slice %680 {offsets = [2, 3, 0], sizes = [1, 1, 8], strides = [1, 1, 1]} : vector<3x4x8xf32> to vector<1x1x8xf32>
    %851 = vector.shape_cast %850 : vector<1x1x8xf32> to vector<1x8xf32>
    %852 = vector.broadcast %851 : vector<1x8xf32> to vector<16x8xf32>
    %853 = arith.addf %849, %852 : vector<16x8xf32>
    %cst_300 = arith.constant dense<0.000000e+00> : vector<16x16xf32>
    %854 = tpu.matmul %839, %846, %cst_300 {dimension_numbers = #tpu.dot_dimension_numbers<[1], [1], [0], [0], [0, 0, 1, 0], [], []>} : vector<16x8xf32>, vector<16x8xf32>, vector<16x16xf32> -> vector<16x16xf32>
    %cst_301 = arith.constant 0.353553385 : f32
    %855 = vector.broadcast %cst_301 : f32 to vector<16x16xf32>
    %856 = arith.mulf %854, %855 : vector<16x16xf32>
    %cst_302 = arith.constant -1.000000e+30 : f32
    %857 = vector.broadcast %cst_302 : f32 to vector<16x16xf32>
    %858 = arith.select %2, %856, %857 : vector<16x16xi1>, vector<16x16xf32>
    %cst_303 = arith.constant dense<0xFF800000> : vector<16xf32>
    %859 = vector.multi_reduction <maximumf>, %858, %cst_303 [1] : vector<16x16xf32> to vector<16xf32>
    %860 = vector.shape_cast %859 : vector<16xf32> to vector<16x1xf32>
    %861 = vector.broadcast %860 : vector<16x1xf32> to vector<16x16xf32>
    %862 = arith.subf %858, %861 : vector<16x16xf32>
    %863 = math.exp %862 : vector<16x16xf32>
    %cst_304 = arith.constant dense<0.000000e+00> : vector<16xf32>
    %864 = vector.multi_reduction <add>, %863, %cst_304 [1] : vector<16x16xf32> to vector<16xf32>
    %865 = vector.shape_cast %864 : vector<16xf32> to vector<16x1xf32>
    %866 = tpu.reciprocal %865 : vector<16x1xf32> -> vector<16x1xf32>
    %867 = vector.broadcast %866 : vector<16x1xf32> to vector<16x16xf32>
    %868 = arith.mulf %863, %867 : vector<16x16xf32>
    %cst_305 = arith.constant dense<0.000000e+00> : vector<16x8xf32>
    %869 = tpu.matmul %868, %853, %cst_305 {dimension_numbers = #tpu.dot_dimension_numbers<[1], [0], [0], [1], [0, 0, 1, 1], [], []>} : vector<16x16xf32>, vector<16x8xf32>, vector<16x8xf32> -> vector<16x8xf32>
    %870 = vector.extract_strided_slice %688 {offsets = [3, 0, 0], sizes = [1, 8, 32], strides = [1, 1, 1]} : vector<4x8x32xf32> to vector<1x8x32xf32>
    %871 = vector.shape_cast %870 : vector<1x8x32xf32> to vector<8x32xf32>
    %cst_306 = arith.constant dense<0.000000e+00> : vector<16x32xf32>
    %872 = tpu.matmul %869, %871, %cst_306 {dimension_numbers = #tpu.dot_dimension_numbers<[1], [0], [0], [1], [0, 0, 1, 1], [], []>} : vector<16x8xf32>, vector<8x32xf32>, vector<16x32xf32> -> vector<16x32xf32>
    %873 = arith.addf %832, %872 : vector<16x32xf32>
    %874 = arith.addf %670, %873 : vector<16x32xf32>
    %875 = vector.broadcast %675 : vector<1x32xf32> to vector<16x32xf32>
    %876 = arith.addf %874, %875 : vector<16x32xf32>
    %cst_307 = arith.constant dense<0.000000e+00> : vector<16xf32>
    %877 = vector.multi_reduction <add>, %876, %cst_307 [1] : vector<16x32xf32> to vector<16xf32>
    %878 = vector.shape_cast %877 : vector<16xf32> to vector<16x1xf32>
    %cst_308 = arith.constant 3.200000e+01 : f32
    %879 = vector.broadcast %cst_308 : f32 to vector<16x1xf32>
    %880 = arith.divf %878, %879 : vector<16x1xf32>
    %881 = vector.broadcast %880 : vector<16x1xf32> to vector<16x32xf32>
    %882 = arith.subf %876, %881 : vector<16x32xf32>
    %883 = arith.mulf %882, %882 : vector<16x32xf32>
    %cst_309 = arith.constant dense<0.000000e+00> : vector<16xf32>
    %884 = vector.multi_reduction <add>, %883, %cst_309 [1] : vector<16x32xf32> to vector<16xf32>
    %885 = vector.shape_cast %884 : vector<16xf32> to vector<16x1xf32>
    %cst_310 = arith.constant 3.200000e+01 : f32
    %886 = vector.broadcast %cst_310 : f32 to vector<16x1xf32>
    %887 = arith.divf %885, %886 : vector<16x1xf32>
    %888 = vector.broadcast %880 : vector<16x1xf32> to vector<16x32xf32>
    %889 = arith.subf %876, %888 : vector<16x32xf32>
    %cst_311 = arith.constant 9.99999974E-6 : f32
    %890 = vector.broadcast %cst_311 : f32 to vector<16x1xf32>
    %891 = arith.addf %887, %890 : vector<16x1xf32>
    %892 = math.rsqrt %891 : vector<16x1xf32>
    %893 = vector.broadcast %892 : vector<16x1xf32> to vector<16x32xf32>
    %894 = arith.mulf %889, %893 : vector<16x32xf32>
    %895 = vector.broadcast %676 : vector<1x32xf32> to vector<16x32xf32>
    %896 = arith.mulf %894, %895 : vector<16x32xf32>
    %897 = vector.broadcast %677 : vector<1x32xf32> to vector<16x32xf32>
    %898 = arith.addf %896, %897 : vector<16x32xf32>
    %c0_312 = arith.constant 0 : index
    %c0_313 = arith.constant 0 : index
    %c0_314 = arith.constant 0 : index
    %899 = vector.load %arg7[%c0_312, %c0_313, %c0_314] : memref<2x32x128xf32, #tpu.memory_space<vmem>>, vector<1x32x128xf32>
    %900 = vector.shape_cast %899 : vector<1x32x128xf32> to vector<32x128xf32>
    %cst_315 = arith.constant dense<0.000000e+00> : vector<16x128xf32>
    %901 = tpu.matmul %898, %900, %cst_315 {dimension_numbers = #tpu.dot_dimension_numbers<[1], [0], [0], [1], [0, 0, 1, 1], [], []>} : vector<16x32xf32>, vector<32x128xf32>, vector<16x128xf32> -> vector<16x128xf32>
    %c0_316 = arith.constant 0 : index
    %c0_317 = arith.constant 0 : index
    %c0_318 = arith.constant 0 : index
    %902 = vector.load %arg8[%c0_316, %c0_317, %c0_318] : memref<2x1x128xf32, #tpu.memory_space<vmem>>, vector<1x1x128xf32>
    %903 = vector.shape_cast %902 : vector<1x1x128xf32> to vector<1x128xf32>
    %904 = vector.broadcast %903 : vector<1x128xf32> to vector<16x128xf32>
    %905 = arith.addf %901, %904 : vector<16x128xf32>
    %cst_319 = arith.constant 5.000000e-01 : f32
    %906 = vector.broadcast %cst_319 : f32 to vector<16x128xf32>
    %907 = arith.mulf %905, %906 : vector<16x128xf32>
    %cst_320 = arith.constant 0.707106769 : f32
    %908 = vector.broadcast %cst_320 : f32 to vector<16x128xf32>
    %909 = arith.mulf %905, %908 : vector<16x128xf32>
    %910 = math.absf %909 : vector<16x128xf32>
    %cst_321 = arith.constant 0.327591091 : f32
    %911 = vector.broadcast %cst_321 : f32 to vector<16x128xf32>
    %912 = arith.mulf %911, %910 : vector<16x128xf32>
    %cst_322 = arith.constant 1.000000e+00 : f32
    %913 = vector.broadcast %cst_322 : f32 to vector<16x128xf32>
    %914 = arith.addf %913, %912 : vector<16x128xf32>
    %cst_323 = arith.constant 1.000000e+00 : f32
    %915 = vector.broadcast %cst_323 : f32 to vector<16x128xf32>
    %916 = arith.divf %915, %914 : vector<16x128xf32>
    %cst_324 = arith.constant 1.06140542 : f32
    %917 = vector.broadcast %cst_324 : f32 to vector<16x128xf32>
    %918 = arith.mulf %917, %916 : vector<16x128xf32>
    %cst_325 = arith.constant -1.45315206 : f32
    %919 = vector.broadcast %cst_325 : f32 to vector<16x128xf32>
    %920 = arith.addf %918, %919 : vector<16x128xf32>
    %921 = arith.mulf %920, %916 : vector<16x128xf32>
    %cst_326 = arith.constant 1.42141378 : f32
    %922 = vector.broadcast %cst_326 : f32 to vector<16x128xf32>
    %923 = arith.addf %921, %922 : vector<16x128xf32>
    %924 = arith.mulf %923, %916 : vector<16x128xf32>
    %cst_327 = arith.constant -0.284496725 : f32
    %925 = vector.broadcast %cst_327 : f32 to vector<16x128xf32>
    %926 = arith.addf %924, %925 : vector<16x128xf32>
    %927 = arith.mulf %926, %916 : vector<16x128xf32>
    %cst_328 = arith.constant 0.254829586 : f32
    %928 = vector.broadcast %cst_328 : f32 to vector<16x128xf32>
    %929 = arith.addf %927, %928 : vector<16x128xf32>
    %930 = arith.mulf %929, %916 : vector<16x128xf32>
    %cst_329 = arith.constant 0.000000e+00 : f32
    %931 = vector.broadcast %cst_329 : f32 to vector<16x128xf32>
    %932 = arith.subf %931, %910 : vector<16x128xf32>
    %933 = arith.mulf %932, %910 : vector<16x128xf32>
    %934 = math.exp %933 : vector<16x128xf32>
    %935 = arith.mulf %930, %934 : vector<16x128xf32>
    %cst_330 = arith.constant 1.000000e+00 : f32
    %936 = vector.broadcast %cst_330 : f32 to vector<16x128xf32>
    %937 = arith.subf %936, %935 : vector<16x128xf32>
    %cst_331 = arith.constant 0.000000e+00 : f32
    %938 = vector.broadcast %cst_331 : f32 to vector<16x128xf32>
    %939 = arith.cmpf olt, %909, %938 : vector<16x128xf32>
    %cst_332 = arith.constant 0.000000e+00 : f32
    %940 = vector.broadcast %cst_332 : f32 to vector<16x128xf32>
    %941 = arith.subf %940, %937 : vector<16x128xf32>
    %942 = arith.select %939, %941, %937 : vector<16x128xi1>, vector<16x128xf32>
    %cst_333 = arith.constant 1.000000e+00 : f32
    %943 = vector.broadcast %cst_333 : f32 to vector<16x128xf32>
    %944 = arith.addf %943, %942 : vector<16x128xf32>
    %945 = arith.mulf %907, %944 : vector<16x128xf32>
    %c0_334 = arith.constant 0 : index
    %c0_335 = arith.constant 0 : index
    %c0_336 = arith.constant 0 : index
    %946 = vector.load %arg9[%c0_334, %c0_335, %c0_336] : memref<2x128x32xf32, #tpu.memory_space<vmem>>, vector<1x128x32xf32>
    %947 = vector.shape_cast %946 : vector<1x128x32xf32> to vector<128x32xf32>
    %cst_337 = arith.constant dense<0.000000e+00> : vector<16x32xf32>
    %948 = tpu.matmul %945, %947, %cst_337 {dimension_numbers = #tpu.dot_dimension_numbers<[1], [0], [0], [1], [0, 0, 1, 1], [], []>} : vector<16x128xf32>, vector<128x32xf32>, vector<16x32xf32> -> vector<16x32xf32>
    %949 = vector.broadcast %678 : vector<1x32xf32> to vector<16x32xf32>
    %950 = arith.addf %948, %949 : vector<16x32xf32>
    %951 = arith.addf %876, %950 : vector<16x32xf32>
    %c1_338 = arith.constant 1 : index
    %c0_339 = arith.constant 0 : index
    %c0_340 = arith.constant 0 : index
    %952 = vector.load %arg1[%c1_338, %c0_339, %c0_340] : memref<2x6x32xf32, #tpu.memory_space<vmem>>, vector<1x6x32xf32>
    %953 = vector.shape_cast %952 : vector<1x6x32xf32> to vector<6x32xf32>
    %954 = vector.extract_strided_slice %953 {offsets = [0, 0], sizes = [1, 32], strides = [1, 1]} : vector<6x32xf32> to vector<1x32xf32>
    %955 = vector.extract_strided_slice %953 {offsets = [1, 0], sizes = [1, 32], strides = [1, 1]} : vector<6x32xf32> to vector<1x32xf32>
    %956 = vector.extract_strided_slice %953 {offsets = [2, 0], sizes = [1, 32], strides = [1, 1]} : vector<6x32xf32> to vector<1x32xf32>
    %957 = vector.extract_strided_slice %953 {offsets = [3, 0], sizes = [1, 32], strides = [1, 1]} : vector<6x32xf32> to vector<1x32xf32>
    %958 = vector.extract_strided_slice %953 {offsets = [4, 0], sizes = [1, 32], strides = [1, 1]} : vector<6x32xf32> to vector<1x32xf32>
    %959 = vector.extract_strided_slice %953 {offsets = [5, 0], sizes = [1, 32], strides = [1, 1]} : vector<6x32xf32> to vector<1x32xf32>
    %c1_341 = arith.constant 1 : index
    %c0_342 = arith.constant 0 : index
    %c0_343 = arith.constant 0 : index
    %c0_344 = arith.constant 0 : index
    %960 = vector.load %arg2[%c1_341, %c0_342, %c0_343, %c0_344] : memref<2x3x4x8xf32, #tpu.memory_space<vmem>>, vector<1x3x4x8xf32>
    %961 = vector.shape_cast %960 : vector<1x3x4x8xf32> to vector<3x4x8xf32>
    %c1_345 = arith.constant 1 : index
    %c0_346 = arith.constant 0 : index
    %c0_347 = arith.constant 0 : index
    %c0_348 = arith.constant 0 : index
    %962 = vector.load %arg3[%c1_345, %c0_346, %c0_347, %c0_348] : memref<2x4x32x8xf32, #tpu.memory_space<vmem>>, vector<1x4x32x8xf32>
    %963 = vector.shape_cast %962 : vector<1x4x32x8xf32> to vector<4x32x8xf32>
    %c1_349 = arith.constant 1 : index
    %c0_350 = arith.constant 0 : index
    %c0_351 = arith.constant 0 : index
    %c0_352 = arith.constant 0 : index
    %964 = vector.load %arg4[%c1_349, %c0_350, %c0_351, %c0_352] : memref<2x4x32x8xf32, #tpu.memory_space<vmem>>, vector<1x4x32x8xf32>
    %965 = vector.shape_cast %964 : vector<1x4x32x8xf32> to vector<4x32x8xf32>
    %c1_353 = arith.constant 1 : index
    %c0_354 = arith.constant 0 : index
    %c0_355 = arith.constant 0 : index
    %c0_356 = arith.constant 0 : index
    %966 = vector.load %arg5[%c1_353, %c0_354, %c0_355, %c0_356] : memref<2x4x32x8xf32, #tpu.memory_space<vmem>>, vector<1x4x32x8xf32>
    %967 = vector.shape_cast %966 : vector<1x4x32x8xf32> to vector<4x32x8xf32>
    %c1_357 = arith.constant 1 : index
    %c0_358 = arith.constant 0 : index
    %c0_359 = arith.constant 0 : index
    %c0_360 = arith.constant 0 : index
    %968 = vector.load %arg6[%c1_357, %c0_358, %c0_359, %c0_360] : memref<2x4x8x32xf32, #tpu.memory_space<vmem>>, vector<1x4x8x32xf32>
    %969 = vector.shape_cast %968 : vector<1x4x8x32xf32> to vector<4x8x32xf32>
    %cst_361 = arith.constant dense<0.000000e+00> : vector<16xf32>
    %970 = vector.multi_reduction <add>, %951, %cst_361 [1] : vector<16x32xf32> to vector<16xf32>
    %971 = vector.shape_cast %970 : vector<16xf32> to vector<16x1xf32>
    %cst_362 = arith.constant 3.200000e+01 : f32
    %972 = vector.broadcast %cst_362 : f32 to vector<16x1xf32>
    %973 = arith.divf %971, %972 : vector<16x1xf32>
    %974 = vector.broadcast %973 : vector<16x1xf32> to vector<16x32xf32>
    %975 = arith.subf %951, %974 : vector<16x32xf32>
    %976 = arith.mulf %975, %975 : vector<16x32xf32>
    %cst_363 = arith.constant dense<0.000000e+00> : vector<16xf32>
    %977 = vector.multi_reduction <add>, %976, %cst_363 [1] : vector<16x32xf32> to vector<16xf32>
    %978 = vector.shape_cast %977 : vector<16xf32> to vector<16x1xf32>
    %cst_364 = arith.constant 3.200000e+01 : f32
    %979 = vector.broadcast %cst_364 : f32 to vector<16x1xf32>
    %980 = arith.divf %978, %979 : vector<16x1xf32>
    %981 = vector.broadcast %973 : vector<16x1xf32> to vector<16x32xf32>
    %982 = arith.subf %951, %981 : vector<16x32xf32>
    %cst_365 = arith.constant 9.99999974E-6 : f32
    %983 = vector.broadcast %cst_365 : f32 to vector<16x1xf32>
    %984 = arith.addf %980, %983 : vector<16x1xf32>
    %985 = math.rsqrt %984 : vector<16x1xf32>
    %986 = vector.broadcast %985 : vector<16x1xf32> to vector<16x32xf32>
    %987 = arith.mulf %982, %986 : vector<16x32xf32>
    %988 = vector.broadcast %954 : vector<1x32xf32> to vector<16x32xf32>
    %989 = arith.mulf %987, %988 : vector<16x32xf32>
    %990 = vector.broadcast %955 : vector<1x32xf32> to vector<16x32xf32>
    %991 = arith.addf %989, %990 : vector<16x32xf32>
    %992 = vector.extract_strided_slice %963 {offsets = [0, 0, 0], sizes = [1, 32, 8], strides = [1, 1, 1]} : vector<4x32x8xf32> to vector<1x32x8xf32>
    %993 = vector.shape_cast %992 : vector<1x32x8xf32> to vector<32x8xf32>
    %cst_366 = arith.constant dense<0.000000e+00> : vector<16x8xf32>
    %994 = tpu.matmul %991, %993, %cst_366 {dimension_numbers = #tpu.dot_dimension_numbers<[1], [0], [0], [1], [0, 0, 1, 1], [], []>} : vector<16x32xf32>, vector<32x8xf32>, vector<16x8xf32> -> vector<16x8xf32>
    %995 = vector.extract_strided_slice %961 {offsets = [0, 0, 0], sizes = [1, 1, 8], strides = [1, 1, 1]} : vector<3x4x8xf32> to vector<1x1x8xf32>
    %996 = vector.shape_cast %995 : vector<1x1x8xf32> to vector<1x8xf32>
    %997 = vector.broadcast %996 : vector<1x8xf32> to vector<16x8xf32>
    %998 = arith.addf %994, %997 : vector<16x8xf32>
    %999 = vector.extract_strided_slice %965 {offsets = [0, 0, 0], sizes = [1, 32, 8], strides = [1, 1, 1]} : vector<4x32x8xf32> to vector<1x32x8xf32>
    %1000 = vector.shape_cast %999 : vector<1x32x8xf32> to vector<32x8xf32>
    %cst_367 = arith.constant dense<0.000000e+00> : vector<16x8xf32>
    %1001 = tpu.matmul %991, %1000, %cst_367 {dimension_numbers = #tpu.dot_dimension_numbers<[1], [0], [0], [1], [0, 0, 1, 1], [], []>} : vector<16x32xf32>, vector<32x8xf32>, vector<16x8xf32> -> vector<16x8xf32>
    %1002 = vector.extract_strided_slice %961 {offsets = [1, 0, 0], sizes = [1, 1, 8], strides = [1, 1, 1]} : vector<3x4x8xf32> to vector<1x1x8xf32>
    %1003 = vector.shape_cast %1002 : vector<1x1x8xf32> to vector<1x8xf32>
    %1004 = vector.broadcast %1003 : vector<1x8xf32> to vector<16x8xf32>
    %1005 = arith.addf %1001, %1004 : vector<16x8xf32>
    %1006 = vector.extract_strided_slice %967 {offsets = [0, 0, 0], sizes = [1, 32, 8], strides = [1, 1, 1]} : vector<4x32x8xf32> to vector<1x32x8xf32>
    %1007 = vector.shape_cast %1006 : vector<1x32x8xf32> to vector<32x8xf32>
    %cst_368 = arith.constant dense<0.000000e+00> : vector<16x8xf32>
    %1008 = tpu.matmul %991, %1007, %cst_368 {dimension_numbers = #tpu.dot_dimension_numbers<[1], [0], [0], [1], [0, 0, 1, 1], [], []>} : vector<16x32xf32>, vector<32x8xf32>, vector<16x8xf32> -> vector<16x8xf32>
    %1009 = vector.extract_strided_slice %961 {offsets = [2, 0, 0], sizes = [1, 1, 8], strides = [1, 1, 1]} : vector<3x4x8xf32> to vector<1x1x8xf32>
    %1010 = vector.shape_cast %1009 : vector<1x1x8xf32> to vector<1x8xf32>
    %1011 = vector.broadcast %1010 : vector<1x8xf32> to vector<16x8xf32>
    %1012 = arith.addf %1008, %1011 : vector<16x8xf32>
    %cst_369 = arith.constant dense<0.000000e+00> : vector<16x16xf32>
    %1013 = tpu.matmul %998, %1005, %cst_369 {dimension_numbers = #tpu.dot_dimension_numbers<[1], [1], [0], [0], [0, 0, 1, 0], [], []>} : vector<16x8xf32>, vector<16x8xf32>, vector<16x16xf32> -> vector<16x16xf32>
    %cst_370 = arith.constant 0.353553385 : f32
    %1014 = vector.broadcast %cst_370 : f32 to vector<16x16xf32>
    %1015 = arith.mulf %1013, %1014 : vector<16x16xf32>
    %cst_371 = arith.constant -1.000000e+30 : f32
    %1016 = vector.broadcast %cst_371 : f32 to vector<16x16xf32>
    %1017 = arith.select %2, %1015, %1016 : vector<16x16xi1>, vector<16x16xf32>
    %cst_372 = arith.constant dense<0xFF800000> : vector<16xf32>
    %1018 = vector.multi_reduction <maximumf>, %1017, %cst_372 [1] : vector<16x16xf32> to vector<16xf32>
    %1019 = vector.shape_cast %1018 : vector<16xf32> to vector<16x1xf32>
    %1020 = vector.broadcast %1019 : vector<16x1xf32> to vector<16x16xf32>
    %1021 = arith.subf %1017, %1020 : vector<16x16xf32>
    %1022 = math.exp %1021 : vector<16x16xf32>
    %cst_373 = arith.constant dense<0.000000e+00> : vector<16xf32>
    %1023 = vector.multi_reduction <add>, %1022, %cst_373 [1] : vector<16x16xf32> to vector<16xf32>
    %1024 = vector.shape_cast %1023 : vector<16xf32> to vector<16x1xf32>
    %1025 = tpu.reciprocal %1024 : vector<16x1xf32> -> vector<16x1xf32>
    %1026 = vector.broadcast %1025 : vector<16x1xf32> to vector<16x16xf32>
    %1027 = arith.mulf %1022, %1026 : vector<16x16xf32>
    %cst_374 = arith.constant dense<0.000000e+00> : vector<16x8xf32>
    %1028 = tpu.matmul %1027, %1012, %cst_374 {dimension_numbers = #tpu.dot_dimension_numbers<[1], [0], [0], [1], [0, 0, 1, 1], [], []>} : vector<16x16xf32>, vector<16x8xf32>, vector<16x8xf32> -> vector<16x8xf32>
    %1029 = vector.extract_strided_slice %969 {offsets = [0, 0, 0], sizes = [1, 8, 32], strides = [1, 1, 1]} : vector<4x8x32xf32> to vector<1x8x32xf32>
    %1030 = vector.shape_cast %1029 : vector<1x8x32xf32> to vector<8x32xf32>
    %cst_375 = arith.constant dense<0.000000e+00> : vector<16x32xf32>
    %1031 = tpu.matmul %1028, %1030, %cst_375 {dimension_numbers = #tpu.dot_dimension_numbers<[1], [0], [0], [1], [0, 0, 1, 1], [], []>} : vector<16x8xf32>, vector<8x32xf32>, vector<16x32xf32> -> vector<16x32xf32>
    %1032 = vector.extract_strided_slice %963 {offsets = [1, 0, 0], sizes = [1, 32, 8], strides = [1, 1, 1]} : vector<4x32x8xf32> to vector<1x32x8xf32>
    %1033 = vector.shape_cast %1032 : vector<1x32x8xf32> to vector<32x8xf32>
    %cst_376 = arith.constant dense<0.000000e+00> : vector<16x8xf32>
    %1034 = tpu.matmul %991, %1033, %cst_376 {dimension_numbers = #tpu.dot_dimension_numbers<[1], [0], [0], [1], [0, 0, 1, 1], [], []>} : vector<16x32xf32>, vector<32x8xf32>, vector<16x8xf32> -> vector<16x8xf32>
    %1035 = vector.extract_strided_slice %961 {offsets = [0, 1, 0], sizes = [1, 1, 8], strides = [1, 1, 1]} : vector<3x4x8xf32> to vector<1x1x8xf32>
    %1036 = vector.shape_cast %1035 : vector<1x1x8xf32> to vector<1x8xf32>
    %1037 = vector.broadcast %1036 : vector<1x8xf32> to vector<16x8xf32>
    %1038 = arith.addf %1034, %1037 : vector<16x8xf32>
    %1039 = vector.extract_strided_slice %965 {offsets = [1, 0, 0], sizes = [1, 32, 8], strides = [1, 1, 1]} : vector<4x32x8xf32> to vector<1x32x8xf32>
    %1040 = vector.shape_cast %1039 : vector<1x32x8xf32> to vector<32x8xf32>
    %cst_377 = arith.constant dense<0.000000e+00> : vector<16x8xf32>
    %1041 = tpu.matmul %991, %1040, %cst_377 {dimension_numbers = #tpu.dot_dimension_numbers<[1], [0], [0], [1], [0, 0, 1, 1], [], []>} : vector<16x32xf32>, vector<32x8xf32>, vector<16x8xf32> -> vector<16x8xf32>
    %1042 = vector.extract_strided_slice %961 {offsets = [1, 1, 0], sizes = [1, 1, 8], strides = [1, 1, 1]} : vector<3x4x8xf32> to vector<1x1x8xf32>
    %1043 = vector.shape_cast %1042 : vector<1x1x8xf32> to vector<1x8xf32>
    %1044 = vector.broadcast %1043 : vector<1x8xf32> to vector<16x8xf32>
    %1045 = arith.addf %1041, %1044 : vector<16x8xf32>
    %1046 = vector.extract_strided_slice %967 {offsets = [1, 0, 0], sizes = [1, 32, 8], strides = [1, 1, 1]} : vector<4x32x8xf32> to vector<1x32x8xf32>
    %1047 = vector.shape_cast %1046 : vector<1x32x8xf32> to vector<32x8xf32>
    %cst_378 = arith.constant dense<0.000000e+00> : vector<16x8xf32>
    %1048 = tpu.matmul %991, %1047, %cst_378 {dimension_numbers = #tpu.dot_dimension_numbers<[1], [0], [0], [1], [0, 0, 1, 1], [], []>} : vector<16x32xf32>, vector<32x8xf32>, vector<16x8xf32> -> vector<16x8xf32>
    %1049 = vector.extract_strided_slice %961 {offsets = [2, 1, 0], sizes = [1, 1, 8], strides = [1, 1, 1]} : vector<3x4x8xf32> to vector<1x1x8xf32>
    %1050 = vector.shape_cast %1049 : vector<1x1x8xf32> to vector<1x8xf32>
    %1051 = vector.broadcast %1050 : vector<1x8xf32> to vector<16x8xf32>
    %1052 = arith.addf %1048, %1051 : vector<16x8xf32>
    %cst_379 = arith.constant dense<0.000000e+00> : vector<16x16xf32>
    %1053 = tpu.matmul %1038, %1045, %cst_379 {dimension_numbers = #tpu.dot_dimension_numbers<[1], [1], [0], [0], [0, 0, 1, 0], [], []>} : vector<16x8xf32>, vector<16x8xf32>, vector<16x16xf32> -> vector<16x16xf32>
    %cst_380 = arith.constant 0.353553385 : f32
    %1054 = vector.broadcast %cst_380 : f32 to vector<16x16xf32>
    %1055 = arith.mulf %1053, %1054 : vector<16x16xf32>
    %cst_381 = arith.constant -1.000000e+30 : f32
    %1056 = vector.broadcast %cst_381 : f32 to vector<16x16xf32>
    %1057 = arith.select %2, %1055, %1056 : vector<16x16xi1>, vector<16x16xf32>
    %cst_382 = arith.constant dense<0xFF800000> : vector<16xf32>
    %1058 = vector.multi_reduction <maximumf>, %1057, %cst_382 [1] : vector<16x16xf32> to vector<16xf32>
    %1059 = vector.shape_cast %1058 : vector<16xf32> to vector<16x1xf32>
    %1060 = vector.broadcast %1059 : vector<16x1xf32> to vector<16x16xf32>
    %1061 = arith.subf %1057, %1060 : vector<16x16xf32>
    %1062 = math.exp %1061 : vector<16x16xf32>
    %cst_383 = arith.constant dense<0.000000e+00> : vector<16xf32>
    %1063 = vector.multi_reduction <add>, %1062, %cst_383 [1] : vector<16x16xf32> to vector<16xf32>
    %1064 = vector.shape_cast %1063 : vector<16xf32> to vector<16x1xf32>
    %1065 = tpu.reciprocal %1064 : vector<16x1xf32> -> vector<16x1xf32>
    %1066 = vector.broadcast %1065 : vector<16x1xf32> to vector<16x16xf32>
    %1067 = arith.mulf %1062, %1066 : vector<16x16xf32>
    %cst_384 = arith.constant dense<0.000000e+00> : vector<16x8xf32>
    %1068 = tpu.matmul %1067, %1052, %cst_384 {dimension_numbers = #tpu.dot_dimension_numbers<[1], [0], [0], [1], [0, 0, 1, 1], [], []>} : vector<16x16xf32>, vector<16x8xf32>, vector<16x8xf32> -> vector<16x8xf32>
    %1069 = vector.extract_strided_slice %969 {offsets = [1, 0, 0], sizes = [1, 8, 32], strides = [1, 1, 1]} : vector<4x8x32xf32> to vector<1x8x32xf32>
    %1070 = vector.shape_cast %1069 : vector<1x8x32xf32> to vector<8x32xf32>
    %cst_385 = arith.constant dense<0.000000e+00> : vector<16x32xf32>
    %1071 = tpu.matmul %1068, %1070, %cst_385 {dimension_numbers = #tpu.dot_dimension_numbers<[1], [0], [0], [1], [0, 0, 1, 1], [], []>} : vector<16x8xf32>, vector<8x32xf32>, vector<16x32xf32> -> vector<16x32xf32>
    %1072 = arith.addf %1031, %1071 : vector<16x32xf32>
    %1073 = vector.extract_strided_slice %963 {offsets = [2, 0, 0], sizes = [1, 32, 8], strides = [1, 1, 1]} : vector<4x32x8xf32> to vector<1x32x8xf32>
    %1074 = vector.shape_cast %1073 : vector<1x32x8xf32> to vector<32x8xf32>
    %cst_386 = arith.constant dense<0.000000e+00> : vector<16x8xf32>
    %1075 = tpu.matmul %991, %1074, %cst_386 {dimension_numbers = #tpu.dot_dimension_numbers<[1], [0], [0], [1], [0, 0, 1, 1], [], []>} : vector<16x32xf32>, vector<32x8xf32>, vector<16x8xf32> -> vector<16x8xf32>
    %1076 = vector.extract_strided_slice %961 {offsets = [0, 2, 0], sizes = [1, 1, 8], strides = [1, 1, 1]} : vector<3x4x8xf32> to vector<1x1x8xf32>
    %1077 = vector.shape_cast %1076 : vector<1x1x8xf32> to vector<1x8xf32>
    %1078 = vector.broadcast %1077 : vector<1x8xf32> to vector<16x8xf32>
    %1079 = arith.addf %1075, %1078 : vector<16x8xf32>
    %1080 = vector.extract_strided_slice %965 {offsets = [2, 0, 0], sizes = [1, 32, 8], strides = [1, 1, 1]} : vector<4x32x8xf32> to vector<1x32x8xf32>
    %1081 = vector.shape_cast %1080 : vector<1x32x8xf32> to vector<32x8xf32>
    %cst_387 = arith.constant dense<0.000000e+00> : vector<16x8xf32>
    %1082 = tpu.matmul %991, %1081, %cst_387 {dimension_numbers = #tpu.dot_dimension_numbers<[1], [0], [0], [1], [0, 0, 1, 1], [], []>} : vector<16x32xf32>, vector<32x8xf32>, vector<16x8xf32> -> vector<16x8xf32>
    %1083 = vector.extract_strided_slice %961 {offsets = [1, 2, 0], sizes = [1, 1, 8], strides = [1, 1, 1]} : vector<3x4x8xf32> to vector<1x1x8xf32>
    %1084 = vector.shape_cast %1083 : vector<1x1x8xf32> to vector<1x8xf32>
    %1085 = vector.broadcast %1084 : vector<1x8xf32> to vector<16x8xf32>
    %1086 = arith.addf %1082, %1085 : vector<16x8xf32>
    %1087 = vector.extract_strided_slice %967 {offsets = [2, 0, 0], sizes = [1, 32, 8], strides = [1, 1, 1]} : vector<4x32x8xf32> to vector<1x32x8xf32>
    %1088 = vector.shape_cast %1087 : vector<1x32x8xf32> to vector<32x8xf32>
    %cst_388 = arith.constant dense<0.000000e+00> : vector<16x8xf32>
    %1089 = tpu.matmul %991, %1088, %cst_388 {dimension_numbers = #tpu.dot_dimension_numbers<[1], [0], [0], [1], [0, 0, 1, 1], [], []>} : vector<16x32xf32>, vector<32x8xf32>, vector<16x8xf32> -> vector<16x8xf32>
    %1090 = vector.extract_strided_slice %961 {offsets = [2, 2, 0], sizes = [1, 1, 8], strides = [1, 1, 1]} : vector<3x4x8xf32> to vector<1x1x8xf32>
    %1091 = vector.shape_cast %1090 : vector<1x1x8xf32> to vector<1x8xf32>
    %1092 = vector.broadcast %1091 : vector<1x8xf32> to vector<16x8xf32>
    %1093 = arith.addf %1089, %1092 : vector<16x8xf32>
    %cst_389 = arith.constant dense<0.000000e+00> : vector<16x16xf32>
    %1094 = tpu.matmul %1079, %1086, %cst_389 {dimension_numbers = #tpu.dot_dimension_numbers<[1], [1], [0], [0], [0, 0, 1, 0], [], []>} : vector<16x8xf32>, vector<16x8xf32>, vector<16x16xf32> -> vector<16x16xf32>
    %cst_390 = arith.constant 0.353553385 : f32
    %1095 = vector.broadcast %cst_390 : f32 to vector<16x16xf32>
    %1096 = arith.mulf %1094, %1095 : vector<16x16xf32>
    %cst_391 = arith.constant -1.000000e+30 : f32
    %1097 = vector.broadcast %cst_391 : f32 to vector<16x16xf32>
    %1098 = arith.select %2, %1096, %1097 : vector<16x16xi1>, vector<16x16xf32>
    %cst_392 = arith.constant dense<0xFF800000> : vector<16xf32>
    %1099 = vector.multi_reduction <maximumf>, %1098, %cst_392 [1] : vector<16x16xf32> to vector<16xf32>
    %1100 = vector.shape_cast %1099 : vector<16xf32> to vector<16x1xf32>
    %1101 = vector.broadcast %1100 : vector<16x1xf32> to vector<16x16xf32>
    %1102 = arith.subf %1098, %1101 : vector<16x16xf32>
    %1103 = math.exp %1102 : vector<16x16xf32>
    %cst_393 = arith.constant dense<0.000000e+00> : vector<16xf32>
    %1104 = vector.multi_reduction <add>, %1103, %cst_393 [1] : vector<16x16xf32> to vector<16xf32>
    %1105 = vector.shape_cast %1104 : vector<16xf32> to vector<16x1xf32>
    %1106 = tpu.reciprocal %1105 : vector<16x1xf32> -> vector<16x1xf32>
    %1107 = vector.broadcast %1106 : vector<16x1xf32> to vector<16x16xf32>
    %1108 = arith.mulf %1103, %1107 : vector<16x16xf32>
    %cst_394 = arith.constant dense<0.000000e+00> : vector<16x8xf32>
    %1109 = tpu.matmul %1108, %1093, %cst_394 {dimension_numbers = #tpu.dot_dimension_numbers<[1], [0], [0], [1], [0, 0, 1, 1], [], []>} : vector<16x16xf32>, vector<16x8xf32>, vector<16x8xf32> -> vector<16x8xf32>
    %1110 = vector.extract_strided_slice %969 {offsets = [2, 0, 0], sizes = [1, 8, 32], strides = [1, 1, 1]} : vector<4x8x32xf32> to vector<1x8x32xf32>
    %1111 = vector.shape_cast %1110 : vector<1x8x32xf32> to vector<8x32xf32>
    %cst_395 = arith.constant dense<0.000000e+00> : vector<16x32xf32>
    %1112 = tpu.matmul %1109, %1111, %cst_395 {dimension_numbers = #tpu.dot_dimension_numbers<[1], [0], [0], [1], [0, 0, 1, 1], [], []>} : vector<16x8xf32>, vector<8x32xf32>, vector<16x32xf32> -> vector<16x32xf32>
    %1113 = arith.addf %1072, %1112 : vector<16x32xf32>
    %1114 = vector.extract_strided_slice %963 {offsets = [3, 0, 0], sizes = [1, 32, 8], strides = [1, 1, 1]} : vector<4x32x8xf32> to vector<1x32x8xf32>
    %1115 = vector.shape_cast %1114 : vector<1x32x8xf32> to vector<32x8xf32>
    %cst_396 = arith.constant dense<0.000000e+00> : vector<16x8xf32>
    %1116 = tpu.matmul %991, %1115, %cst_396 {dimension_numbers = #tpu.dot_dimension_numbers<[1], [0], [0], [1], [0, 0, 1, 1], [], []>} : vector<16x32xf32>, vector<32x8xf32>, vector<16x8xf32> -> vector<16x8xf32>
    %1117 = vector.extract_strided_slice %961 {offsets = [0, 3, 0], sizes = [1, 1, 8], strides = [1, 1, 1]} : vector<3x4x8xf32> to vector<1x1x8xf32>
    %1118 = vector.shape_cast %1117 : vector<1x1x8xf32> to vector<1x8xf32>
    %1119 = vector.broadcast %1118 : vector<1x8xf32> to vector<16x8xf32>
    %1120 = arith.addf %1116, %1119 : vector<16x8xf32>
    %1121 = vector.extract_strided_slice %965 {offsets = [3, 0, 0], sizes = [1, 32, 8], strides = [1, 1, 1]} : vector<4x32x8xf32> to vector<1x32x8xf32>
    %1122 = vector.shape_cast %1121 : vector<1x32x8xf32> to vector<32x8xf32>
    %cst_397 = arith.constant dense<0.000000e+00> : vector<16x8xf32>
    %1123 = tpu.matmul %991, %1122, %cst_397 {dimension_numbers = #tpu.dot_dimension_numbers<[1], [0], [0], [1], [0, 0, 1, 1], [], []>} : vector<16x32xf32>, vector<32x8xf32>, vector<16x8xf32> -> vector<16x8xf32>
    %1124 = vector.extract_strided_slice %961 {offsets = [1, 3, 0], sizes = [1, 1, 8], strides = [1, 1, 1]} : vector<3x4x8xf32> to vector<1x1x8xf32>
    %1125 = vector.shape_cast %1124 : vector<1x1x8xf32> to vector<1x8xf32>
    %1126 = vector.broadcast %1125 : vector<1x8xf32> to vector<16x8xf32>
    %1127 = arith.addf %1123, %1126 : vector<16x8xf32>
    %1128 = vector.extract_strided_slice %967 {offsets = [3, 0, 0], sizes = [1, 32, 8], strides = [1, 1, 1]} : vector<4x32x8xf32> to vector<1x32x8xf32>
    %1129 = vector.shape_cast %1128 : vector<1x32x8xf32> to vector<32x8xf32>
    %cst_398 = arith.constant dense<0.000000e+00> : vector<16x8xf32>
    %1130 = tpu.matmul %991, %1129, %cst_398 {dimension_numbers = #tpu.dot_dimension_numbers<[1], [0], [0], [1], [0, 0, 1, 1], [], []>} : vector<16x32xf32>, vector<32x8xf32>, vector<16x8xf32> -> vector<16x8xf32>
    %1131 = vector.extract_strided_slice %961 {offsets = [2, 3, 0], sizes = [1, 1, 8], strides = [1, 1, 1]} : vector<3x4x8xf32> to vector<1x1x8xf32>
    %1132 = vector.shape_cast %1131 : vector<1x1x8xf32> to vector<1x8xf32>
    %1133 = vector.broadcast %1132 : vector<1x8xf32> to vector<16x8xf32>
    %1134 = arith.addf %1130, %1133 : vector<16x8xf32>
    %cst_399 = arith.constant dense<0.000000e+00> : vector<16x16xf32>
    %1135 = tpu.matmul %1120, %1127, %cst_399 {dimension_numbers = #tpu.dot_dimension_numbers<[1], [1], [0], [0], [0, 0, 1, 0], [], []>} : vector<16x8xf32>, vector<16x8xf32>, vector<16x16xf32> -> vector<16x16xf32>
    %cst_400 = arith.constant 0.353553385 : f32
    %1136 = vector.broadcast %cst_400 : f32 to vector<16x16xf32>
    %1137 = arith.mulf %1135, %1136 : vector<16x16xf32>
    %cst_401 = arith.constant -1.000000e+30 : f32
    %1138 = vector.broadcast %cst_401 : f32 to vector<16x16xf32>
    %1139 = arith.select %2, %1137, %1138 : vector<16x16xi1>, vector<16x16xf32>
    %cst_402 = arith.constant dense<0xFF800000> : vector<16xf32>
    %1140 = vector.multi_reduction <maximumf>, %1139, %cst_402 [1] : vector<16x16xf32> to vector<16xf32>
    %1141 = vector.shape_cast %1140 : vector<16xf32> to vector<16x1xf32>
    %1142 = vector.broadcast %1141 : vector<16x1xf32> to vector<16x16xf32>
    %1143 = arith.subf %1139, %1142 : vector<16x16xf32>
    %1144 = math.exp %1143 : vector<16x16xf32>
    %cst_403 = arith.constant dense<0.000000e+00> : vector<16xf32>
    %1145 = vector.multi_reduction <add>, %1144, %cst_403 [1] : vector<16x16xf32> to vector<16xf32>
    %1146 = vector.shape_cast %1145 : vector<16xf32> to vector<16x1xf32>
    %1147 = tpu.reciprocal %1146 : vector<16x1xf32> -> vector<16x1xf32>
    %1148 = vector.broadcast %1147 : vector<16x1xf32> to vector<16x16xf32>
    %1149 = arith.mulf %1144, %1148 : vector<16x16xf32>
    %cst_404 = arith.constant dense<0.000000e+00> : vector<16x8xf32>
    %1150 = tpu.matmul %1149, %1134, %cst_404 {dimension_numbers = #tpu.dot_dimension_numbers<[1], [0], [0], [1], [0, 0, 1, 1], [], []>} : vector<16x16xf32>, vector<16x8xf32>, vector<16x8xf32> -> vector<16x8xf32>
    %1151 = vector.extract_strided_slice %969 {offsets = [3, 0, 0], sizes = [1, 8, 32], strides = [1, 1, 1]} : vector<4x8x32xf32> to vector<1x8x32xf32>
    %1152 = vector.shape_cast %1151 : vector<1x8x32xf32> to vector<8x32xf32>
    %cst_405 = arith.constant dense<0.000000e+00> : vector<16x32xf32>
    %1153 = tpu.matmul %1150, %1152, %cst_405 {dimension_numbers = #tpu.dot_dimension_numbers<[1], [0], [0], [1], [0, 0, 1, 1], [], []>} : vector<16x8xf32>, vector<8x32xf32>, vector<16x32xf32> -> vector<16x32xf32>
    %1154 = arith.addf %1113, %1153 : vector<16x32xf32>
    %1155 = arith.addf %951, %1154 : vector<16x32xf32>
    %1156 = vector.broadcast %956 : vector<1x32xf32> to vector<16x32xf32>
    %1157 = arith.addf %1155, %1156 : vector<16x32xf32>
    %cst_406 = arith.constant dense<0.000000e+00> : vector<16xf32>
    %1158 = vector.multi_reduction <add>, %1157, %cst_406 [1] : vector<16x32xf32> to vector<16xf32>
    %1159 = vector.shape_cast %1158 : vector<16xf32> to vector<16x1xf32>
    %cst_407 = arith.constant 3.200000e+01 : f32
    %1160 = vector.broadcast %cst_407 : f32 to vector<16x1xf32>
    %1161 = arith.divf %1159, %1160 : vector<16x1xf32>
    %1162 = vector.broadcast %1161 : vector<16x1xf32> to vector<16x32xf32>
    %1163 = arith.subf %1157, %1162 : vector<16x32xf32>
    %1164 = arith.mulf %1163, %1163 : vector<16x32xf32>
    %cst_408 = arith.constant dense<0.000000e+00> : vector<16xf32>
    %1165 = vector.multi_reduction <add>, %1164, %cst_408 [1] : vector<16x32xf32> to vector<16xf32>
    %1166 = vector.shape_cast %1165 : vector<16xf32> to vector<16x1xf32>
    %cst_409 = arith.constant 3.200000e+01 : f32
    %1167 = vector.broadcast %cst_409 : f32 to vector<16x1xf32>
    %1168 = arith.divf %1166, %1167 : vector<16x1xf32>
    %1169 = vector.broadcast %1161 : vector<16x1xf32> to vector<16x32xf32>
    %1170 = arith.subf %1157, %1169 : vector<16x32xf32>
    %cst_410 = arith.constant 9.99999974E-6 : f32
    %1171 = vector.broadcast %cst_410 : f32 to vector<16x1xf32>
    %1172 = arith.addf %1168, %1171 : vector<16x1xf32>
    %1173 = math.rsqrt %1172 : vector<16x1xf32>
    %1174 = vector.broadcast %1173 : vector<16x1xf32> to vector<16x32xf32>
    %1175 = arith.mulf %1170, %1174 : vector<16x32xf32>
    %1176 = vector.broadcast %957 : vector<1x32xf32> to vector<16x32xf32>
    %1177 = arith.mulf %1175, %1176 : vector<16x32xf32>
    %1178 = vector.broadcast %958 : vector<1x32xf32> to vector<16x32xf32>
    %1179 = arith.addf %1177, %1178 : vector<16x32xf32>
    %c1_411 = arith.constant 1 : index
    %c0_412 = arith.constant 0 : index
    %c0_413 = arith.constant 0 : index
    %1180 = vector.load %arg7[%c1_411, %c0_412, %c0_413] : memref<2x32x128xf32, #tpu.memory_space<vmem>>, vector<1x32x128xf32>
    %1181 = vector.shape_cast %1180 : vector<1x32x128xf32> to vector<32x128xf32>
    %cst_414 = arith.constant dense<0.000000e+00> : vector<16x128xf32>
    %1182 = tpu.matmul %1179, %1181, %cst_414 {dimension_numbers = #tpu.dot_dimension_numbers<[1], [0], [0], [1], [0, 0, 1, 1], [], []>} : vector<16x32xf32>, vector<32x128xf32>, vector<16x128xf32> -> vector<16x128xf32>
    %c1_415 = arith.constant 1 : index
    %c0_416 = arith.constant 0 : index
    %c0_417 = arith.constant 0 : index
    %1183 = vector.load %arg8[%c1_415, %c0_416, %c0_417] : memref<2x1x128xf32, #tpu.memory_space<vmem>>, vector<1x1x128xf32>
    %1184 = vector.shape_cast %1183 : vector<1x1x128xf32> to vector<1x128xf32>
    %1185 = vector.broadcast %1184 : vector<1x128xf32> to vector<16x128xf32>
    %1186 = arith.addf %1182, %1185 : vector<16x128xf32>
    %cst_418 = arith.constant 5.000000e-01 : f32
    %1187 = vector.broadcast %cst_418 : f32 to vector<16x128xf32>
    %1188 = arith.mulf %1186, %1187 : vector<16x128xf32>
    %cst_419 = arith.constant 0.707106769 : f32
    %1189 = vector.broadcast %cst_419 : f32 to vector<16x128xf32>
    %1190 = arith.mulf %1186, %1189 : vector<16x128xf32>
    %1191 = math.absf %1190 : vector<16x128xf32>
    %cst_420 = arith.constant 0.327591091 : f32
    %1192 = vector.broadcast %cst_420 : f32 to vector<16x128xf32>
    %1193 = arith.mulf %1192, %1191 : vector<16x128xf32>
    %cst_421 = arith.constant 1.000000e+00 : f32
    %1194 = vector.broadcast %cst_421 : f32 to vector<16x128xf32>
    %1195 = arith.addf %1194, %1193 : vector<16x128xf32>
    %cst_422 = arith.constant 1.000000e+00 : f32
    %1196 = vector.broadcast %cst_422 : f32 to vector<16x128xf32>
    %1197 = arith.divf %1196, %1195 : vector<16x128xf32>
    %cst_423 = arith.constant 1.06140542 : f32
    %1198 = vector.broadcast %cst_423 : f32 to vector<16x128xf32>
    %1199 = arith.mulf %1198, %1197 : vector<16x128xf32>
    %cst_424 = arith.constant -1.45315206 : f32
    %1200 = vector.broadcast %cst_424 : f32 to vector<16x128xf32>
    %1201 = arith.addf %1199, %1200 : vector<16x128xf32>
    %1202 = arith.mulf %1201, %1197 : vector<16x128xf32>
    %cst_425 = arith.constant 1.42141378 : f32
    %1203 = vector.broadcast %cst_425 : f32 to vector<16x128xf32>
    %1204 = arith.addf %1202, %1203 : vector<16x128xf32>
    %1205 = arith.mulf %1204, %1197 : vector<16x128xf32>
    %cst_426 = arith.constant -0.284496725 : f32
    %1206 = vector.broadcast %cst_426 : f32 to vector<16x128xf32>
    %1207 = arith.addf %1205, %1206 : vector<16x128xf32>
    %1208 = arith.mulf %1207, %1197 : vector<16x128xf32>
    %cst_427 = arith.constant 0.254829586 : f32
    %1209 = vector.broadcast %cst_427 : f32 to vector<16x128xf32>
    %1210 = arith.addf %1208, %1209 : vector<16x128xf32>
    %1211 = arith.mulf %1210, %1197 : vector<16x128xf32>
    %cst_428 = arith.constant 0.000000e+00 : f32
    %1212 = vector.broadcast %cst_428 : f32 to vector<16x128xf32>
    %1213 = arith.subf %1212, %1191 : vector<16x128xf32>
    %1214 = arith.mulf %1213, %1191 : vector<16x128xf32>
    %1215 = math.exp %1214 : vector<16x128xf32>
    %1216 = arith.mulf %1211, %1215 : vector<16x128xf32>
    %cst_429 = arith.constant 1.000000e+00 : f32
    %1217 = vector.broadcast %cst_429 : f32 to vector<16x128xf32>
    %1218 = arith.subf %1217, %1216 : vector<16x128xf32>
    %cst_430 = arith.constant 0.000000e+00 : f32
    %1219 = vector.broadcast %cst_430 : f32 to vector<16x128xf32>
    %1220 = arith.cmpf olt, %1190, %1219 : vector<16x128xf32>
    %cst_431 = arith.constant 0.000000e+00 : f32
    %1221 = vector.broadcast %cst_431 : f32 to vector<16x128xf32>
    %1222 = arith.subf %1221, %1218 : vector<16x128xf32>
    %1223 = arith.select %1220, %1222, %1218 : vector<16x128xi1>, vector<16x128xf32>
    %cst_432 = arith.constant 1.000000e+00 : f32
    %1224 = vector.broadcast %cst_432 : f32 to vector<16x128xf32>
    %1225 = arith.addf %1224, %1223 : vector<16x128xf32>
    %1226 = arith.mulf %1188, %1225 : vector<16x128xf32>
    %c1_433 = arith.constant 1 : index
    %c0_434 = arith.constant 0 : index
    %c0_435 = arith.constant 0 : index
    %1227 = vector.load %arg9[%c1_433, %c0_434, %c0_435] : memref<2x128x32xf32, #tpu.memory_space<vmem>>, vector<1x128x32xf32>
    %1228 = vector.shape_cast %1227 : vector<1x128x32xf32> to vector<128x32xf32>
    %cst_436 = arith.constant dense<0.000000e+00> : vector<16x32xf32>
    %1229 = tpu.matmul %1226, %1228, %cst_436 {dimension_numbers = #tpu.dot_dimension_numbers<[1], [0], [0], [1], [0, 0, 1, 1], [], []>} : vector<16x128xf32>, vector<128x32xf32>, vector<16x32xf32> -> vector<16x32xf32>
    %1230 = vector.broadcast %959 : vector<1x32xf32> to vector<16x32xf32>
    %1231 = arith.addf %1229, %1230 : vector<16x32xf32>
    %1232 = arith.addf %1157, %1231 : vector<16x32xf32>
    %1233 = vector.extract_strided_slice %3 {offsets = [0, 0], sizes = [1, 32], strides = [1, 1]} : vector<5x32xf32> to vector<1x32xf32>
    %1234 = vector.extract_strided_slice %3 {offsets = [1, 0], sizes = [1, 32], strides = [1, 1]} : vector<5x32xf32> to vector<1x32xf32>
    %cst_437 = arith.constant dense<0.000000e+00> : vector<16xf32>
    %1235 = vector.multi_reduction <add>, %1232, %cst_437 [1] : vector<16x32xf32> to vector<16xf32>
    %1236 = vector.shape_cast %1235 : vector<16xf32> to vector<16x1xf32>
    %cst_438 = arith.constant 3.200000e+01 : f32
    %1237 = vector.broadcast %cst_438 : f32 to vector<16x1xf32>
    %1238 = arith.divf %1236, %1237 : vector<16x1xf32>
    %1239 = vector.broadcast %1238 : vector<16x1xf32> to vector<16x32xf32>
    %1240 = arith.subf %1232, %1239 : vector<16x32xf32>
    %1241 = arith.mulf %1240, %1240 : vector<16x32xf32>
    %cst_439 = arith.constant dense<0.000000e+00> : vector<16xf32>
    %1242 = vector.multi_reduction <add>, %1241, %cst_439 [1] : vector<16x32xf32> to vector<16xf32>
    %1243 = vector.shape_cast %1242 : vector<16xf32> to vector<16x1xf32>
    %cst_440 = arith.constant 3.200000e+01 : f32
    %1244 = vector.broadcast %cst_440 : f32 to vector<16x1xf32>
    %1245 = arith.divf %1243, %1244 : vector<16x1xf32>
    %1246 = vector.broadcast %1238 : vector<16x1xf32> to vector<16x32xf32>
    %1247 = arith.subf %1232, %1246 : vector<16x32xf32>
    %cst_441 = arith.constant 9.99999974E-6 : f32
    %1248 = vector.broadcast %cst_441 : f32 to vector<16x1xf32>
    %1249 = arith.addf %1245, %1248 : vector<16x1xf32>
    %1250 = math.rsqrt %1249 : vector<16x1xf32>
    %1251 = vector.broadcast %1250 : vector<16x1xf32> to vector<16x32xf32>
    %1252 = arith.mulf %1247, %1251 : vector<16x32xf32>
    %1253 = vector.broadcast %1233 : vector<1x32xf32> to vector<16x32xf32>
    %1254 = arith.mulf %1252, %1253 : vector<16x32xf32>
    %1255 = vector.broadcast %1234 : vector<1x32xf32> to vector<16x32xf32>
    %1256 = arith.addf %1254, %1255 : vector<16x32xf32>
    %cst_442 = arith.constant dense<0.000000e+00> : vector<16x32xf32>
    %1257 = tpu.matmul %1256, %4, %cst_442 {dimension_numbers = #tpu.dot_dimension_numbers<[1], [0], [0], [1], [0, 0, 1, 1], [], []>} : vector<16x32xf32>, vector<32x32xf32>, vector<16x32xf32> -> vector<16x32xf32>
    %1258 = vector.extract_strided_slice %3 {offsets = [2, 0], sizes = [1, 32], strides = [1, 1]} : vector<5x32xf32> to vector<1x32xf32>
    %1259 = vector.broadcast %1258 : vector<1x32xf32> to vector<16x32xf32>
    %1260 = arith.addf %1257, %1259 : vector<16x32xf32>
    %cst_443 = arith.constant 5.000000e-01 : f32
    %1261 = vector.broadcast %cst_443 : f32 to vector<16x32xf32>
    %1262 = arith.mulf %1260, %1261 : vector<16x32xf32>
    %cst_444 = arith.constant 0.707106769 : f32
    %1263 = vector.broadcast %cst_444 : f32 to vector<16x32xf32>
    %1264 = arith.mulf %1260, %1263 : vector<16x32xf32>
    %1265 = math.absf %1264 : vector<16x32xf32>
    %cst_445 = arith.constant 0.327591091 : f32
    %1266 = vector.broadcast %cst_445 : f32 to vector<16x32xf32>
    %1267 = arith.mulf %1266, %1265 : vector<16x32xf32>
    %cst_446 = arith.constant 1.000000e+00 : f32
    %1268 = vector.broadcast %cst_446 : f32 to vector<16x32xf32>
    %1269 = arith.addf %1268, %1267 : vector<16x32xf32>
    %cst_447 = arith.constant 1.000000e+00 : f32
    %1270 = vector.broadcast %cst_447 : f32 to vector<16x32xf32>
    %1271 = arith.divf %1270, %1269 : vector<16x32xf32>
    %cst_448 = arith.constant 1.06140542 : f32
    %1272 = vector.broadcast %cst_448 : f32 to vector<16x32xf32>
    %1273 = arith.mulf %1272, %1271 : vector<16x32xf32>
    %cst_449 = arith.constant -1.45315206 : f32
    %1274 = vector.broadcast %cst_449 : f32 to vector<16x32xf32>
    %1275 = arith.addf %1273, %1274 : vector<16x32xf32>
    %1276 = arith.mulf %1275, %1271 : vector<16x32xf32>
    %cst_450 = arith.constant 1.42141378 : f32
    %1277 = vector.broadcast %cst_450 : f32 to vector<16x32xf32>
    %1278 = arith.addf %1276, %1277 : vector<16x32xf32>
    %1279 = arith.mulf %1278, %1271 : vector<16x32xf32>
    %cst_451 = arith.constant -0.284496725 : f32
    %1280 = vector.broadcast %cst_451 : f32 to vector<16x32xf32>
    %1281 = arith.addf %1279, %1280 : vector<16x32xf32>
    %1282 = arith.mulf %1281, %1271 : vector<16x32xf32>
    %cst_452 = arith.constant 0.254829586 : f32
    %1283 = vector.broadcast %cst_452 : f32 to vector<16x32xf32>
    %1284 = arith.addf %1282, %1283 : vector<16x32xf32>
    %1285 = arith.mulf %1284, %1271 : vector<16x32xf32>
    %cst_453 = arith.constant 0.000000e+00 : f32
    %1286 = vector.broadcast %cst_453 : f32 to vector<16x32xf32>
    %1287 = arith.subf %1286, %1265 : vector<16x32xf32>
    %1288 = arith.mulf %1287, %1265 : vector<16x32xf32>
    %1289 = math.exp %1288 : vector<16x32xf32>
    %1290 = arith.mulf %1285, %1289 : vector<16x32xf32>
    %cst_454 = arith.constant 1.000000e+00 : f32
    %1291 = vector.broadcast %cst_454 : f32 to vector<16x32xf32>
    %1292 = arith.subf %1291, %1290 : vector<16x32xf32>
    %cst_455 = arith.constant 0.000000e+00 : f32
    %1293 = vector.broadcast %cst_455 : f32 to vector<16x32xf32>
    %1294 = arith.cmpf olt, %1264, %1293 : vector<16x32xf32>
    %cst_456 = arith.constant 0.000000e+00 : f32
    %1295 = vector.broadcast %cst_456 : f32 to vector<16x32xf32>
    %1296 = arith.subf %1295, %1292 : vector<16x32xf32>
    %1297 = arith.select %1294, %1296, %1292 : vector<16x32xi1>, vector<16x32xf32>
    %cst_457 = arith.constant 1.000000e+00 : f32
    %1298 = vector.broadcast %cst_457 : f32 to vector<16x32xf32>
    %1299 = arith.addf %1298, %1297 : vector<16x32xf32>
    %1300 = arith.mulf %1262, %1299 : vector<16x32xf32>
    %1301 = vector.extract_strided_slice %3 {offsets = [3, 0], sizes = [1, 32], strides = [1, 1]} : vector<5x32xf32> to vector<1x32xf32>
    %1302 = vector.extract_strided_slice %3 {offsets = [4, 0], sizes = [1, 32], strides = [1, 1]} : vector<5x32xf32> to vector<1x32xf32>
    %cst_458 = arith.constant dense<0.000000e+00> : vector<16xf32>
    %1303 = vector.multi_reduction <add>, %1300, %cst_458 [1] : vector<16x32xf32> to vector<16xf32>
    %1304 = vector.shape_cast %1303 : vector<16xf32> to vector<16x1xf32>
    %cst_459 = arith.constant 3.200000e+01 : f32
    %1305 = vector.broadcast %cst_459 : f32 to vector<16x1xf32>
    %1306 = arith.divf %1304, %1305 : vector<16x1xf32>
    %1307 = vector.broadcast %1306 : vector<16x1xf32> to vector<16x32xf32>
    %1308 = arith.subf %1300, %1307 : vector<16x32xf32>
    %1309 = arith.mulf %1308, %1308 : vector<16x32xf32>
    %cst_460 = arith.constant dense<0.000000e+00> : vector<16xf32>
    %1310 = vector.multi_reduction <add>, %1309, %cst_460 [1] : vector<16x32xf32> to vector<16xf32>
    %1311 = vector.shape_cast %1310 : vector<16xf32> to vector<16x1xf32>
    %cst_461 = arith.constant 3.200000e+01 : f32
    %1312 = vector.broadcast %cst_461 : f32 to vector<16x1xf32>
    %1313 = arith.divf %1311, %1312 : vector<16x1xf32>
    %1314 = vector.broadcast %1306 : vector<16x1xf32> to vector<16x32xf32>
    %1315 = arith.subf %1300, %1314 : vector<16x32xf32>
    %cst_462 = arith.constant 9.99999974E-6 : f32
    %1316 = vector.broadcast %cst_462 : f32 to vector<16x1xf32>
    %1317 = arith.addf %1313, %1316 : vector<16x1xf32>
    %1318 = math.rsqrt %1317 : vector<16x1xf32>
    %1319 = vector.broadcast %1318 : vector<16x1xf32> to vector<16x32xf32>
    %1320 = arith.mulf %1315, %1319 : vector<16x32xf32>
    %1321 = vector.broadcast %1301 : vector<1x32xf32> to vector<16x32xf32>
    %1322 = arith.mulf %1320, %1321 : vector<16x32xf32>
    %1323 = vector.broadcast %1302 : vector<1x32xf32> to vector<16x32xf32>
    %1324 = arith.addf %1322, %1323 : vector<16x32xf32>
    %cst_463 = arith.constant dense<0.000000e+00> : vector<16x128xf32>
    %1325 = tpu.matmul %1324, %5, %cst_463 {dimension_numbers = #tpu.dot_dimension_numbers<[1], [0], [0], [1], [0, 0, 1, 1], [], []>} : vector<16x32xf32>, vector<32x128xf32>, vector<16x128xf32> -> vector<16x128xf32>
    %1326 = vector.broadcast %6 : vector<1x128xf32> to vector<16x128xf32>
    %1327 = arith.addf %1325, %1326 : vector<16x128xf32>
    %c1_464 = arith.constant 1 : index
    %c0_465 = arith.constant 0 : index
    %c0_466 = arith.constant 0 : index
    %1328 = vector.load %arg14[%c1_464, %c0_465, %c0_466] : memref<2x16x128xf32, #tpu.memory_space<vmem>>, vector<1x16x128xf32>
    %1329 = vector.shape_cast %1328 : vector<1x16x128xf32> to vector<16x128xf32>
    %1330 = vector.shape_cast %1327 : vector<16x128xf32> to vector<1x16x128xf32>
    tpu.vector_store %arg14[%c1_464, %c0_465, %c0_466], %1330 {strides = array<i32>} : memref<2x16x128xf32, #tpu.memory_space<vmem>>, vector<1x16x128xf32>,
    return
  }
}

</mosaic_0001>

<bundles_post_ra>
// kernel: tpu_custom_call.1
= control target key start
LH: loop header
LB: loop body
LE: loop exit
PB: predicated region body
PF: predicated region fallthrough
CT: control target
= control target key end

     0   :  { %vm123_vm0 = vcmask 261120   ;;  %s15538_s0 = inlined_call_operand.vmem [shape: f32[2,16,32], index: 0, kind: input, shape index: {}]   ;;  %s15539_s1 = inlined_call_operand.vmem [shape: f32[2,6,32], index: 1, kind: input, shape index: {}]   ;;  %s15540_s2 = inlined_call_operand.vmem [shape: f32[2,3,4,8], index: 2, kind: input, shape index: {}]   ;;  %s15541_s3 = inlined_call_operand.vmem [shape: f32[2,4,32,8], index: 3, kind: input, shape index: {}]   ;;  %s15542_s4 = inlined_call_operand.vmem [shape: f32[2,4,32,8], index: 4, kind: input, shape index: {}]   ;;  %s15543_s5 = inlined_call_operand.vmem [shape: f32[2,4,32,8], index: 5, kind: input, shape index: {}]   ;;  %s15544_s6 = inlined_call_operand.vmem [shape: f32[2,4,8,32], index: 6, kind: input, shape index: {}]   ;;  %s15545_s7 = inlined_call_operand.vmem [shape: f32[2,32,128], index: 7, kind: input, shape index: {}]   ;;  %s15546_s8 = inlined_call_operand.vmem [shape: f32[2,1,128], index: 8, kind: input, shape index: {}]   ;;  %s15547_s9 = inlined_call_operand.vmem [shape: f32[2,128,32], index: 9, kind: input, shape index: {}]   ;;  %s15548_s10 = inlined_call_operand.vmem [shape: f32[5,32], index: 10, kind: input, shape index: {}]   ;;  %s15549_s11 = inlined_call_operand.vmem [shape: f32[32,32], index: 11, kind: input, shape index: {}]   ;;  %s15550_s12 = inlined_call_operand.vmem [shape: f32[32,128], index: 12, kind: input, shape index: {}]   ;;  %s15551_s13 = inlined_call_operand.vmem [shape: f32[1,128], index: 13, kind: input, shape index: {}]   ;;  %s15552_s14 = inlined_call_operand.hbm [shape: f32[2,16,128], index: 14, kind: output, shape index: {}]  }
   0x1   :  { %v13588_v0 = vld [vmem:[%s15538_s0] sm:$0xff]  ;;  %v13593_v1 = vld [vmem:[%s15538_s0 + $0x8] sm:$0xff] }
   0x2   :  { %19 = vsyncpa [#allocation3], 0  ;;  %v124_v2 = vsel %vm123_vm0, %v13588_v0, 0.0  ;;  %v127_v3 = vsel %vm123_vm0, %v13593_v1, 0.0  ;;  %v71_v14 = vld [vmem:[%s15541_s3] sm:$0xff]  ;;  %v72_v15 = vld [vmem:[%s15541_s3 + $0x8] sm:$0xff]  ;;  %v48_v31 = vlaneseq }
   0x3   :  { %125 = vadd.xlane.f32.xlu0 %v124_v2  ;;  %v12491_v16 = vpack.c.bf16 %v72_v15, %v71_v14  ;;  %v103_v17 = vld [vmem:[%s15543_s5] sm:$0xff]  ;;  %v104_v18 = vld [vmem:[%s15543_s5 + $0x8] sm:$0xff]  ;;  %v73_v20 = vld [vmem:[%s15541_s3 + $0x10] sm:$0xff]  ;;  %vm406_vm1 = vcmask 64512   ;;  %vm498_vm4 = vcmask 130048  }
   0x4   :  { %v12507_v19 = vpack.c.bf16 %v104_v18, %v103_v17  ;;  %v74_v21 = vld [vmem:[%s15541_s3 + $0x18] sm:$0xff]  ;;  %v105_v23 = vld [vmem:[%s15543_s5 + $0x10] sm:$0xff]  ;;  %v87_v26 = vld [vmem:[%s15542_s4] sm:$0xff]  ;;  %v13634_v35 = vshrl.u32 %v48_v31, 7 }
   0x5   :  { %12492 = vmatprep.subr.bf16.mxu1 %v12491_v16  ;;  %v12495_v22 = vpack.c.bf16 %v74_v21, %v73_v20  ;;  %v106_v24 = vld [vmem:[%s15543_s5 + $0x18] sm:$0xff]  ;;  %v88_v27 = vld [vmem:[%s15542_s4 + $0x8] sm:$0xff]  ;;  %v13642_v38 = vld [vmem:[%s15539_s1] sm:$0x3f] }
   0x6   :  { %12494 = vmatpush3.bf16.msra.mxu1 %v12491_v16  ;;  %12508 = vmatprep.subr.bf16.mxu0 %v12507_v19  ;;  %v12511_v25 = vpack.c.bf16 %v106_v24, %v105_v23  ;;  %v12499_v28 = vpack.c.bf16 %v88_v27, %v87_v26  ;;  %v13637_v37 = vsub.s32 0, %v13634_v35  ;;  %v13645_v39 = vsub.s32 1, %v13634_v35  ;;  %v89_v48 = vld [vmem:[%s15542_s4 + $0x10] sm:$0xff]  ;;  %v90_v49 = vld [vmem:[%s15542_s4 + $0x18] sm:$0xff]  ;;  %v13676_v53 = vld [vmem:[%s15540_s2 + $0x8] sm:$0xf] }
   0x7   :  { %128 = vadd.xlane.f32.xlu0 %v127_v3  ;;  %12510 = vmatpush3.bf16.msra.mxu0 %v12507_v19  ;;  %v12503_v52 = vpack.c.bf16 %v90_v49, %v89_v48  ;;  %v13681_v54 = vld [vmem:[%s15540_s2] sm:$0xf]  ;;  %v13690_v2 = vld [vmem:[%s15540_s2 + $0x4] sm:$0xf]  ;;  %vm13703_vm2 = vmpackc.low %vm406_vm1, %vm406_vm1  ;;  %v50_v24 = vadd.s32 8, %v13634_v35 }
   0x8   :  { %12496 = vmatprep.subr.bf16.mxu1 %v12495_v22  ;;  %12512 = vmatprep.subr.bf16.mxu0 %v12511_v25  ;;  %v154_v40 = vrot.slane %v13642_v38, %v13637_v37  ;;  %v160_v43 = vrot.slane %v13642_v38, %v13645_v39  ;;  %v330_v55 = vrot.slane %v13676_v53, %v13637_v37  ;;  %v77_v14 = vld [vmem:[%s15541_s3 + $0x30] sm:$0xff]  ;;  %v78_v15 = vld [vmem:[%s15541_s3 + $0x38] sm:$0xff]  ;;  %v107_v18 = vld [vmem:[%s15543_s5 + $0x20] sm:$0xff] }
   0x9   :  { %v166_v56 = vrot.slane %v13681_v54, %v13637_v37  ;;  %v12529_v17 = vpack.c.bf16 %v78_v15, %v77_v14  ;;  %v108_v19 = vld [vmem:[%s15543_s5 + $0x28] sm:$0xff]  ;;  %v109_v21 = vld [vmem:[%s15543_s5 + $0x30] sm:$0xff] }
   0xa   :  { %12498 = vmatpush3.bf16.msra.mxu1 %v12495_v22  ;;  %v12541_v20 = vpack.c.bf16 %v108_v19, %v107_v18  ;;  %v110_v22 = vld [vmem:[%s15543_s5 + $0x38] sm:$0xff]  ;;  %v684_v19 = vrot.slane %v13690_v2, %v13645_v39 }
   0xb   :  { %12514 = vmatpush3.bf16.msra.mxu0 %v12511_v25  ;;  %12500 = vmatprep.subr.bf16.mxu1 %v12499_v28  ;;  %v12545_v23 = vpack.c.bf16 %v110_v22, %v109_v21  ;;  %v52_v25 = vand.u32 127, %v48_v31 }
   0xd   :  { %vm13740_vm3 = vcmp.le.s32.totalorder %v52_v25, %v50_v24  ;;  %vm13745_vm5 = vcmp.le.s32.totalorder %v52_v25, %v13634_v35 }
  0x90   :  { %v126_v4 = vpop.xlane.xlu0 %125 }
  0x91   :  { %v131_v5 = vmul.f32 0.03125, %v126_v4  ;;  %v251_v4 = vrot.slane %v13690_v2, %v13637_v37 }
  0x93   :  { %v133_v6 = vsub.f32 %v13588_v0, %v131_v5 }
  0x94   :  { %v129_v7 = vpop.xlane.xlu0 %128 }
  0x95   :  { %v132_v8 = vmul.f32 0.03125, %v129_v7  ;;  %v135_v9 = vmul.f32 %v133_v6, %v133_v6 }
  0x97   :  { %v134_v10 = vsub.f32 %v13593_v1, %v132_v8  ;;  %v137_v11 = vsel %vm123_vm0, %v135_v9, 0.0  ;;  %v75_v8 = vld [vmem:[%s15541_s3 + $0x20] sm:$0xff]  ;;  %v76_v9 = vld [vmem:[%s15541_s3 + $0x28] sm:$0xff] }
  0x98   :  { %138 = vadd.xlane.f32.xlu1 %v137_v11 }
  0x99   :  { %v136_v12 = vmul.f32 %v134_v10, %v134_v10 }
  0x9b   :  { %v140_v13 = vsel %vm123_vm0, %v136_v12, 0.0 }
  0x9c   :  { %141 = vadd.xlane.f32.xlu1 %v140_v13  ;;  %v12525_v13 = vpack.c.bf16 %v76_v9, %v75_v8  ;;  %v93_v9 = vld [vmem:[%s15542_s4 + $0x30] sm:$0xff] }
 0x125   :  { %v139_v29 = vpop.xlane.xlu1 %138 }
 0x126   :  { %v143_v30 = vmul.f32 0.03125, %v139_v29 }
 0x128   :  { %v145_v32 = vadd.f32 1e-05, %v143_v30 }
 0x129   :  { %v142_v33 = vpop.xlane.xlu1 %141 }
 0x12a   :  { %13254 = vrsqrt.f32 %v145_v32  ;;  %v144_v34 = vmul.f32 0.03125, %v142_v33 }
 0x12c   :  { %v146_v36 = vadd.f32 1e-05, %v144_v34 }
 0x12e   :  { %13256 = vrsqrt.f32 %v146_v36 }
 0x134   :  { %v13255_v41 = vpop.eup %13254 }
 0x135   :  { %v149_v42 = vmul.f32 %v13255_v41, %v133_v6 }
 0x137   :  { %v155_v44 = vmul.f32 %v154_v40, %v149_v42 }
 0x138   :  { %v13257_v45 = vpop.eup %13256 }
 0x139   :  { %v13651_v46 = vadd.f32 %v160_v43, %v155_v44  ;;  %v150_v47 = vmul.f32 %v13257_v45, %v134_v10  ;;  %v763_v44 = vrot.slane %v13676_v53, %v13645_v39 }
 0x13b   :  { %v156_v50 = vmul.f32 %v154_v40, %v150_v47  ;;  %11439 = vmatprep.mubr.msk.f32.mxu1 %vm123_vm0, %v13651_v46  ;;  %11461 = vmatprep.mubr.msk.f32.mxu0 %vm123_vm0, %v13651_v46  ;;  %v605_v40 = vrot.slane %v13681_v54, %v13645_v39 }
 0x13d   :  { %v13663_v51 = vadd.f32 %v160_v43, %v156_v50 }
 0x13f   :  { %11440 = vmatmul.mubr.msk.f32.vlgmr.msra.gmra.mrb[0].mxu1 %vm123_vm0, %v13663_v51  ;;  %11462 = vmatmul.mubr.msk.f32.vlgmr.msra.gmra.mrb[0].mxu0 %vm123_vm0, %v13663_v51 }
 0x140   :  { %12502 = vmatpush3.bf16.msra.mxu1 %v12499_v28  ;;  %11450 = vmatprep.mubr.msk.f32.mxu1 %vm123_vm0, %v13651_v46 }
 0x141   :  { %12504 = vmatprep.subr.bf16.mxu1 %v12503_v52 }
 0x144   :  { %12506 = vmatpush3.bf16.msra.mxu1 %v12503_v52 }
 0x147   :  { %11451 = vmatmul.mubr.msk.f32.vlgmr.msra.gmra.mrb[2].mxu1 %vm123_vm0, %v13663_v51 }
 0x212   :  { %v11441_v57 = vpop.f32.mrb[0].mxu1  ;;  %v11463_v58 = vpop.f32.mrb[0].mxu0 }
 0x213   :  { %v403_v59 = vadd.f32 %v11463_v58, %v330_v55  ;;  %v239_v60 = vpop.f32.mrb[1].mxu1  ;;  %v397_v61 = vpop.f32.mrb[1].mxu0  ;;  %v245_v16 = vadd.f32 %v11441_v57, %v166_v56 }
 0x214   :  { %v240_v62 = vadd.f32 %v239_v60, %v166_v56  ;;  %v398_v63 = vadd.f32 %v397_v61, %v330_v55 }
 0x216   :  { %v12521_v3 = vpack.c.bf16 %v403_v59, %v398_v63  ;;  %11468 = vmatprep.mubr.msk.f32.mxu1 %vm406_vm1, %v240_v62 }
 0x218   :  { %12522 = vmatprep.subr.bf16.mxu0 %v12521_v3 }
 0x219   :  { %12524 = vmatpush3.bf16.msra.mxu0 %v12521_v3  ;;  %v91_v3 = vld [vmem:[%s15542_s4 + $0x20] sm:$0xff] }
 0x21a   :  { %v11452_v5 = vpop.f32.mrb[2].mxu1 }
 0x21b   :  { %v324_v6 = vadd.f32 %v11452_v5, %v251_v4  ;;  %v318_v7 = vpop.f32.mrb[3].mxu1 }
 0x21c   :  { %v319_v10 = vadd.f32 %v318_v7, %v251_v4  ;;  %v92_v4 = vld [vmem:[%s15542_s4 + $0x28] sm:$0xff] }
 0x21d   :  { %v12533_v5 = vpack.c.bf16 %v92_v4, %v91_v3 }
 0x21e   :  { %v12515_v12 = vpack.c.bf16 %v324_v6, %v319_v10  ;;  %v94_v10 = vld [vmem:[%s15542_s4 + $0x38] sm:$0xff] }
 0x21f   :  { %12534 = vmatprep.subr.bf16.mxu0 %v12533_v5  ;;  %v12537_v15 = vpack.c.bf16 %v94_v10, %v93_v9  ;;  %v114_v9 = vld [vmem:[%s15543_s5 + $0x58] sm:$0xff] }
 0x220   :  { %12517 = vmatprep.subr.msk.bf16.mxu1 %vm13703_vm2, %v12515_v12 }
 0x221   :  { %12520 = vmatpush3.bf16.xpose.msk.msra.mxu1 %vm13703_vm2, %v12515_v12 }
 0x222   :  { %12526 = vmatprep.subr.bf16.mxu1 %v12525_v13 }
 0x228   :  { %11469 = vmatmul.mubr.msk.f32.vlgmr.msra.gmra.mrb[4].mxu1 %vm406_vm1, %v245_v16 }
 0x229   :  { %12528 = vmatpush3.bf16.msra.mxu1 %v12525_v13  ;;  %11486 = vmatprep.mubr.msk.f32.mxu1 %vm123_vm0, %v13651_v46 }
 0x22a   :  { %12530 = vmatprep.subr.bf16.mxu1 %v12529_v17 }
 0x22d   :  { %12532 = vmatpush3.bf16.msra.mxu1 %v12529_v17 }
 0x22e   :  { %12542 = vmatprep.subr.bf16.mxu1 %v12541_v20 }
 0x230   :  { %11487 = vmatmul.mubr.msk.f32.vlgmr.msra.gmra.mrb[6].mxu1 %vm123_vm0, %v13663_v51 }
 0x231   :  { %12544 = vmatpush3.bf16.msra.mxu1 %v12541_v20  ;;  %11508 = vmatprep.mubr.msk.f32.mxu1 %vm123_vm0, %v13651_v46 }
 0x232   :  { %12546 = vmatprep.subr.bf16.mxu1 %v12545_v23 }
 0x235   :  { %12548 = vmatpush3.bf16.msra.mxu1 %v12545_v23 }
 0x238   :  { %11509 = vmatmul.mubr.msk.f32.vlgmr.msra.gmra.mrb[8].mxu1 %vm123_vm0, %v13663_v51 }
 0x2fb   :  { %v11470_v26 = vpop.f32.mrb[4].mxu1 }
 0x2fc   :  { %v495_v28 = vmul.f32 0.35355338, %v11470_v26  ;;  %v485_v29 = vpop.f32.mrb[5].mxu1 }
 0x2fd   :  { %v494_v32 = vmul.f32 0.35355338, %v485_v29 }
 0x2fe   :  { %v497_v33 = vsel %vm13740_vm3, %v495_v28, -1e+30 }
 0x2ff   :  { %v502_v34 = vsel %vm498_vm4, %v497_v33, -inf  ;;  %v496_v31 = vsel %vm13745_vm5, %v494_v32, -1e+30 }
 0x300   :  { %503 = vmax.xlane.f32.xlu1 %v502_v34  ;;  %v499_v36 = vsel %vm498_vm4, %v496_v31, -inf }
 0x301   :  { %500 = vmax.xlane.f32.xlu0 %v499_v36 }
 0x303   :  { %v11488_v41 = vpop.f32.mrb[6].mxu1 }
 0x304   :  { %v678_v42 = vadd.f32 %v11488_v41, %v605_v40  ;;  %v672_v43 = vpop.f32.mrb[7].mxu1 }
 0x305   :  { %v673_v16 = vadd.f32 %v672_v43, %v605_v40 }
 0x30b   :  { %v11510_v45 = vpop.f32.mrb[8].mxu1 }
 0x30c   :  { %v836_v47 = vadd.f32 %v11510_v45, %v763_v44  ;;  %v830_v48 = vpop.f32.mrb[9].mxu1 }
 0x30d   :  { %v831_v49 = vadd.f32 %v830_v48, %v763_v44 }
 0x30f   :  { %v12555_v50 = vpack.c.bf16 %v836_v47, %v831_v49 }
 0x311   :  { %12556 = vmatprep.subr.bf16.mxu1 %v12555_v50 }
 0x312   :  { %12558 = vmatpush3.bf16.msra.mxu1 %v12555_v50  ;;  %v79_v50 = vld [vmem:[%s15541_s3 + $0x40] sm:$0xff] }
 0x38d   :  { %v504_v52 = vpop.xlane.xlu1 %503 }
 0x38e   :  { %v506_v55 = vsub.f32 %v497_v33, %v504_v52  ;;  %v501_v56 = vpop.xlane.xlu0 %500  ;;  %v80_v52 = vld [vmem:[%s15541_s3 + $0x48] sm:$0xff] }
 0x38f   :  { %v505_v57 = vsub.f32 %v496_v31, %v501_v56  ;;  %v120_v56 = vld [vmem:[%s15544_s6 + $0x8] sm:$0xff] }
 0x390   :  { %v509_v58 = vmul.f32 1.442695, %v506_v55  ;;  %v12559_v55 = vpack.c.bf16 %v80_v52, %v79_v50 }
 0x391   :  { %v507_v59 = vmul.f32 1.442695, %v505_v57 }
 0x392   :  { %13258 = vpow2.f32 %v509_v58  ;;  %12560 = vmatprep.subr.bf16.mxu1 %v12559_v55 }
 0x393   :  { %13260 = vpow2.f32 %v507_v59 }
 0x39c   :  { %v13259_v60 = vpop.eup %13258 }
 0x39d   :  { %v13261_v61 = vpop.eup %13260  ;;  %v514_v62 = vsel %vm498_vm4, %v13259_v60, 0.0 }
 0x39e   :  { %515 = vadd.xlane.f32.xlu1 %v514_v62  ;;  %v511_v63 = vsel %vm498_vm4, %v13261_v61, 0.0 }
 0x39f   :  { %512 = vadd.xlane.f32.xlu0 %v511_v63 }
 0x42b   :  { %v516_v6 = vpop.xlane.xlu1 %515 }
 0x42c   :  { %13262 = vrcp.f32 %v516_v6  ;;  %v513_v7 = vpop.xlane.xlu0 %512  ;;  %v112_v6 = vld [vmem:[%s15543_s5 + $0x48] sm:$0xff] }
 0x42d   :  { %13264 = vrcp.f32 %v513_v7 }
 0x436   :  { %v13263_v8 = vpop.eup %13262 }
 0x437   :  { %v13265_v12 = vpop.eup %13264  ;;  %v520_v14 = vmul.f32 %v13263_v8, %v13259_v60  ;;  %v81_v60 = vld [vmem:[%s15541_s3 + $0x50] sm:$0xff] }
 0x438   :  { %v519_v13 = vmul.f32 %v13265_v12, %v13261_v61  ;;  %v82_v61 = vld [vmem:[%s15541_s3 + $0x58] sm:$0xff]  ;;  %v113_v8 = vld [vmem:[%s15543_s5 + $0x50] sm:$0xff]  ;;  %v119_v12 = vld [vmem:[%s15544_s6] sm:$0xff] }
 0x439   :  { %v12563_v4 = vpack.c.bf16 %v82_v61, %v81_v60  ;;  %v12579_v10 = vpack.c.bf16 %v114_v9, %v113_v8  ;;  %v121_v9 = vld [vmem:[%s15544_s6 + $0x10] sm:$0xff] }
 0x43a   :  { %11475 = vmatprep.mubr.msk.f32.mxu0 %vm498_vm4, %v519_v13  ;;  %v95_v13 = vld [vmem:[%s15542_s4 + $0x40] sm:$0xff] }
 0x43b   :  { %11476 = vmatmul.mubr.msk.f32.vlgmr.msra.gmra.mrb[2].mxu0 %vm498_vm4, %v520_v14  ;;  %v96_v14 = vld [vmem:[%s15542_s4 + $0x48] sm:$0xff] }
 0x43c   :  { %12536 = vmatpush3.bf16.msra.mxu0 %v12533_v5  ;;  %11497 = vmatprep.mubr.msk.f32.mxu0 %vm123_vm0, %v13651_v46  ;;  %v111_v5 = vld [vmem:[%s15543_s5 + $0x40] sm:$0xff] }
 0x43d   :  { %12538 = vmatprep.subr.bf16.mxu0 %v12537_v15  ;;  %v12575_v7 = vpack.c.bf16 %v112_v6, %v111_v5  ;;  %v83_v6 = vld [vmem:[%s15541_s3 + $0x60] sm:$0xff] }
 0x440   :  { %12540 = vmatpush3.bf16.msra.mxu0 %v12537_v15 }
 0x443   :  { %11498 = vmatmul.mubr.msk.f32.vlgmr.msra.gmra.mrb[4].mxu0 %vm123_vm0, %v13663_v51 }
 0x444   :  { %11515 = vmatprep.mubr.msk.f32.mxu0 %vm406_vm1, %v673_v16 }
 0x50e   :  { %v13780_v17 = vpop.f32.mrb[2].mxu0 }
 0x50f   :  { %v13782_v18 = vpop.f32.mrb[3].mxu0 }
 0x516   :  { %v11499_v20 = vpop.f32.mrb[4].mxu0 }
 0x517   :  { %v757_v21 = vadd.f32 %v11499_v20, %v684_v19  ;;  %v751_v22 = vpop.f32.mrb[5].mxu0  ;;  %v12567_v20 = vpack.c.bf16 %v96_v14, %v95_v13  ;;  %v85_v14 = vld [vmem:[%s15541_s3 + $0x70] sm:$0xff] }
 0x518   :  { %v752_v23 = vadd.f32 %v751_v22, %v684_v19  ;;  %v13846_v19 = vsub.s32 2, %v13634_v35  ;;  %v97_v22 = vld [vmem:[%s15542_s4 + $0x50] sm:$0xff] }
 0x51a   :  { %v12549_v24 = vpack.c.bf16 %v757_v21, %v752_v23  ;;  %v1198_v21 = vrot.slane %v13681_v54, %v13846_v19  ;;  %v98_v23 = vld [vmem:[%s15542_s4 + $0x58] sm:$0xff] }
 0x51c   :  { %12551 = vmatprep.subr.msk.bf16.mxu0 %vm13703_vm2, %v12549_v24 }
 0x51d   :  { %12554 = vmatpush3.bf16.xpose.msk.msra.mxu0 %vm13703_vm2, %v12549_v24 }
 0x51e   :  { %11525 = vmatprep.subr.mxu0 %v120_v56 }
 0x524   :  { %11516 = vmatmul.mubr.msk.f32.vlgmr.msra.gmra.mrb[6].mxu0 %vm406_vm1, %v678_v42 }
 0x525   :  { %11526 = vmatpush3.msra.mxu0 %v120_v56 }
 0x526   :  { %11530 = vmatprep.subr.mxu0 %v119_v12 }
 0x5f7   :  { %v11517_v25 = vpop.f32.mrb[6].mxu0 }
 0x5f8   :  { %v927_v26 = vmul.f32 0.35355338, %v11517_v25  ;;  %v917_v28 = vpop.f32.mrb[7].mxu0 }
 0x5f9   :  { %v926_v29 = vmul.f32 0.35355338, %v917_v28  ;;  %v12571_v28 = vpack.c.bf16 %v98_v23, %v97_v22  ;;  %v115_v23 = vld [vmem:[%s15543_s5 + $0x60] sm:$0xff] }
 0x5fa   :  { %v929_v32 = vsel %vm13740_vm3, %v927_v26, -1e+30 }
 0x5fb   :  { %v933_v33 = vsel %vm498_vm4, %v929_v32, -inf  ;;  %v928_v34 = vsel %vm13745_vm5, %v926_v29, -1e+30 }
 0x5fc   :  { %934 = vmax.xlane.f32.xlu1 %v933_v33  ;;  %v930_v31 = vsel %vm498_vm4, %v928_v34, -inf }
 0x5fd   :  { %931 = vmax.xlane.f32.xlu0 %v930_v31 }
 0x689   :  { %v935_v36 = vpop.xlane.xlu1 %934 }
 0x68a   :  { %v937_v40 = vsub.f32 %v929_v32, %v935_v36  ;;  %v932_v41 = vpop.xlane.xlu0 %931 }
 0x68b   :  { %v936_v42 = vsub.f32 %v928_v34, %v932_v41 }
 0x68c   :  { %v940_v43 = vmul.f32 1.442695, %v937_v40 }
 0x68d   :  { %v938_v44 = vmul.f32 1.442695, %v936_v42 }
 0x68e   :  { %13266 = vpow2.f32 %v940_v43 }
 0x68f   :  { %13268 = vpow2.f32 %v938_v44 }
 0x698   :  { %v13267_v45 = vpop.eup %13266 }
 0x699   :  { %v13269_v47 = vpop.eup %13268  ;;  %v945_v48 = vsel %vm498_vm4, %v13267_v45, 0.0 }
 0x69a   :  { %946 = vadd.xlane.f32.xlu1 %v945_v48  ;;  %v942_v49 = vsel %vm498_vm4, %v13269_v47, 0.0 }
 0x69b   :  { %943 = vadd.xlane.f32.xlu0 %v942_v49 }
 0x727   :  { %v947_v57 = vpop.xlane.xlu1 %946 }
 0x728   :  { %13270 = vrcp.f32 %v947_v57  ;;  %v944_v58 = vpop.xlane.xlu0 %943 }
 0x729   :  { %13272 = vrcp.f32 %v944_v58 }
 0x732   :  { %v13271_v59 = vpop.eup %13270 }
 0x733   :  { %v13273_v62 = vpop.eup %13272  ;;  %v951_v3 = vmul.f32 %v13271_v59, %v13267_v45 }
 0x734   :  { %v950_v63 = vmul.f32 %v13273_v62, %v13269_v47 }
 0x736   :  { %11522 = vmatprep.mubr.msk.f32.mxu1 %vm498_vm4, %v950_v63 }
 0x737   :  { %11523 = vmatmul.mubr.msk.f32.vlgmr.msra.gmra.mrb[10].mxu1 %vm498_vm4, %v951_v3 }
 0x738   :  { %12562 = vmatpush3.bf16.msra.mxu1 %v12559_v55  ;;  %11543 = vmatprep.mubr.msk.f32.mxu1 %vm123_vm0, %v13651_v46 }
 0x739   :  { %12564 = vmatprep.subr.bf16.mxu1 %v12563_v4 }
 0x73c   :  { %12566 = vmatpush3.bf16.msra.mxu1 %v12563_v4 }
 0x73d   :  { %12576 = vmatprep.subr.bf16.mxu1 %v12575_v7 }
 0x73f   :  { %11544 = vmatmul.mubr.msk.f32.vlgmr.msra.gmra.mrb[12].mxu1 %vm123_vm0, %v13663_v51 }
 0x740   :  { %12578 = vmatpush3.bf16.msra.mxu1 %v12575_v7  ;;  %11565 = vmatprep.mubr.msk.f32.mxu1 %vm123_vm0, %v13651_v46  ;;  %v84_v7 = vld [vmem:[%s15541_s3 + $0x68] sm:$0xff] }
 0x741   :  { %12580 = vmatprep.subr.bf16.mxu1 %v12579_v10  ;;  %v12593_v8 = vpack.c.bf16 %v84_v7, %v83_v6 }
 0x744   :  { %12582 = vmatpush3.bf16.msra.mxu1 %v12579_v10 }
 0x747   :  { %11566 = vmatmul.mubr.msk.f32.vlgmr.msra.gmra.mrb[14].mxu1 %vm123_vm0, %v13663_v51 }
 0x80a   :  { %v11524_v15 = vpop.f32.mrb[10].mxu1 }
 0x80b   :  { %v1024_v16 = vpop.f32.mrb[11].mxu1 }
 0x80c   :  { %11527 = vmatprep.mubr.msk.f32.mxu0 %vm406_vm1, %v1024_v16 }
 0x80d   :  { %11528 = vmatmul.mubr.msk.f32.vlgmr.msra.gmra.mrb[8].mxu0 %vm406_vm1, %v11524_v15  ;;  %v86_v15 = vld [vmem:[%s15541_s3 + $0x78] sm:$0xff] }
 0x80e   :  { %11531 = vmatpush3.msra.mxu0 %v119_v12  ;;  %11532 = vmatprep.mubr.msk.f32.mxu0 %vm406_vm1, %v13782_v18  ;;  %v1356_v18 = vrot.slane %v13676_v53, %v13846_v19  ;;  %v12597_v22 = vpack.c.bf16 %v86_v15, %v85_v14 }
 0x80f   :  { %12568 = vmatprep.subr.bf16.mxu0 %v12567_v20 }
 0x812   :  { %v11545_v24 = vpop.f32.mrb[12].mxu1 }
 0x813   :  { %v1271_v25 = vadd.f32 %v11545_v24, %v1198_v21  ;;  %v1265_v26 = vpop.f32.mrb[13].mxu1  ;;  %v116_v24 = vld [vmem:[%s15543_s5 + $0x68] sm:$0xff] }
 0x814   :  { %v1266_v34 = vadd.f32 %v1265_v26, %v1198_v21  ;;  %v117_v26 = vld [vmem:[%s15543_s5 + $0x70] sm:$0xff] }
 0x815   :  { %11533 = vmatmul.mubr.msk.f32.vlgmr.msra.gmra.mrb[8].mxu0 %vm406_vm1, %v13780_v17  ;;  %v1277_v17 = vrot.slane %v13690_v2, %v13846_v19 }
 0x816   :  { %12570 = vmatpush3.bf16.msra.mxu0 %v12567_v20  ;;  %11554 = vmatprep.mubr.msk.f32.mxu0 %vm123_vm0, %v13651_v46 }
 0x817   :  { %12572 = vmatprep.subr.bf16.mxu0 %v12571_v28 }
 0x81a   :  { %12574 = vmatpush3.bf16.msra.mxu0 %v12571_v28  ;;  %v11567_v29 = vpop.f32.mrb[14].mxu1  ;;  %v118_v28 = vld [vmem:[%s15543_s5 + $0x78] sm:$0xff] }
 0x81b   :  { %v1429_v32 = vadd.f32 %v11567_v29, %v1356_v18  ;;  %v1423_v33 = vpop.f32.mrb[15].mxu1  ;;  %v99_v29 = vld [vmem:[%s15542_s4 + $0x60] sm:$0xff] }
 0x81c   :  { %v1424_v31 = vadd.f32 %v1423_v33, %v1356_v18  ;;  %v12613_v18 = vpack.c.bf16 %v118_v28, %v117_v26 }
 0x81d   :  { %11555 = vmatmul.mubr.msk.f32.vlgmr.msra.gmra.mrb[10].mxu0 %vm123_vm0, %v13663_v51 }
 0x81e   :  { %v12589_v36 = vpack.c.bf16 %v1429_v32, %v1424_v31  ;;  %11572 = vmatprep.mubr.msk.f32.mxu0 %vm406_vm1, %v1266_v34  ;;  %v100_v32 = vld [vmem:[%s15542_s4 + $0x68] sm:$0xff]  ;;  %v101_v34 = vld [vmem:[%s15542_s4 + $0x70] sm:$0xff]  ;;  %v102_v31 = vld [vmem:[%s15542_s4 + $0x78] sm:$0xff] }
 0x81f   :  { %v12601_v33 = vpack.c.bf16 %v100_v32, %v99_v29 }
 0x820   :  { %12590 = vmatprep.subr.bf16.mxu1 %v12589_v36 }
 0x821   :  { %12592 = vmatpush3.bf16.msra.mxu1 %v12589_v36 }
 0x822   :  { %12594 = vmatprep.subr.bf16.mxu1 %v12593_v8 }
 0x8f0   :  { %v11556_v40 = vpop.f32.mrb[10].mxu0 }
 0x8f1   :  { %v1350_v41 = vadd.f32 %v11556_v40, %v1277_v17  ;;  %v1344_v42 = vpop.f32.mrb[11].mxu0  ;;  %v12605_v40 = vpack.c.bf16 %v102_v31, %v101_v34 }
 0x8f2   :  { %v1345_v43 = vadd.f32 %v1344_v42, %v1277_v17 }
 0x8f4   :  { %v12583_v44 = vpack.c.bf16 %v1350_v41, %v1345_v43  ;;  %v13934_v41 = vsub.s32 3, %v13634_v35 }
 0x8f6   :  { %12585 = vmatprep.subr.msk.bf16.mxu0 %vm13703_vm2, %v12583_v44  ;;  %v1712_v42 = vrot.slane %v13681_v54, %v13934_v41  ;;  %v1791_v54 = vrot.slane %v13690_v2, %v13934_v41 }
 0x8f7   :  { %12588 = vmatpush3.bf16.xpose.msk.msra.mxu0 %vm13703_vm2, %v12583_v44 }
 0x8f8   :  { %11582 = vmatprep.subr.mxu0 %v121_v9 }
 0x8fe   :  { %11573 = vmatmul.mubr.msk.f32.vlgmr.msra.gmra.mrb[12].mxu0 %vm406_vm1, %v1271_v25  ;;  %v12609_v25 = vpack.c.bf16 %v116_v24, %v115_v23 }
 0x8ff   :  { %11583 = vmatpush3.msra.mxu0 %v121_v9 }
 0x900   :  { %12602 = vmatprep.subr.bf16.mxu0 %v12601_v33 }
 0x9d1   :  { %v11574_v45 = vpop.f32.mrb[12].mxu0 }
 0x9d2   :  { %v1520_v47 = vmul.f32 0.35355338, %v11574_v45  ;;  %v1510_v48 = vpop.f32.mrb[13].mxu0 }
 0x9d3   :  { %v1519_v49 = vmul.f32 0.35355338, %v1510_v48  ;;  %v1870_v48 = vrot.slane %v13676_v53, %v13934_v41 }
 0x9d4   :  { %v1522_v50 = vsel %vm13740_vm3, %v1520_v47, -1e+30 }
 0x9d5   :  { %v1526_v52 = vsel %vm498_vm4, %v1522_v50, -inf  ;;  %v1521_v55 = vsel %vm13745_vm5, %v1519_v49, -1e+30 }
 0x9d6   :  { %1527 = vmax.xlane.f32.xlu1 %v1526_v52  ;;  %v1523_v56 = vsel %vm498_vm4, %v1521_v55, -inf }
 0x9d7   :  { %1524 = vmax.xlane.f32.xlu0 %v1523_v56 }
 0xa63   :  { %v1528_v57 = vpop.xlane.xlu1 %1527 }
 0xa64   :  { %v1530_v58 = vsub.f32 %v1522_v50, %v1528_v57  ;;  %v1525_v59 = vpop.xlane.xlu0 %1524 }
 0xa65   :  { %v1529_v60 = vsub.f32 %v1521_v55, %v1525_v59 }
 0xa66   :  { %v1533_v61 = vmul.f32 1.442695, %v1530_v58 }
 0xa67   :  { %v1531_v62 = vmul.f32 1.442695, %v1529_v60 }
 0xa68   :  { %13274 = vpow2.f32 %v1533_v61 }
 0xa69   :  { %13276 = vpow2.f32 %v1531_v62 }
 0xa72   :  { %v13275_v63 = vpop.eup %13274 }
 0xa73   :  { %v13277_v3 = vpop.eup %13276  ;;  %v1538_v4 = vsel %vm498_vm4, %v13275_v63, 0.0 }
 0xa74   :  { %1539 = vadd.xlane.f32.xlu1 %v1538_v4  ;;  %v1535_v5 = vsel %vm498_vm4, %v13277_v3, 0.0 }
 0xa75   :  { %1536 = vadd.xlane.f32.xlu0 %v1535_v5 }
 0xb01   :  { %v1540_v10 = vpop.xlane.xlu1 %1539 }
 0xb02   :  { %13278 = vrcp.f32 %v1540_v10  ;;  %v1537_v12 = vpop.xlane.xlu0 %1536 }
 0xb03   :  { %13280 = vrcp.f32 %v1537_v12 }
 0xb0c   :  { %v13279_v13 = vpop.eup %13278 }
 0xb0d   :  { %v13281_v16 = vpop.eup %13280  ;;  %v1544_v21 = vmul.f32 %v13279_v13, %v13275_v63 }
 0xb0e   :  { %v1543_v20 = vmul.f32 %v13281_v16, %v13277_v3  ;;  %v122_v16 = vld [vmem:[%s15544_s6 + $0x18] sm:$0xff] }
 0xb10   :  { %11579 = vmatprep.mubr.msk.f32.mxu1 %vm498_vm4, %v1543_v20 }
 0xb11   :  { %11580 = vmatmul.mubr.msk.f32.vlgmr.msra.gmra.mrb[16].mxu1 %vm498_vm4, %v1544_v21 }
 0xb12   :  { %12596 = vmatpush3.bf16.msra.mxu1 %v12593_v8  ;;  %11595 = vmatprep.mubr.msk.f32.mxu1 %vm123_vm0, %v13651_v46 }
 0xb13   :  { %12598 = vmatprep.subr.bf16.mxu1 %v12597_v22 }
 0xb16   :  { %12600 = vmatpush3.bf16.msra.mxu1 %v12597_v22 }
 0xb17   :  { %12610 = vmatprep.subr.bf16.mxu1 %v12609_v25 }
 0xb19   :  { %11596 = vmatmul.mubr.msk.f32.vlgmr.msra.gmra.mrb[18].mxu1 %vm123_vm0, %v13663_v51 }
 0xb1a   :  { %12612 = vmatpush3.bf16.msra.mxu1 %v12609_v25  ;;  %11617 = vmatprep.mubr.msk.f32.mxu1 %vm123_vm0, %v13651_v46 }
 0xb1b   :  { %12614 = vmatprep.subr.bf16.mxu1 %v12613_v18 }
 0xb1e   :  { %12616 = vmatpush3.bf16.msra.mxu1 %v12613_v18  ;;  %v2228_v18 = vrot.slane %v13642_v38, %v13846_v19 }
 0xb21   :  { %11618 = vmatmul.mubr.msk.f32.vlgmr.msra.gmra.mrb[20].mxu1 %vm123_vm0, %v13663_v51 }
 0xbe4   :  { %v11581_v36 = vpop.f32.mrb[16].mxu1 }
 0xbe5   :  { %v1617_v17 = vpop.f32.mrb[17].mxu1 }
 0xbe6   :  { %11584 = vmatprep.mubr.msk.f32.mxu0 %vm406_vm1, %v1617_v17 }
 0xbe7   :  { %11585 = vmatmul.mubr.msk.f32.vlgmr.msra.gmra.mrb[8].mxu0 %vm406_vm1, %v11581_v36 }
 0xbe8   :  { %12604 = vmatpush3.bf16.msra.mxu0 %v12601_v33  ;;  %11606 = vmatprep.mubr.msk.f32.mxu0 %vm123_vm0, %v13651_v46 }
 0xbe9   :  { %12606 = vmatprep.subr.bf16.mxu0 %v12605_v40 }
 0xbec   :  { %v11597_v43 = vpop.f32.mrb[18].mxu1  ;;  %12608 = vmatpush3.bf16.msra.mxu0 %v12605_v40 }
 0xbed   :  { %v1785_v44 = vadd.f32 %v11597_v43, %v1712_v42  ;;  %v1779_v45 = vpop.f32.mrb[19].mxu1 }
 0xbee   :  { %v1780_v47 = vadd.f32 %v1779_v45, %v1712_v42 }
 0xbef   :  { %11607 = vmatmul.mubr.msk.f32.vlgmr.msra.gmra.mrb[14].mxu0 %vm123_vm0, %v13663_v51 }
 0xbf0   :  { %11624 = vmatprep.mubr.msk.f32.mxu0 %vm406_vm1, %v1780_v47 }
 0xbf4   :  { %v11619_v49 = vpop.f32.mrb[20].mxu1 }
 0xbf5   :  { %v1943_v50 = vadd.f32 %v11619_v49, %v1870_v48  ;;  %v1937_v46 = vpop.f32.mrb[21].mxu1 }
 0xbf6   :  { %v1938_v52 = vadd.f32 %v1937_v46, %v1870_v48  ;;  %v2269_v46 = vld [vmem:[%s15545_s7] sm:$0xff] }
 0xbf8   :  { %v12623_v55 = vpack.c.bf16 %v1943_v50, %v1938_v52  ;;  %v2270_v52 = vld [vmem:[%s15545_s7 + $0x8] sm:$0xff] }
 0xbfa   :  { %12624 = vmatprep.subr.bf16.mxu1 %v12623_v55 }
 0xbfb   :  { %12626 = vmatpush3.bf16.msra.mxu1 %v12623_v55  ;;  %v12627_v55 = vpack.c.bf16 %v2270_v52, %v2269_v46 }
 0xbfd   :  { %12628 = vmatprep.subr.bf16.mxu1 %v12627_v55 }
 0xcc2   :  { %v11608_v56 = vpop.f32.mrb[14].mxu0 }
 0xcc3   :  { %v1864_v57 = vadd.f32 %v11608_v56, %v1791_v54  ;;  %v1858_v58 = vpop.f32.mrb[15].mxu0  ;;  %v2272_v56 = vld [vmem:[%s15545_s7 + $0x18] sm:$0xff] }
 0xcc4   :  { %v1859_v59 = vadd.f32 %v1858_v58, %v1791_v54  ;;  %v2271_v54 = vld [vmem:[%s15545_s7 + $0x10] sm:$0xff] }
 0xcc6   :  { %v12617_v51 = vpack.c.bf16 %v1864_v57, %v1859_v59  ;;  %v12631_v57 = vpack.c.bf16 %v2272_v56, %v2271_v54 }
 0xcc8   :  { %12619 = vmatprep.subr.msk.bf16.mxu0 %vm13703_vm2, %v12617_v51 }
 0xcc9   :  { %12622 = vmatpush3.bf16.xpose.msk.msra.mxu0 %vm13703_vm2, %v12617_v51 }
 0xcca   :  { %11634 = vmatprep.subr.mxu0 %v122_v16 }
 0xcd0   :  { %11625 = vmatmul.mubr.msk.f32.vlgmr.msra.gmra.mrb[16].mxu0 %vm406_vm1, %v1785_v44 }
 0xcd1   :  { %11635 = vmatpush3.msra.mxu0 %v122_v16 }
 0xda3   :  { %v11626_v53 = vpop.f32.mrb[16].mxu0 }
 0xda4   :  { %v2034_v60 = vmul.f32 0.35355338, %v11626_v53  ;;  %v2024_v61 = vpop.f32.mrb[17].mxu0 }
 0xda5   :  { %v2033_v62 = vmul.f32 0.35355338, %v2024_v61 }
 0xda6   :  { %v2036_v2 = vsel %vm13740_vm3, %v2034_v60, -1e+30 }
 0xda7   :  { %v2040_v63 = vsel %vm498_vm4, %v2036_v2, -inf  ;;  %v2035_v3 = vsel %vm13745_vm5, %v2033_v62, -1e+30  ;;  %v13998_v62 = vsub.s32 4, %v13634_v35 }
 0xda8   :  { %2041 = vmax.xlane.f32.xlu1 %v2040_v63  ;;  %v2037_v4 = vsel %vm498_vm4, %v2035_v3, -inf }
 0xda9   :  { %2038 = vmax.xlane.f32.xlu0 %v2037_v4 }
 0xe35   :  { %v2042_v5 = vpop.xlane.xlu1 %2041 }
 0xe36   :  { %v2044_v6 = vsub.f32 %v2036_v2, %v2042_v5  ;;  %v2039_v7 = vpop.xlane.xlu0 %2038  ;;  %v2260_v2 = vrot.slane %v13642_v38, %v13934_v41 }
 0xe37   :  { %v2043_v8 = vsub.f32 %v2035_v3, %v2039_v7 }
 0xe38   :  { %v2047_v9 = vmul.f32 1.442695, %v2044_v6  ;;  %v2266_v6 = vrot.slane %v13642_v38, %v13998_v62  ;;  %v2417_v38 = vld [vmem:[%s15547_s9 + $0x10] sm:$0xff] }
 0xe39   :  { %v2045_v10 = vmul.f32 1.442695, %v2043_v8 }
 0xe3a   :  { %13282 = vpow2.f32 %v2047_v9 }
 0xe3b   :  { %13284 = vpow2.f32 %v2045_v10 }
 0xe44   :  { %v13283_v12 = vpop.eup %13282 }
 0xe45   :  { %v13285_v13 = vpop.eup %13284  ;;  %v2052_v14 = vsel %vm498_vm4, %v13283_v12, 0.0 }
 0xe46   :  { %2053 = vadd.xlane.f32.xlu1 %v2052_v14  ;;  %v2049_v15 = vsel %vm498_vm4, %v13285_v13, 0.0 }
 0xe47   :  { %2050 = vadd.xlane.f32.xlu0 %v2049_v15  ;;  %v2418_v15 = vld [vmem:[%s15547_s9 + $0x18] sm:$0xff] }
 0xe48   :  { %v12639_v16 = vpack.c.bf16 %v2418_v15, %v2417_v38 }
 0xed3   :  { %v2054_v20 = vpop.xlane.xlu1 %2053 }
 0xed4   :  { %13286 = vrcp.f32 %v2054_v20  ;;  %v2051_v21 = vpop.xlane.xlu0 %2050  ;;  %v2419_v20 = vld [vmem:[%s15547_s9 + $0x20] sm:$0xff] }
 0xed5   :  { %13288 = vrcp.f32 %v2051_v21  ;;  %v2420_v21 = vld [vmem:[%s15547_s9 + $0x28] sm:$0xff] }
 0xede   :  { %v13287_v22 = vpop.eup %13286 }
 0xedf   :  { %v13289_v23 = vpop.eup %13288  ;;  %v2058_v25 = vmul.f32 %v13287_v22, %v13283_v12  ;;  %v2415_v12 = vld [vmem:[%s15547_s9] sm:$0xff]  ;;  %v12643_v22 = vpack.c.bf16 %v2420_v21, %v2419_v20 }
 0xee0   :  { %v2057_v24 = vmul.f32 %v13289_v23, %v13285_v13  ;;  %v2416_v13 = vld [vmem:[%s15547_s9 + $0x8] sm:$0xff]  ;;  %v2421_v23 = vld [vmem:[%s15547_s9 + $0x30] sm:$0xff] }
 0xee1   :  { %v12635_v14 = vpack.c.bf16 %v2416_v13, %v2415_v12 }
 0xee2   :  { %11631 = vmatprep.mubr.msk.f32.mxu1 %vm498_vm4, %v2057_v24  ;;  %v2422_v24 = vld [vmem:[%s15547_s9 + $0x38] sm:$0xff] }
 0xee3   :  { %11632 = vmatmul.mubr.msk.f32.vlgmr.msra.gmra.mrb[22].mxu1 %vm498_vm4, %v2058_v25  ;;  %12636 = vmatprep.subr.bf16.mxu0 %v12635_v14  ;;  %v12647_v25 = vpack.c.bf16 %v2422_v24, %v2421_v23 }
 0xee4   :  { %12630 = vmatpush3.bf16.msra.mxu1 %v12627_v55 }
 0xee5   :  { %12632 = vmatprep.subr.bf16.mxu1 %v12631_v57 }
 0xee8   :  { %12634 = vmatpush3.bf16.msra.mxu1 %v12631_v57 }
 0xfb6   :  { %v11633_v26 = vpop.f32.mrb[22].mxu1 }
 0xfb7   :  { %v2131_v28 = vpop.f32.mrb[23].mxu1 }
 0xfb8   :  { %11636 = vmatprep.mubr.msk.f32.mxu0 %vm406_vm1, %v2131_v28  ;;  %v2424_v28 = vld [vmem:[%s15547_s9 + $0x48] sm:$0xff] }
 0xfb9   :  { %11637 = vmatmul.mubr.msk.f32.vlgmr.msra.gmra.mrb[8].mxu0 %vm406_vm1, %v11633_v26  ;;  %v2423_v26 = vld [vmem:[%s15547_s9 + $0x40] sm:$0xff] }
 0xfba   :  { %12638 = vmatpush3.bf16.msra.mxu0 %v12635_v14 }
 0xfbb   :  { %12640 = vmatprep.subr.bf16.mxu0 %v12639_v16 }
 0xfbe   :  { %12642 = vmatpush3.bf16.msra.mxu0 %v12639_v16 }
 0xfbf   :  { %12644 = vmatprep.subr.bf16.mxu0 %v12643_v22 }
 0xfc2   :  { %12646 = vmatpush3.bf16.msra.mxu0 %v12643_v22 }
 0xfc3   :  { %12648 = vmatprep.subr.bf16.mxu0 %v12647_v25 }
 0xfc6   :  { %12650 = vmatpush3.bf16.msra.mxu0 %v12647_v25 }
0x108c   :  { %v11638_v29 = vpop.f32.mrb[8].mxu0 }
0x108d   :  { %v2224_v32 = vadd.f32 %v11638_v29, %v13593_v1  ;;  %v2212_v33 = vpop.f32.mrb[9].mxu0  ;;  %v2425_v29 = vld [vmem:[%s15547_s9 + $0x50] sm:$0xff] }
0x108e   :  { %v2223_v34 = vadd.f32 %v2212_v33, %v13588_v0 }
0x108f   :  { %v13973_v31 = vadd.f32 %v2228_v18, %v2224_v32  ;;  %v2426_v32 = vld [vmem:[%s15547_s9 + $0x58] sm:$0xff] }
0x1090   :  { %v13975_v36 = vadd.f32 %v2228_v18, %v2223_v34  ;;  %v12651_v18 = vpack.c.bf16 %v2424_v28, %v2423_v26  ;;  %v12655_v33 = vpack.c.bf16 %v2426_v32, %v2425_v29  ;;  %v2427_v34 = vld [vmem:[%s15547_s9 + $0x60] sm:$0xff] }
0x1091   :  { %v2234_v17 = vsel %vm123_vm0, %v13973_v31, 0.0 }
0x1092   :  { %2235 = vadd.xlane.f32.xlu1 %v2234_v17  ;;  %v2231_v40 = vsel %vm123_vm0, %v13975_v36, 0.0  ;;  %12652 = vmatprep.subr.bf16.mxu0 %v12651_v18  ;;  %v2428_v17 = vld [vmem:[%s15547_s9 + $0x68] sm:$0xff] }
0x1093   :  { %2232 = vadd.xlane.f32.xlu0 %v2231_v40  ;;  %12654 = vmatpush3.bf16.msra.mxu0 %v12651_v18  ;;  %v12659_v40 = vpack.c.bf16 %v2428_v17, %v2427_v34 }
0x1094   :  { %12656 = vmatprep.subr.bf16.mxu0 %v12655_v33 }
0x1097   :  { %12658 = vmatpush3.bf16.msra.mxu0 %v12655_v33 }
0x1098   :  { %12660 = vmatprep.subr.bf16.mxu0 %v12659_v40 }
0x109b   :  { %12662 = vmatpush3.bf16.msra.mxu0 %v12659_v40 }
0x111f   :  { %v2236_v42 = vpop.xlane.xlu1 %2235 }
0x1120   :  { %v2238_v43 = vmul.f32 0.03125, %v2236_v42  ;;  %v2233_v44 = vpop.xlane.xlu0 %2232  ;;  %v2429_v42 = vld [vmem:[%s15547_s9 + $0x70] sm:$0xff] }
0x1121   :  { %v2237_v45 = vmul.f32 0.03125, %v2233_v44 }
0x1122   :  { %v2240_v1 = vsub.f32 %v13973_v31, %v2238_v43  ;;  %v2430_v43 = vld [vmem:[%s15547_s9 + $0x78] sm:$0xff] }
0x1123   :  { %v2239_v0 = vsub.f32 %v13975_v36, %v2237_v45  ;;  %v12663_v44 = vpack.c.bf16 %v2430_v43, %v2429_v42  ;;  %v10502_v45 = vld [vmem:[%s15546_s8] ss:$0 sm:$0xff] }
0x1124   :  { %v2242_v47 = vmul.f32 %v2240_v1, %v2240_v1 }
0x1125   :  { %v2241_v48 = vmul.f32 %v2239_v0, %v2239_v0  ;;  %12664 = vmatprep.subr.bf16.mxu0 %v12663_v44 }
0x1126   :  { %v2246_v49 = vsel %vm123_vm0, %v2242_v47, 0.0  ;;  %12666 = vmatpush3.bf16.msra.mxu0 %v12663_v44 }
0x1127   :  { %2247 = vadd.xlane.f32.xlu1 %v2246_v49  ;;  %v2243_v50 = vsel %vm123_vm0, %v2241_v48, 0.0 }
0x1128   :  { %2244 = vadd.xlane.f32.xlu0 %v2243_v50 }
0x11b4   :  { %v2248_v58 = vpop.xlane.xlu1 %2247 }
0x11b5   :  { %v2250_v59 = vmul.f32 0.03125, %v2248_v58  ;;  %v2245_v51 = vpop.xlane.xlu0 %2244 }
0x11b6   :  { %v2249_v53 = vmul.f32 0.03125, %v2245_v51 }
0x11b7   :  { %v2252_v60 = vadd.f32 1e-05, %v2250_v59 }
0x11b8   :  { %v2251_v61 = vadd.f32 1e-05, %v2249_v53 }
0x11b9   :  { %13290 = vrsqrt.f32 %v2252_v60 }
0x11ba   :  { %13292 = vrsqrt.f32 %v2251_v61 }
0x11c3   :  { %v13291_v63 = vpop.eup %13290 }
0x11c4   :  { %v13293_v3 = vpop.eup %13292  ;;  %v2256_v4 = vmul.f32 %v13291_v63, %v2240_v1 }
0x11c5   :  { %v2255_v5 = vmul.f32 %v13293_v3, %v2239_v0 }
0x11c6   :  { %v2262_v7 = vmul.f32 %v2260_v2, %v2256_v4 }
0x11c7   :  { %v2261_v8 = vmul.f32 %v2260_v2, %v2255_v5 }
0x11c8   :  { %v2268_v10 = vadd.f32 %v2266_v6, %v2262_v7 }
0x11c9   :  { %v2267_v9 = vadd.f32 %v2266_v6, %v2261_v8 }
0x11cb   :  { %11647 = vmatprep.mubr.msk.f32.mxu1 %vm123_vm0, %v2267_v9 }
0x11cc   :  { %11648 = vmatmul.mubr.msk.f32.vlgmr.msra.gmra.mrb[24].mxu1 %vm123_vm0, %v2268_v10 }
0x129f   :  { %v11649_v1 = vpop.f32.mrb[24].mxu1 }
0x12a0   :  { %v2358_v0 = vadd.f32 %v11649_v1, %v10502_v45  ;;  %v2352_v47 = vpop.f32.mrb[25].mxu1 }
0x12a1   :  { %v2353_v48 = vadd.f32 %v10502_v45, %v2352_v47  ;;  %v14058_v47 = vsub.s32 5, %v13634_v35 }
0x12a2   :  { %v2364_v49 = vmul.f32 0.70710677, %v2358_v0  ;;  %v2362_v44 = vmul.f32 0.5, %v2358_v0 }
0x12a3   :  { %v2363_v50 = vmul.f32 0.70710677, %v2353_v48  ;;  %v2361_v42 = vmul.f32 0.5, %v2353_v48 }
0x12a4   :  { %v2366_v46 = vand.u32 2147483647, %v2364_v49  ;;  %vm2406_vm6 = vcmp.lt.f32.partialorder %v2364_v49, 0.0 }
0x12a5   :  { %v2365_v52 = vand.u32 2147483647, %v2363_v50  ;;  %vm2405_vm7 = vcmp.lt.f32.partialorder %v2363_v50, 0.0 }
0x12a6   :  { %v2368_v55 = vmul.f32 0.3275911, %v2366_v46  ;;  %v2394_v58 = vsub.f32 0.0, %v2366_v46 }
0x12a7   :  { %v2367_v54 = vmul.f32 0.3275911, %v2365_v52  ;;  %v2393_v59 = vsub.f32 0.0, %v2365_v52 }
0x12a8   :  { %v2370_v56 = vadd.f32 1.0, %v2368_v55  ;;  %v2396_v53 = vmul.f32 %v2394_v58, %v2366_v46  ;;  %v13478_v46 = vld [vmem:[%s15539_s1] sm:$0x3f] }
0x12a9   :  { %v2369_v57 = vadd.f32 1.0, %v2367_v54  ;;  %v2395_v2 = vmul.f32 %v2393_v59, %v2365_v52  ;;  %v2434_v49 = vrot.slane %v13478_v46, %v14058_v47  ;;  %v14142_v46 = vld [vmem:[%s15540_s2 + $0xc] sm:$0xf] }
0x12aa   :  { %13294 = vrcp.f32 %v2370_v56  ;;  %v2399_v4 = vmul.f32 1.442695, %v2396_v53 }
0x12ab   :  { %13296 = vrcp.f32 %v2369_v57  ;;  %v2397_v7 = vmul.f32 1.442695, %v2395_v2 }
0x12ac   :  { %13298 = vpow2.f32 %v2399_v4 }
0x12ad   :  { %13300 = vpow2.f32 %v2397_v7 }
0x12b4   :  { %v13295_v51 = vpop.eup %13294 }
0x12b5   :  { %v13297_v60 = vpop.eup %13296  ;;  %v2376_v61 = vmul.f32 1.0614054, %v13295_v51 }
0x12b6   :  { %v2375_v63 = vmul.f32 1.0614054, %v13297_v60  ;;  %v13299_v23 = vpop.eup %13298 }
0x12b7   :  { %v2378_v3 = vadd.f32 -1.4531521, %v2376_v61  ;;  %v13301_v25 = vpop.eup %13300 }
0x12b8   :  { %v2377_v5 = vadd.f32 -1.4531521, %v2375_v63  ;;  %v10509_v63 = vld [vmem:[%s15541_s3 + $0x80] sm:$0xff] }
0x12b9   :  { %v2380_v6 = vmul.f32 %v13295_v51, %v2378_v3  ;;  %v10510_v3 = vld [vmem:[%s15541_s3 + $0x88] sm:$0xff] }
0x12ba   :  { %v2379_v8 = vmul.f32 %v13297_v60, %v2377_v5  ;;  %v12667_v4 = vpack.c.bf16 %v10510_v3, %v10509_v63  ;;  %v10511_v5 = vld [vmem:[%s15541_s3 + $0x90] sm:$0xff] }
0x12bb   :  { %v2382_v9 = vadd.f32 1.4214138, %v2380_v6  ;;  %v10512_v6 = vld [vmem:[%s15541_s3 + $0x98] sm:$0xff] }
0x12bc   :  { %v2381_v10 = vadd.f32 1.4214138, %v2379_v8  ;;  %12668 = vmatprep.subr.bf16.mxu1 %v12667_v4  ;;  %v12671_v7 = vpack.c.bf16 %v10512_v6, %v10511_v5  ;;  %v10525_v8 = vld [vmem:[%s15542_s4 + $0x80] sm:$0xff]  ;;  %v10516_v5 = vld [vmem:[%s15541_s3 + $0xb8] sm:$0xff] }
0x12bd   :  { %v2384_v12 = vmul.f32 %v13295_v51, %v2382_v9  ;;  %12670 = vmatpush3.bf16.msra.mxu1 %v12667_v4  ;;  %v10526_v9 = vld [vmem:[%s15542_s4 + $0x88] sm:$0xff]  ;;  %v10515_v4 = vld [vmem:[%s15541_s3 + $0xb0] sm:$0xff] }
0x12be   :  { %v2383_v13 = vmul.f32 %v13297_v60, %v2381_v10  ;;  %12672 = vmatprep.subr.bf16.mxu1 %v12671_v7  ;;  %v12675_v10 = vpack.c.bf16 %v10526_v9, %v10525_v8  ;;  %v12705_v9 = vpack.c.bf16 %v10516_v5, %v10515_v4  ;;  %v10532_v4 = vld [vmem:[%s15542_s4 + $0xb8] sm:$0xff] }
0x12bf   :  { %v2386_v14 = vadd.f32 -0.28449672, %v2384_v12 }
0x12c0   :  { %v2385_v38 = vadd.f32 -0.28449672, %v2383_v13 }
0x12c1   :  { %v2388_v15 = vmul.f32 %v13295_v51, %v2386_v14  ;;  %12674 = vmatpush3.bf16.msra.mxu1 %v12671_v7 }
0x12c2   :  { %v2387_v16 = vmul.f32 %v13297_v60, %v2385_v38  ;;  %12676 = vmatprep.subr.bf16.mxu1 %v12675_v10 }
0x12c3   :  { %v2390_v20 = vadd.f32 0.2548296, %v2388_v15 }
0x12c4   :  { %v2389_v21 = vadd.f32 0.2548296, %v2387_v16 }
0x12c5   :  { %v2392_v22 = vmul.f32 %v13295_v51, %v2390_v20  ;;  %v14099_v20 = vld [vmem:[%s15539_s1 + $0x8] sm:$0x3f] }
0x12c6   :  { %v2391_v24 = vmul.f32 %v13297_v60, %v2389_v21  ;;  %v2603_v21 = vrot.slane %v14099_v20, %v13637_v37 }
0x12c7   :  { %v2402_v26 = vmul.f32 %v13299_v23, %v2392_v22 }
0x12c8   :  { %v2401_v28 = vmul.f32 %v13301_v25, %v2391_v24  ;;  %v2609_v25 = vrot.slane %v14099_v20, %v13645_v39 }
0x12c9   :  { %v2404_v18 = vsub.f32 1.0, %v2402_v26 }
0x12ca   :  { %v2403_v29 = vsub.f32 1.0, %v2401_v28 }
0x12cb   :  { %v2408_v32 = vsub.f32 0.0, %v2404_v18 }
0x12cc   :  { %v2407_v33 = vsub.f32 0.0, %v2403_v29 }
0x12cd   :  { %v2410_v34 = vsel %vm2406_vm6, %v2408_v32, %v2404_v18  ;;  %v10528_v32 = vld [vmem:[%s15542_s4 + $0x98] sm:$0xff] }
0x12ce   :  { %v2412_v17 = vadd.f32 1.0, %v2410_v34  ;;  %v2409_v40 = vsel %vm2405_vm7, %v2407_v33, %v2403_v29  ;;  %v10527_v29 = vld [vmem:[%s15542_s4 + $0x90] sm:$0xff] }
0x12cf   :  { %v2411_v43 = vadd.f32 1.0, %v2409_v40  ;;  %v10541_v40 = vld [vmem:[%s15543_s5 + $0x80] sm:$0xff] }
0x12d0   :  { %v2414_v1 = vmul.f32 %v2412_v17, %v2362_v44  ;;  %v12679_v17 = vpack.c.bf16 %v10528_v32, %v10527_v29  ;;  %v10543_v44 = vld [vmem:[%s15543_s5 + $0x90] sm:$0xff] }
0x12d1   :  { %v2413_v45 = vmul.f32 %v2411_v43, %v2361_v42  ;;  %v10542_v42 = vld [vmem:[%s15543_s5 + $0x88] sm:$0xff] }
0x12d2   :  { %v12683_v43 = vpack.c.bf16 %v10542_v42, %v10541_v40 }
0x12d3   :  { %11682 = vmatprep.mubr.f32.mxu0 %v2413_v45  ;;  %v10544_v45 = vld [vmem:[%s15543_s5 + $0x98] sm:$0xff] }
0x12d4   :  { %11683 = vmatmul.mubr.f32.vlgmr.msra.gmra.mrb[18].mxu0 %v2414_v1  ;;  %v12687_v1 = vpack.c.bf16 %v10544_v45, %v10543_v44 }
0x13a7   :  { %v11684_v52 = vpop.f32.mrb[18].mxu0 }
0x13a8   :  { %v2507_v50 = vadd.f32 %v11684_v52, %v2434_v49  ;;  %v2501_v55 = vpop.f32.mrb[19].mxu0 }
0x13a9   :  { %v2502_v54 = vadd.f32 %v2501_v55, %v2434_v49  ;;  %v2615_v49 = vrot.slane %v14142_v46, %v13637_v37 }
0x13aa   :  { %v14065_v48 = vadd.f32 %v2507_v50, %v13973_v31 }
0x13ab   :  { %v14068_v0 = vadd.f32 %v2502_v54, %v13975_v36  ;;  %v14149_v54 = vld [vmem:[%s15540_s2 + $0x10] sm:$0xf] }
0x13ac   :  { %v2577_v35 = vsel %vm123_vm0, %v14065_v48, 0.0 }
0x13ad   :  { %2578 = vadd.xlane.f32.xlu1 %v2577_v35  ;;  %v2574_v56 = vsel %vm123_vm0, %v14068_v0, 0.0  ;;  %v2700_v35 = vrot.slane %v14149_v54, %v13637_v37 }
0x13ae   :  { %2575 = vadd.xlane.f32.xlu0 %v2574_v56 }
0x143a   :  { %v2579_v57 = vpop.xlane.xlu1 %2578 }
0x143b   :  { %v2581_v58 = vmul.f32 0.03125, %v2579_v57  ;;  %v2576_v59 = vpop.xlane.xlu0 %2575 }
0x143c   :  { %v2580_v51 = vmul.f32 0.03125, %v2576_v59  ;;  %v10513_v59 = vld [vmem:[%s15541_s3 + $0xa0] sm:$0xff] }
0x143d   :  { %v2583_v53 = vsub.f32 %v14065_v48, %v2581_v58 }
0x143e   :  { %v2582_v31 = vsub.f32 %v14068_v0, %v2580_v51  ;;  %v10514_v51 = vld [vmem:[%s15541_s3 + $0xa8] sm:$0xff] }
0x143f   :  { %v2585_v60 = vmul.f32 %v2583_v53, %v2583_v53 }
0x1440   :  { %v2584_v61 = vmul.f32 %v2582_v31, %v2582_v31 }
0x1441   :  { %v2589_v36 = vsel %vm123_vm0, %v2585_v60, 0.0 }
0x1442   :  { %2590 = vadd.xlane.f32.xlu1 %v2589_v36  ;;  %v2586_v2 = vsel %vm123_vm0, %v2584_v61, 0.0  ;;  %v12701_v61 = vpack.c.bf16 %v10514_v51, %v10513_v59 }
0x1443   :  { %2587 = vadd.xlane.f32.xlu0 %v2586_v2 }
0x14cf   :  { %v2591_v12 = vpop.xlane.xlu1 %2590 }
0x14d0   :  { %v2593_v13 = vmul.f32 0.03125, %v2591_v12  ;;  %v2588_v14 = vpop.xlane.xlu0 %2587  ;;  %v10546_v12 = vld [vmem:[%s15543_s5 + $0xa8] sm:$0xff] }
0x14d1   :  { %v2592_v38 = vmul.f32 0.03125, %v2588_v14  ;;  %v10547_v14 = vld [vmem:[%s15543_s5 + $0xb0] sm:$0xff] }
0x14d2   :  { %v2595_v15 = vadd.f32 1e-05, %v2593_v13 }
0x14d3   :  { %v2594_v16 = vadd.f32 1e-05, %v2592_v38  ;;  %v10548_v38 = vld [vmem:[%s15543_s5 + $0xb8] sm:$0xff] }
0x14d4   :  { %13302 = vrsqrt.f32 %v2595_v15  ;;  %v12721_v15 = vpack.c.bf16 %v10548_v38, %v10547_v14 }
0x14d5   :  { %13304 = vrsqrt.f32 %v2594_v16 }
0x14de   :  { %v13303_v22 = vpop.eup %13302 }
0x14df   :  { %v13305_v23 = vpop.eup %13304  ;;  %v2599_v24 = vmul.f32 %v13303_v22, %v2583_v53 }
0x14e0   :  { %v2598_v26 = vmul.f32 %v13305_v23, %v2582_v31  ;;  %v14163_v31 = vld [vmem:[%s15540_s2 + $0x14] sm:$0xf] }
0x14e1   :  { %v2605_v28 = vmul.f32 %v2603_v21, %v2599_v24  ;;  %v2779_v36 = vrot.slane %v14163_v31, %v13637_v37  ;;  %v3210_v40 = vrot.slane %v14163_v31, %v13645_v39 }
0x14e2   :  { %v2604_v18 = vmul.f32 %v2603_v21, %v2598_v26 }
0x14e3   :  { %v14113_v34 = vadd.f32 %v2609_v25, %v2605_v28 }
0x14e4   :  { %v14111_v33 = vadd.f32 %v2609_v25, %v2604_v18  ;;  %v3052_v18 = vrot.slane %v14142_v46, %v13645_v39 }
0x14e6   :  { %11693 = vmatprep.mubr.msk.f32.mxu1 %vm123_vm0, %v14111_v33 }
0x14e7   :  { %11694 = vmatmul.mubr.msk.f32.vlgmr.msra.gmra.mrb[26].mxu1 %vm123_vm0, %v14113_v34 }
0x14e8   :  { %12678 = vmatpush3.bf16.msra.mxu1 %v12675_v10  ;;  %11704 = vmatprep.mubr.msk.f32.mxu1 %vm123_vm0, %v14111_v33  ;;  %v10545_v10 = vld [vmem:[%s15543_s5 + $0xa0] sm:$0xff] }
0x14e9   :  { %12680 = vmatprep.subr.bf16.mxu1 %v12679_v17  ;;  %v12717_v13 = vpack.c.bf16 %v10546_v12, %v10545_v10 }
0x14ec   :  { %12682 = vmatpush3.bf16.msra.mxu1 %v12679_v17 }
0x14ed   :  { %12684 = vmatprep.subr.bf16.mxu1 %v12683_v43 }
0x14ef   :  { %11705 = vmatmul.mubr.msk.f32.vlgmr.msra.gmra.mrb[28].mxu1 %vm123_vm0, %v14113_v34 }
0x14f0   :  { %12686 = vmatpush3.bf16.msra.mxu1 %v12683_v43  ;;  %11715 = vmatprep.mubr.msk.f32.mxu1 %vm123_vm0, %v14111_v33 }
0x14f1   :  { %12688 = vmatprep.subr.bf16.mxu1 %v12687_v1 }
0x14f4   :  { %12690 = vmatpush3.bf16.msra.mxu1 %v12687_v1 }
0x14f7   :  { %11716 = vmatmul.mubr.msk.f32.vlgmr.msra.gmra.mrb[30].mxu1 %vm123_vm0, %v14113_v34 }
0x15ba   :  { %v11695_v52 = vpop.f32.mrb[26].mxu1 }
0x15bb   :  { %v2688_v50 = vpop.f32.mrb[27].mxu1  ;;  %v2694_v7 = vadd.f32 %v11695_v52, %v2615_v49 }
0x15bc   :  { %v2689_v55 = vadd.f32 %v2688_v50, %v2615_v49 }
0x15be   :  { %11722 = vmatprep.mubr.msk.f32.mxu1 %vm406_vm1, %v2689_v55 }
0x15c2   :  { %v11706_v56 = vpop.f32.mrb[28].mxu1 }
0x15c3   :  { %v2773_v57 = vadd.f32 %v11706_v56, %v2700_v35  ;;  %v2767_v58 = vpop.f32.mrb[29].mxu1 }
0x15c4   :  { %v2768_v53 = vadd.f32 %v2767_v58, %v2700_v35 }
0x15c6   :  { %v12691_v60 = vpack.c.bf16 %v2773_v57, %v2768_v53  ;;  %v10529_v53 = vld [vmem:[%s15542_s4 + $0xa0] sm:$0xff] }
0x15c8   :  { %12693 = vmatprep.subr.msk.bf16.mxu1 %vm13703_vm2, %v12691_v60 }
0x15c9   :  { %12696 = vmatpush3.bf16.xpose.msk.msra.mxu1 %vm13703_vm2, %v12691_v60  ;;  %v10530_v60 = vld [vmem:[%s15542_s4 + $0xa8] sm:$0xff] }
0x15ca   :  { %v11717_v2 = vpop.f32.mrb[30].mxu1  ;;  %12702 = vmatprep.subr.bf16.mxu1 %v12701_v61 }
0x15cb   :  { %v2852_v63 = vadd.f32 %v11717_v2, %v2779_v36  ;;  %v2846_v3 = vpop.f32.mrb[31].mxu1 }
0x15cc   :  { %v2847_v6 = vadd.f32 %v2846_v3, %v2779_v36  ;;  %v10531_v3 = vld [vmem:[%s15542_s4 + $0xb0] sm:$0xff] }
0x15ce   :  { %v12697_v8 = vpack.c.bf16 %v2852_v63, %v2847_v6 }
0x15d0   :  { %11723 = vmatmul.mubr.msk.f32.vlgmr.msra.gmra.mrb[32].mxu1 %vm406_vm1, %v2694_v7  ;;  %12698 = vmatprep.subr.bf16.mxu0 %v12697_v8 }
0x15d1   :  { %12700 = vmatpush3.bf16.msra.mxu0 %v12697_v8  ;;  %12704 = vmatpush3.bf16.msra.mxu1 %v12701_v61  ;;  %v12709_v61 = vpack.c.bf16 %v10530_v60, %v10529_v53  ;;  %v12713_v8 = vpack.c.bf16 %v10532_v4, %v10531_v3  ;;  %v10520_v53 = vld [vmem:[%s15541_s3 + $0xd8] sm:$0xff]  ;;  %v10550_v3 = vld [vmem:[%s15543_s5 + $0xc8] sm:$0xff] }
0x15d2   :  { %11740 = vmatprep.mubr.msk.f32.mxu1 %vm123_vm0, %v14111_v33  ;;  %12706 = vmatprep.subr.bf16.mxu1 %v12705_v9 }
0x15d3   :  { %12710 = vmatprep.subr.bf16.mxu0 %v12709_v61 }
0x15d5   :  { %12708 = vmatpush3.bf16.msra.mxu1 %v12705_v9 }
0x15d6   :  { %12718 = vmatprep.subr.bf16.mxu1 %v12717_v13 }
0x15d8   :  { %11741 = vmatmul.mubr.msk.f32.vlgmr.msra.gmra.mrb[34].mxu1 %vm123_vm0, %v14113_v34 }
0x15d9   :  { %12720 = vmatpush3.bf16.msra.mxu1 %v12717_v13  ;;  %11762 = vmatprep.mubr.msk.f32.mxu1 %vm123_vm0, %v14111_v33  ;;  %v3131_v13 = vrot.slane %v14149_v54, %v13645_v39 }
0x15da   :  { %12722 = vmatprep.subr.bf16.mxu1 %v12721_v15 }
0x15dd   :  { %12724 = vmatpush3.bf16.msra.mxu1 %v12721_v15 }
0x15e0   :  { %11763 = vmatmul.mubr.msk.f32.vlgmr.msra.gmra.mrb[36].mxu1 %vm123_vm0, %v14113_v34 }
0x16a3   :  { %v11724_v16 = vpop.f32.mrb[32].mxu1 }
0x16a4   :  { %v2943_v21 = vmul.f32 0.35355338, %v11724_v16  ;;  %v2933_v22 = vpop.f32.mrb[33].mxu1 }
0x16a5   :  { %v2942_v23 = vmul.f32 0.35355338, %v2933_v22 }
0x16a6   :  { %v2945_v24 = vsel %vm13740_vm3, %v2943_v21, -1e+30 }
0x16a7   :  { %v2949_v25 = vsel %vm498_vm4, %v2945_v24, -inf  ;;  %v2944_v26 = vsel %vm13745_vm5, %v2942_v23, -1e+30 }
0x16a8   :  { %2950 = vmax.xlane.f32.xlu1 %v2949_v25  ;;  %v2946_v28 = vsel %vm498_vm4, %v2944_v26, -inf }
0x16a9   :  { %2947 = vmax.xlane.f32.xlu0 %v2946_v28 }
0x16ab   :  { %v11742_v29 = vpop.f32.mrb[34].mxu1 }
0x16ac   :  { %v3125_v32 = vadd.f32 %v11742_v29, %v3052_v18  ;;  %v3119_v17 = vpop.f32.mrb[35].mxu1 }
0x16ad   :  { %v3120_v9 = vadd.f32 %v3119_v17, %v3052_v18 }
0x16b3   :  { %v11764_v42 = vpop.f32.mrb[36].mxu1 }
0x16b4   :  { %v3283_v43 = vadd.f32 %v11764_v42, %v3210_v40  ;;  %v3277_v44 = vpop.f32.mrb[37].mxu1 }
0x16b5   :  { %v3278_v45 = vadd.f32 %v3277_v44, %v3210_v40 }
0x16b7   :  { %v12731_v1 = vpack.c.bf16 %v3283_v43, %v3278_v45 }
0x16b9   :  { %12732 = vmatprep.subr.bf16.mxu1 %v12731_v1 }
0x16ba   :  { %12734 = vmatpush3.bf16.msra.mxu1 %v12731_v1 }
0x1735   :  { %v2951_v49 = vpop.xlane.xlu1 %2950 }
0x1736   :  { %v2953_v52 = vsub.f32 %v2945_v24, %v2951_v49  ;;  %v2948_v50 = vpop.xlane.xlu0 %2947 }
0x1737   :  { %v2952_v55 = vsub.f32 %v2944_v26, %v2948_v50  ;;  %v10517_v50 = vld [vmem:[%s15541_s3 + $0xc0] sm:$0xff] }
0x1738   :  { %v2956_v35 = vmul.f32 1.442695, %v2953_v52 }
0x1739   :  { %v2954_v56 = vmul.f32 1.442695, %v2952_v55  ;;  %v10518_v55 = vld [vmem:[%s15541_s3 + $0xc8] sm:$0xff] }
0x173a   :  { %13306 = vpow2.f32 %v2956_v35  ;;  %v12735_v35 = vpack.c.bf16 %v10518_v55, %v10517_v50 }
0x173b   :  { %13308 = vpow2.f32 %v2954_v56  ;;  %v10558_v56 = vld [vmem:[%s15544_s6 + $0x28] sm:$0xff] }
0x173c   :  { %12736 = vmatprep.subr.bf16.mxu1 %v12735_v35 }
0x1744   :  { %v13307_v57 = vpop.eup %13306 }
0x1745   :  { %v13309_v58 = vpop.eup %13308  ;;  %v2961_v59 = vsel %vm498_vm4, %v13307_v57, 0.0 }
0x1746   :  { %2962 = vadd.xlane.f32.xlu1 %v2961_v59  ;;  %v2958_v51 = vsel %vm498_vm4, %v13309_v58, 0.0 }
0x1747   :  { %2959 = vadd.xlane.f32.xlu0 %v2958_v51  ;;  %v10519_v51 = vld [vmem:[%s15541_s3 + $0xd0] sm:$0xff] }
0x17d3   :  { %v2963_v36 = vpop.xlane.xlu1 %2962 }
0x17d4   :  { %13310 = vrcp.f32 %v2963_v36  ;;  %v2960_v2 = vpop.xlane.xlu0 %2959 }
0x17d5   :  { %13312 = vrcp.f32 %v2960_v2  ;;  %v12739_v2 = vpack.c.bf16 %v10520_v53, %v10519_v51 }
0x17de   :  { %v13311_v63 = vpop.eup %13310 }
0x17df   :  { %v13313_v5 = vpop.eup %13312  ;;  %v2967_v7 = vmul.f32 %v13311_v63, %v13307_v57  ;;  %v10549_v63 = vld [vmem:[%s15543_s5 + $0xc0] sm:$0xff] }
0x17e0   :  { %v2966_v6 = vmul.f32 %v13313_v5, %v13309_v58  ;;  %v12751_v4 = vpack.c.bf16 %v10550_v3, %v10549_v63  ;;  %v10551_v5 = vld [vmem:[%s15543_s5 + $0xd0] sm:$0xff] }
0x17e2   :  { %11729 = vmatprep.mubr.msk.f32.mxu0 %vm498_vm4, %v2966_v6  ;;  %v10552_v6 = vld [vmem:[%s15543_s5 + $0xd8] sm:$0xff] }
0x17e3   :  { %11730 = vmatmul.mubr.msk.f32.vlgmr.msra.gmra.mrb[20].mxu0 %vm498_vm4, %v2967_v7  ;;  %v12755_v7 = vpack.c.bf16 %v10552_v6, %v10551_v5  ;;  %v10521_v5 = vld [vmem:[%s15541_s3 + $0xe0] sm:$0xff]  ;;  %v10522_v6 = vld [vmem:[%s15541_s3 + $0xe8] sm:$0xff] }
0x17e4   :  { %12712 = vmatpush3.bf16.msra.mxu0 %v12709_v61  ;;  %11751 = vmatprep.mubr.msk.f32.mxu0 %vm123_vm0, %v14111_v33 }
0x17e5   :  { %12714 = vmatprep.subr.bf16.mxu0 %v12713_v8 }
0x17e8   :  { %12716 = vmatpush3.bf16.msra.mxu0 %v12713_v8  ;;  %v10557_v8 = vld [vmem:[%s15544_s6 + $0x20] sm:$0xff] }
0x17eb   :  { %11752 = vmatmul.mubr.msk.f32.vlgmr.msra.gmra.mrb[22].mxu0 %vm123_vm0, %v14113_v34 }
0x17ec   :  { %11769 = vmatprep.mubr.msk.f32.mxu0 %vm406_vm1, %v3120_v9  ;;  %v10533_v9 = vld [vmem:[%s15542_s4 + $0xc0] sm:$0xff] }
0x18b6   :  { %v14229_v10 = vpop.f32.mrb[20].mxu0 }
0x18b7   :  { %v14231_v12 = vpop.f32.mrb[21].mxu0 }
0x18be   :  { %v11753_v14 = vpop.f32.mrb[22].mxu0 }
0x18bf   :  { %v3204_v38 = vadd.f32 %v11753_v14, %v3131_v13  ;;  %v3198_v15 = vpop.f32.mrb[23].mxu0 }
0x18c0   :  { %v3199_v16 = vadd.f32 %v3198_v15, %v3131_v13  ;;  %v10534_v13 = vld [vmem:[%s15542_s4 + $0xc8] sm:$0xff] }
0x18c1   :  { %v12743_v15 = vpack.c.bf16 %v10534_v13, %v10533_v9 }
0x18c2   :  { %v12725_v21 = vpack.c.bf16 %v3204_v38, %v3199_v16  ;;  %v3645_v16 = vrot.slane %v14142_v46, %v13846_v19 }
0x18c4   :  { %12727 = vmatprep.subr.msk.bf16.mxu0 %vm13703_vm2, %v12725_v21 }
0x18c5   :  { %12730 = vmatpush3.bf16.xpose.msk.msra.mxu0 %vm13703_vm2, %v12725_v21  ;;  %v10535_v21 = vld [vmem:[%s15542_s4 + $0xd0] sm:$0xff] }
0x18c6   :  { %11779 = vmatprep.subr.mxu0 %v10558_v56 }
0x18cc   :  { %11770 = vmatmul.mubr.msk.f32.vlgmr.msra.gmra.mrb[24].mxu0 %vm406_vm1, %v3125_v32 }
0x18cd   :  { %11780 = vmatpush3.msra.mxu0 %v10558_v56 }
0x18ce   :  { %11784 = vmatprep.subr.mxu0 %v10557_v8 }
0x199f   :  { %v11771_v22 = vpop.f32.mrb[24].mxu0 }
0x19a0   :  { %v3374_v23 = vmul.f32 0.35355338, %v11771_v22  ;;  %v3364_v24 = vpop.f32.mrb[25].mxu0  ;;  %v10536_v22 = vld [vmem:[%s15542_s4 + $0xd8] sm:$0xff] }
0x19a1   :  { %v3373_v25 = vmul.f32 0.35355338, %v3364_v24 }
0x19a2   :  { %v3376_v26 = vsel %vm13740_vm3, %v3374_v23, -1e+30 }
0x19a3   :  { %v3380_v28 = vsel %vm498_vm4, %v3376_v26, -inf  ;;  %v3375_v18 = vsel %vm13745_vm5, %v3373_v25, -1e+30 }
0x19a4   :  { %3381 = vmax.xlane.f32.xlu1 %v3380_v28  ;;  %v3377_v29 = vsel %vm498_vm4, %v3375_v18, -inf }
0x19a5   :  { %3378 = vmax.xlane.f32.xlu0 %v3377_v29 }
0x1a31   :  { %v3382_v17 = vpop.xlane.xlu1 %3381 }
0x1a32   :  { %v3384_v40 = vsub.f32 %v3376_v26, %v3382_v17  ;;  %v3379_v42 = vpop.xlane.xlu0 %3378  ;;  %v12747_v26 = vpack.c.bf16 %v10536_v22, %v10535_v21 }
0x1a33   :  { %v3383_v32 = vsub.f32 %v3375_v18, %v3379_v42 }
0x1a34   :  { %v3387_v43 = vmul.f32 1.442695, %v3384_v40 }
0x1a35   :  { %v3385_v44 = vmul.f32 1.442695, %v3383_v32 }
0x1a36   :  { %13314 = vpow2.f32 %v3387_v43 }
0x1a37   :  { %13316 = vpow2.f32 %v3385_v44 }
0x1a40   :  { %v13315_v45 = vpop.eup %13314 }
0x1a41   :  { %v13317_v1 = vpop.eup %13316  ;;  %v3392_v49 = vsel %vm498_vm4, %v13315_v45, 0.0 }
0x1a42   :  { %3393 = vadd.xlane.f32.xlu1 %v3392_v49  ;;  %v3389_v52 = vsel %vm498_vm4, %v13317_v1, 0.0 }
0x1a43   :  { %3390 = vadd.xlane.f32.xlu0 %v3389_v52 }
0x1acf   :  { %v3394_v57 = vpop.xlane.xlu1 %3393 }
0x1ad0   :  { %13318 = vrcp.f32 %v3394_v57  ;;  %v3391_v58 = vpop.xlane.xlu0 %3390 }
0x1ad1   :  { %13320 = vrcp.f32 %v3391_v58 }
0x1ada   :  { %v13319_v59 = vpop.eup %13318 }
0x1adb   :  { %v13321_v60 = vpop.eup %13320  ;;  %v3398_v36 = vmul.f32 %v13319_v59, %v13315_v45 }
0x1adc   :  { %v3397_v61 = vmul.f32 %v13321_v60, %v13317_v1 }
0x1ade   :  { %11776 = vmatprep.mubr.msk.f32.mxu1 %vm498_vm4, %v3397_v61 }
0x1adf   :  { %11777 = vmatmul.mubr.msk.f32.vlgmr.msra.gmra.mrb[38].mxu1 %vm498_vm4, %v3398_v36 }
0x1ae0   :  { %12738 = vmatpush3.bf16.msra.mxu1 %v12735_v35  ;;  %11797 = vmatprep.mubr.msk.f32.mxu1 %vm123_vm0, %v14111_v33 }
0x1ae1   :  { %12740 = vmatprep.subr.bf16.mxu1 %v12739_v2 }
0x1ae4   :  { %12742 = vmatpush3.bf16.msra.mxu1 %v12739_v2 }
0x1ae5   :  { %12752 = vmatprep.subr.bf16.mxu1 %v12751_v4 }
0x1ae7   :  { %11798 = vmatmul.mubr.msk.f32.vlgmr.msra.gmra.mrb[40].mxu1 %vm123_vm0, %v14113_v34 }
0x1ae8   :  { %12754 = vmatpush3.bf16.msra.mxu1 %v12751_v4  ;;  %11819 = vmatprep.mubr.msk.f32.mxu1 %vm123_vm0, %v14111_v33 }
0x1ae9   :  { %12756 = vmatprep.subr.bf16.mxu1 %v12755_v7 }
0x1aec   :  { %12758 = vmatpush3.bf16.msra.mxu1 %v12755_v7  ;;  %v12769_v7 = vpack.c.bf16 %v10522_v6, %v10521_v5 }
0x1aef   :  { %11820 = vmatmul.mubr.msk.f32.vlgmr.msra.gmra.mrb[42].mxu1 %vm123_vm0, %v14113_v34 }
0x1bb2   :  { %v11778_v14 = vpop.f32.mrb[38].mxu1 }
0x1bb3   :  { %v3471_v38 = vpop.f32.mrb[39].mxu1 }
0x1bb4   :  { %11781 = vmatprep.mubr.msk.f32.mxu0 %vm406_vm1, %v3471_v38  ;;  %v10523_v38 = vld [vmem:[%s15541_s3 + $0xf0] sm:$0xff] }
0x1bb5   :  { %11782 = vmatmul.mubr.msk.f32.vlgmr.msra.gmra.mrb[26].mxu0 %vm406_vm1, %v11778_v14 }
0x1bb6   :  { %11785 = vmatpush3.msra.mxu0 %v10557_v8  ;;  %11786 = vmatprep.mubr.msk.f32.mxu0 %vm406_vm1, %v14231_v12  ;;  %v3803_v12 = vrot.slane %v14163_v31, %v13846_v19  ;;  %v10559_v8 = vld [vmem:[%s15544_s6 + $0x30] sm:$0xff] }
0x1bb7   :  { %12744 = vmatprep.subr.bf16.mxu0 %v12743_v15 }
0x1bba   :  { %v11799_v23 = vpop.f32.mrb[40].mxu1 }
0x1bbb   :  { %v3718_v24 = vadd.f32 %v11799_v23, %v3645_v16  ;;  %v3712_v25 = vpop.f32.mrb[41].mxu1 }
0x1bbc   :  { %v3713_v17 = vadd.f32 %v3712_v25, %v3645_v16  ;;  %v10554_v25 = vld [vmem:[%s15543_s5 + $0xe8] sm:$0xff] }
0x1bbd   :  { %11787 = vmatmul.mubr.msk.f32.vlgmr.msra.gmra.mrb[26].mxu0 %vm406_vm1, %v14229_v10  ;;  %v3724_v10 = vrot.slane %v14149_v54, %v13846_v19 }
0x1bbe   :  { %12746 = vmatpush3.bf16.msra.mxu0 %v12743_v15  ;;  %11808 = vmatprep.mubr.msk.f32.mxu0 %vm123_vm0, %v14111_v33  ;;  %v10524_v15 = vld [vmem:[%s15541_s3 + $0xf8] sm:$0xff] }
0x1bbf   :  { %12748 = vmatprep.subr.bf16.mxu0 %v12747_v26  ;;  %v12773_v23 = vpack.c.bf16 %v10524_v15, %v10523_v38 }
0x1bc2   :  { %12750 = vmatpush3.bf16.msra.mxu0 %v12747_v26  ;;  %v11821_v28 = vpop.f32.mrb[42].mxu1 }
0x1bc3   :  { %v3876_v18 = vadd.f32 %v11821_v28, %v3803_v12  ;;  %v3870_v29 = vpop.f32.mrb[43].mxu1  ;;  %v10556_v28 = vld [vmem:[%s15543_s5 + $0xf8] sm:$0xff] }
0x1bc4   :  { %v3871_v40 = vadd.f32 %v3870_v29, %v3803_v12  ;;  %v10555_v12 = vld [vmem:[%s15543_s5 + $0xf0] sm:$0xff]  ;;  %v10537_v29 = vld [vmem:[%s15542_s4 + $0xe0] sm:$0xff] }
0x1bc5   :  { %11809 = vmatmul.mubr.msk.f32.vlgmr.msra.gmra.mrb[28].mxu0 %vm123_vm0, %v14113_v34 }
0x1bc6   :  { %v12765_v42 = vpack.c.bf16 %v3876_v18, %v3871_v40  ;;  %11826 = vmatprep.mubr.msk.f32.mxu0 %vm406_vm1, %v3713_v17  ;;  %v12789_v18 = vpack.c.bf16 %v10556_v28, %v10555_v12  ;;  %v10538_v17 = vld [vmem:[%s15542_s4 + $0xe8] sm:$0xff] }
0x1bc7   :  { %v12777_v40 = vpack.c.bf16 %v10538_v17, %v10537_v29  ;;  %v4675_v29 = vrot.slane %v14099_v20, %v13846_v19 }
0x1bc8   :  { %12766 = vmatprep.subr.bf16.mxu1 %v12765_v42 }
0x1bc9   :  { %12768 = vmatpush3.bf16.msra.mxu1 %v12765_v42  ;;  %v10539_v42 = vld [vmem:[%s15542_s4 + $0xf0] sm:$0xff] }
0x1bca   :  { %12770 = vmatprep.subr.bf16.mxu1 %v12769_v7 }
0x1c98   :  { %v11810_v32 = vpop.f32.mrb[28].mxu0 }
0x1c99   :  { %v3797_v43 = vadd.f32 %v11810_v32, %v3724_v10  ;;  %v3791_v44 = vpop.f32.mrb[29].mxu0 }
0x1c9a   :  { %v3792_v45 = vadd.f32 %v3791_v44, %v3724_v10  ;;  %v10540_v10 = vld [vmem:[%s15542_s4 + $0xf8] sm:$0xff] }
0x1c9b   :  { %v12781_v44 = vpack.c.bf16 %v10540_v10, %v10539_v42 }
0x1c9c   :  { %v12759_v1 = vpack.c.bf16 %v3797_v43, %v3792_v45  ;;  %v4159_v45 = vrot.slane %v14142_v46, %v13934_v41  ;;  %v4238_v46 = vrot.slane %v14149_v54, %v13934_v41 }
0x1c9e   :  { %12761 = vmatprep.subr.msk.bf16.mxu0 %vm13703_vm2, %v12759_v1 }
0x1c9f   :  { %12764 = vmatpush3.bf16.xpose.msk.msra.mxu0 %vm13703_vm2, %v12759_v1 }
0x1ca0   :  { %11836 = vmatprep.subr.mxu0 %v10559_v8 }
0x1ca6   :  { %11827 = vmatmul.mubr.msk.f32.vlgmr.msra.gmra.mrb[30].mxu0 %vm406_vm1, %v3718_v24  ;;  %v10553_v24 = vld [vmem:[%s15543_s5 + $0xe0] sm:$0xff] }
0x1ca7   :  { %11837 = vmatpush3.msra.mxu0 %v10559_v8  ;;  %v12785_v26 = vpack.c.bf16 %v10554_v25, %v10553_v24 }
0x1ca8   :  { %12778 = vmatprep.subr.bf16.mxu0 %v12777_v40 }
0x1d79   :  { %v11828_v49 = vpop.f32.mrb[30].mxu0 }
0x1d7a   :  { %v3967_v52 = vmul.f32 0.35355338, %v11828_v49  ;;  %v3957_v50 = vpop.f32.mrb[31].mxu0 }
0x1d7b   :  { %v3966_v55 = vmul.f32 0.35355338, %v3957_v50 }
0x1d7c   :  { %v3969_v35 = vsel %vm13740_vm3, %v3967_v52, -1e+30 }
0x1d7d   :  { %v3973_v56 = vsel %vm498_vm4, %v3969_v35, -inf  ;;  %v3968_v57 = vsel %vm13745_vm5, %v3966_v55, -1e+30  ;;  %v4317_v55 = vrot.slane %v14163_v31, %v13934_v41 }
0x1d7e   :  { %3974 = vmax.xlane.f32.xlu1 %v3973_v56  ;;  %v3970_v58 = vsel %vm498_vm4, %v3968_v57, -inf }
0x1d7f   :  { %3971 = vmax.xlane.f32.xlu0 %v3970_v58 }
0x1e0b   :  { %v3975_v59 = vpop.xlane.xlu1 %3974 }
0x1e0c   :  { %v3977_v51 = vsub.f32 %v3969_v35, %v3975_v59  ;;  %v3972_v53 = vpop.xlane.xlu0 %3971 }
0x1e0d   :  { %v3976_v60 = vsub.f32 %v3968_v57, %v3972_v53 }
0x1e0e   :  { %v3980_v61 = vmul.f32 1.442695, %v3977_v51 }
0x1e0f   :  { %v3978_v36 = vmul.f32 1.442695, %v3976_v60 }
0x1e10   :  { %13322 = vpow2.f32 %v3980_v61 }
0x1e11   :  { %13324 = vpow2.f32 %v3978_v36 }
0x1e1a   :  { %v13323_v2 = vpop.eup %13322 }
0x1e1b   :  { %v13325_v63 = vpop.eup %13324  ;;  %v3985_v3 = vsel %vm498_vm4, %v13323_v2, 0.0 }
0x1e1c   :  { %3986 = vadd.xlane.f32.xlu1 %v3985_v3  ;;  %v3982_v4 = vsel %vm498_vm4, %v13325_v63, 0.0 }
0x1e1d   :  { %3983 = vadd.xlane.f32.xlu0 %v3982_v4 }
0x1ea9   :  { %v3987_v9 = vpop.xlane.xlu1 %3986 }
0x1eaa   :  { %13326 = vrcp.f32 %v3987_v9  ;;  %v3984_v13 = vpop.xlane.xlu0 %3983 }
0x1eab   :  { %13328 = vrcp.f32 %v3984_v13 }
0x1eb4   :  { %v13327_v14 = vpop.eup %13326 }
0x1eb5   :  { %v13329_v16 = vpop.eup %13328  ;;  %v3991_v22 = vmul.f32 %v13327_v14, %v13323_v2 }
0x1eb6   :  { %v3990_v21 = vmul.f32 %v13329_v16, %v13325_v63 }
0x1eb8   :  { %11833 = vmatprep.mubr.msk.f32.mxu1 %vm498_vm4, %v3990_v21  ;;  %v10560_v21 = vld [vmem:[%s15544_s6 + $0x38] sm:$0xff] }
0x1eb9   :  { %11834 = vmatmul.mubr.msk.f32.vlgmr.msra.gmra.mrb[44].mxu1 %vm498_vm4, %v3991_v22 }
0x1eba   :  { %12772 = vmatpush3.bf16.msra.mxu1 %v12769_v7  ;;  %11849 = vmatprep.mubr.msk.f32.mxu1 %vm123_vm0, %v14111_v33 }
0x1ebb   :  { %12774 = vmatprep.subr.bf16.mxu1 %v12773_v23 }
0x1ebe   :  { %12776 = vmatpush3.bf16.msra.mxu1 %v12773_v23 }
0x1ebf   :  { %12786 = vmatprep.subr.bf16.mxu1 %v12785_v26 }
0x1ec1   :  { %11850 = vmatmul.mubr.msk.f32.vlgmr.msra.gmra.mrb[46].mxu1 %vm123_vm0, %v14113_v34 }
0x1ec2   :  { %12788 = vmatpush3.bf16.msra.mxu1 %v12785_v26  ;;  %11871 = vmatprep.mubr.msk.f32.mxu1 %vm123_vm0, %v14111_v33 }
0x1ec3   :  { %12790 = vmatprep.subr.bf16.mxu1 %v12789_v18 }
0x1ec6   :  { %12792 = vmatpush3.bf16.msra.mxu1 %v12789_v18 }
0x1ec9   :  { %11872 = vmatmul.mubr.msk.f32.vlgmr.msra.gmra.mrb[48].mxu1 %vm123_vm0, %v14113_v34 }
0x1f8c   :  { %v11835_v32 = vpop.f32.mrb[44].mxu1 }
0x1f8d   :  { %v4064_v43 = vpop.f32.mrb[45].mxu1 }
0x1f8e   :  { %11838 = vmatprep.mubr.msk.f32.mxu0 %vm406_vm1, %v4064_v43 }
0x1f8f   :  { %11839 = vmatmul.mubr.msk.f32.vlgmr.msra.gmra.mrb[26].mxu0 %vm406_vm1, %v11835_v32 }
0x1f90   :  { %12780 = vmatpush3.bf16.msra.mxu0 %v12777_v40  ;;  %11860 = vmatprep.mubr.msk.f32.mxu0 %vm123_vm0, %v14111_v33 }
0x1f91   :  { %12782 = vmatprep.subr.bf16.mxu0 %v12781_v44 }
0x1f94   :  { %v11851_v1 = vpop.f32.mrb[46].mxu1  ;;  %12784 = vmatpush3.bf16.msra.mxu0 %v12781_v44 }
0x1f95   :  { %v4232_v49 = vadd.f32 %v11851_v1, %v4159_v45  ;;  %v4226_v52 = vpop.f32.mrb[47].mxu1 }
0x1f96   :  { %v4227_v50 = vadd.f32 %v4226_v52, %v4159_v45 }
0x1f97   :  { %11861 = vmatmul.mubr.msk.f32.vlgmr.msra.gmra.mrb[32].mxu0 %vm123_vm0, %v14113_v34 }
0x1f98   :  { %11878 = vmatprep.mubr.msk.f32.mxu0 %vm406_vm1, %v4227_v50 }
0x1f9c   :  { %v11873_v35 = vpop.f32.mrb[48].mxu1 }
0x1f9d   :  { %v4390_v56 = vadd.f32 %v11873_v35, %v4317_v55  ;;  %v4384_v33 = vpop.f32.mrb[49].mxu1 }
0x1f9e   :  { %v4385_v57 = vadd.f32 %v4384_v33, %v4317_v55 }
0x1fa0   :  { %v12799_v58 = vpack.c.bf16 %v4390_v56, %v4385_v57  ;;  %v10617_v57 = vld [vmem:[%s15545_s7 + $0x20] sm:$0xff] }
0x1fa2   :  { %12800 = vmatprep.subr.bf16.mxu1 %v12799_v58 }
0x1fa3   :  { %12802 = vmatpush3.bf16.msra.mxu1 %v12799_v58  ;;  %v10618_v58 = vld [vmem:[%s15545_s7 + $0x28] sm:$0xff] }
0x206a   :  { %v11862_v59 = vpop.f32.mrb[32].mxu0 }
0x206b   :  { %v4311_v51 = vadd.f32 %v11862_v59, %v4238_v46  ;;  %v4305_v53 = vpop.f32.mrb[33].mxu0  ;;  %v10619_v59 = vld [vmem:[%s15545_s7 + $0x30] sm:$0xff] }
0x206c   :  { %v4306_v60 = vadd.f32 %v4305_v53, %v4238_v46  ;;  %v12803_v46 = vpack.c.bf16 %v10618_v58, %v10617_v57 }
0x206e   :  { %v12793_v34 = vpack.c.bf16 %v4311_v51, %v4306_v60  ;;  %12804 = vmatprep.subr.bf16.mxu1 %v12803_v46  ;;  %v10620_v51 = vld [vmem:[%s15545_s7 + $0x38] sm:$0xff] }
0x206f   :  { %v12807_v53 = vpack.c.bf16 %v10620_v51, %v10619_v59 }
0x2070   :  { %12795 = vmatprep.subr.msk.bf16.mxu0 %vm13703_vm2, %v12793_v34 }
0x2071   :  { %12798 = vmatpush3.bf16.xpose.msk.msra.mxu0 %vm13703_vm2, %v12793_v34 }
0x2072   :  { %11888 = vmatprep.subr.mxu0 %v10560_v21 }
0x2078   :  { %11879 = vmatmul.mubr.msk.f32.vlgmr.msra.gmra.mrb[34].mxu0 %vm406_vm1, %v4232_v49 }
0x2079   :  { %11889 = vmatpush3.msra.mxu0 %v10560_v21 }
0x214b   :  { %v11880_v31 = vpop.f32.mrb[34].mxu0 }
0x214c   :  { %v4481_v61 = vmul.f32 0.35355338, %v11880_v31  ;;  %v4471_v36 = vpop.f32.mrb[35].mxu0 }
0x214d   :  { %v4480_v2 = vmul.f32 0.35355338, %v4471_v36 }
0x214e   :  { %v4483_v54 = vsel %vm13740_vm3, %v4481_v61, -1e+30 }
0x214f   :  { %v4487_v63 = vsel %vm498_vm4, %v4483_v54, -inf  ;;  %v4482_v3 = vsel %vm13745_vm5, %v4480_v2, -1e+30 }
0x2150   :  { %4488 = vmax.xlane.f32.xlu1 %v4487_v63  ;;  %v4484_v4 = vsel %vm498_vm4, %v4482_v3, -inf }
0x2151   :  { %4485 = vmax.xlane.f32.xlu0 %v4484_v4 }
0x21dd   :  { %v4489_v5 = vpop.xlane.xlu1 %4488 }
0x21de   :  { %v4491_v6 = vsub.f32 %v4483_v54, %v4489_v5  ;;  %v4486_v7 = vpop.xlane.xlu0 %4485  ;;  %v4707_v54 = vrot.slane %v14099_v20, %v13934_v41 }
0x21df   :  { %v4490_v8 = vsub.f32 %v4482_v3, %v4486_v7 }
0x21e0   :  { %v4494_v9 = vmul.f32 1.442695, %v4491_v6  ;;  %v4713_v6 = vrot.slane %v14099_v20, %v13998_v62  ;;  %v10627_v20 = vld [vmem:[%s15547_s9 + $0x90] sm:$0xff] }
0x21e1   :  { %v4492_v13 = vmul.f32 1.442695, %v4490_v8 }
0x21e2   :  { %13330 = vpow2.f32 %v4494_v9 }
0x21e3   :  { %13332 = vpow2.f32 %v4492_v13 }
0x21ec   :  { %v13331_v14 = vpop.eup %13330 }
0x21ed   :  { %v13333_v38 = vpop.eup %13332  ;;  %v4499_v15 = vsel %vm498_vm4, %v13331_v14, 0.0 }
0x21ee   :  { %4500 = vadd.xlane.f32.xlu1 %v4499_v15  ;;  %v4496_v16 = vsel %vm498_vm4, %v13333_v38, 0.0 }
0x21ef   :  { %4497 = vadd.xlane.f32.xlu0 %v4496_v16  ;;  %v10628_v16 = vld [vmem:[%s15547_s9 + $0x98] sm:$0xff] }
0x21f0   :  { %v12815_v21 = vpack.c.bf16 %v10628_v16, %v10627_v20 }
0x227b   :  { %v4501_v22 = vpop.xlane.xlu1 %4500 }
0x227c   :  { %13334 = vrcp.f32 %v4501_v22  ;;  %v4498_v23 = vpop.xlane.xlu0 %4497  ;;  %v10629_v22 = vld [vmem:[%s15547_s9 + $0xa0] sm:$0xff] }
0x227d   :  { %13336 = vrcp.f32 %v4498_v23  ;;  %v10630_v23 = vld [vmem:[%s15547_s9 + $0xa8] sm:$0xff] }
0x2286   :  { %v13335_v24 = vpop.eup %13334 }
0x2287   :  { %v13337_v25 = vpop.eup %13336  ;;  %v4505_v12 = vmul.f32 %v13335_v24, %v13331_v14  ;;  %v10625_v14 = vld [vmem:[%s15547_s9 + $0x80] sm:$0xff]  ;;  %v12819_v24 = vpack.c.bf16 %v10630_v23, %v10629_v22 }
0x2288   :  { %v4504_v26 = vmul.f32 %v13337_v25, %v13333_v38  ;;  %v10626_v38 = vld [vmem:[%s15547_s9 + $0x88] sm:$0xff]  ;;  %v10631_v25 = vld [vmem:[%s15547_s9 + $0xb0] sm:$0xff] }
0x2289   :  { %v12811_v15 = vpack.c.bf16 %v10626_v38, %v10625_v14 }
0x228a   :  { %11885 = vmatprep.mubr.msk.f32.mxu1 %vm498_vm4, %v4504_v26  ;;  %v10632_v26 = vld [vmem:[%s15547_s9 + $0xb8] sm:$0xff] }
0x228b   :  { %11886 = vmatmul.mubr.msk.f32.vlgmr.msra.gmra.mrb[50].mxu1 %vm498_vm4, %v4505_v12  ;;  %12812 = vmatprep.subr.bf16.mxu0 %v12811_v15  ;;  %v12823_v12 = vpack.c.bf16 %v10632_v26, %v10631_v25 }
0x228c   :  { %12806 = vmatpush3.bf16.msra.mxu1 %v12803_v46 }
0x228d   :  { %12808 = vmatprep.subr.bf16.mxu1 %v12807_v53 }
0x2290   :  { %12810 = vmatpush3.bf16.msra.mxu1 %v12807_v53 }
0x235e   :  { %v11887_v28 = vpop.f32.mrb[50].mxu1 }
0x235f   :  { %v4578_v18 = vpop.f32.mrb[51].mxu1 }
0x2360   :  { %11890 = vmatprep.mubr.msk.f32.mxu0 %vm406_vm1, %v4578_v18  ;;  %v10634_v18 = vld [vmem:[%s15547_s9 + $0xc8] sm:$0xff] }
0x2361   :  { %11891 = vmatmul.mubr.msk.f32.vlgmr.msra.gmra.mrb[26].mxu0 %vm406_vm1, %v11887_v28  ;;  %v10633_v28 = vld [vmem:[%s15547_s9 + $0xc0] sm:$0xff] }
0x2362   :  { %12814 = vmatpush3.bf16.msra.mxu0 %v12811_v15 }
0x2363   :  { %12816 = vmatprep.subr.bf16.mxu0 %v12815_v21 }
0x2366   :  { %12818 = vmatpush3.bf16.msra.mxu0 %v12815_v21 }
0x2367   :  { %12820 = vmatprep.subr.bf16.mxu0 %v12819_v24 }
0x236a   :  { %12822 = vmatpush3.bf16.msra.mxu0 %v12819_v24 }
0x236b   :  { %12824 = vmatprep.subr.bf16.mxu0 %v12823_v12 }
0x236e   :  { %12826 = vmatpush3.bf16.msra.mxu0 %v12823_v12 }
0x2434   :  { %v11892_v17 = vpop.f32.mrb[26].mxu0 }
0x2435   :  { %v4671_v40 = vadd.f32 %v11892_v17, %v14065_v48  ;;  %v4659_v42 = vpop.f32.mrb[27].mxu0  ;;  %v10635_v17 = vld [vmem:[%s15547_s9 + $0xd0] sm:$0xff] }
0x2436   :  { %v4670_v10 = vadd.f32 %v4659_v42, %v14068_v0 }
0x2437   :  { %v14416_v32 = vadd.f32 %v4675_v29, %v4671_v40  ;;  %v10636_v40 = vld [vmem:[%s15547_s9 + $0xd8] sm:$0xff] }
0x2438   :  { %v14418_v43 = vadd.f32 %v4675_v29, %v4670_v10  ;;  %v12827_v29 = vpack.c.bf16 %v10634_v18, %v10633_v28  ;;  %v12831_v42 = vpack.c.bf16 %v10636_v40, %v10635_v17  ;;  %v10637_v10 = vld [vmem:[%s15547_s9 + $0xe0] sm:$0xff] }
0x2439   :  { %v4681_v44 = vsel %vm123_vm0, %v14416_v32, 0.0 }
0x243a   :  { %4682 = vadd.xlane.f32.xlu1 %v4681_v44  ;;  %v4678_v45 = vsel %vm123_vm0, %v14418_v43, 0.0  ;;  %12828 = vmatprep.subr.bf16.mxu0 %v12827_v29  ;;  %v10638_v44 = vld [vmem:[%s15547_s9 + $0xe8] sm:$0xff] }
0x243b   :  { %4679 = vadd.xlane.f32.xlu0 %v4678_v45  ;;  %12830 = vmatpush3.bf16.msra.mxu0 %v12827_v29  ;;  %v12835_v45 = vpack.c.bf16 %v10638_v44, %v10637_v10 }
0x243c   :  { %12832 = vmatprep.subr.bf16.mxu0 %v12831_v42 }
0x243f   :  { %12834 = vmatpush3.bf16.msra.mxu0 %v12831_v42 }
0x2440   :  { %12836 = vmatprep.subr.bf16.mxu0 %v12835_v45 }
0x2443   :  { %12838 = vmatpush3.bf16.msra.mxu0 %v12835_v45 }
0x24c7   :  { %v4683_v1 = vpop.xlane.xlu1 %4682 }
0x24c8   :  { %v4685_v49 = vmul.f32 0.03125, %v4683_v1  ;;  %v4680_v52 = vpop.xlane.xlu0 %4679  ;;  %v10639_v1 = vld [vmem:[%s15547_s9 + $0xf0] sm:$0xff] }
0x24c9   :  { %v4684_v50 = vmul.f32 0.03125, %v4680_v52 }
0x24ca   :  { %v4687_v48 = vsub.f32 %v14416_v32, %v4685_v49  ;;  %v10640_v49 = vld [vmem:[%s15547_s9 + $0xf8] sm:$0xff] }
0x24cb   :  { %v4686_v0 = vsub.f32 %v14418_v43, %v4684_v50  ;;  %v12839_v52 = vpack.c.bf16 %v10640_v49, %v10639_v1  ;;  %v10622_v50 = vld [vmem:[%s15546_s8 + $0x1] ss:$0 sm:$0xff] }
0x24cc   :  { %v4689_v55 = vmul.f32 %v4687_v48, %v4687_v48 }
0x24cd   :  { %v4688_v35 = vmul.f32 %v4686_v0, %v4686_v0  ;;  %12840 = vmatprep.subr.bf16.mxu0 %v12839_v52 }
0x24ce   :  { %v4693_v56 = vsel %vm123_vm0, %v4689_v55, 0.0  ;;  %12842 = vmatpush3.bf16.msra.mxu0 %v12839_v52 }
0x24cf   :  { %4694 = vadd.xlane.f32.xlu1 %v4693_v56  ;;  %v4690_v33 = vsel %vm123_vm0, %v4688_v35, 0.0 }
0x24d0   :  { %4691 = vadd.xlane.f32.xlu0 %v4690_v33 }
0x255c   :  { %v4695_v60 = vpop.xlane.xlu1 %4694 }
0x255d   :  { %v4697_v34 = vmul.f32 0.03125, %v4695_v60  ;;  %v4692_v31 = vpop.xlane.xlu0 %4691 }
0x255e   :  { %v4696_v61 = vmul.f32 0.03125, %v4692_v31 }
0x255f   :  { %v4699_v36 = vadd.f32 1e-05, %v4697_v34 }
0x2560   :  { %v4698_v2 = vadd.f32 1e-05, %v4696_v61 }
0x2561   :  { %13338 = vrsqrt.f32 %v4699_v36 }
0x2562   :  { %13340 = vrsqrt.f32 %v4698_v2 }
0x256b   :  { %v13339_v63 = vpop.eup %13338 }
0x256c   :  { %v13341_v3 = vpop.eup %13340  ;;  %v4703_v4 = vmul.f32 %v13339_v63, %v4687_v48 }
0x256d   :  { %v4702_v5 = vmul.f32 %v13341_v3, %v4686_v0 }
0x256e   :  { %v4709_v7 = vmul.f32 %v4707_v54, %v4703_v4 }
0x256f   :  { %v4708_v8 = vmul.f32 %v4707_v54, %v4702_v5 }
0x2570   :  { %v4715_v13 = vadd.f32 %v4713_v6, %v4709_v7 }
0x2571   :  { %v4714_v9 = vadd.f32 %v4713_v6, %v4708_v8 }
0x2573   :  { %11901 = vmatprep.mubr.msk.f32.mxu1 %vm123_vm0, %v4714_v9 }
0x2574   :  { %11902 = vmatmul.mubr.msk.f32.vlgmr.msra.gmra.mrb[52].mxu1 %vm123_vm0, %v4715_v13 }
0x2647   :  { %v11903_v48 = vpop.f32.mrb[52].mxu1 }
0x2648   :  { %v4807_v0 = vadd.f32 %v11903_v48, %v10622_v50  ;;  %v4801_v55 = vpop.f32.mrb[53].mxu1 }
0x2649   :  { %v4802_v35 = vadd.f32 %v10622_v50, %v4801_v55  ;;  %v13479_v55 = vld [vmem:[%s15539_s1 + $0x8] sm:$0x3f] }
0x264a   :  { %v4813_v56 = vmul.f32 0.70710677, %v4807_v0  ;;  %v4811_v52 = vmul.f32 0.5, %v4807_v0 }
0x264b   :  { %v4812_v33 = vmul.f32 0.70710677, %v4802_v35  ;;  %v4810_v1 = vmul.f32 0.5, %v4802_v35 }
0x264c   :  { %v4815_v57 = vand.u32 2147483647, %v4813_v56  ;;  %vm4855_vm8 = vcmp.lt.f32.partialorder %v4813_v56, 0.0 }
0x264d   :  { %v4814_v58 = vand.u32 2147483647, %v4812_v33  ;;  %vm4854_vm9 = vcmp.lt.f32.partialorder %v4812_v33, 0.0 }
0x264e   :  { %v4817_v46 = vmul.f32 0.3275911, %v4815_v57  ;;  %v4843_v60 = vsub.f32 0.0, %v4815_v57 }
0x264f   :  { %v4816_v59 = vmul.f32 0.3275911, %v4814_v58  ;;  %v4842_v34 = vsub.f32 0.0, %v4814_v58 }
0x2650   :  { %v4819_v51 = vadd.f32 1.0, %v4817_v46  ;;  %v4845_v61 = vmul.f32 %v4843_v60, %v4815_v57  ;;  %v4884_v57 = vrot.slane %v13479_v55, %v14058_v47 }
0x2651   :  { %v4818_v53 = vadd.f32 1.0, %v4816_v59  ;;  %v4844_v54 = vmul.f32 %v4842_v34, %v4814_v58 }
0x2652   :  { %13342 = vrcp.f32 %v4819_v51  ;;  %v4848_v4 = vmul.f32 1.442695, %v4845_v61 }
0x2653   :  { %13344 = vrcp.f32 %v4818_v53  ;;  %v4846_v7 = vmul.f32 1.442695, %v4844_v54 }
0x2654   :  { %13346 = vpow2.f32 %v4848_v4 }
0x2655   :  { %13348 = vpow2.f32 %v4846_v7 }
0x265c   :  { %v13343_v31 = vpop.eup %13342 }
0x265d   :  { %v13345_v36 = vpop.eup %13344  ;;  %v4825_v2 = vmul.f32 1.0614054, %v13343_v31 }
0x265e   :  { %v4824_v63 = vmul.f32 1.0614054, %v13345_v36  ;;  %v13347_v25 = vpop.eup %13346 }
0x265f   :  { %v4827_v3 = vadd.f32 -1.4531521, %v4825_v2  ;;  %v13349_v12 = vpop.eup %13348 }
0x2660   :  { %v4826_v5 = vadd.f32 -1.4531521, %v4824_v63 }
0x2661   :  { %v4829_v6 = vmul.f32 %v13343_v31, %v4827_v3  ;;  %v57_v3 = vld [vmem:[%s15549_s11 + $0x8] sm:$0xff] }
0x2662   :  { %v4828_v8 = vmul.f32 %v13345_v36, %v4826_v5  ;;  %v58_v5 = vld [vmem:[%s15549_s11 + $0x10] sm:$0xff] }
0x2663   :  { %v4831_v9 = vadd.f32 1.4214138, %v4829_v6  ;;  %v59_v6 = vld [vmem:[%s15549_s11 + $0x18] sm:$0xff] }
0x2664   :  { %v4830_v13 = vadd.f32 1.4214138, %v4828_v8  ;;  %v14523_v7 = vpack.c.bf16 %v59_v6, %v58_v5 }
0x2665   :  { %v4833_v14 = vmul.f32 %v13343_v31, %v4831_v9 }
0x2666   :  { %v4832_v38 = vmul.f32 %v13345_v36, %v4830_v13 }
0x2667   :  { %v4835_v15 = vadd.f32 -0.28449672, %v4833_v14 }
0x2668   :  { %v4834_v20 = vadd.f32 -0.28449672, %v4832_v38 }
0x2669   :  { %v4837_v16 = vmul.f32 %v13343_v31, %v4835_v15 }
0x266a   :  { %v4836_v21 = vmul.f32 %v13345_v36, %v4834_v20  ;;  %v14530_v20 = vld [vmem:[%s15548_s10] sm:$0x1f] }
0x266b   :  { %v4839_v22 = vadd.f32 0.2548296, %v4837_v16  ;;  %v14534_v16 = vrot.slane %v14530_v20, %v13637_v37 }
0x266c   :  { %v4838_v23 = vadd.f32 0.2548296, %v4836_v21 }
0x266d   :  { %v4841_v24 = vmul.f32 %v13343_v31, %v4839_v22 }
0x266e   :  { %v4840_v26 = vmul.f32 %v13345_v36, %v4838_v23 }
0x266f   :  { %v4851_v28 = vmul.f32 %v13347_v25, %v4841_v24  ;;  %v14538_v25 = vrot.slane %v14530_v20, %v13645_v39 }
0x2670   :  { %v4850_v18 = vmul.f32 %v13349_v12, %v4840_v26 }
0x2671   :  { %v4853_v29 = vsub.f32 1.0, %v4851_v28 }
0x2672   :  { %v4852_v17 = vsub.f32 1.0, %v4850_v18 }
0x2673   :  { %v4857_v40 = vsub.f32 0.0, %v4853_v29 }
0x2674   :  { %v4856_v42 = vsub.f32 0.0, %v4852_v17 }
0x2675   :  { %v4859_v10 = vsel %vm4855_vm8, %v4857_v40, %v4853_v29  ;;  %v14548_v29 = vrot.slane %v14530_v20, %v13846_v19 }
0x2676   :  { %v4861_v44 = vadd.f32 1.0, %v4859_v10  ;;  %v4858_v45 = vsel %vm4854_vm9, %v4856_v42, %v4852_v17 }
0x2677   :  { %v4860_v49 = vadd.f32 1.0, %v4858_v45 }
0x2678   :  { %v4863_v48 = vmul.f32 %v4861_v44, %v4811_v52 }
0x2679   :  { %v4862_v50 = vmul.f32 %v4860_v49, %v4810_v1 }
0x267b   :  { %11936 = vmatprep.mubr.f32.mxu0 %v4862_v50 }
0x267c   :  { %11937 = vmatmul.mubr.f32.vlgmr.msra.gmra.mrb[36].mxu0 %v4863_v48 }
0x274f   :  { %v11938_v58 = vpop.f32.mrb[36].mxu0 }
0x2750   :  { %v4957_v56 = vadd.f32 %v11938_v58, %v4884_v57  ;;  %v4951_v46 = vpop.f32.mrb[37].mxu0 }
0x2751   :  { %v4952_v59 = vadd.f32 %v4951_v46, %v4884_v57 }
0x2752   :  { %v4961_v33 = vadd.f32 %v4957_v56, %v14416_v32 }
0x2753   :  { %v4960_v35 = vadd.f32 %v4952_v59, %v14418_v43  ;;  %v56_v43 = vld [vmem:[%s15549_s11] sm:$0xff] }
0x2754   :  { %v4965_v0 = vsel %vm123_vm0, %v4961_v33, 0.0  ;;  %v14513_v4 = vpack.c.bf16 %v57_v3, %v56_v43 }
0x2755   :  { %4966 = vadd.xlane.f32.xlu1 %v4965_v0  ;;  %v4962_v51 = vsel %vm123_vm0, %v4960_v35, 0.0 }
0x2756   :  { %4963 = vadd.xlane.f32.xlu0 %v4962_v51  ;;  %12844 = vmatprep.subr.bf16.mxu1 %v14513_v4 }
0x2757   :  { %12846 = vmatpush3.bf16.msra.mxu1 %v14513_v4 }
0x2758   :  { %12848 = vmatprep.subr.bf16.mxu1 %v14523_v7 }
0x275b   :  { %12850 = vmatpush3.bf16.msra.mxu1 %v14523_v7 }
0x27e2   :  { %v4967_v53 = vpop.xlane.xlu1 %4966 }
0x27e3   :  { %v4969_v60 = vmul.f32 0.03125, %v4967_v53  ;;  %v4964_v34 = vpop.xlane.xlu0 %4963 }
0x27e4   :  { %v4968_v31 = vmul.f32 0.03125, %v4964_v34 }
0x27e5   :  { %v4971_v61 = vsub.f32 %v4961_v33, %v4969_v60 }
0x27e6   :  { %v4970_v36 = vsub.f32 %v4960_v35, %v4968_v31 }
0x27e7   :  { %v4973_v2 = vmul.f32 %v4971_v61, %v4971_v61 }
0x27e8   :  { %v4972_v54 = vmul.f32 %v4970_v36, %v4970_v36 }
0x27e9   :  { %v4977_v63 = vsel %vm123_vm0, %v4973_v2, 0.0 }
0x27ea   :  { %4978 = vadd.xlane.f32.xlu1 %v4977_v63  ;;  %v4974_v32 = vsel %vm123_vm0, %v4972_v54, 0.0 }
0x27eb   :  { %4975 = vadd.xlane.f32.xlu0 %v4974_v32 }
0x2877   :  { %v4979_v8 = vpop.xlane.xlu1 %4978 }
0x2878   :  { %v4981_v9 = vmul.f32 0.03125, %v4979_v8  ;;  %v4976_v13 = vpop.xlane.xlu0 %4975 }
0x2879   :  { %v4980_v14 = vmul.f32 0.03125, %v4976_v13 }
0x287a   :  { %v4983_v38 = vadd.f32 1e-05, %v4981_v9 }
0x287b   :  { %v4982_v15 = vadd.f32 1e-05, %v4980_v14 }
0x287c   :  { %13350 = vrsqrt.f32 %v4983_v38 }
0x287d   :  { %13352 = vrsqrt.f32 %v4982_v15 }
0x2886   :  { %v13351_v21 = vpop.eup %13350 }
0x2887   :  { %v13353_v22 = vpop.eup %13352  ;;  %v4987_v23 = vmul.f32 %v13351_v21, %v4971_v61 }
0x2888   :  { %v4986_v24 = vmul.f32 %v13353_v22, %v4970_v36 }
0x2889   :  { %v4993_v26 = vmul.f32 %v14534_v16, %v4987_v23 }
0x288a   :  { %v4992_v12 = vmul.f32 %v14534_v16, %v4986_v24 }
0x288b   :  { %v4999_v18 = vadd.f32 %v14538_v25, %v4993_v26 }
0x288c   :  { %v4998_v28 = vadd.f32 %v14538_v25, %v4992_v12 }
0x288e   :  { %11947 = vmatprep.mubr.msk.f32.mxu1 %vm123_vm0, %v4998_v28 }
0x288f   :  { %11948 = vmatmul.mubr.msk.f32.vlgmr.msra.gmra.mrb[54].mxu1 %vm123_vm0, %v4999_v18 }
0x2962   :  { %v11949_v17 = vpop.f32.mrb[54].mxu1 }
0x2963   :  { %v5082_v40 = vadd.f32 %v11949_v17, %v14548_v29  ;;  %v5076_v42 = vpop.f32.mrb[55].mxu1 }
0x2964   :  { %v5077_v10 = vadd.f32 %v5076_v42, %v14548_v29 }
0x2965   :  { %v5088_v44 = vmul.f32 0.70710677, %v5082_v40  ;;  %v5086_v28 = vmul.f32 0.5, %v5082_v40 }
0x2966   :  { %v5087_v45 = vmul.f32 0.70710677, %v5077_v10  ;;  %v5085_v42 = vmul.f32 0.5, %v5077_v10 }
0x2967   :  { %v5090_v1 = vand.u32 2147483647, %v5088_v44  ;;  %vm5130_vm10 = vcmp.lt.f32.partialorder %v5088_v44, 0.0  ;;  %v14561_v44 = vld [vmem:[%s15538_s0 + $0x10] sm:$0xff] }
0x2968   :  { %v5089_v49 = vand.u32 2147483647, %v5087_v45  ;;  %vm5129_vm11 = vcmp.lt.f32.partialorder %v5087_v45, 0.0  ;;  %v5325_v45 = vsel %vm123_vm0, %v14561_v44, 0.0 }
0x2969   :  { %v5092_v52 = vmul.f32 0.3275911, %v5090_v1  ;;  %v5118_v57 = vsub.f32 0.0, %v5090_v1 }
0x296a   :  { %v5091_v50 = vmul.f32 0.3275911, %v5089_v49  ;;  %v5117_v58 = vsub.f32 0.0, %v5089_v49 }
0x296b   :  { %v5094_v48 = vadd.f32 1.0, %v5092_v52  ;;  %v5120_v46 = vmul.f32 %v5118_v57, %v5090_v1 }
0x296c   :  { %v5093_v55 = vadd.f32 1.0, %v5091_v50  ;;  %v5119_v33 = vmul.f32 %v5117_v58, %v5089_v49  ;;  %v14555_v50 = vld [vmem:[%s15538_s0 + $0x18] sm:$0xff] }
0x296d   :  { %13354 = vrcp.f32 %v5094_v48  ;;  %v5123_v53 = vmul.f32 1.442695, %v5120_v46  ;;  %v5328_v10 = vsel %vm123_vm0, %v14555_v50, 0.0 }
0x296e   :  { %13356 = vrcp.f32 %v5093_v55  ;;  %v5121_v34 = vmul.f32 1.442695, %v5119_v33 }
0x296f   :  { %13358 = vpow2.f32 %v5123_v53 }
0x2970   :  { %13360 = vpow2.f32 %v5121_v34 }
0x2977   :  { %v13355_v56 = vpop.eup %13354 }
0x2978   :  { %v13357_v59 = vpop.eup %13356  ;;  %v5100_v35 = vmul.f32 1.0614054, %v13355_v56 }
0x2979   :  { %v5099_v0 = vmul.f32 1.0614054, %v13357_v59  ;;  %v13359_v13 = vpop.eup %13358 }
0x297a   :  { %v5102_v51 = vadd.f32 -1.4531521, %v5100_v35  ;;  %v13361_v38 = vpop.eup %13360 }
0x297b   :  { %v5101_v60 = vadd.f32 -1.4531521, %v5099_v0 }
0x297c   :  { %v5104_v31 = vmul.f32 %v13355_v56, %v5102_v51 }
0x297d   :  { %v5103_v61 = vmul.f32 %v13357_v59, %v5101_v60 }
0x297e   :  { %v5106_v36 = vadd.f32 1.4214138, %v5104_v31 }
0x297f   :  { %v5105_v2 = vadd.f32 1.4214138, %v5103_v61 }
0x2980   :  { %v5108_v54 = vmul.f32 %v13355_v56, %v5106_v36 }
0x2981   :  { %v5107_v63 = vmul.f32 %v13357_v59, %v5105_v2 }
0x2982   :  { %v5110_v32 = vadd.f32 -0.28449672, %v5108_v54 }
0x2983   :  { %v5109_v43 = vadd.f32 -0.28449672, %v5107_v63 }
0x2984   :  { %v5112_v3 = vmul.f32 %v13355_v56, %v5110_v32 }
0x2985   :  { %v5111_v5 = vmul.f32 %v13357_v59, %v5109_v43  ;;  %v60_v43 = vld [vmem:[%s15550_s12] sm:$0xff] }
0x2986   :  { %v5114_v6 = vadd.f32 0.2548296, %v5112_v3  ;;  %v61_v3 = vld [vmem:[%s15550_s12 + $0x8] sm:$0xff] }
0x2987   :  { %v5113_v8 = vadd.f32 0.2548296, %v5111_v5  ;;  %v14596_v5 = vpack.c.bf16 %v61_v3, %v60_v43 }
0x2988   :  { %v5116_v9 = vmul.f32 %v13355_v56, %v5114_v6  ;;  %v62_v6 = vld [vmem:[%s15550_s12 + $0x10] sm:$0xff] }
0x2989   :  { %v5115_v14 = vmul.f32 %v13357_v59, %v5113_v8  ;;  %12852 = vmatprep.subr.bf16.mxu1 %v14596_v5  ;;  %v63_v8 = vld [vmem:[%s15550_s12 + $0x18] sm:$0xff] }
0x298a   :  { %v5126_v15 = vmul.f32 %v13359_v13, %v5116_v9  ;;  %12854 = vmatpush3.bf16.msra.mxu1 %v14596_v5  ;;  %v14606_v9 = vpack.c.bf16 %v63_v8, %v62_v6  ;;  %v5305_v13 = vld [vmem:[%s15543_s5] sm:$0xff] }
0x298b   :  { %v5125_v21 = vmul.f32 %v13361_v38, %v5115_v14  ;;  %v5306_v14 = vld [vmem:[%s15543_s5 + $0x8] sm:$0xff]  ;;  %v5289_v8 = vld [vmem:[%s15542_s4] sm:$0xff] }
0x298c   :  { %v5128_v22 = vsub.f32 1.0, %v5126_v15  ;;  %v12875_v38 = vpack.c.bf16 %v5306_v14, %v5305_v13  ;;  %12856 = vmatprep.subr.bf16.mxu1 %v14606_v9  ;;  %v5273_v15 = vld [vmem:[%s15541_s3] sm:$0xff] }
0x298d   :  { %v5127_v23 = vsub.f32 1.0, %v5125_v21  ;;  %v5274_v21 = vld [vmem:[%s15541_s3 + $0x8] sm:$0xff] }
0x298e   :  { %v5132_v24 = vsub.f32 0.0, %v5128_v22  ;;  %12858 = vmatpush3.bf16.msra.mxu1 %v14606_v9  ;;  %12876 = vmatprep.subr.bf16.mxu0 %v12875_v38 }
0x298f   :  { %v5131_v26 = vsub.f32 0.0, %v5127_v23  ;;  %12878 = vmatpush3.bf16.msra.mxu0 %v12875_v38  ;;  %v5291_v38 = vld [vmem:[%s15542_s4 + $0x10] sm:$0xff] }
0x2990   :  { %v5134_v12 = vsel %vm5130_vm10, %v5132_v24, %v5128_v22  ;;  %v12859_v22 = vpack.c.bf16 %v5274_v21, %v5273_v15  ;;  %v5308_v24 = vld [vmem:[%s15543_s5 + $0x18] sm:$0xff] }
0x2991   :  { %v5136_v18 = vadd.f32 1.0, %v5134_v12  ;;  %v5133_v17 = vsel %vm5129_vm11, %v5131_v26, %v5127_v23  ;;  %v5307_v23 = vld [vmem:[%s15543_s5 + $0x10] sm:$0xff]  ;;  %v5292_v15 = vld [vmem:[%s15542_s4 + $0x18] sm:$0xff] }
0x2992   :  { %v5135_v1 = vadd.f32 1.0, %v5133_v17  ;;  %12860 = vmatprep.subr.bf16.mxu1 %v12859_v22  ;;  %v12879_v26 = vpack.c.bf16 %v5308_v24, %v5307_v23  ;;  %v12871_v21 = vpack.c.bf16 %v5292_v15, %v5291_v38  ;;  %v14695_v23 = vld [vmem:[%s15540_s2 + $0x8] sm:$0xf] }
0x2993   :  { %v5138_v49 = vmul.f32 %v5136_v18, %v5086_v28 }
0x2994   :  { %v5137_v52 = vmul.f32 %v5135_v1, %v5085_v42  ;;  %12880 = vmatprep.subr.bf16.mxu0 %v12879_v26 }
0x2995   :  { %v5142_v48 = vsel %vm123_vm0, %v5138_v49, 0.0  ;;  %12882 = vmatpush3.bf16.msra.mxu0 %v12879_v26 }
0x2996   :  { %5143 = vadd.xlane.f32.xlu1 %v5142_v48  ;;  %v5139_v40 = vsel %vm123_vm0, %v5137_v52, 0.0 }
0x2997   :  { %5140 = vadd.xlane.f32.xlu0 %v5139_v40 }
0x299a   :  { %5329 = vadd.xlane.f32.xlu1 %v5328_v10 }
0x299b   :  { %5326 = vadd.xlane.f32.xlu0 %v5325_v45 }
0x2a23   :  { %v5144_v55 = vpop.xlane.xlu1 %5143 }
0x2a24   :  { %v5146_v57 = vmul.f32 0.03125, %v5144_v55  ;;  %v5141_v58 = vpop.xlane.xlu0 %5140  ;;  %v14630_v55 = vrot.slane %v14530_v20, %v13934_v41 }
0x2a25   :  { %v5145_v56 = vmul.f32 0.03125, %v5141_v58  ;;  %v14635_v58 = vld [vmem:[%s15539_s1] sm:$0x3f] }
0x2a26   :  { %v14568_v46 = vsub.f32 %v5138_v49, %v5146_v57 }
0x2a27   :  { %v14570_v59 = vsub.f32 %v5137_v52, %v5145_v56  ;;  %v5330_v33 = vpop.xlane.xlu1 %5329 }
0x2a28   :  { %v5332_v35 = vmul.f32 0.03125, %v5330_v33  ;;  %v5327_v0 = vpop.xlane.xlu0 %5326  ;;  %v5150_v51 = vmul.f32 %v14568_v46, %v14568_v46 }
0x2a29   :  { %v5331_v53 = vmul.f32 0.03125, %v5327_v0  ;;  %v5149_v60 = vmul.f32 %v14570_v59, %v14570_v59  ;;  %v14641_v0 = vrot.slane %v14530_v20, %v13998_v62 }
0x2a2a   :  { %v14577_v34 = vsub.f32 %v14555_v50, %v5332_v35  ;;  %v5154_v31 = vsel %vm123_vm0, %v5150_v51, 0.0  ;;  %v5354_v51 = vrot.slane %v14635_v58, %v13637_v37 }
0x2a2b   :  { %v14581_v61 = vsub.f32 %v14561_v44, %v5331_v53  ;;  %5155 = vadd.xlane.f32.xlu1 %v5154_v31  ;;  %v5151_v36 = vsel %vm123_vm0, %v5149_v60, 0.0 }
0x2a2c   :  { %5152 = vadd.xlane.f32.xlu0 %v5151_v36  ;;  %v5336_v2 = vmul.f32 %v14577_v34, %v14577_v34  ;;  %v5275_v36 = vld [vmem:[%s15541_s3 + $0x10] sm:$0xff] }
0x2a2d   :  { %v5335_v54 = vmul.f32 %v14581_v61, %v14581_v61 }
0x2a2e   :  { %v5340_v63 = vsel %vm123_vm0, %v5336_v2, 0.0  ;;  %v5360_v2 = vrot.slane %v14635_v58, %v13645_v39 }
0x2a2f   :  { %5341 = vadd.xlane.f32.xlu1 %v5340_v63  ;;  %v5337_v32 = vsel %vm123_vm0, %v5335_v54, 0.0 }
0x2a30   :  { %5338 = vadd.xlane.f32.xlu0 %v5337_v32 }
0x2ab8   :  { %v5156_v12 = vpop.xlane.xlu1 %5155 }
0x2ab9   :  { %v5158_v28 = vmul.f32 0.03125, %v5156_v12  ;;  %v5153_v18 = vpop.xlane.xlu0 %5152 }
0x2aba   :  { %v5157_v17 = vmul.f32 0.03125, %v5153_v18 }
0x2abb   :  { %v5160_v42 = vadd.f32 1e-05, %v5158_v28  ;;  %v5530_v28 = vrot.slane %v14695_v23, %v13637_v37 }
0x2abc   :  { %v5159_v1 = vadd.f32 1e-05, %v5157_v17  ;;  %v5342_v49 = vpop.xlane.xlu1 %5341  ;;  %v14702_v17 = vld [vmem:[%s15540_s2] sm:$0xf] }
0x2abd   :  { %13362 = vrsqrt.f32 %v5160_v42  ;;  %v5344_v52 = vmul.f32 0.03125, %v5342_v49  ;;  %v5339_v48 = vpop.xlane.xlu0 %5338 }
0x2abe   :  { %13364 = vrsqrt.f32 %v5159_v1  ;;  %v5343_v40 = vmul.f32 0.03125, %v5339_v48  ;;  %v5366_v48 = vrot.slane %v14702_v17, %v13637_v37 }
0x2abf   :  { %v5346_v10 = vadd.f32 1e-05, %v5344_v52 }
0x2ac0   :  { %v5345_v45 = vadd.f32 1e-05, %v5343_v40 }
0x2ac1   :  { %13366 = vrsqrt.f32 %v5346_v10 }
0x2ac2   :  { %13368 = vrsqrt.f32 %v5345_v45 }
0x2ac7   :  { %v13363_v57 = vpop.eup %13362 }
0x2ac8   :  { %v13365_v56 = vpop.eup %13364  ;;  %v5164_v33 = vmul.f32 %v13363_v57, %v14568_v46  ;;  %v5276_v46 = vld [vmem:[%s15541_s3 + $0x18] sm:$0xff] }
0x2ac9   :  { %v5163_v35 = vmul.f32 %v13365_v56, %v14570_v59  ;;  %v12863_v3 = vpack.c.bf16 %v5276_v46, %v5275_v36  ;;  %v14709_v56 = vld [vmem:[%s15540_s2 + $0x4] sm:$0xf] }
0x2aca   :  { %v5170_v53 = vmul.f32 %v14630_v55, %v5164_v33  ;;  %v5451_v33 = vrot.slane %v14709_v56, %v13637_v37 }
0x2acb   :  { %v13367_v60 = vpop.eup %13366  ;;  %v5169_v31 = vmul.f32 %v14630_v55, %v5163_v35 }
0x2acc   :  { %v13369_v59 = vpop.eup %13368  ;;  %v5350_v20 = vmul.f32 %v13367_v60, %v14577_v34  ;;  %v5176_v43 = vadd.f32 %v14641_v0, %v5170_v53  ;;  %v5290_v34 = vld [vmem:[%s15542_s4 + $0x8] sm:$0xff]  ;;  %v5277_v60 = vld [vmem:[%s15541_s3 + $0x20] sm:$0xff] }
0x2acd   :  { %v5349_v54 = vmul.f32 %v13369_v59, %v14581_v61  ;;  %v5175_v63 = vadd.f32 %v14641_v0, %v5169_v31  ;;  %v12867_v14 = vpack.c.bf16 %v5290_v34, %v5289_v8  ;;  %v5278_v31 = vld [vmem:[%s15541_s3 + $0x28] sm:$0xff]  ;;  %v5312_v8 = vld [vmem:[%s15543_s5 + $0x38] sm:$0xff] }
0x2ace   :  { %v5356_v32 = vmul.f32 %v5354_v51, %v5350_v20  ;;  %v12893_v59 = vpack.c.bf16 %v5278_v31, %v5277_v60  ;;  %v5279_v20 = vld [vmem:[%s15541_s3 + $0x30] sm:$0xff] }
0x2acf   :  { %v5355_v6 = vmul.f32 %v5354_v51, %v5349_v54  ;;  %11958 = vmatprep.mubr.msk.f32.mxu1 %vm123_vm0, %v5175_v63 }
0x2ad0   :  { %11959 = vmatmul.mubr.msk.f32.vlgmr.msra.gmra.mrb[56].mxu1 %vm123_vm0, %v5176_v43  ;;  %v14669_v13 = vadd.f32 %v5360_v2, %v5356_v32  ;;  %v5309_v32 = vld [vmem:[%s15543_s5 + $0x20] sm:$0xff]  ;;  %v5310_v43 = vld [vmem:[%s15543_s5 + $0x28] sm:$0xff] }
0x2ad1   :  { %v14667_v61 = vadd.f32 %v5360_v2, %v5355_v6  ;;  %12862 = vmatpush3.bf16.msra.mxu1 %v12859_v22  ;;  %v10643_v22 = vld [vmem:[%s15551_s13] ss:$0 sm:$0xff]  ;;  %v5280_v2 = vld [vmem:[%s15541_s3 + $0x38] sm:$0xff]  ;;  %v5311_v6 = vld [vmem:[%s15543_s5 + $0x30] sm:$0xff] }
0x2ad2   :  { %12864 = vmatprep.subr.bf16.mxu1 %v12863_v3  ;;  %v12897_v63 = vpack.c.bf16 %v5280_v2, %v5279_v20  ;;  %v12913_v34 = vpack.c.bf16 %v5312_v8, %v5311_v6  ;;  %v5293_v20 = vld [vmem:[%s15542_s4 + $0x20] sm:$0xff]  ;;  %v5294_v2 = vld [vmem:[%s15542_s4 + $0x28] sm:$0xff]  ;;  %v5296_v6 = vld [vmem:[%s15542_s4 + $0x38] sm:$0xff] }
0x2ad3   :  { %11969 = vmatprep.mubr.msk.f32.mxu1 %vm123_vm0, %v14667_v61  ;;  %11991 = vmatprep.mubr.msk.f32.mxu0 %vm123_vm0, %v14667_v61 }
0x2ad4   :  { %11992 = vmatmul.mubr.msk.f32.vlgmr.msra.gmra.mrb[38].mxu0 %vm123_vm0, %v14669_v13 }
0x2ad5   :  { %12866 = vmatpush3.bf16.msra.mxu1 %v12863_v3  ;;  %v12909_v3 = vpack.c.bf16 %v5310_v43, %v5309_v32 }
0x2ad6   :  { %12868 = vmatprep.subr.bf16.mxu1 %v12867_v14 }
0x2ad8   :  { %11970 = vmatmul.mubr.msk.f32.vlgmr.msra.gmra.mrb[58].mxu1 %vm123_vm0, %v14669_v13 }
0x2ad9   :  { %12870 = vmatpush3.bf16.msra.mxu1 %v12867_v14  ;;  %11980 = vmatprep.mubr.msk.f32.mxu1 %vm123_vm0, %v14667_v61 }
0x2ada   :  { %12872 = vmatprep.subr.bf16.mxu1 %v12871_v21 }
0x2add   :  { %12874 = vmatpush3.bf16.msra.mxu1 %v12871_v21 }
0x2ae0   :  { %11981 = vmatmul.mubr.msk.f32.vlgmr.msra.gmra.mrb[60].mxu1 %vm123_vm0, %v14669_v13 }
0x2ba3   :  { %v11960_v24 = vpop.f32.mrb[56].mxu1 }
0x2ba4   :  { %v5261_v26 = vadd.f32 %v11960_v24, %v10643_v22  ;;  %v5255_v12 = vpop.f32.mrb[57].mxu1 }
0x2ba5   :  { %v5256_v18 = vadd.f32 %v10643_v22, %v5255_v12 }
0x2ba6   :  { %5265 = vst [vmem:[#allocation2 + $0x8] sm:$0xff] %v5261_v26 }
0x2ba7   :  { %5264 = vst [vmem:[#allocation2] sm:$0xff] %v5256_v18  ;;  %v11993_v42 = vpop.f32.mrb[38].mxu0 }
0x2ba8   :  { %v5603_v1 = vadd.f32 %v11993_v42, %v5530_v28  ;;  %v5597_v49 = vpop.f32.mrb[39].mxu0 }
0x2ba9   :  { %v5598_v52 = vadd.f32 %v5597_v49, %v5530_v28  ;;  %v5803_v28 = vrot.slane %v14702_v17, %v13645_v39  ;;  %v5961_v49 = vrot.slane %v14695_v23, %v13645_v39 }
0x2bab   :  { %v12889_v40 = vpack.c.bf16 %v5603_v1, %v5598_v52  ;;  %v11971_v10 = vpop.f32.mrb[58].mxu1 }
0x2bac   :  { %v5439_v45 = vpop.f32.mrb[59].mxu1  ;;  %v5445_v54 = vadd.f32 %v11971_v10, %v5366_v48 }
0x2bad   :  { %v5440_v57 = vadd.f32 %v5439_v45, %v5366_v48  ;;  %12890 = vmatprep.subr.bf16.mxu0 %v12889_v40 }
0x2bae   :  { %12892 = vmatpush3.bf16.msra.mxu0 %v12889_v40 }
0x2baf   :  { %11998 = vmatprep.mubr.msk.f32.mxu1 %vm406_vm1, %v5440_v57 }
0x2bb3   :  { %v11982_v35 = vpop.f32.mrb[60].mxu1 }
0x2bb4   :  { %v5524_v51 = vadd.f32 %v11982_v35, %v5451_v33  ;;  %v5518_v53 = vpop.f32.mrb[61].mxu1 }
0x2bb5   :  { %v5519_v36 = vadd.f32 %v5518_v53, %v5451_v33 }
0x2bb7   :  { %v12883_v46 = vpack.c.bf16 %v5524_v51, %v5519_v36 }
0x2bb9   :  { %12885 = vmatprep.subr.msk.bf16.mxu1 %vm13703_vm2, %v12883_v46 }
0x2bba   :  { %12888 = vmatpush3.bf16.xpose.msk.msra.mxu1 %vm13703_vm2, %v12883_v46 }
0x2bbb   :  { %12894 = vmatprep.subr.bf16.mxu1 %v12893_v59 }
0x2bc1   :  { %11999 = vmatmul.mubr.msk.f32.vlgmr.msra.gmra.mrb[62].mxu1 %vm406_vm1, %v5445_v54  ;;  %v12901_v54 = vpack.c.bf16 %v5294_v2, %v5293_v20  ;;  %v5281_v2 = vld [vmem:[%s15541_s3 + $0x40] sm:$0xff] }
0x2bc2   :  { %12896 = vmatpush3.bf16.msra.mxu1 %v12893_v59  ;;  %12016 = vmatprep.mubr.msk.f32.mxu1 %vm123_vm0, %v14667_v61 }
0x2bc3   :  { %12898 = vmatprep.subr.bf16.mxu1 %v12897_v63  ;;  %12902 = vmatprep.subr.bf16.mxu0 %v12901_v54 }
0x2bc6   :  { %12900 = vmatpush3.bf16.msra.mxu1 %v12897_v63 }
0x2bc7   :  { %12910 = vmatprep.subr.bf16.mxu1 %v12909_v3 }
0x2bc9   :  { %12017 = vmatmul.mubr.msk.f32.vlgmr.msra.gmra.mrb[64].mxu1 %vm123_vm0, %v14669_v13 }
0x2bca   :  { %12912 = vmatpush3.bf16.msra.mxu1 %v12909_v3  ;;  %12038 = vmatprep.mubr.msk.f32.mxu1 %vm123_vm0, %v14667_v61  ;;  %v5295_v3 = vld [vmem:[%s15542_s4 + $0x30] sm:$0xff] }
0x2bcb   :  { %12914 = vmatprep.subr.bf16.mxu1 %v12913_v34 }
0x2bce   :  { %12916 = vmatpush3.bf16.msra.mxu1 %v12913_v34 }
0x2bd1   :  { %12039 = vmatmul.mubr.msk.f32.vlgmr.msra.gmra.mrb[66].mxu1 %vm123_vm0, %v14669_v13 }
0x2c94   :  { %v12000_v14 = vpop.f32.mrb[62].mxu1 }
0x2c95   :  { %v5694_v38 = vmul.f32 0.35355338, %v12000_v14  ;;  %v5684_v15 = vpop.f32.mrb[63].mxu1 }
0x2c96   :  { %v5693_v21 = vmul.f32 0.35355338, %v5684_v15 }
0x2c97   :  { %v5696_v22 = vsel %vm13740_vm3, %v5694_v38, -1e+30  ;;  %v12905_v38 = vpack.c.bf16 %v5296_v6, %v5295_v3 }
0x2c98   :  { %v5700_v24 = vsel %vm498_vm4, %v5696_v22, -inf  ;;  %v5695_v26 = vsel %vm13745_vm5, %v5693_v21, -1e+30 }
0x2c99   :  { %5701 = vmax.xlane.f32.xlu1 %v5700_v24  ;;  %v5697_v12 = vsel %vm498_vm4, %v5695_v26, -inf  ;;  %v5882_v24 = vrot.slane %v14709_v56, %v13645_v39 }
0x2c9a   :  { %5698 = vmax.xlane.f32.xlu0 %v5697_v12 }
0x2c9c   :  { %v12018_v18 = vpop.f32.mrb[64].mxu1 }
0x2c9d   :  { %v5876_v42 = vadd.f32 %v12018_v18, %v5803_v28  ;;  %v5870_v1 = vpop.f32.mrb[65].mxu1 }
0x2c9e   :  { %v5871_v15 = vadd.f32 %v5870_v1, %v5803_v28 }
0x2ca4   :  { %v12040_v52 = vpop.f32.mrb[66].mxu1 }
0x2ca5   :  { %v6034_v48 = vadd.f32 %v12040_v52, %v5961_v49  ;;  %v6028_v40 = vpop.f32.mrb[67].mxu1 }
0x2ca6   :  { %v6029_v10 = vadd.f32 %v6028_v40, %v5961_v49 }
0x2ca8   :  { %v12923_v45 = vpack.c.bf16 %v6034_v48, %v6029_v10 }
0x2caa   :  { %12924 = vmatprep.subr.bf16.mxu1 %v12923_v45 }
0x2cab   :  { %12926 = vmatpush3.bf16.msra.mxu1 %v12923_v45 }
0x2d26   :  { %v5702_v57 = vpop.xlane.xlu1 %5701 }
0x2d27   :  { %v5704_v33 = vsub.f32 %v5696_v22, %v5702_v57  ;;  %v5699_v35 = vpop.xlane.xlu0 %5698 }
0x2d28   :  { %v5703_v51 = vsub.f32 %v5695_v26, %v5699_v35 }
0x2d29   :  { %v5707_v53 = vmul.f32 1.442695, %v5704_v33 }
0x2d2a   :  { %v5705_v60 = vmul.f32 1.442695, %v5703_v51 }
0x2d2b   :  { %13370 = vpow2.f32 %v5707_v53 }
0x2d2c   :  { %13372 = vpow2.f32 %v5705_v60 }
0x2d35   :  { %v13371_v31 = vpop.eup %13370 }
0x2d36   :  { %v13373_v36 = vpop.eup %13372  ;;  %v5712_v46 = vsel %vm498_vm4, %v13371_v31, 0.0 }
0x2d37   :  { %5713 = vadd.xlane.f32.xlu1 %v5712_v46  ;;  %v5709_v59 = vsel %vm498_vm4, %v13373_v36, 0.0 }
0x2d38   :  { %5710 = vadd.xlane.f32.xlu0 %v5709_v59 }
0x2dc4   :  { %v5714_v63 = vpop.xlane.xlu1 %5713 }
0x2dc5   :  { %13374 = vrcp.f32 %v5714_v63  ;;  %v5711_v32 = vpop.xlane.xlu0 %5710 }
0x2dc6   :  { %13376 = vrcp.f32 %v5711_v32  ;;  %v5322_v32 = vld [vmem:[%s15544_s6 + $0x8] sm:$0xff] }
0x2dcf   :  { %v13375_v43 = vpop.eup %13374 }
0x2dd0   :  { %v13377_v8 = vpop.eup %13376  ;;  %v5718_v14 = vmul.f32 %v13375_v43, %v13371_v31 }
0x2dd1   :  { %v5717_v34 = vmul.f32 %v13377_v8, %v13373_v36  ;;  %v5283_v8 = vld [vmem:[%s15541_s3 + $0x50] sm:$0xff] }
0x2dd3   :  { %12005 = vmatprep.mubr.msk.f32.mxu0 %vm498_vm4, %v5717_v34  ;;  %v5284_v34 = vld [vmem:[%s15541_s3 + $0x58] sm:$0xff] }
0x2dd4   :  { %12006 = vmatmul.mubr.msk.f32.vlgmr.msra.gmra.mrb[40].mxu0 %vm498_vm4, %v5718_v14 }
0x2dd5   :  { %12904 = vmatpush3.bf16.msra.mxu0 %v12901_v54  ;;  %12027 = vmatprep.mubr.msk.f32.mxu0 %vm123_vm0, %v14667_v61  ;;  %v5282_v54 = vld [vmem:[%s15541_s3 + $0x48] sm:$0xff] }
0x2dd6   :  { %12906 = vmatprep.subr.bf16.mxu0 %v12905_v38  ;;  %v12927_v63 = vpack.c.bf16 %v5282_v54, %v5281_v2 }
0x2dd8   :  { %12928 = vmatprep.subr.bf16.mxu1 %v12927_v63 }
0x2dd9   :  { %12908 = vmatpush3.bf16.msra.mxu0 %v12905_v38 }
0x2ddc   :  { %12028 = vmatmul.mubr.msk.f32.vlgmr.msra.gmra.mrb[42].mxu0 %vm123_vm0, %v14669_v13 }
0x2ddd   :  { %12045 = vmatprep.mubr.msk.f32.mxu0 %vm406_vm1, %v5871_v15 }
0x2ea7   :  { %v14782_v21 = vpop.f32.mrb[40].mxu0 }
0x2ea8   :  { %v14784_v22 = vpop.f32.mrb[41].mxu0 }
0x2eaf   :  { %v12029_v26 = vpop.f32.mrb[42].mxu0 }
0x2eb0   :  { %v5955_v12 = vadd.f32 %v12029_v26, %v5882_v24  ;;  %v5949_v18 = vpop.f32.mrb[43].mxu0  ;;  %v5313_v26 = vld [vmem:[%s15543_s5 + $0x40] sm:$0xff] }
0x2eb1   :  { %v5950_v49 = vadd.f32 %v5949_v18, %v5882_v24  ;;  %v12931_v24 = vpack.c.bf16 %v5284_v34, %v5283_v8 }
0x2eb3   :  { %v12917_v52 = vpack.c.bf16 %v5955_v12, %v5950_v49  ;;  %v5314_v12 = vld [vmem:[%s15543_s5 + $0x48] sm:$0xff]  ;;  %v5315_v49 = vld [vmem:[%s15543_s5 + $0x50] sm:$0xff] }
0x2eb4   :  { %v12943_v18 = vpack.c.bf16 %v5314_v12, %v5313_v26 }
0x2eb5   :  { %12919 = vmatprep.subr.msk.bf16.mxu0 %vm13703_vm2, %v12917_v52 }
0x2eb6   :  { %12922 = vmatpush3.bf16.xpose.msk.msra.mxu0 %vm13703_vm2, %v12917_v52  ;;  %v5316_v52 = vld [vmem:[%s15543_s5 + $0x58] sm:$0xff] }
0x2eb7   :  { %12055 = vmatprep.subr.mxu0 %v5322_v32 }
0x2ebd   :  { %12046 = vmatmul.mubr.msk.f32.vlgmr.msra.gmra.mrb[44].mxu0 %vm406_vm1, %v5876_v42 }
0x2ebe   :  { %12056 = vmatpush3.msra.mxu0 %v5322_v32 }
0x2f90   :  { %v12047_v28 = vpop.f32.mrb[44].mxu0 }
0x2f91   :  { %v6125_v1 = vmul.f32 0.35355338, %v12047_v28  ;;  %v6115_v48 = vpop.f32.mrb[45].mxu0  ;;  %v12947_v28 = vpack.c.bf16 %v5316_v52, %v5315_v49 }
0x2f92   :  { %v6124_v40 = vmul.f32 0.35355338, %v6115_v48  ;;  %v5297_v48 = vld [vmem:[%s15542_s4 + $0x40] sm:$0xff] }
0x2f93   :  { %v6127_v10 = vsel %vm13740_vm3, %v6125_v1, -1e+30  ;;  %v5321_v1 = vld [vmem:[%s15544_s6] sm:$0xff] }
0x2f94   :  { %v6131_v45 = vsel %vm498_vm4, %v6127_v10, -inf  ;;  %v6126_v57 = vsel %vm13745_vm5, %v6124_v40, -1e+30  ;;  %12060 = vmatprep.subr.mxu0 %v5321_v1  ;;  %v5298_v40 = vld [vmem:[%s15542_s4 + $0x48] sm:$0xff] }
0x2f95   :  { %6132 = vmax.xlane.f32.xlu1 %v6131_v45  ;;  %v6128_v33 = vsel %vm498_vm4, %v6126_v57, -inf }
0x2f96   :  { %6129 = vmax.xlane.f32.xlu0 %v6128_v33  ;;  %v6396_v33 = vrot.slane %v14702_v17, %v13846_v19 }
0x3022   :  { %v6133_v35 = vpop.xlane.xlu1 %6132 }
0x3023   :  { %v6135_v51 = vsub.f32 %v6127_v10, %v6133_v35  ;;  %v6130_v53 = vpop.xlane.xlu0 %6129  ;;  %v5299_v35 = vld [vmem:[%s15542_s4 + $0x50] sm:$0xff] }
0x3024   :  { %v6134_v42 = vsub.f32 %v6126_v57, %v6130_v53  ;;  %v12935_v57 = vpack.c.bf16 %v5298_v40, %v5297_v48 }
0x3025   :  { %v6138_v60 = vmul.f32 1.442695, %v6135_v51  ;;  %v5300_v51 = vld [vmem:[%s15542_s4 + $0x58] sm:$0xff] }
0x3026   :  { %v6136_v31 = vmul.f32 1.442695, %v6134_v42 }
0x3027   :  { %13378 = vpow2.f32 %v6138_v60 }
0x3028   :  { %13380 = vpow2.f32 %v6136_v31  ;;  %v12939_v31 = vpack.c.bf16 %v5300_v51, %v5299_v35  ;;  %v5286_v35 = vld [vmem:[%s15541_s3 + $0x68] sm:$0xff] }
0x3031   :  { %v13379_v36 = vpop.eup %13378 }
0x3032   :  { %v13381_v46 = vpop.eup %13380  ;;  %v6143_v59 = vsel %vm498_vm4, %v13379_v36, 0.0 }
0x3033   :  { %6144 = vadd.xlane.f32.xlu1 %v6143_v59  ;;  %v6140_v20 = vsel %vm498_vm4, %v13381_v46, 0.0 }
0x3034   :  { %6141 = vadd.xlane.f32.xlu0 %v6140_v20 }
0x30c0   :  { %v6145_v43 = vpop.xlane.xlu1 %6144 }
0x30c1   :  { %13382 = vrcp.f32 %v6145_v43  ;;  %v6142_v3 = vpop.xlane.xlu0 %6141 }
0x30c2   :  { %13384 = vrcp.f32 %v6142_v3 }
0x30cb   :  { %v13383_v6 = vpop.eup %13382 }
0x30cc   :  { %v13385_v14 = vpop.eup %13384  ;;  %v6149_v15 = vmul.f32 %v13383_v6, %v13379_v36 }
0x30cd   :  { %v6148_v38 = vmul.f32 %v13385_v14, %v13381_v46 }
0x30cf   :  { %12052 = vmatprep.mubr.msk.f32.mxu1 %vm498_vm4, %v6148_v38 }
0x30d0   :  { %12053 = vmatmul.mubr.msk.f32.vlgmr.msra.gmra.mrb[68].mxu1 %vm498_vm4, %v6149_v15 }
0x30d1   :  { %12930 = vmatpush3.bf16.msra.mxu1 %v12927_v63  ;;  %12073 = vmatprep.mubr.msk.f32.mxu1 %vm123_vm0, %v14667_v61 }
0x30d2   :  { %12932 = vmatprep.subr.bf16.mxu1 %v12931_v24 }
0x30d5   :  { %12934 = vmatpush3.bf16.msra.mxu1 %v12931_v24 }
0x30d6   :  { %12944 = vmatprep.subr.bf16.mxu1 %v12943_v18 }
0x30d8   :  { %12074 = vmatmul.mubr.msk.f32.vlgmr.msra.gmra.mrb[70].mxu1 %vm123_vm0, %v14669_v13 }
0x30d9   :  { %12946 = vmatpush3.bf16.msra.mxu1 %v12943_v18  ;;  %12095 = vmatprep.mubr.msk.f32.mxu1 %vm123_vm0, %v14667_v61 }
0x30da   :  { %12948 = vmatprep.subr.bf16.mxu1 %v12947_v28 }
0x30dd   :  { %12950 = vmatpush3.bf16.msra.mxu1 %v12947_v28 }
0x30e0   :  { %12096 = vmatmul.mubr.msk.f32.vlgmr.msra.gmra.mrb[72].mxu1 %vm123_vm0, %v14669_v13 }
0x31a3   :  { %v12054_v10 = vpop.f32.mrb[68].mxu1 }
0x31a4   :  { %v6222_v45 = vpop.f32.mrb[69].mxu1 }
0x31a5   :  { %12057 = vmatprep.mubr.msk.f32.mxu0 %vm406_vm1, %v6222_v45 }
0x31a6   :  { %12058 = vmatmul.mubr.msk.f32.vlgmr.msra.gmra.mrb[46].mxu0 %vm406_vm1, %v12054_v10 }
0x31a7   :  { %12061 = vmatpush3.msra.mxu0 %v5321_v1  ;;  %12062 = vmatprep.mubr.msk.f32.mxu0 %vm406_vm1, %v14784_v22  ;;  %v6554_v22 = vrot.slane %v14695_v23, %v13846_v19 }
0x31a8   :  { %12936 = vmatprep.subr.bf16.mxu0 %v12935_v57 }
0x31ab   :  { %v12075_v53 = vpop.f32.mrb[70].mxu1 }
0x31ac   :  { %v6469_v42 = vadd.f32 %v12075_v53, %v6396_v33  ;;  %v6463_v60 = vpop.f32.mrb[71].mxu1  ;;  %v5323_v53 = vld [vmem:[%s15544_s6 + $0x10] sm:$0xff] }
0x31ad   :  { %v6464_v20 = vadd.f32 %v6463_v60, %v6396_v33  ;;  %v5285_v33 = vld [vmem:[%s15541_s3 + $0x60] sm:$0xff] }
0x31ae   :  { %12063 = vmatmul.mubr.msk.f32.vlgmr.msra.gmra.mrb[46].mxu0 %vm406_vm1, %v14782_v21  ;;  %v6475_v21 = vrot.slane %v14709_v56, %v13846_v19  ;;  %v12961_v51 = vpack.c.bf16 %v5286_v35, %v5285_v33 }
0x31af   :  { %12938 = vmatpush3.bf16.msra.mxu0 %v12935_v57  ;;  %12084 = vmatprep.mubr.msk.f32.mxu0 %vm123_vm0, %v14667_v61 }
0x31b0   :  { %12940 = vmatprep.subr.bf16.mxu0 %v12939_v31 }
0x31b3   :  { %12942 = vmatpush3.bf16.msra.mxu0 %v12939_v31  ;;  %v12097_v36 = vpop.f32.mrb[72].mxu1 }
0x31b4   :  { %v6627_v46 = vadd.f32 %v12097_v36, %v6554_v22  ;;  %v6621_v59 = vpop.f32.mrb[73].mxu1  ;;  %v5288_v36 = vld [vmem:[%s15541_s3 + $0x78] sm:$0xff] }
0x31b5   :  { %v6622_v2 = vadd.f32 %v6621_v59, %v6554_v22  ;;  %v5287_v22 = vld [vmem:[%s15541_s3 + $0x70] sm:$0xff] }
0x31b6   :  { %12085 = vmatmul.mubr.msk.f32.vlgmr.msra.gmra.mrb[48].mxu0 %vm123_vm0, %v14669_v13 }
0x31b7   :  { %v12957_v54 = vpack.c.bf16 %v6627_v46, %v6622_v2  ;;  %12102 = vmatprep.mubr.msk.f32.mxu0 %vm406_vm1, %v6464_v20  ;;  %v12965_v2 = vpack.c.bf16 %v5288_v36, %v5287_v22 }
0x31b9   :  { %12958 = vmatprep.subr.bf16.mxu1 %v12957_v54 }
0x31ba   :  { %12960 = vmatpush3.bf16.msra.mxu1 %v12957_v54  ;;  %v5317_v54 = vld [vmem:[%s15543_s5 + $0x60] sm:$0xff] }
0x31bb   :  { %12962 = vmatprep.subr.bf16.mxu1 %v12961_v51 }
0x3289   :  { %v12086_v63 = vpop.f32.mrb[48].mxu0 }
0x328a   :  { %v6548_v32 = vadd.f32 %v12086_v63, %v6475_v21  ;;  %v6542_v43 = vpop.f32.mrb[49].mxu0 }
0x328b   :  { %v6543_v3 = vadd.f32 %v6542_v43, %v6475_v21  ;;  %v5318_v21 = vld [vmem:[%s15543_s5 + $0x68] sm:$0xff]  ;;  %v5320_v43 = vld [vmem:[%s15543_s5 + $0x78] sm:$0xff] }
0x328c   :  { %v12977_v63 = vpack.c.bf16 %v5318_v21, %v5317_v54 }
0x328d   :  { %v12951_v6 = vpack.c.bf16 %v6548_v32, %v6543_v3  ;;  %v5319_v32 = vld [vmem:[%s15543_s5 + $0x70] sm:$0xff] }
0x328e   :  { %v12981_v3 = vpack.c.bf16 %v5320_v43, %v5319_v32 }
0x328f   :  { %12953 = vmatprep.subr.msk.bf16.mxu0 %vm13703_vm2, %v12951_v6 }
0x3290   :  { %12956 = vmatpush3.bf16.xpose.msk.msra.mxu0 %vm13703_vm2, %v12951_v6  ;;  %v5301_v6 = vld [vmem:[%s15542_s4 + $0x60] sm:$0xff] }
0x3291   :  { %12112 = vmatprep.subr.mxu0 %v5323_v53 }
0x3297   :  { %12103 = vmatmul.mubr.msk.f32.vlgmr.msra.gmra.mrb[50].mxu0 %vm406_vm1, %v6469_v42 }
0x3298   :  { %12113 = vmatpush3.msra.mxu0 %v5323_v53 }
0x336a   :  { %v12104_v8 = vpop.f32.mrb[50].mxu0 }
0x336b   :  { %v6718_v34 = vmul.f32 0.35355338, %v12104_v8  ;;  %v6708_v14 = vpop.f32.mrb[51].mxu0  ;;  %v5302_v8 = vld [vmem:[%s15542_s4 + $0x68] sm:$0xff] }
0x336c   :  { %v6717_v38 = vmul.f32 0.35355338, %v6708_v14  ;;  %v5303_v14 = vld [vmem:[%s15542_s4 + $0x70] sm:$0xff] }
0x336d   :  { %v6720_v15 = vsel %vm13740_vm3, %v6718_v34, -1e+30  ;;  %v12969_v34 = vpack.c.bf16 %v5302_v8, %v5301_v6  ;;  %v5324_v6 = vld [vmem:[%s15544_s6 + $0x18] sm:$0xff] }
0x336e   :  { %v6724_v24 = vsel %vm498_vm4, %v6720_v15, -inf  ;;  %v6719_v26 = vsel %vm13745_vm5, %v6717_v38, -1e+30  ;;  %v5304_v38 = vld [vmem:[%s15542_s4 + $0x78] sm:$0xff] }
0x336f   :  { %6725 = vmax.xlane.f32.xlu1 %v6724_v24  ;;  %v6721_v12 = vsel %vm498_vm4, %v6719_v26, -inf  ;;  %12970 = vmatprep.subr.bf16.mxu0 %v12969_v34 }
0x3370   :  { %6722 = vmax.xlane.f32.xlu0 %v6721_v12  ;;  %v6910_v12 = vrot.slane %v14702_v17, %v13934_v41  ;;  %v6989_v17 = vrot.slane %v14709_v56, %v13934_v41 }
0x33fc   :  { %v6726_v18 = vpop.xlane.xlu1 %6725 }
0x33fd   :  { %v6728_v49 = vsub.f32 %v6720_v15, %v6726_v18  ;;  %v6723_v52 = vpop.xlane.xlu0 %6722 }
0x33fe   :  { %v6727_v28 = vsub.f32 %v6719_v26, %v6723_v52  ;;  %v12973_v26 = vpack.c.bf16 %v5304_v38, %v5303_v14 }
0x33ff   :  { %v6731_v1 = vmul.f32 1.442695, %v6728_v49 }
0x3400   :  { %v6729_v48 = vmul.f32 1.442695, %v6727_v28 }
0x3401   :  { %13386 = vpow2.f32 %v6731_v1  ;;  %v7068_v1 = vrot.slane %v14695_v23, %v13934_v41 }
0x3402   :  { %13388 = vpow2.f32 %v6729_v48 }
0x340b   :  { %v13387_v40 = vpop.eup %13386 }
0x340c   :  { %v13389_v10 = vpop.eup %13388  ;;  %v6736_v45 = vsel %vm498_vm4, %v13387_v40, 0.0 }
0x340d   :  { %6737 = vadd.xlane.f32.xlu1 %v6736_v45  ;;  %v6733_v57 = vsel %vm498_vm4, %v13389_v10, 0.0 }
0x340e   :  { %6734 = vadd.xlane.f32.xlu0 %v6733_v57 }
0x349a   :  { %v6738_v42 = vpop.xlane.xlu1 %6737 }
0x349b   :  { %13390 = vrcp.f32 %v6738_v42  ;;  %v6735_v60 = vpop.xlane.xlu0 %6734 }
0x349c   :  { %13392 = vrcp.f32 %v6735_v60 }
0x34a5   :  { %v13391_v31 = vpop.eup %13390 }
0x34a6   :  { %v13393_v46 = vpop.eup %13392  ;;  %v6742_v20 = vmul.f32 %v13391_v31, %v13387_v40 }
0x34a7   :  { %v6741_v59 = vmul.f32 %v13393_v46, %v13389_v10 }
0x34a9   :  { %12109 = vmatprep.mubr.msk.f32.mxu1 %vm498_vm4, %v6741_v59 }
0x34aa   :  { %12110 = vmatmul.mubr.msk.f32.vlgmr.msra.gmra.mrb[74].mxu1 %vm498_vm4, %v6742_v20 }
0x34ab   :  { %12964 = vmatpush3.bf16.msra.mxu1 %v12961_v51  ;;  %12125 = vmatprep.mubr.msk.f32.mxu1 %vm123_vm0, %v14667_v61 }
0x34ac   :  { %12966 = vmatprep.subr.bf16.mxu1 %v12965_v2 }
0x34af   :  { %12968 = vmatpush3.bf16.msra.mxu1 %v12965_v2 }
0x34b0   :  { %12978 = vmatprep.subr.bf16.mxu1 %v12977_v63 }
0x34b2   :  { %12126 = vmatmul.mubr.msk.f32.vlgmr.msra.gmra.mrb[76].mxu1 %vm123_vm0, %v14669_v13 }
0x34b3   :  { %12980 = vmatpush3.bf16.msra.mxu1 %v12977_v63  ;;  %12147 = vmatprep.mubr.msk.f32.mxu1 %vm123_vm0, %v14667_v61 }
0x34b4   :  { %12982 = vmatprep.subr.bf16.mxu1 %v12981_v3 }
0x34b7   :  { %12984 = vmatpush3.bf16.msra.mxu1 %v12981_v3 }
0x34ba   :  { %12148 = vmatmul.mubr.msk.f32.vlgmr.msra.gmra.mrb[78].mxu1 %vm123_vm0, %v14669_v13 }
0x357d   :  { %v12111_v15 = vpop.f32.mrb[74].mxu1 }
0x357e   :  { %v6815_v24 = vpop.f32.mrb[75].mxu1 }
0x357f   :  { %12114 = vmatprep.mubr.msk.f32.mxu0 %vm406_vm1, %v6815_v24 }
0x3580   :  { %12115 = vmatmul.mubr.msk.f32.vlgmr.msra.gmra.mrb[46].mxu0 %vm406_vm1, %v12111_v15 }
0x3581   :  { %12972 = vmatpush3.bf16.msra.mxu0 %v12969_v34  ;;  %12136 = vmatprep.mubr.msk.f32.mxu0 %vm123_vm0, %v14667_v61 }
0x3582   :  { %12974 = vmatprep.subr.bf16.mxu0 %v12973_v26 }
0x3585   :  { %v12127_v18 = vpop.f32.mrb[76].mxu1  ;;  %12976 = vmatpush3.bf16.msra.mxu0 %v12973_v26 }
0x3586   :  { %v6983_v49 = vadd.f32 %v12127_v18, %v6910_v12  ;;  %v6977_v52 = vpop.f32.mrb[77].mxu1  ;;  %v7426_v18 = vrot.slane %v14635_v58, %v13846_v19 }
0x3587   :  { %v6978_v28 = vadd.f32 %v6977_v52, %v6910_v12 }
0x3588   :  { %12137 = vmatmul.mubr.msk.f32.vlgmr.msra.gmra.mrb[52].mxu0 %vm123_vm0, %v14669_v13 }
0x3589   :  { %12154 = vmatprep.mubr.msk.f32.mxu0 %vm406_vm1, %v6978_v28 }
0x358d   :  { %v12149_v48 = vpop.f32.mrb[78].mxu1 }
0x358e   :  { %v7141_v40 = vadd.f32 %v12149_v48, %v7068_v1  ;;  %v7135_v61 = vpop.f32.mrb[79].mxu1 }
0x358f   :  { %v7136_v10 = vadd.f32 %v7135_v61, %v7068_v1 }
0x3591   :  { %v12991_v45 = vpack.c.bf16 %v7141_v40, %v7136_v10 }
0x3593   :  { %12992 = vmatprep.subr.bf16.mxu1 %v12991_v45 }
0x3594   :  { %12994 = vmatpush3.bf16.msra.mxu1 %v12991_v45 }
0x365b   :  { %v12138_v57 = vpop.f32.mrb[52].mxu0 }
0x365c   :  { %v7062_v33 = vadd.f32 %v12138_v57, %v6989_v17  ;;  %v7056_v35 = vpop.f32.mrb[53].mxu0 }
0x365d   :  { %v7057_v51 = vadd.f32 %v7056_v35, %v6989_v17 }
0x365f   :  { %v12985_v13 = vpack.c.bf16 %v7062_v33, %v7057_v51 }
0x3661   :  { %12987 = vmatprep.subr.msk.bf16.mxu0 %vm13703_vm2, %v12985_v13 }
0x3662   :  { %12990 = vmatpush3.bf16.xpose.msk.msra.mxu0 %vm13703_vm2, %v12985_v13 }
0x3663   :  { %12164 = vmatprep.subr.mxu0 %v5324_v6 }
0x3669   :  { %12155 = vmatmul.mubr.msk.f32.vlgmr.msra.gmra.mrb[54].mxu0 %vm406_vm1, %v6983_v49 }
0x366a   :  { %12165 = vmatpush3.msra.mxu0 %v5324_v6  ;;  %v7464_v6 = vrot.slane %v14635_v58, %v13998_v62 }
0x373c   :  { %v12156_v23 = vpop.f32.mrb[54].mxu0 }
0x373d   :  { %v7232_v53 = vmul.f32 0.35355338, %v12156_v23  ;;  %v7222_v42 = vpop.f32.mrb[55].mxu0 }
0x373e   :  { %v7231_v60 = vmul.f32 0.35355338, %v7222_v42  ;;  %v7468_v42 = vld [vmem:[%s15545_s7 + $0x8] sm:$0xff] }
0x373f   :  { %v7234_v56 = vsel %vm13740_vm3, %v7232_v53, -1e+30  ;;  %v7467_v53 = vld [vmem:[%s15545_s7] sm:$0xff] }
0x3740   :  { %v7238_v31 = vsel %vm498_vm4, %v7234_v56, -inf  ;;  %v7233_v22 = vsel %vm13745_vm5, %v7231_v60, -1e+30  ;;  %v12995_v60 = vpack.c.bf16 %v7468_v42, %v7467_v53  ;;  %v7628_v53 = vld [vmem:[%s15547_s9 + $0x78] sm:$0xff] }
0x3741   :  { %7239 = vmax.xlane.f32.xlu1 %v7238_v31  ;;  %v7235_v36 = vsel %vm498_vm4, %v7233_v22, -inf  ;;  %v7470_v31 = vld [vmem:[%s15545_s7 + $0x18] sm:$0xff] }
0x3742   :  { %7236 = vmax.xlane.f32.xlu0 %v7235_v36  ;;  %12996 = vmatprep.subr.bf16.mxu1 %v12995_v60 }
0x37ce   :  { %v7240_v46 = vpop.xlane.xlu1 %7239 }
0x37cf   :  { %v7242_v59 = vsub.f32 %v7234_v56, %v7240_v46  ;;  %v7237_v20 = vpop.xlane.xlu0 %7236  ;;  %v7469_v56 = vld [vmem:[%s15545_s7 + $0x10] sm:$0xff] }
0x37d0   :  { %v7241_v2 = vsub.f32 %v7233_v22, %v7237_v20  ;;  %v12999_v22 = vpack.c.bf16 %v7470_v31, %v7469_v56 }
0x37d1   :  { %v7245_v54 = vmul.f32 1.442695, %v7242_v59 }
0x37d2   :  { %v7243_v21 = vmul.f32 1.442695, %v7241_v2 }
0x37d3   :  { %13394 = vpow2.f32 %v7245_v54 }
0x37d4   :  { %13396 = vpow2.f32 %v7243_v21  ;;  %v7458_v21 = vrot.slane %v14635_v58, %v13934_v41  ;;  %v7615_v58 = vld [vmem:[%s15547_s9 + $0x10] sm:$0xff] }
0x37dd   :  { %v13395_v63 = vpop.eup %13394 }
0x37de   :  { %v13397_v32 = vpop.eup %13396  ;;  %v7250_v43 = vsel %vm498_vm4, %v13395_v63, 0.0 }
0x37df   :  { %7251 = vadd.xlane.f32.xlu1 %v7250_v43  ;;  %v7247_v3 = vsel %vm498_vm4, %v13397_v32, 0.0 }
0x37e0   :  { %7248 = vadd.xlane.f32.xlu0 %v7247_v3 }
0x386c   :  { %v7252_v8 = vpop.xlane.xlu1 %7251 }
0x386d   :  { %13398 = vrcp.f32 %v7252_v8  ;;  %v7249_v34 = vpop.xlane.xlu0 %7248 }
0x386e   :  { %13400 = vrcp.f32 %v7249_v34 }
0x3877   :  { %v13399_v14 = vpop.eup %13398 }
0x3878   :  { %v13401_v38 = vpop.eup %13400  ;;  %v7256_v24 = vmul.f32 %v13399_v14, %v13395_v63 }
0x3879   :  { %v7255_v15 = vmul.f32 %v13401_v38, %v13397_v32 }
0x387b   :  { %12161 = vmatprep.mubr.msk.f32.mxu1 %vm498_vm4, %v7255_v15  ;;  %v7613_v15 = vld [vmem:[%s15547_s9] sm:$0xff] }
0x387c   :  { %12162 = vmatmul.mubr.msk.f32.vlgmr.msra.gmra.mrb[80].mxu1 %vm498_vm4, %v7256_v24  ;;  %v7614_v24 = vld [vmem:[%s15547_s9 + $0x8] sm:$0xff] }
0x387d   :  { %12998 = vmatpush3.bf16.msra.mxu1 %v12995_v60  ;;  %v10704_v60 = vld [vmem:[%s15546_s8] ss:$0 sm:$0xff] }
0x387e   :  { %13000 = vmatprep.subr.bf16.mxu1 %v12999_v22 }
0x3881   :  { %13002 = vmatpush3.bf16.msra.mxu1 %v12999_v22 }
0x394f   :  { %v12163_v26 = vpop.f32.mrb[80].mxu1 }
0x3950   :  { %v7329_v12 = vpop.f32.mrb[81].mxu1 }
0x3951   :  { %12166 = vmatprep.mubr.msk.f32.mxu0 %vm406_vm1, %v7329_v12  ;;  %v7616_v12 = vld [vmem:[%s15547_s9 + $0x18] sm:$0xff] }
0x3952   :  { %12167 = vmatmul.mubr.msk.f32.vlgmr.msra.gmra.mrb[46].mxu0 %vm406_vm1, %v12163_v26  ;;  %v13003_v26 = vpack.c.bf16 %v7614_v24, %v7613_v15 }
0x3954   :  { %13004 = vmatprep.subr.bf16.mxu0 %v13003_v26 }
0x3955   :  { %13006 = vmatpush3.bf16.msra.mxu0 %v13003_v26 }
0x3a25   :  { %v12168_v49 = vpop.f32.mrb[46].mxu0 }
0x3a26   :  { %v7422_v52 = vadd.f32 %v12168_v49, %v14555_v50  ;;  %v7410_v28 = vpop.f32.mrb[47].mxu0  ;;  %v7617_v49 = vld [vmem:[%s15547_s9 + $0x20] sm:$0xff] }
0x3a27   :  { %v7421_v1 = vadd.f32 %v14561_v44, %v7410_v28 }
0x3a28   :  { %v14969_v48 = vadd.f32 %v7426_v18, %v7422_v52  ;;  %v7618_v52 = vld [vmem:[%s15547_s9 + $0x28] sm:$0xff] }
0x3a29   :  { %v14971_v40 = vadd.f32 %v7426_v18, %v7421_v1  ;;  %v13007_v18 = vpack.c.bf16 %v7616_v12, %v7615_v58  ;;  %v13011_v28 = vpack.c.bf16 %v7618_v52, %v7617_v49  ;;  %v7619_v1 = vld [vmem:[%s15547_s9 + $0x30] sm:$0xff] }
0x3a2a   :  { %v7432_v61 = vsel %vm123_vm0, %v14969_v48, 0.0 }
0x3a2b   :  { %7433 = vadd.xlane.f32.xlu1 %v7432_v61  ;;  %v7429_v10 = vsel %vm123_vm0, %v14971_v40, 0.0  ;;  %13008 = vmatprep.subr.bf16.mxu0 %v13007_v18  ;;  %v7620_v61 = vld [vmem:[%s15547_s9 + $0x38] sm:$0xff] }
0x3a2c   :  { %7430 = vadd.xlane.f32.xlu0 %v7429_v10  ;;  %13010 = vmatpush3.bf16.msra.mxu0 %v13007_v18  ;;  %v13015_v10 = vpack.c.bf16 %v7620_v61, %v7619_v1 }
0x3a2d   :  { %13012 = vmatprep.subr.bf16.mxu0 %v13011_v28 }
0x3a30   :  { %13014 = vmatpush3.bf16.msra.mxu0 %v13011_v28 }
0x3a31   :  { %13016 = vmatprep.subr.bf16.mxu0 %v13015_v10 }
0x3a34   :  { %13018 = vmatpush3.bf16.msra.mxu0 %v13015_v10 }
0x3ab8   :  { %v7434_v45 = vpop.xlane.xlu1 %7433 }
0x3ab9   :  { %v7436_v17 = vmul.f32 0.03125, %v7434_v45  ;;  %v7431_v57 = vpop.xlane.xlu0 %7430  ;;  %v7621_v45 = vld [vmem:[%s15547_s9 + $0x40] sm:$0xff] }
0x3aba   :  { %v7435_v33 = vmul.f32 0.03125, %v7431_v57 }
0x3abb   :  { %v7438_v50 = vsub.f32 %v14969_v48, %v7436_v17  ;;  %v7622_v17 = vld [vmem:[%s15547_s9 + $0x48] sm:$0xff] }
0x3abc   :  { %v7437_v44 = vsub.f32 %v14971_v40, %v7435_v33  ;;  %v13019_v57 = vpack.c.bf16 %v7622_v17, %v7621_v45  ;;  %v7623_v33 = vld [vmem:[%s15547_s9 + $0x50] sm:$0xff] }
0x3abd   :  { %v7440_v35 = vmul.f32 %v7438_v50, %v7438_v50 }
0x3abe   :  { %v7439_v51 = vmul.f32 %v7437_v44, %v7437_v44  ;;  %13020 = vmatprep.subr.bf16.mxu0 %v13019_v57 }
0x3abf   :  { %v7444_v13 = vsel %vm123_vm0, %v7440_v35, 0.0  ;;  %13022 = vmatpush3.bf16.msra.mxu0 %v13019_v57  ;;  %v7625_v35 = vld [vmem:[%s15547_s9 + $0x60] sm:$0xff] }
0x3ac0   :  { %7445 = vadd.xlane.f32.xlu1 %v7444_v13  ;;  %v7441_v23 = vsel %vm123_vm0, %v7439_v51, 0.0  ;;  %v7626_v51 = vld [vmem:[%s15547_s9 + $0x68] sm:$0xff] }
0x3ac1   :  { %7442 = vadd.xlane.f32.xlu0 %v7441_v23  ;;  %v13027_v13 = vpack.c.bf16 %v7626_v51, %v7625_v35  ;;  %v7627_v23 = vld [vmem:[%s15547_s9 + $0x70] sm:$0xff] }
0x3ac2   :  { %v13031_v42 = vpack.c.bf16 %v7628_v53, %v7627_v23 }
0x3b4d   :  { %v7446_v36 = vpop.xlane.xlu1 %7445 }
0x3b4e   :  { %v7448_v46 = vmul.f32 0.03125, %v7446_v36  ;;  %v7443_v59 = vpop.xlane.xlu0 %7442 }
0x3b4f   :  { %v7447_v20 = vmul.f32 0.03125, %v7443_v59 }
0x3b50   :  { %v7450_v2 = vadd.f32 1e-05, %v7448_v46 }
0x3b51   :  { %v7449_v54 = vadd.f32 1e-05, %v7447_v20 }
0x3b52   :  { %13402 = vrsqrt.f32 %v7450_v2 }
0x3b53   :  { %13404 = vrsqrt.f32 %v7449_v54 }
0x3b5c   :  { %v13403_v63 = vpop.eup %13402 }
0x3b5d   :  { %v13405_v32 = vpop.eup %13404  ;;  %v7454_v43 = vmul.f32 %v13403_v63, %v7438_v50  ;;  %v7624_v50 = vld [vmem:[%s15547_s9 + $0x58] sm:$0xff] }
0x3b5e   :  { %v7453_v3 = vmul.f32 %v13405_v32, %v7437_v44  ;;  %v13023_v44 = vpack.c.bf16 %v7624_v50, %v7623_v33 }
0x3b5f   :  { %v7460_v8 = vmul.f32 %v7458_v21, %v7454_v43 }
0x3b60   :  { %v7459_v34 = vmul.f32 %v7458_v21, %v7453_v3  ;;  %13024 = vmatprep.subr.bf16.mxu0 %v13023_v44 }
0x3b61   :  { %v7466_v38 = vadd.f32 %v7464_v6, %v7460_v8  ;;  %13026 = vmatpush3.bf16.msra.mxu0 %v13023_v44 }
0x3b62   :  { %v7465_v14 = vadd.f32 %v7464_v6, %v7459_v34  ;;  %13028 = vmatprep.subr.bf16.mxu0 %v13027_v13 }
0x3b64   :  { %12177 = vmatprep.mubr.msk.f32.mxu1 %vm123_vm0, %v7465_v14 }
0x3b65   :  { %12178 = vmatmul.mubr.msk.f32.vlgmr.msra.gmra.mrb[82].mxu1 %vm123_vm0, %v7466_v38  ;;  %13030 = vmatpush3.bf16.msra.mxu0 %v13027_v13 }
0x3b66   :  { %13032 = vmatprep.subr.bf16.mxu0 %v13031_v42 }
0x3b69   :  { %13034 = vmatpush3.bf16.msra.mxu0 %v13031_v42 }
0x3c38   :  { %v12179_v56 = vpop.f32.mrb[82].mxu1 }
0x3c39   :  { %v7556_v31 = vadd.f32 %v12179_v56, %v10704_v60  ;;  %v7550_v22 = vpop.f32.mrb[83].mxu1 }
0x3c3a   :  { %v7551_v36 = vadd.f32 %v10704_v60, %v7550_v22 }
0x3c3b   :  { %v7562_v46 = vmul.f32 0.70710677, %v7556_v31 }
0x3c3c   :  { %v7561_v59 = vmul.f32 0.70710677, %v7551_v36 }
0x3c3d   :  { %v7564_v20 = vand.u32 2147483647, %v7562_v46  ;;  %vm7604_vm12 = vcmp.lt.f32.partialorder %v7562_v46, 0.0 }
0x3c3e   :  { %v7563_v2 = vand.u32 2147483647, %v7561_v59  ;;  %vm7603_vm13 = vcmp.lt.f32.partialorder %v7561_v59, 0.0 }
0x3c3f   :  { %v7566_v54 = vmul.f32 0.3275911, %v7564_v20  ;;  %v7592_v43 = vsub.f32 0.0, %v7564_v20 }
0x3c40   :  { %v7565_v21 = vmul.f32 0.3275911, %v7563_v2  ;;  %v7591_v3 = vsub.f32 0.0, %v7563_v2 }
0x3c41   :  { %v7568_v63 = vadd.f32 1.0, %v7566_v54  ;;  %v7594_v8 = vmul.f32 %v7592_v43, %v7564_v20 }
0x3c42   :  { %v7567_v32 = vadd.f32 1.0, %v7565_v21  ;;  %v7593_v38 = vmul.f32 %v7591_v3, %v7563_v2  ;;  %v7559_v21 = vmul.f32 0.5, %v7551_v36 }
0x3c43   :  { %13406 = vrcp.f32 %v7568_v63  ;;  %v7597_v26 = vmul.f32 1.442695, %v7594_v8 }
0x3c44   :  { %13408 = vrcp.f32 %v7567_v32  ;;  %v7595_v18 = vmul.f32 1.442695, %v7593_v38  ;;  %v7560_v32 = vmul.f32 0.5, %v7556_v31 }
0x3c45   :  { %13410 = vpow2.f32 %v7597_v26 }
0x3c46   :  { %13412 = vpow2.f32 %v7595_v18 }
0x3c4d   :  { %v13407_v6 = vpop.eup %13406 }
0x3c4e   :  { %v13409_v34 = vpop.eup %13408  ;;  %v7574_v14 = vmul.f32 1.0614054, %v13407_v6 }
0x3c4f   :  { %v7573_v15 = vmul.f32 1.0614054, %v13409_v34  ;;  %v13411_v35 = vpop.eup %13410 }
0x3c50   :  { %v7576_v24 = vadd.f32 -1.4531521, %v7574_v14  ;;  %v13413_v13 = vpop.eup %13412 }
0x3c51   :  { %v7575_v58 = vadd.f32 -1.4531521, %v7573_v15 }
0x3c52   :  { %v7578_v12 = vmul.f32 %v13407_v6, %v7576_v24 }
0x3c53   :  { %v7577_v49 = vmul.f32 %v13409_v34, %v7575_v58 }
0x3c54   :  { %v7580_v52 = vadd.f32 1.4214138, %v7578_v12 }
0x3c55   :  { %v7579_v28 = vadd.f32 1.4214138, %v7577_v49 }
0x3c56   :  { %v7582_v1 = vmul.f32 %v13407_v6, %v7580_v52 }
0x3c57   :  { %v7581_v61 = vmul.f32 %v13409_v34, %v7579_v28 }
0x3c58   :  { %v7584_v10 = vadd.f32 -0.28449672, %v7582_v1  ;;  %v10711_v1 = vld [vmem:[%s15541_s3 + $0x80] sm:$0xff] }
0x3c59   :  { %v7583_v45 = vadd.f32 -0.28449672, %v7581_v61  ;;  %v10712_v61 = vld [vmem:[%s15541_s3 + $0x88] sm:$0xff] }
0x3c5a   :  { %v7586_v17 = vmul.f32 %v13407_v6, %v7584_v10  ;;  %v13035_v10 = vpack.c.bf16 %v10712_v61, %v10711_v1  ;;  %v10715_v61 = vld [vmem:[%s15541_s3 + $0xa0] sm:$0xff] }
0x3c5b   :  { %v7585_v57 = vmul.f32 %v13409_v34, %v7583_v45  ;;  %v10713_v45 = vld [vmem:[%s15541_s3 + $0x90] sm:$0xff] }
0x3c5c   :  { %v7588_v33 = vadd.f32 0.2548296, %v7586_v17  ;;  %13036 = vmatprep.subr.bf16.mxu1 %v13035_v10  ;;  %v10714_v17 = vld [vmem:[%s15541_s3 + $0x98] sm:$0xff] }
0x3c5d   :  { %v7587_v50 = vadd.f32 0.2548296, %v7585_v57  ;;  %13038 = vmatpush3.bf16.msra.mxu1 %v13035_v10  ;;  %v13039_v57 = vpack.c.bf16 %v10714_v17, %v10713_v45  ;;  %v10716_v10 = vld [vmem:[%s15541_s3 + $0xa8] sm:$0xff]  ;;  %v15153_v17 = vld [vmem:[%s15540_s2 + $0x14] sm:$0xf] }
0x3c5e   :  { %v7590_v44 = vmul.f32 %v13407_v6, %v7588_v33  ;;  %v13480_v6 = vld [vmem:[%s15539_s1] sm:$0x3f] }
0x3c5f   :  { %v7589_v51 = vmul.f32 %v13409_v34, %v7587_v50  ;;  %v7632_v8 = vrot.slane %v13480_v6, %v14058_v47  ;;  %13040 = vmatprep.subr.bf16.mxu1 %v13039_v57  ;;  %v10727_v33 = vld [vmem:[%s15542_s4 + $0x80] sm:$0xff]  ;;  %v10728_v50 = vld [vmem:[%s15542_s4 + $0x88] sm:$0xff] }
0x3c60   :  { %v7600_v23 = vmul.f32 %v13411_v35, %v7590_v44  ;;  %v13043_v44 = vpack.c.bf16 %v10728_v50, %v10727_v33  ;;  %v13069_v33 = vpack.c.bf16 %v10716_v10, %v10715_v61  ;;  %v7971_v50 = vrot.slane %v15153_v17, %v13637_v37 }
0x3c61   :  { %v7599_v53 = vmul.f32 %v13413_v13, %v7589_v51  ;;  %13042 = vmatpush3.bf16.msra.mxu1 %v13039_v57 }
0x3c62   :  { %v7602_v42 = vsub.f32 1.0, %v7600_v23  ;;  %13044 = vmatprep.subr.bf16.mxu1 %v13043_v44 }
0x3c63   :  { %v7601_v60 = vsub.f32 1.0, %v7599_v53 }
0x3c64   :  { %v7606_v56 = vsub.f32 0.0, %v7602_v42 }
0x3c65   :  { %v7605_v22 = vsub.f32 0.0, %v7601_v60 }
0x3c66   :  { %v7608_v20 = vsel %vm7604_vm12, %v7606_v56, %v7602_v42 }
0x3c67   :  { %v7610_v2 = vadd.f32 1.0, %v7608_v20  ;;  %v7607_v54 = vsel %vm7603_vm13, %v7605_v22, %v7601_v60  ;;  %v15089_v60 = vld [vmem:[%s15539_s1 + $0x8] sm:$0x3f] }
0x3c68   :  { %v7609_v63 = vadd.f32 1.0, %v7607_v54  ;;  %v7795_v56 = vrot.slane %v15089_v60, %v13637_v37  ;;  %v7801_v54 = vrot.slane %v15089_v60, %v13645_v39 }
0x3c69   :  { %v7612_v3 = vmul.f32 %v7610_v2, %v7560_v32 }
0x3c6a   :  { %v7611_v43 = vmul.f32 %v7609_v63, %v7559_v21 }
0x3c6c   :  { %12212 = vmatprep.mubr.f32.mxu0 %v7611_v43  ;;  %v10729_v43 = vld [vmem:[%s15542_s4 + $0x90] sm:$0xff] }
0x3c6d   :  { %12213 = vmatmul.mubr.f32.vlgmr.msra.gmra.mrb[56].mxu0 %v7612_v3  ;;  %v10730_v3 = vld [vmem:[%s15542_s4 + $0x98] sm:$0xff] }
0x3d40   :  { %v12214_v34 = vpop.f32.mrb[56].mxu0 }
0x3d41   :  { %v7705_v46 = vadd.f32 %v12214_v34, %v7632_v8  ;;  %v7699_v14 = vpop.f32.mrb[57].mxu0  ;;  %v13047_v34 = vpack.c.bf16 %v10730_v3, %v10729_v43 }
0x3d42   :  { %v7700_v38 = vadd.f32 %v7699_v14, %v7632_v8  ;;  %v10744_v14 = vld [vmem:[%s15543_s5 + $0x88] sm:$0xff] }
0x3d43   :  { %v15055_v59 = vadd.f32 %v7705_v46, %v14969_v48  ;;  %v10743_v46 = vld [vmem:[%s15543_s5 + $0x80] sm:$0xff] }
0x3d44   :  { %v15058_v36 = vadd.f32 %v7700_v38, %v14971_v40  ;;  %v13051_v38 = vpack.c.bf16 %v10744_v14, %v10743_v46 }
0x3d45   :  { %v7769_v31 = vsel %vm123_vm0, %v15055_v59, 0.0 }
0x3d46   :  { %7770 = vadd.xlane.f32.xlu1 %v7769_v31  ;;  %v7766_v15 = vsel %vm123_vm0, %v15058_v36, 0.0  ;;  %v10745_v31 = vld [vmem:[%s15543_s5 + $0x90] sm:$0xff] }
0x3d47   :  { %7767 = vadd.xlane.f32.xlu0 %v7766_v15  ;;  %v10746_v15 = vld [vmem:[%s15543_s5 + $0x98] sm:$0xff] }
0x3dd3   :  { %v7771_v24 = vpop.xlane.xlu1 %7770 }
0x3dd4   :  { %v7773_v26 = vmul.f32 0.03125, %v7771_v24  ;;  %v7768_v58 = vpop.xlane.xlu0 %7767  ;;  %v13055_v24 = vpack.c.bf16 %v10746_v15, %v10745_v31 }
0x3dd5   :  { %v7772_v12 = vmul.f32 0.03125, %v7768_v58 }
0x3dd6   :  { %v7775_v18 = vsub.f32 %v15055_v59, %v7773_v26  ;;  %v15132_v26 = vld [vmem:[%s15540_s2 + $0xc] sm:$0xf] }
0x3dd7   :  { %v7774_v48 = vsub.f32 %v15058_v36, %v7772_v12  ;;  %v7807_v58 = vrot.slane %v15132_v26, %v13637_v37  ;;  %v8244_v15 = vrot.slane %v15132_v26, %v13645_v39 }
0x3dd8   :  { %v7777_v49 = vmul.f32 %v7775_v18, %v7775_v18 }
0x3dd9   :  { %v7776_v52 = vmul.f32 %v7774_v48, %v7774_v48 }
0x3dda   :  { %v7781_v40 = vsel %vm123_vm0, %v7777_v49, 0.0  ;;  %v15139_v49 = vld [vmem:[%s15540_s2 + $0x10] sm:$0xf] }
0x3ddb   :  { %7782 = vadd.xlane.f32.xlu1 %v7781_v40  ;;  %v7778_v28 = vsel %vm123_vm0, %v7776_v52, 0.0  ;;  %v7892_v52 = vrot.slane %v15139_v49, %v13637_v37 }
0x3ddc   :  { %7779 = vadd.xlane.f32.xlu0 %v7778_v28 }
0x3e68   :  { %v7783_v35 = vpop.xlane.xlu1 %7782 }
0x3e69   :  { %v7785_v51 = vmul.f32 0.03125, %v7783_v35  ;;  %v7780_v13 = vpop.xlane.xlu0 %7779 }
0x3e6a   :  { %v7784_v23 = vmul.f32 0.03125, %v7780_v13  ;;  %v10717_v13 = vld [vmem:[%s15541_s3 + $0xb0] sm:$0xff] }
0x3e6b   :  { %v7787_v53 = vadd.f32 1e-05, %v7785_v51 }
0x3e6c   :  { %v7786_v42 = vadd.f32 1e-05, %v7784_v23  ;;  %v10718_v23 = vld [vmem:[%s15541_s3 + $0xb8] sm:$0xff] }
0x3e6d   :  { %13414 = vrsqrt.f32 %v7787_v53 }
0x3e6e   :  { %13416 = vrsqrt.f32 %v7786_v42 }
0x3e77   :  { %v13415_v22 = vpop.eup %13414 }
0x3e78   :  { %v13417_v20 = vpop.eup %13416  ;;  %v7791_v2 = vmul.f32 %v13415_v22, %v7775_v18  ;;  %v10747_v22 = vld [vmem:[%s15543_s5 + $0xa0] sm:$0xff] }
0x3e79   :  { %v7790_v21 = vmul.f32 %v13417_v20, %v7774_v48  ;;  %v10748_v20 = vld [vmem:[%s15543_s5 + $0xa8] sm:$0xff] }
0x3e7a   :  { %v7797_v63 = vmul.f32 %v7795_v56, %v7791_v2  ;;  %v13085_v2 = vpack.c.bf16 %v10748_v20, %v10747_v22  ;;  %v10733_v20 = vld [vmem:[%s15542_s4 + $0xb0] sm:$0xff] }
0x3e7b   :  { %v7796_v32 = vmul.f32 %v7795_v56, %v7790_v21  ;;  %v13073_v56 = vpack.c.bf16 %v10718_v23, %v10717_v13  ;;  %v10750_v21 = vld [vmem:[%s15543_s5 + $0xb8] sm:$0xff]  ;;  %v10731_v23 = vld [vmem:[%s15542_s4 + $0xa0] sm:$0xff] }
0x3e7c   :  { %v15103_v8 = vadd.f32 %v7801_v54, %v7797_v63 }
0x3e7d   :  { %v15101_v6 = vadd.f32 %v7801_v54, %v7796_v32  ;;  %v10749_v54 = vld [vmem:[%s15543_s5 + $0xb0] sm:$0xff] }
0x3e7e   :  { %v13089_v63 = vpack.c.bf16 %v10750_v21, %v10749_v54 }
0x3e7f   :  { %12223 = vmatprep.mubr.msk.f32.mxu1 %vm123_vm0, %v15101_v6 }
0x3e80   :  { %12224 = vmatmul.mubr.msk.f32.vlgmr.msra.gmra.mrb[84].mxu1 %vm123_vm0, %v15103_v8 }
0x3e81   :  { %13046 = vmatpush3.bf16.msra.mxu1 %v13043_v44  ;;  %12234 = vmatprep.mubr.msk.f32.mxu1 %vm123_vm0, %v15101_v6 }
0x3e82   :  { %13048 = vmatprep.subr.bf16.mxu1 %v13047_v34 }
0x3e85   :  { %13050 = vmatpush3.bf16.msra.mxu1 %v13047_v34 }
0x3e86   :  { %13052 = vmatprep.subr.bf16.mxu1 %v13051_v38 }
0x3e88   :  { %12235 = vmatmul.mubr.msk.f32.vlgmr.msra.gmra.mrb[86].mxu1 %vm123_vm0, %v15103_v8 }
0x3e89   :  { %13054 = vmatpush3.bf16.msra.mxu1 %v13051_v38  ;;  %12245 = vmatprep.mubr.msk.f32.mxu1 %vm123_vm0, %v15101_v6 }
0x3e8a   :  { %13056 = vmatprep.subr.bf16.mxu1 %v13055_v24 }
0x3e8d   :  { %13058 = vmatpush3.bf16.msra.mxu1 %v13055_v24 }
0x3e90   :  { %12246 = vmatmul.mubr.msk.f32.vlgmr.msra.gmra.mrb[88].mxu1 %vm123_vm0, %v15103_v8 }
0x3f53   :  { %v12225_v12 = vpop.f32.mrb[84].mxu1 }
0x3f54   :  { %v7880_v18 = vpop.f32.mrb[85].mxu1  ;;  %v7886_v37 = vadd.f32 %v12225_v12, %v7807_v58 }
0x3f55   :  { %v7881_v48 = vadd.f32 %v7880_v18, %v7807_v58  ;;  %v8402_v18 = vrot.slane %v15153_v17, %v13645_v39 }
0x3f57   :  { %12252 = vmatprep.mubr.msk.f32.mxu1 %vm406_vm1, %v7881_v48 }
0x3f5b   :  { %v12236_v40 = vpop.f32.mrb[86].mxu1 }
0x3f5c   :  { %v7965_v28 = vadd.f32 %v12236_v40, %v7892_v52  ;;  %v7959_v1 = vpop.f32.mrb[87].mxu1 }
0x3f5d   :  { %v7960_v45 = vadd.f32 %v7959_v1, %v7892_v52 }
0x3f5f   :  { %v13059_v57 = vpack.c.bf16 %v7965_v28, %v7960_v45 }
0x3f61   :  { %13061 = vmatprep.subr.msk.bf16.mxu1 %vm13703_vm2, %v13059_v57 }
0x3f62   :  { %13064 = vmatpush3.bf16.xpose.msk.msra.mxu1 %vm13703_vm2, %v13059_v57 }
0x3f63   :  { %v12247_v44 = vpop.f32.mrb[88].mxu1  ;;  %13070 = vmatprep.subr.bf16.mxu1 %v13069_v33 }
0x3f64   :  { %v8044_v35 = vadd.f32 %v12247_v44, %v7971_v50  ;;  %v8038_v51 = vpop.f32.mrb[89].mxu1 }
0x3f65   :  { %v8039_v53 = vadd.f32 %v8038_v51, %v7971_v50 }
0x3f67   :  { %v13065_v42 = vpack.c.bf16 %v8044_v35, %v8039_v53  ;;  %v10732_v53 = vld [vmem:[%s15542_s4 + $0xa8] sm:$0xff] }
0x3f69   :  { %12253 = vmatmul.mubr.msk.f32.vlgmr.msra.gmra.mrb[90].mxu1 %vm406_vm1, %v7886_v37  ;;  %13066 = vmatprep.subr.bf16.mxu0 %v13065_v42  ;;  %v13077_v37 = vpack.c.bf16 %v10732_v53, %v10731_v23  ;;  %v10720_v23 = vld [vmem:[%s15541_s3 + $0xc8] sm:$0xff] }
0x3f6a   :  { %13068 = vmatpush3.bf16.msra.mxu0 %v13065_v42  ;;  %13072 = vmatpush3.bf16.msra.mxu1 %v13069_v33 }
0x3f6b   :  { %12270 = vmatprep.mubr.msk.f32.mxu1 %vm123_vm0, %v15101_v6  ;;  %13074 = vmatprep.subr.bf16.mxu1 %v13073_v56 }
0x3f6c   :  { %13078 = vmatprep.subr.bf16.mxu0 %v13077_v37 }
0x3f6e   :  { %13076 = vmatpush3.bf16.msra.mxu1 %v13073_v56 }
0x3f6f   :  { %13086 = vmatprep.subr.bf16.mxu1 %v13085_v2 }
0x3f71   :  { %12271 = vmatmul.mubr.msk.f32.vlgmr.msra.gmra.mrb[92].mxu1 %vm123_vm0, %v15103_v8 }
0x3f72   :  { %13088 = vmatpush3.bf16.msra.mxu1 %v13085_v2  ;;  %12292 = vmatprep.mubr.msk.f32.mxu1 %vm123_vm0, %v15101_v6  ;;  %v10734_v2 = vld [vmem:[%s15542_s4 + $0xb8] sm:$0xff] }
0x3f73   :  { %13090 = vmatprep.subr.bf16.mxu1 %v13089_v63 }
0x3f76   :  { %13092 = vmatpush3.bf16.msra.mxu1 %v13089_v63 }
0x3f79   :  { %12293 = vmatmul.mubr.msk.f32.vlgmr.msra.gmra.mrb[94].mxu1 %vm123_vm0, %v15103_v8 }
0x403c   :  { %v12254_v32 = vpop.f32.mrb[90].mxu1 }
0x403d   :  { %v8135_v43 = vmul.f32 0.35355338, %v12254_v32  ;;  %v8125_v3 = vpop.f32.mrb[91].mxu1  ;;  %v13081_v32 = vpack.c.bf16 %v10734_v2, %v10733_v20  ;;  %v10721_v20 = vld [vmem:[%s15541_s3 + $0xd0] sm:$0xff]  ;;  %v10722_v2 = vld [vmem:[%s15541_s3 + $0xd8] sm:$0xff] }
0x403e   :  { %v8134_v34 = vmul.f32 0.35355338, %v8125_v3 }
0x403f   :  { %v8137_v46 = vsel %vm13740_vm3, %v8135_v43, -1e+30 }
0x4040   :  { %v8141_v14 = vsel %vm498_vm4, %v8137_v46, -inf  ;;  %v8136_v38 = vsel %vm13745_vm5, %v8134_v34, -1e+30 }
0x4041   :  { %8142 = vmax.xlane.f32.xlu1 %v8141_v14  ;;  %v8138_v31 = vsel %vm498_vm4, %v8136_v38, -inf }
0x4042   :  { %8139 = vmax.xlane.f32.xlu0 %v8138_v31 }
0x4044   :  { %v12272_v24 = vpop.f32.mrb[92].mxu1 }
0x4045   :  { %v8317_v58 = vadd.f32 %v12272_v24, %v8244_v15  ;;  %v8311_v12 = vpop.f32.mrb[93].mxu1 }
0x4046   :  { %v8312_v43 = vadd.f32 %v8311_v12, %v8244_v15 }
0x404c   :  { %v12294_v48 = vpop.f32.mrb[94].mxu1 }
0x404d   :  { %v8475_v52 = vadd.f32 %v12294_v48, %v8402_v18  ;;  %v8469_v40 = vpop.f32.mrb[95].mxu1 }
0x404e   :  { %v8470_v28 = vadd.f32 %v8469_v40, %v8402_v18 }
0x4050   :  { %v13099_v1 = vpack.c.bf16 %v8475_v52, %v8470_v28 }
0x4052   :  { %13100 = vmatprep.subr.bf16.mxu1 %v13099_v1 }
0x4053   :  { %13102 = vmatpush3.bf16.msra.mxu1 %v13099_v1 }
0x40ce   :  { %v8143_v61 = vpop.xlane.xlu1 %8142 }
0x40cf   :  { %v8145_v10 = vsub.f32 %v8137_v46, %v8143_v61  ;;  %v8140_v45 = vpop.xlane.xlu0 %8139  ;;  %v8323_v46 = vrot.slane %v15139_v49, %v13645_v39 }
0x40d0   :  { %v8144_v57 = vsub.f32 %v8136_v38, %v8140_v45 }
0x40d1   :  { %v8148_v33 = vmul.f32 1.442695, %v8145_v10 }
0x40d2   :  { %v8146_v50 = vmul.f32 1.442695, %v8144_v57 }
0x40d3   :  { %13418 = vpow2.f32 %v8148_v33 }
0x40d4   :  { %13420 = vpow2.f32 %v8146_v50 }
0x40dd   :  { %v13419_v44 = vpop.eup %13418 }
0x40de   :  { %v13421_v35 = vpop.eup %13420  ;;  %v8153_v51 = vsel %vm498_vm4, %v13419_v44, 0.0 }
0x40df   :  { %8154 = vadd.xlane.f32.xlu1 %v8153_v51  ;;  %v8150_v13 = vsel %vm498_vm4, %v13421_v35, 0.0 }
0x40e0   :  { %8151 = vadd.xlane.f32.xlu0 %v8150_v13  ;;  %v10719_v13 = vld [vmem:[%s15541_s3 + $0xc0] sm:$0xff] }
0x40e1   :  { %v13103_v53 = vpack.c.bf16 %v10720_v23, %v10719_v13 }
0x40e3   :  { %13104 = vmatprep.subr.bf16.mxu1 %v13103_v53 }
0x416c   :  { %v8155_v42 = vpop.xlane.xlu1 %8154 }
0x416d   :  { %13422 = vrcp.f32 %v8155_v42  ;;  %v8152_v56 = vpop.xlane.xlu0 %8151 }
0x416e   :  { %13424 = vrcp.f32 %v8152_v56 }
0x4177   :  { %v13423_v22 = vpop.eup %13422 }
0x4178   :  { %v13425_v54 = vpop.eup %13424  ;;  %v8159_v63 = vmul.f32 %v13423_v22, %v13419_v44 }
0x4179   :  { %v8158_v21 = vmul.f32 %v13425_v54, %v13421_v35 }
0x417b   :  { %12259 = vmatprep.mubr.msk.f32.mxu0 %vm498_vm4, %v8158_v21 }
0x417c   :  { %12260 = vmatmul.mubr.msk.f32.vlgmr.msra.gmra.mrb[58].mxu0 %vm498_vm4, %v8159_v63 }
0x417d   :  { %13080 = vmatpush3.bf16.msra.mxu0 %v13077_v37  ;;  %12281 = vmatprep.mubr.msk.f32.mxu0 %vm123_vm0, %v15101_v6  ;;  %v10760_v37 = vld [vmem:[%s15544_s6 + $0x28] sm:$0xff] }
0x417e   :  { %13082 = vmatprep.subr.bf16.mxu0 %v13081_v32 }
0x4181   :  { %13084 = vmatpush3.bf16.msra.mxu0 %v13081_v32  ;;  %v13107_v32 = vpack.c.bf16 %v10722_v2, %v10721_v20 }
0x4184   :  { %12282 = vmatmul.mubr.msk.f32.vlgmr.msra.gmra.mrb[60].mxu0 %vm123_vm0, %v15103_v8 }
0x4185   :  { %12299 = vmatprep.mubr.msk.f32.mxu0 %vm406_vm1, %v8312_v43  ;;  %v10751_v43 = vld [vmem:[%s15543_s5 + $0xc0] sm:$0xff] }
0x424f   :  { %v15219_v3 = vpop.f32.mrb[58].mxu0 }
0x4250   :  { %v15221_v34 = vpop.f32.mrb[59].mxu0 }
0x4257   :  { %v12283_v14 = vpop.f32.mrb[60].mxu0 }
0x4258   :  { %v8396_v38 = vadd.f32 %v12283_v14, %v8323_v46  ;;  %v8390_v31 = vpop.f32.mrb[61].mxu0 }
0x4259   :  { %v8391_v24 = vadd.f32 %v8390_v31, %v8323_v46  ;;  %v10752_v46 = vld [vmem:[%s15543_s5 + $0xc8] sm:$0xff]  ;;  %v10754_v31 = vld [vmem:[%s15543_s5 + $0xd8] sm:$0xff] }
0x425a   :  { %v13119_v14 = vpack.c.bf16 %v10752_v46, %v10751_v43 }
0x425b   :  { %v13093_v18 = vpack.c.bf16 %v8396_v38, %v8391_v24  ;;  %v10753_v38 = vld [vmem:[%s15543_s5 + $0xd0] sm:$0xff] }
0x425c   :  { %v13123_v24 = vpack.c.bf16 %v10754_v31, %v10753_v38 }
0x425d   :  { %13095 = vmatprep.subr.msk.bf16.mxu0 %vm13703_vm2, %v13093_v18 }
0x425e   :  { %13098 = vmatpush3.bf16.xpose.msk.msra.mxu0 %vm13703_vm2, %v13093_v18  ;;  %v10759_v18 = vld [vmem:[%s15544_s6 + $0x20] sm:$0xff] }
0x425f   :  { %12309 = vmatprep.subr.mxu0 %v10760_v37 }
0x4265   :  { %12300 = vmatmul.mubr.msk.f32.vlgmr.msra.gmra.mrb[62].mxu0 %vm406_vm1, %v8317_v58 }
0x4266   :  { %12310 = vmatpush3.msra.mxu0 %v10760_v37 }
0x4267   :  { %12314 = vmatprep.subr.mxu0 %v10759_v18 }
0x4338   :  { %v12301_v15 = vpop.f32.mrb[62].mxu0 }
0x4339   :  { %v8566_v12 = vmul.f32 0.35355338, %v12301_v15  ;;  %v8556_v48 = vpop.f32.mrb[63].mxu0  ;;  %v10735_v15 = vld [vmem:[%s15542_s4 + $0xc0] sm:$0xff] }
0x433a   :  { %v8565_v52 = vmul.f32 0.35355338, %v8556_v48 }
0x433b   :  { %v8568_v39 = vsel %vm13740_vm3, %v8566_v12, -1e+30  ;;  %v10736_v12 = vld [vmem:[%s15542_s4 + $0xc8] sm:$0xff] }
0x433c   :  { %v8572_v40 = vsel %vm498_vm4, %v8568_v39, -inf  ;;  %v8567_v28 = vsel %vm13745_vm5, %v8565_v52, -1e+30 }
0x433d   :  { %8573 = vmax.xlane.f32.xlu1 %v8572_v40  ;;  %v8569_v1 = vsel %vm498_vm4, %v8567_v28, -inf  ;;  %v8837_v40 = vrot.slane %v15132_v26, %v13846_v19 }
0x433e   :  { %8570 = vmax.xlane.f32.xlu0 %v8569_v1  ;;  %v10738_v1 = vld [vmem:[%s15542_s4 + $0xd8] sm:$0xff] }
0x43ca   :  { %v8574_v61 = vpop.xlane.xlu1 %8573 }
0x43cb   :  { %v8576_v10 = vsub.f32 %v8568_v39, %v8574_v61  ;;  %v8571_v45 = vpop.xlane.xlu0 %8570  ;;  %v13111_v39 = vpack.c.bf16 %v10736_v12, %v10735_v15 }
0x43cc   :  { %v8575_v58 = vsub.f32 %v8567_v28, %v8571_v45  ;;  %v10737_v28 = vld [vmem:[%s15542_s4 + $0xd0] sm:$0xff] }
0x43cd   :  { %v8579_v57 = vmul.f32 1.442695, %v8576_v10 }
0x43ce   :  { %v8577_v33 = vmul.f32 1.442695, %v8575_v58  ;;  %v13115_v58 = vpack.c.bf16 %v10738_v1, %v10737_v28  ;;  %v10761_v28 = vld [vmem:[%s15544_s6 + $0x30] sm:$0xff] }
0x43cf   :  { %13426 = vpow2.f32 %v8579_v57 }
0x43d0   :  { %13428 = vpow2.f32 %v8577_v33 }
0x43d9   :  { %v13427_v50 = vpop.eup %13426 }
0x43da   :  { %v13429_v44 = vpop.eup %13428  ;;  %v8584_v35 = vsel %vm498_vm4, %v13427_v50, 0.0 }
0x43db   :  { %8585 = vadd.xlane.f32.xlu1 %v8584_v35  ;;  %v8581_v51 = vsel %vm498_vm4, %v13429_v44, 0.0 }
0x43dc   :  { %8582 = vadd.xlane.f32.xlu0 %v8581_v51 }
0x4468   :  { %v8586_v42 = vpop.xlane.xlu1 %8585 }
0x4469   :  { %13430 = vrcp.f32 %v8586_v42  ;;  %v8583_v56 = vpop.xlane.xlu0 %8582 }
0x446a   :  { %13432 = vrcp.f32 %v8583_v56 }
0x4473   :  { %v13431_v22 = vpop.eup %13430 }
0x4474   :  { %v13433_v54 = vpop.eup %13432  ;;  %v8590_v63 = vmul.f32 %v13431_v22, %v13427_v50 }
0x4475   :  { %v8589_v21 = vmul.f32 %v13433_v54, %v13429_v44 }
0x4477   :  { %12306 = vmatprep.mubr.msk.f32.mxu1 %vm498_vm4, %v8589_v21 }
0x4478   :  { %12307 = vmatmul.mubr.msk.f32.vlgmr.msra.gmra.mrb[96].mxu1 %vm498_vm4, %v8590_v63 }
0x4479   :  { %13106 = vmatpush3.bf16.msra.mxu1 %v13103_v53  ;;  %12327 = vmatprep.mubr.msk.f32.mxu1 %vm123_vm0, %v15101_v6 }
0x447a   :  { %13108 = vmatprep.subr.bf16.mxu1 %v13107_v32 }
0x447d   :  { %13110 = vmatpush3.bf16.msra.mxu1 %v13107_v32 }
0x447e   :  { %13120 = vmatprep.subr.bf16.mxu1 %v13119_v14 }
0x4480   :  { %12328 = vmatmul.mubr.msk.f32.vlgmr.msra.gmra.mrb[98].mxu1 %vm123_vm0, %v15103_v8 }
0x4481   :  { %13122 = vmatpush3.bf16.msra.mxu1 %v13119_v14  ;;  %12349 = vmatprep.mubr.msk.f32.mxu1 %vm123_vm0, %v15101_v6 }
0x4482   :  { %13124 = vmatprep.subr.bf16.mxu1 %v13123_v24 }
0x4485   :  { %13126 = vmatpush3.bf16.msra.mxu1 %v13123_v24 }
0x4488   :  { %12350 = vmatmul.mubr.msk.f32.vlgmr.msra.gmra.mrb[100].mxu1 %vm123_vm0, %v15103_v8 }
0x454b   :  { %v12308_v48 = vpop.f32.mrb[96].mxu1 }
0x454c   :  { %v8663_v52 = vpop.f32.mrb[97].mxu1 }
0x454d   :  { %12311 = vmatprep.mubr.msk.f32.mxu0 %vm406_vm1, %v8663_v52  ;;  %v10723_v52 = vld [vmem:[%s15541_s3 + $0xe0] sm:$0xff] }
0x454e   :  { %12312 = vmatmul.mubr.msk.f32.vlgmr.msra.gmra.mrb[64].mxu0 %vm406_vm1, %v12308_v48 }
0x454f   :  { %12315 = vmatpush3.msra.mxu0 %v10759_v18  ;;  %12316 = vmatprep.mubr.msk.f32.mxu0 %vm406_vm1, %v15221_v34  ;;  %v8995_v34 = vrot.slane %v15153_v17, %v13846_v19 }
0x4550   :  { %13112 = vmatprep.subr.bf16.mxu0 %v13111_v39 }
0x4553   :  { %v12329_v61 = vpop.f32.mrb[98].mxu1 }
0x4554   :  { %v8910_v10 = vadd.f32 %v12329_v61, %v8837_v40  ;;  %v8904_v45 = vpop.f32.mrb[99].mxu1 }
0x4555   :  { %v8905_v44 = vadd.f32 %v8904_v45, %v8837_v40  ;;  %v10725_v45 = vld [vmem:[%s15541_s3 + $0xf0] sm:$0xff] }
0x4556   :  { %12317 = vmatmul.mubr.msk.f32.vlgmr.msra.gmra.mrb[64].mxu0 %vm406_vm1, %v15219_v3  ;;  %v8916_v3 = vrot.slane %v15139_v49, %v13846_v19 }
0x4557   :  { %13114 = vmatpush3.bf16.msra.mxu0 %v13111_v39  ;;  %12338 = vmatprep.mubr.msk.f32.mxu0 %vm123_vm0, %v15101_v6  ;;  %v10724_v39 = vld [vmem:[%s15541_s3 + $0xe8] sm:$0xff] }
0x4558   :  { %13116 = vmatprep.subr.bf16.mxu0 %v13115_v58  ;;  %v13137_v40 = vpack.c.bf16 %v10724_v39, %v10723_v52 }
0x455b   :  { %13118 = vmatpush3.bf16.msra.mxu0 %v13115_v58  ;;  %v12351_v57 = vpop.f32.mrb[100].mxu1  ;;  %v10726_v58 = vld [vmem:[%s15541_s3 + $0xf8] sm:$0xff] }
0x455c   :  { %v9068_v33 = vadd.f32 %v12351_v57, %v8995_v34  ;;  %v9062_v50 = vpop.f32.mrb[101].mxu1 }
0x455d   :  { %v9063_v35 = vadd.f32 %v9062_v50, %v8995_v34  ;;  %v13141_v50 = vpack.c.bf16 %v10726_v58, %v10725_v45 }
0x455e   :  { %12339 = vmatmul.mubr.msk.f32.vlgmr.msra.gmra.mrb[66].mxu0 %vm123_vm0, %v15103_v8 }
0x455f   :  { %v13133_v51 = vpack.c.bf16 %v9068_v33, %v9063_v35  ;;  %12356 = vmatprep.mubr.msk.f32.mxu0 %vm406_vm1, %v8905_v44  ;;  %v10755_v44 = vld [vmem:[%s15543_s5 + $0xe0] sm:$0xff]  ;;  %v10756_v35 = vld [vmem:[%s15543_s5 + $0xe8] sm:$0xff] }
0x4561   :  { %13134 = vmatprep.subr.bf16.mxu1 %v13133_v51 }
0x4562   :  { %13136 = vmatpush3.bf16.msra.mxu1 %v13133_v51  ;;  %v13153_v51 = vpack.c.bf16 %v10756_v35, %v10755_v44  ;;  %v10762_v35 = vld [vmem:[%s15544_s6 + $0x38] sm:$0xff] }
0x4563   :  { %13138 = vmatprep.subr.bf16.mxu1 %v13137_v40 }
0x4631   :  { %v12340_v13 = vpop.f32.mrb[66].mxu0 }
0x4632   :  { %v8989_v23 = vadd.f32 %v12340_v13, %v8916_v3  ;;  %v8983_v53 = vpop.f32.mrb[67].mxu0  ;;  %v10758_v13 = vld [vmem:[%s15543_s5 + $0xf8] sm:$0xff] }
0x4633   :  { %v8984_v37 = vadd.f32 %v8983_v53, %v8916_v3  ;;  %v10757_v3 = vld [vmem:[%s15543_s5 + $0xf0] sm:$0xff]  ;;  %v10739_v53 = vld [vmem:[%s15542_s4 + $0xe0] sm:$0xff] }
0x4635   :  { %v13127_v42 = vpack.c.bf16 %v8989_v23, %v8984_v37  ;;  %v13157_v23 = vpack.c.bf16 %v10758_v13, %v10757_v3  ;;  %v10740_v37 = vld [vmem:[%s15542_s4 + $0xe8] sm:$0xff] }
0x4637   :  { %13129 = vmatprep.subr.msk.bf16.mxu0 %vm13703_vm2, %v13127_v42 }
0x4638   :  { %13132 = vmatpush3.bf16.xpose.msk.msra.mxu0 %vm13703_vm2, %v13127_v42  ;;  %v13145_v42 = vpack.c.bf16 %v10740_v37, %v10739_v53 }
0x4639   :  { %12366 = vmatprep.subr.mxu0 %v10761_v28 }
0x463f   :  { %12357 = vmatmul.mubr.msk.f32.vlgmr.msra.gmra.mrb[68].mxu0 %vm406_vm1, %v8910_v10 }
0x4640   :  { %12367 = vmatpush3.msra.mxu0 %v10761_v28 }
0x4641   :  { %13146 = vmatprep.subr.bf16.mxu0 %v13145_v42 }
0x4712   :  { %v12358_v56 = vpop.f32.mrb[68].mxu0 }
0x4713   :  { %v9159_v22 = vmul.f32 0.35355338, %v12358_v56  ;;  %v9149_v20 = vpop.f32.mrb[69].mxu0  ;;  %v10741_v56 = vld [vmem:[%s15542_s4 + $0xf0] sm:$0xff] }
0x4714   :  { %v9158_v2 = vmul.f32 0.35355338, %v9149_v20 }
0x4715   :  { %v9161_v54 = vsel %vm13740_vm3, %v9159_v22, -1e+30  ;;  %v10742_v22 = vld [vmem:[%s15542_s4 + $0xf8] sm:$0xff] }
0x4716   :  { %v9165_v21 = vsel %vm498_vm4, %v9161_v54, -inf  ;;  %v9160_v63 = vsel %vm13745_vm5, %v9158_v2, -1e+30 }
0x4717   :  { %9166 = vmax.xlane.f32.xlu1 %v9165_v21  ;;  %v9162_v32 = vsel %vm498_vm4, %v9160_v63, -inf  ;;  %v9351_v21 = vrot.slane %v15132_v26, %v13934_v41  ;;  %v9430_v26 = vrot.slane %v15139_v49, %v13934_v41 }
0x4718   :  { %9163 = vmax.xlane.f32.xlu0 %v9162_v32 }
0x47a4   :  { %v9167_v43 = vpop.xlane.xlu1 %9166 }
0x47a5   :  { %v9169_v46 = vsub.f32 %v9161_v54, %v9167_v43  ;;  %v9164_v14 = vpop.xlane.xlu0 %9163  ;;  %v13149_v54 = vpack.c.bf16 %v10742_v22, %v10741_v56  ;;  %v9867_v22 = vrot.slane %v15089_v60, %v13846_v19 }
0x47a6   :  { %v9168_v38 = vsub.f32 %v9160_v63, %v9164_v14  ;;  %v9509_v14 = vrot.slane %v15153_v17, %v13934_v41 }
0x47a7   :  { %v9172_v31 = vmul.f32 1.442695, %v9169_v46 }
0x47a8   :  { %v9170_v24 = vmul.f32 1.442695, %v9168_v38 }
0x47a9   :  { %13434 = vpow2.f32 %v9172_v31 }
0x47aa   :  { %13436 = vpow2.f32 %v9170_v24 }
0x47b3   :  { %v13435_v18 = vpop.eup %13434 }
0x47b4   :  { %v13437_v15 = vpop.eup %13436  ;;  %v9177_v12 = vsel %vm498_vm4, %v13435_v18, 0.0 }
0x47b5   :  { %9178 = vadd.xlane.f32.xlu1 %v9177_v12  ;;  %v9174_v48 = vsel %vm498_vm4, %v13437_v15, 0.0 }
0x47b6   :  { %9175 = vadd.xlane.f32.xlu0 %v9174_v48 }
0x4842   :  { %v9179_v1 = vpop.xlane.xlu1 %9178 }
0x4843   :  { %13438 = vrcp.f32 %v9179_v1  ;;  %v9176_v61 = vpop.xlane.xlu0 %9175 }
0x4844   :  { %13440 = vrcp.f32 %v9176_v61 }
0x484d   :  { %v13439_v10 = vpop.eup %13438 }
0x484e   :  { %v13441_v34 = vpop.eup %13440  ;;  %v9183_v33 = vmul.f32 %v13439_v10, %v13435_v18 }
0x484f   :  { %v9182_v57 = vmul.f32 %v13441_v34, %v13437_v15 }
0x4851   :  { %12363 = vmatprep.mubr.msk.f32.mxu1 %vm498_vm4, %v9182_v57 }
0x4852   :  { %12364 = vmatmul.mubr.msk.f32.vlgmr.msra.gmra.mrb[102].mxu1 %vm498_vm4, %v9183_v33 }
0x4853   :  { %13140 = vmatpush3.bf16.msra.mxu1 %v13137_v40  ;;  %12379 = vmatprep.mubr.msk.f32.mxu1 %vm123_vm0, %v15101_v6 }
0x4854   :  { %13142 = vmatprep.subr.bf16.mxu1 %v13141_v50 }
0x4857   :  { %13144 = vmatpush3.bf16.msra.mxu1 %v13141_v50 }
0x4858   :  { %13154 = vmatprep.subr.bf16.mxu1 %v13153_v51 }
0x485a   :  { %12380 = vmatmul.mubr.msk.f32.vlgmr.msra.gmra.mrb[104].mxu1 %vm123_vm0, %v15103_v8 }
0x485b   :  { %13156 = vmatpush3.bf16.msra.mxu1 %v13153_v51  ;;  %12401 = vmatprep.mubr.msk.f32.mxu1 %vm123_vm0, %v15101_v6 }
0x485c   :  { %13158 = vmatprep.subr.bf16.mxu1 %v13157_v23 }
0x485f   :  { %13160 = vmatpush3.bf16.msra.mxu1 %v13157_v23 }
0x4862   :  { %12402 = vmatmul.mubr.msk.f32.vlgmr.msra.gmra.mrb[106].mxu1 %vm123_vm0, %v15103_v8 }
0x4925   :  { %v12365_v20 = vpop.f32.mrb[102].mxu1 }
0x4926   :  { %v9256_v2 = vpop.f32.mrb[103].mxu1 }
0x4927   :  { %12368 = vmatprep.mubr.msk.f32.mxu0 %vm406_vm1, %v9256_v2 }
0x4928   :  { %12369 = vmatmul.mubr.msk.f32.vlgmr.msra.gmra.mrb[64].mxu0 %vm406_vm1, %v12365_v20 }
0x4929   :  { %13148 = vmatpush3.bf16.msra.mxu0 %v13145_v42  ;;  %12390 = vmatprep.mubr.msk.f32.mxu0 %vm123_vm0, %v15101_v6 }
0x492a   :  { %13150 = vmatprep.subr.bf16.mxu0 %v13149_v54 }
0x492d   :  { %v12381_v63 = vpop.f32.mrb[104].mxu1  ;;  %13152 = vmatpush3.bf16.msra.mxu0 %v13149_v54 }
0x492e   :  { %v9424_v32 = vadd.f32 %v12381_v63, %v9351_v21  ;;  %v9418_v43 = vpop.f32.mrb[105].mxu1 }
0x492f   :  { %v9419_v46 = vadd.f32 %v9418_v43, %v9351_v21 }
0x4930   :  { %12391 = vmatmul.mubr.msk.f32.vlgmr.msra.gmra.mrb[70].mxu0 %vm123_vm0, %v15103_v8 }
0x4931   :  { %12408 = vmatprep.mubr.msk.f32.mxu0 %vm406_vm1, %v9419_v46 }
0x4935   :  { %v12403_v38 = vpop.f32.mrb[106].mxu1 }
0x4936   :  { %v9582_v31 = vadd.f32 %v12403_v38, %v9509_v14  ;;  %v9576_v6 = vpop.f32.mrb[107].mxu1 }
0x4937   :  { %v9577_v24 = vadd.f32 %v9576_v6, %v9509_v14 }
0x4939   :  { %v13167_v18 = vpack.c.bf16 %v9582_v31, %v9577_v24 }
0x493b   :  { %13168 = vmatprep.subr.bf16.mxu1 %v13167_v18 }
0x493c   :  { %13170 = vmatpush3.bf16.msra.mxu1 %v13167_v18 }
0x4a03   :  { %v12392_v15 = vpop.f32.mrb[70].mxu0 }
0x4a04   :  { %v9503_v12 = vadd.f32 %v12392_v15, %v9430_v26  ;;  %v9497_v48 = vpop.f32.mrb[71].mxu0  ;;  %v10819_v15 = vld [vmem:[%s15545_s7 + $0x20] sm:$0xff] }
0x4a05   :  { %v9498_v52 = vadd.f32 %v9497_v48, %v9430_v26 }
0x4a07   :  { %v13161_v8 = vpack.c.bf16 %v9503_v12, %v9498_v52  ;;  %v10820_v12 = vld [vmem:[%s15545_s7 + $0x28] sm:$0xff]  ;;  %v10821_v52 = vld [vmem:[%s15545_s7 + $0x30] sm:$0xff] }
0x4a08   :  { %v13171_v48 = vpack.c.bf16 %v10820_v12, %v10819_v15 }
0x4a09   :  { %13163 = vmatprep.subr.msk.bf16.mxu0 %vm13703_vm2, %v13161_v8 }
0x4a0a   :  { %13166 = vmatpush3.bf16.xpose.msk.msra.mxu0 %vm13703_vm2, %v13161_v8  ;;  %13172 = vmatprep.subr.bf16.mxu1 %v13171_v48  ;;  %v10822_v8 = vld [vmem:[%s15545_s7 + $0x38] sm:$0xff] }
0x4a0b   :  { %12418 = vmatprep.subr.mxu0 %v10762_v35 }
0x4a11   :  { %12409 = vmatmul.mubr.msk.f32.vlgmr.msra.gmra.mrb[72].mxu0 %vm406_vm1, %v9424_v32 }
0x4a12   :  { %12419 = vmatpush3.msra.mxu0 %v10762_v35  ;;  %v10831_v35 = vld [vmem:[%s15547_s9 + $0xa0] sm:$0xff] }
0x4ae4   :  { %v12410_v17 = vpop.f32.mrb[72].mxu0 }
0x4ae5   :  { %v9673_v39 = vmul.f32 0.35355338, %v12410_v17  ;;  %v9663_v40 = vpop.f32.mrb[73].mxu0  ;;  %v13175_v17 = vpack.c.bf16 %v10822_v8, %v10821_v52 }
0x4ae6   :  { %v9672_v28 = vmul.f32 0.35355338, %v9663_v40 }
0x4ae7   :  { %v9675_v49 = vsel %vm13740_vm3, %v9673_v39, -1e+30 }
0x4ae8   :  { %v9679_v1 = vsel %vm498_vm4, %v9675_v49, -inf  ;;  %v9674_v61 = vsel %vm13745_vm5, %v9672_v28, -1e+30 }
0x4ae9   :  { %9680 = vmax.xlane.f32.xlu1 %v9679_v1  ;;  %v9676_v10 = vsel %vm498_vm4, %v9674_v61, -inf }
0x4aea   :  { %9677 = vmax.xlane.f32.xlu0 %v9676_v10  ;;  %v9899_v10 = vrot.slane %v15089_v60, %v13934_v41  ;;  %v10827_v41 = vld [vmem:[%s15547_s9 + $0x80] sm:$0xff] }
0x4b76   :  { %v9681_v11 = vpop.xlane.xlu1 %9680 }
0x4b77   :  { %v9683_v45 = vsub.f32 %v9675_v49, %v9681_v11  ;;  %v9678_v58 = vpop.xlane.xlu0 %9677 }
0x4b78   :  { %v9682_v34 = vsub.f32 %v9674_v61, %v9678_v58 }
0x4b79   :  { %v9686_v57 = vmul.f32 1.442695, %v9683_v45 }
0x4b7a   :  { %v9684_v33 = vmul.f32 1.442695, %v9682_v34 }
0x4b7b   :  { %13442 = vpow2.f32 %v9686_v57  ;;  %v9905_v57 = vrot.slane %v15089_v60, %v13998_v62  ;;  %v10828_v62 = vld [vmem:[%s15547_s9 + $0x88] sm:$0xff] }
0x4b7c   :  { %13444 = vpow2.f32 %v9684_v33  ;;  %v13179_v60 = vpack.c.bf16 %v10828_v62, %v10827_v41 }
0x4b7e   :  { %13180 = vmatprep.subr.bf16.mxu0 %v13179_v60 }
0x4b85   :  { %v13443_v50 = vpop.eup %13442 }
0x4b86   :  { %v13445_v27 = vpop.eup %13444  ;;  %v9691_v44 = vsel %vm498_vm4, %v13443_v50, 0.0 }
0x4b87   :  { %9692 = vadd.xlane.f32.xlu1 %v9691_v44  ;;  %v9688_v30 = vsel %vm498_vm4, %v13445_v27, 0.0 }
0x4b88   :  { %9689 = vadd.xlane.f32.xlu0 %v9688_v30 }
0x4c14   :  { %v9693_v51 = vpop.xlane.xlu1 %9692 }
0x4c15   :  { %13446 = vrcp.f32 %v9693_v51  ;;  %v9690_v3 = vpop.xlane.xlu0 %9689  ;;  %v10832_v51 = vld [vmem:[%s15547_s9 + $0xa8] sm:$0xff] }
0x4c16   :  { %13448 = vrcp.f32 %v9690_v3  ;;  %v13187_v3 = vpack.c.bf16 %v10832_v51, %v10831_v35 }
0x4c1f   :  { %v13447_v13 = vpop.eup %13446 }
0x4c20   :  { %v13449_v23 = vpop.eup %13448  ;;  %v9697_v37 = vmul.f32 %v13447_v13, %v13443_v50  ;;  %v10833_v13 = vld [vmem:[%s15547_s9 + $0xb0] sm:$0xff] }
0x4c21   :  { %v9696_v53 = vmul.f32 %v13449_v23, %v13445_v27  ;;  %v10834_v23 = vld [vmem:[%s15547_s9 + $0xb8] sm:$0xff] }
0x4c23   :  { %12415 = vmatprep.mubr.msk.f32.mxu1 %vm498_vm4, %v9696_v53  ;;  %v13191_v53 = vpack.c.bf16 %v10834_v23, %v10833_v13 }
0x4c24   :  { %12416 = vmatmul.mubr.msk.f32.vlgmr.msra.gmra.mrb[108].mxu1 %vm498_vm4, %v9697_v37  ;;  %v10835_v37 = vld [vmem:[%s15547_s9 + $0xc0] sm:$0xff] }
0x4c25   :  { %13174 = vmatpush3.bf16.msra.mxu1 %v13171_v48 }
0x4c26   :  { %13176 = vmatprep.subr.bf16.mxu1 %v13175_v17 }
0x4c29   :  { %13178 = vmatpush3.bf16.msra.mxu1 %v13175_v17 }
0x4c2a   :  { %13212 = vmatprep.subr.bf16.mxu1 %v14513_v4 }
0x4cf7   :  { %v12417_v42 = vpop.f32.mrb[108].mxu1 }
0x4cf8   :  { %v9770_v56 = vpop.f32.mrb[109].mxu1 }
0x4cf9   :  { %12420 = vmatprep.mubr.msk.f32.mxu0 %vm406_vm1, %v9770_v56 }
0x4cfa   :  { %12421 = vmatmul.mubr.msk.f32.vlgmr.msra.gmra.mrb[64].mxu0 %vm406_vm1, %v12417_v42  ;;  %v10836_v42 = vld [vmem:[%s15547_s9 + $0xc8] sm:$0xff] }
0x4cfb   :  { %13182 = vmatpush3.bf16.msra.mxu0 %v13179_v60  ;;  %v13195_v56 = vpack.c.bf16 %v10836_v42, %v10835_v37 }
0x4dcd   :  { %v12422_v20 = vpop.f32.mrb[64].mxu0 }
0x4dce   :  { %v9863_v2 = vadd.f32 %v12422_v20, %v15055_v59  ;;  %v9851_v54 = vpop.f32.mrb[65].mxu0  ;;  %v10838_v20 = vld [vmem:[%s15547_s9 + $0xd8] sm:$0xff] }
0x4dcf   :  { %v9862_v21 = vadd.f32 %v9851_v54, %v15058_v36  ;;  %v10839_v54 = vld [vmem:[%s15547_s9 + $0xe0] sm:$0xff] }
0x4dd0   :  { %v15406_v63 = vadd.f32 %v9867_v22, %v9863_v2 }
0x4dd1   :  { %v15408_v32 = vadd.f32 %v9867_v22, %v9862_v21  ;;  %v10837_v22 = vld [vmem:[%s15547_s9 + $0xd0] sm:$0xff]  ;;  %v10840_v21 = vld [vmem:[%s15547_s9 + $0xe8] sm:$0xff] }
0x4dd2   :  { %v9873_v43 = vsel %vm123_vm0, %v15406_v63, 0.0  ;;  %v13199_v2 = vpack.c.bf16 %v10838_v20, %v10837_v22 }
0x4dd3   :  { %9874 = vadd.xlane.f32.xlu1 %v9873_v43  ;;  %v9870_v46 = vsel %vm123_vm0, %v15408_v32, 0.0  ;;  %v13203_v43 = vpack.c.bf16 %v10840_v21, %v10839_v54 }
0x4dd4   :  { %9871 = vadd.xlane.f32.xlu0 %v9870_v46  ;;  %v10841_v46 = vld [vmem:[%s15547_s9 + $0xf0] sm:$0xff] }
0x4e60   :  { %v9875_v14 = vpop.xlane.xlu1 %9874 }
0x4e61   :  { %v9877_v19 = vmul.f32 0.03125, %v9875_v14  ;;  %v9872_v38 = vpop.xlane.xlu0 %9871  ;;  %v10842_v14 = vld [vmem:[%s15547_s9 + $0xf8] sm:$0xff] }
0x4e62   :  { %v9876_v31 = vmul.f32 0.03125, %v9872_v38  ;;  %v10824_v38 = vld [vmem:[%s15546_s8 + $0x1] ss:$0 sm:$0xff] }
0x4e63   :  { %v9879_v59 = vsub.f32 %v15406_v63, %v9877_v19  ;;  %v13207_v19 = vpack.c.bf16 %v10842_v14, %v10841_v46 }
0x4e64   :  { %v9878_v36 = vsub.f32 %v15408_v32, %v9876_v31 }
0x4e65   :  { %v9881_v6 = vmul.f32 %v9879_v59, %v9879_v59 }
0x4e66   :  { %v9880_v24 = vmul.f32 %v9878_v36, %v9878_v36 }
0x4e67   :  { %v9885_v18 = vsel %vm123_vm0, %v9881_v6, 0.0 }
0x4e68   :  { %9886 = vadd.xlane.f32.xlu1 %v9885_v18  ;;  %v9882_v26 = vsel %vm123_vm0, %v9880_v24, 0.0 }
0x4e69   :  { %9883 = vadd.xlane.f32.xlu0 %v9882_v26 }
0x4ef5   :  { %v9887_v39 = vpop.xlane.xlu1 %9886 }
0x4ef6   :  { %v9889_v40 = vmul.f32 0.03125, %v9887_v39  ;;  %v9884_v28 = vpop.xlane.xlu0 %9883 }
0x4ef7   :  { %v9888_v49 = vmul.f32 0.03125, %v9884_v28 }
0x4ef8   :  { %v9891_v1 = vadd.f32 1e-05, %v9889_v40 }
0x4ef9   :  { %v9890_v61 = vadd.f32 1e-05, %v9888_v49 }
0x4efa   :  { %13450 = vrsqrt.f32 %v9891_v1 }
0x4efb   :  { %13452 = vrsqrt.f32 %v9890_v61 }
0x4f04   :  { %v13451_v11 = vpop.eup %13450 }
0x4f05   :  { %v13453_v45 = vpop.eup %13452  ;;  %v9895_v58 = vmul.f32 %v13451_v11, %v9879_v59 }
0x4f06   :  { %v9894_v34 = vmul.f32 %v13453_v45, %v9878_v36 }
0x4f07   :  { %v9901_v33 = vmul.f32 %v9899_v10, %v9895_v58 }
0x4f08   :  { %v9900_v50 = vmul.f32 %v9899_v10, %v9894_v34 }
0x4f09   :  { %v9907_v44 = vadd.f32 %v9905_v57, %v9901_v33 }
0x4f0a   :  { %v9906_v27 = vadd.f32 %v9905_v57, %v9900_v50 }
0x4f0c   :  { %12431 = vmatprep.mubr.msk.f32.mxu1 %vm123_vm0, %v9906_v27 }
0x4f0d   :  { %12432 = vmatmul.mubr.msk.f32.vlgmr.msra.gmra.mrb[110].mxu1 %vm123_vm0, %v9907_v44 }
0x4f0e   :  { %13214 = vmatpush3.bf16.msra.mxu1 %v14513_v4  ;;  %v10829_v4 = vld [vmem:[%s15547_s9 + $0x90] sm:$0xff] }
0x4f0f   :  { %13216 = vmatprep.subr.bf16.mxu1 %v14523_v7 }
0x4f12   :  { %13218 = vmatpush3.bf16.msra.mxu1 %v14523_v7  ;;  %v10830_v7 = vld [vmem:[%s15547_s9 + $0x98] sm:$0xff] }
0x4f13   :  { %13220 = vmatprep.subr.bf16.mxu1 %v14596_v5  ;;  %v13183_v30 = vpack.c.bf16 %v10830_v7, %v10829_v4 }
0x4f15   :  { %13184 = vmatprep.subr.bf16.mxu0 %v13183_v30 }
0x4f16   :  { %13186 = vmatpush3.bf16.msra.mxu0 %v13183_v30 }
0x4f17   :  { %13188 = vmatprep.subr.bf16.mxu0 %v13187_v3 }
0x4f1a   :  { %13190 = vmatpush3.bf16.msra.mxu0 %v13187_v3 }
0x4f1b   :  { %13192 = vmatprep.subr.bf16.mxu0 %v13191_v53 }
0x4f1e   :  { %13194 = vmatpush3.bf16.msra.mxu0 %v13191_v53 }
0x4f1f   :  { %13196 = vmatprep.subr.bf16.mxu0 %v13195_v56 }
0x4f22   :  { %13198 = vmatpush3.bf16.msra.mxu0 %v13195_v56 }
0x4f23   :  { %13200 = vmatprep.subr.bf16.mxu0 %v13199_v2 }
0x4f26   :  { %13202 = vmatpush3.bf16.msra.mxu0 %v13199_v2 }
0x4f27   :  { %13204 = vmatprep.subr.bf16.mxu0 %v13203_v43 }
0x4f2a   :  { %13206 = vmatpush3.bf16.msra.mxu0 %v13203_v43 }
0x4f2b   :  { %13208 = vmatprep.subr.bf16.mxu0 %v13207_v19 }
0x4f2e   :  { %13210 = vmatpush3.bf16.msra.mxu0 %v13207_v19 }
0x4fe0   :  { %v12433_v31 = vpop.f32.mrb[110].mxu1 }
0x4fe1   :  { %v9997_v59 = vadd.f32 %v12433_v31, %v10824_v38  ;;  %v9991_v36 = vpop.f32.mrb[111].mxu1  ;;  %v13481_v31 = vld [vmem:[%s15539_s1 + $0x8] sm:$0x3f]  ;;  %s13507_s1 = smov [#allocation2]  }
0x4fe2   :  { %v9992_v6 = vadd.f32 %v10824_v38, %v9991_v36  ;;  %v10073_v36 = vrot.slane %v13481_v31, %v14058_v47  ;;  %s10435_s2 = sshll.u32 %s13507_s1, 4  ;;  %s10436_s2 = int_to_ptr.vmem [resolvable:$true] %s10435_s2 }
0x4fe3   :  { %v10003_v24 = vmul.f32 0.70710677, %v9997_v59  ;;  %v10001_v14 = vmul.f32 0.5, %v9997_v59  ;;  %s13483_s25 = scalar_lea.vmem %s10436_s2, 512  ;;  %p13488_p1 = scmp.lt.s32.totalorder %s10436_s2, %s10436_s2 }
0x4fe4   :  { %v10002_v18 = vmul.f32 0.70710677, %v9992_v6  ;;  %v10000_v43 = vmul.f32 0.5, %v9992_v6  ;;  %p13484_p0 = scmp.ne.s32.totalorder %s10436_s2, %s13483_s25  ;;  %p13489_p2 = scmp.lt.s32.totalorder %s13483_s25, %s13483_s25 }
0x4fe5   :  { %v10005_v26 = vand.u32 2147483647, %v10003_v24  ;;  %vm10045_vm14 = vcmp.lt.f32.partialorder %v10003_v24, 0.0 }
0x4fe6   :  { %v10004_v15 = vand.u32 2147483647, %v10002_v18  ;;  %vm10044_vm15 = vcmp.lt.f32.partialorder %v10002_v18, 0.0  ;;  %p13490_p3 = por %p13489_p2, %p13488_p1 }
0x4fe7   :  { %v10007_v12 = vmul.f32 0.3275911, %v10005_v26  ;;  %v10033_v17 = vsub.f32 0.0, %v10005_v26 }
0x4fe8   :  { %v10006_v48 = vmul.f32 0.3275911, %v10004_v15  ;;  %v10032_v39 = vsub.f32 0.0, %v10004_v15  ;;  %p13491_p4 = pnand %p13490_p3, %p13484_p0 }
0x4fe9   :  { %v10009_v52 = vadd.f32 1.0, %v10007_v12  ;;  %v10035_v28 = vmul.f32 %v10033_v17, %v10005_v26 }
0x4fea   :  { %v10008_v8 = vadd.f32 1.0, %v10006_v48  ;;  %v10034_v61 = vmul.f32 %v10032_v39, %v10004_v15 }
0x4feb   :  { %13454 = vrcp.f32 %v10009_v52  ;;  %v10038_v45 = vmul.f32 1.442695, %v10035_v28 }
0x4fec   :  { %13456 = vrcp.f32 %v10008_v8  ;;  %v10036_v57 = vmul.f32 1.442695, %v10034_v61 }
0x4fed   :  { %13458 = vpow2.f32 %v10038_v45 }
0x4fee   :  { %13460 = vpow2.f32 %v10036_v57 }
0x4ff5   :  { %v13455_v40 = vpop.eup %13454 }
0x4ff6   :  { %v13457_v49 = vpop.eup %13456  ;;  %v10015_v1 = vmul.f32 1.0614054, %v13455_v40 }
0x4ff7   :  { %v10014_v10 = vmul.f32 1.0614054, %v13457_v49  ;;  %v13459_v3 = vpop.eup %13458 }
0x4ff8   :  { %v10017_v11 = vadd.f32 -1.4531521, %v10015_v1  ;;  %v13461_v23 = vpop.eup %13460 }
0x4ff9   :  { %v10016_v58 = vadd.f32 -1.4531521, %v10014_v10 }
0x4ffa   :  { %v10019_v34 = vmul.f32 %v13455_v40, %v10017_v11 }
0x4ffb   :  { %v10018_v33 = vmul.f32 %v13457_v49, %v10016_v58 }
0x4ffc   :  { %v10021_v50 = vadd.f32 1.4214138, %v10019_v34 }
0x4ffd   :  { %v10020_v27 = vadd.f32 1.4214138, %v10018_v33 }
0x4ffe   :  { %v10023_v44 = vmul.f32 %v13455_v40, %v10021_v50 }
0x4fff   :  { %v10022_v41 = vmul.f32 %v13457_v49, %v10020_v27 }
0x5000   :  { %v10025_v62 = vadd.f32 -0.28449672, %v10023_v44 }
0x5001   :  { %v10024_v60 = vadd.f32 -0.28449672, %v10022_v41 }
0x5002   :  { %v10027_v4 = vmul.f32 %v13455_v40, %v10025_v62 }
0x5003   :  { %v10026_v7 = vmul.f32 %v13457_v49, %v10024_v60 }
0x5004   :  { %v10029_v30 = vadd.f32 0.2548296, %v10027_v4 }
0x5005   :  { %v10028_v35 = vadd.f32 0.2548296, %v10026_v7 }
0x5006   :  { %v10031_v51 = vmul.f32 %v13455_v40, %v10029_v30 }
0x5007   :  { %v10030_v13 = vmul.f32 %v13457_v49, %v10028_v35 }
0x5008   :  { %v10041_v53 = vmul.f32 %v13459_v3, %v10031_v51 }
0x5009   :  { %v10040_v37 = vmul.f32 %v13461_v23, %v10030_v13 }
0x500a   :  { %v10043_v42 = vsub.f32 1.0, %v10041_v53 }
0x500b   :  { %v10042_v56 = vsub.f32 1.0, %v10040_v37 }
0x500c   :  { %v10047_v22 = vsub.f32 0.0, %v10043_v42 }
0x500d   :  { %v10046_v20 = vsub.f32 0.0, %v10042_v56 }
0x500e   :  { %v10049_v2 = vsel %vm10045_vm14, %v10047_v22, %v10043_v42 }
0x500f   :  { %v10051_v54 = vadd.f32 1.0, %v10049_v2  ;;  %v10048_v21 = vsel %vm10044_vm15, %v10046_v20, %v10042_v56 }
0x5010   :  { %v10050_v46 = vadd.f32 1.0, %v10048_v21 }
0x5011   :  { %v10053_v38 = vmul.f32 %v10051_v54, %v10001_v14 }
0x5012   :  { %v10052_v19 = vmul.f32 %v10050_v46, %v10000_v43 }
0x5014   :  { %12466 = vmatprep.mubr.f32.mxu0 %v10052_v19 }
0x5015   :  { %12467 = vmatmul.mubr.f32.vlgmr.msra.gmra.mrb[74].mxu0 %v10053_v38 }
0x50e8   :  { %v12468_v26 = vpop.f32.mrb[74].mxu0 }
0x50e9   :  { %v10146_v24 = vadd.f32 %v12468_v26, %v10073_v36  ;;  %v10140_v15 = vpop.f32.mrb[75].mxu0 }
0x50ea   :  { %v10141_v12 = vadd.f32 %v10140_v15, %v10073_v36 }
0x50eb   :  { %v10150_v18 = vadd.f32 %v10146_v24, %v15406_v63 }
0x50ec   :  { %v10149_v6 = vadd.f32 %v10141_v12, %v15408_v32 }
0x50ed   :  { %v10154_v59 = vsel %vm123_vm0, %v10150_v18, 0.0 }
0x50ee   :  { %10155 = vadd.xlane.f32.xlu1 %v10154_v59  ;;  %v10151_v48 = vsel %vm123_vm0, %v10149_v6, 0.0 }
0x50ef   :  { %10152 = vadd.xlane.f32.xlu0 %v10151_v48 }
0x517b   :  { %v10156_v52 = vpop.xlane.xlu1 %10155 }
0x517c   :  { %v10158_v8 = vmul.f32 0.03125, %v10156_v52  ;;  %v10153_v17 = vpop.xlane.xlu0 %10152 }
0x517d   :  { %v10157_v39 = vmul.f32 0.03125, %v10153_v17 }
0x517e   :  { %v10160_v40 = vsub.f32 %v10150_v18, %v10158_v8 }
0x517f   :  { %v10159_v47 = vsub.f32 %v10149_v6, %v10157_v39 }
0x5180   :  { %v10162_v28 = vmul.f32 %v10160_v40, %v10160_v40 }
0x5181   :  { %v10161_v49 = vmul.f32 %v10159_v47, %v10159_v47 }
0x5182   :  { %v10166_v1 = vsel %vm123_vm0, %v10162_v28, 0.0 }
0x5183   :  { %10167 = vadd.xlane.f32.xlu1 %v10166_v1  ;;  %v10163_v63 = vsel %vm123_vm0, %v10161_v49, 0.0 }
0x5184   :  { %10164 = vadd.xlane.f32.xlu0 %v10163_v63 }
0x5210   :  { %v10168_v32 = vpop.xlane.xlu1 %10167 }
0x5211   :  { %v10170_v61 = vmul.f32 0.03125, %v10168_v32  ;;  %v10165_v10 = vpop.xlane.xlu0 %10164 }
0x5212   :  { %v10169_v11 = vmul.f32 0.03125, %v10165_v10 }
0x5213   :  { %v10172_v45 = vadd.f32 1e-05, %v10170_v61 }
0x5214   :  { %v10171_v58 = vadd.f32 1e-05, %v10169_v11 }
0x5215   :  { %13462 = vrsqrt.f32 %v10172_v45 }
0x5216   :  { %13464 = vrsqrt.f32 %v10171_v58 }
0x521f   :  { %v13463_v34 = vpop.eup %13462 }
0x5220   :  { %v13465_v57 = vpop.eup %13464  ;;  %v10176_v33 = vmul.f32 %v13463_v34, %v10160_v40 }
0x5221   :  { %v10175_v50 = vmul.f32 %v13465_v57, %v10159_v47 }
0x5222   :  { %v10178_v27 = vmul.f32 %v10176_v33, %v14534_v16 }
0x5223   :  { %v10177_v44 = vmul.f32 %v10175_v50, %v14534_v16 }
0x5224   :  { %v10180_v62 = vadd.f32 %v10178_v27, %v14538_v25 }
0x5225   :  { %v10179_v41 = vadd.f32 %v10177_v44, %v14538_v25 }
0x5227   :  { %12477 = vmatprep.mubr.msk.f32.mxu1 %vm123_vm0, %v10179_v41 }
0x5228   :  { %12478 = vmatmul.mubr.msk.f32.vlgmr.msra.gmra.mrb[112].mxu1 %vm123_vm0, %v10180_v62 }
0x5229   :  { %13222 = vmatpush3.bf16.msra.mxu1 %v14596_v5 }
0x522a   :  { %13224 = vmatprep.subr.bf16.mxu1 %v14606_v9 }
0x522d   :  { %13226 = vmatpush3.bf16.msra.mxu1 %v14606_v9 }
0x52fb   :  { %v12479_v60 = vpop.f32.mrb[112].mxu1 }
0x52fc   :  { %v10259_v4 = vadd.f32 %v12479_v60, %v14548_v29  ;;  %v10253_v7 = vpop.f32.mrb[113].mxu1 }
0x52fd   :  { %v10254_v16 = vadd.f32 %v10253_v7, %v14548_v29 }
0x52fe   :  { %v10265_v30 = vmul.f32 0.70710677, %v10259_v4  ;;  %v10263_v63 = vmul.f32 0.5, %v10259_v4 }
0x52ff   :  { %v10264_v35 = vmul.f32 0.70710677, %v10254_v16  ;;  %v10262_v10 = vmul.f32 0.5, %v10254_v16 }
0x5300   :  { %v10267_v51 = vand.u32 2147483647, %v10265_v30  ;;  %vm10307_vm1 = vcmp.lt.f32.partialorder %v10265_v30, 0.0 }
0x5301   :  { %v10266_v25 = vand.u32 2147483647, %v10264_v35  ;;  %vm10306_vm2 = vcmp.lt.f32.partialorder %v10264_v35, 0.0 }
0x5302   :  { %v10269_v3 = vmul.f32 0.3275911, %v10267_v51  ;;  %v10295_v5 = vsub.f32 0.0, %v10267_v51 }
0x5303   :  { %v10268_v13 = vmul.f32 0.3275911, %v10266_v25  ;;  %v10294_v37 = vsub.f32 0.0, %v10266_v25 }
0x5304   :  { %v10271_v23 = vadd.f32 1.0, %v10269_v3  ;;  %v10297_v9 = vmul.f32 %v10295_v5, %v10267_v51 }
0x5305   :  { %v10270_v53 = vadd.f32 1.0, %v10268_v13  ;;  %v10296_v22 = vmul.f32 %v10294_v37, %v10266_v25 }
0x5306   :  { %13466 = vrcp.f32 %v10271_v23  ;;  %v10300_v29 = vmul.f32 1.442695, %v10297_v9 }
0x5307   :  { %13468 = vrcp.f32 %v10270_v53  ;;  %v10298_v43 = vmul.f32 1.442695, %v10296_v22 }
0x5308   :  { %13470 = vpow2.f32 %v10300_v29 }
0x5309   :  { %13472 = vpow2.f32 %v10298_v43 }
0x5310   :  { %v13467_v42 = vpop.eup %13466 }
0x5311   :  { %v13469_v56 = vpop.eup %13468  ;;  %v10277_v20 = vmul.f32 1.0614054, %v13467_v42 }
0x5312   :  { %v10276_v2 = vmul.f32 1.0614054, %v13469_v56  ;;  %v13471_v48 = vpop.eup %13470 }
0x5313   :  { %v10279_v54 = vadd.f32 -1.4531521, %v10277_v20  ;;  %v13473_v8 = vpop.eup %13472 }
0x5314   :  { %v10278_v21 = vadd.f32 -1.4531521, %v10276_v2  ;;  %v13482_v2 = vld [vmem:[%s15551_s13] ss:$0 sm:$0xff] }
0x5315   :  { %v10281_v46 = vmul.f32 %v13467_v42, %v10279_v54 }
0x5316   :  { %v10280_v14 = vmul.f32 %v13469_v56, %v10278_v21 }
0x5317   :  { %v10283_v19 = vadd.f32 1.4214138, %v10281_v46 }
0x5318   :  { %v10282_v38 = vadd.f32 1.4214138, %v10280_v14 }
0x5319   :  { %v10285_v31 = vmul.f32 %v13467_v42, %v10283_v19 }
0x531a   :  { %v10284_v36 = vmul.f32 %v13469_v56, %v10282_v38 }
0x531b   :  { %v10287_v26 = vadd.f32 -0.28449672, %v10285_v31 }
0x531c   :  { %v10286_v24 = vadd.f32 -0.28449672, %v10284_v36 }
0x531d   :  { %v10289_v15 = vmul.f32 %v13467_v42, %v10287_v26 }
0x531e   :  { %v10288_v12 = vmul.f32 %v13469_v56, %v10286_v24 }
0x531f   :  { %v10291_v18 = vadd.f32 0.2548296, %v10289_v15 }
0x5320   :  { %v10290_v6 = vadd.f32 0.2548296, %v10288_v12 }
0x5321   :  { %v10293_v59 = vmul.f32 %v13467_v42, %v10291_v18 }
0x5322   :  { %v10292_v52 = vmul.f32 %v13469_v56, %v10290_v6 }
0x5323   :  { %v10303_v17 = vmul.f32 %v13471_v48, %v10293_v59 }
0x5324   :  { %v10302_v39 = vmul.f32 %v13473_v8, %v10292_v52 }
0x5325   :  { %v10305_v40 = vsub.f32 1.0, %v10303_v17 }
0x5326   :  { %v10304_v47 = vsub.f32 1.0, %v10302_v39 }
0x5327   :  { %v10309_v28 = vsub.f32 0.0, %v10305_v40 }
0x5328   :  { %v10308_v49 = vsub.f32 0.0, %v10304_v47 }
0x5329   :  { %v10311_v1 = vsel %vm10307_vm1, %v10309_v28, %v10305_v40 }
0x532a   :  { %v10313_v32 = vadd.f32 1.0, %v10311_v1  ;;  %v10310_v61 = vsel %vm10306_vm2, %v10308_v49, %v10304_v47 }
0x532b   :  { %v10312_v11 = vadd.f32 1.0, %v10310_v61 }
0x532c   :  { %v10315_v45 = vmul.f32 %v10313_v32, %v10263_v63 }
0x532d   :  { %v10314_v58 = vmul.f32 %v10312_v11, %v10262_v10 }
0x532e   :  { %v10319_v34 = vsel %vm123_vm0, %v10315_v45, 0.0 }
0x532f   :  { %10320 = vadd.xlane.f32.xlu1 %v10319_v34  ;;  %v10316_v57 = vsel %vm123_vm0, %v10314_v58, 0.0 }
0x5330   :  { %10317 = vadd.xlane.f32.xlu0 %v10316_v57 }
0x53bc   :  { %v10321_v33 = vpop.xlane.xlu1 %10320 }
0x53bd   :  { %v10323_v50 = vmul.f32 0.03125, %v10321_v33  ;;  %v10318_v27 = vpop.xlane.xlu0 %10317 }
0x53be   :  { %v10322_v44 = vmul.f32 0.03125, %v10318_v27 }
0x53bf   :  { %v10325_v41 = vsub.f32 %v10315_v45, %v10323_v50 }
0x53c0   :  { %v10324_v62 = vsub.f32 %v10314_v58, %v10322_v44 }
0x53c1   :  { %v10327_v60 = vmul.f32 %v10325_v41, %v10325_v41 }
0x53c2   :  { %v10326_v4 = vmul.f32 %v10324_v62, %v10324_v62 }
0x53c3   :  { %v10331_v7 = vsel %vm123_vm0, %v10327_v60, 0.0 }
0x53c4   :  { %10332 = vadd.xlane.f32.xlu1 %v10331_v7  ;;  %v10328_v16 = vsel %vm123_vm0, %v10326_v4, 0.0 }
0x53c5   :  { %10329 = vadd.xlane.f32.xlu0 %v10328_v16 }
0x5451   :  { %v10333_v30 = vpop.xlane.xlu1 %10332 }
0x5452   :  { %v10335_v35 = vmul.f32 0.03125, %v10333_v30  ;;  %v10330_v51 = vpop.xlane.xlu0 %10329 }
0x5453   :  { %v10334_v25 = vmul.f32 0.03125, %v10330_v51 }
0x5454   :  { %v10337_v3 = vadd.f32 1e-05, %v10335_v35 }
0x5455   :  { %v10336_v13 = vadd.f32 1e-05, %v10334_v25 }
0x5456   :  { %13474 = vrsqrt.f32 %v10337_v3 }
0x5457   :  { %13476 = vrsqrt.f32 %v10336_v13 }
0x5460   :  { %v13475_v23 = vpop.eup %13474 }
0x5461   :  { %v13477_v53 = vpop.eup %13476  ;;  %v10341_v5 = vmul.f32 %v13475_v23, %v10325_v41 }
0x5462   :  { %v10340_v37 = vmul.f32 %v13477_v53, %v10324_v62 }
0x5463   :  { %v10343_v42 = vmul.f32 %v10341_v5, %v14630_v55 }
0x5464   :  { %v10342_v9 = vmul.f32 %v10340_v37, %v14630_v55 }
0x5465   :  { %v10345_v22 = vadd.f32 %v10343_v42, %v14641_v0 }
0x5466   :  { %v10344_v56 = vadd.f32 %v10342_v9, %v14641_v0 }
0x5468   :  { %12488 = vmatprep.mubr.msk.f32.mxu1 %vm123_vm0, %v10344_v56 }
0x5469   :  { %12489 = vmatmul.mubr.msk.f32.vlgmr.msra.gmra.mrb[114].mxu1 %vm123_vm0, %v10345_v22 }
0x553c   :  { %v12490_v20 = vpop.f32.mrb[114].mxu1 }
0x553d   :  { %v10424_v54 = vadd.f32 %v13482_v2, %v12490_v20  ;;  %v10418_v29 = vpop.f32.mrb[115].mxu1 }
0x553e   :  { %v10419_v21 = vadd.f32 %v13482_v2, %v10418_v29 }
0x553f   :  { %10429 = vst [vmem:[#allocation2 + $0x18] sm:$0xff] %v10424_v54 }
0x5540   :  { %10428 = vst [vmem:[#allocation2 + $0x10] sm:$0xff] %v10419_v21 }
0x5541   :  { %13494 = shalt.err (!%p13491_p4)
}
0x5542   :  { %s13495_s28 = scalar_lea.hbm %s15552_s14, 512 }
0x5543   :  { %p13496_p5 = scmp.ne.s32.totalorder %s15552_s14, %s13495_s28  ;;  %p13499_p6 = scmp.lt.u32.totalorder %s13495_s28, %s15552_s14 }
0x5545   :  { %p13501_p7 = pnand %p13499_p6, %p13496_p5 }
0x5547   :  { %13504 = shalt.err (!%p13501_p7)
}
0x5548   :  { %s13508_s6 = smov 128   ;;  %s13509_s15 = smov 8  }
0x5549   :  { %10441 = dma.vmem_to_hbm [thread:$0]  %s10436_s2, 512, %s15552_s14, [#allocation3], %s13508_s6, %s13508_s6, %s13509_s15  }
0x554a   :  { %13505 = dma.done.wait [#allocation3], 512  }
0x554b   :  { %13506 = vsyncadd [#allocation3], 4294966784 }
0x554c   :  { %10445 = vsyncpa [#allocation3], 1 }

</bundles_post_ra>
